<compile_context>
chip_gen: v6e
topology: v6e:2x2x1
jax: 0.10.0
libtpu: 0.0.40
codegen_flags: <defaults>
</compile_context>

<pallas_src>
import functools

import jax
import jax.numpy as jnp
from jax.experimental import pallas as pl
from jax.experimental.pallas import tpu as pltpu

_EPS = 1e-5
_CFG = [(64, 2, 1), (128, 2, 2), (256, 2, 2), (512, 2, 2)]  # (planes, blocks, stride)
_LANE = 128


def _round_up(x, m):
    return (x + m - 1) // m * m


def _phys(c):
    # physical (lane-dense) channel count carried through the network
    return max(_round_up(c, _LANE), _LANE)


def _tile(dim, cap, quantum):
    """Largest tile <= cap that is a multiple of `quantum` and divides `dim`."""
    assert dim % quantum == 0
    t = min(cap, dim)
    t -= t % quantum
    t = max(t, quantum)
    while dim % t:
        t -= quantum
    return t


# ----------------------------------------------------------------------------- kernels

def _mm_kernel(x_ref, w_ref, b_ref, *rest, relu, has_mask, has_res):
    """Tiled (tm,tk)@(tk,tn) MXU matmul, bf16 in / f32 accumulate / bf16 out.

    Epilogue fuses bias (+residual) and ReLU (full or per-output-column masked, used by
    the fused conv1+downsample call where only the conv1 half is activated).
    """
    pos = 0
    m_ref = None
    r_ref = None
    if has_mask:
        m_ref = rest[pos]
        pos += 1
    if has_res:
        r_ref = rest[pos]
        pos += 1
    o_ref = rest[pos]
    acc_ref = rest[pos + 1]

    k = pl.program_id(2)

    @pl.when(k == 0)
    def _():
        acc_ref[...] = jnp.zeros_like(acc_ref)

    acc_ref[...] += jnp.dot(x_ref[...], w_ref[...],
                            preferred_element_type=jnp.float32)

    @pl.when(k == pl.num_programs(2) - 1)
    def _():
        out = acc_ref[...] + b_ref[...]              # BN scale already folded into w
        if has_res:
            out = out + r_ref[...].astype(jnp.float32)
        if relu:
            out = jnp.maximum(out, 0.0)
        elif has_mask:
            out = jnp.where(m_ref[...] != 0.0, jnp.maximum(out, 0.0), out)
        o_ref[...] = out.astype(o_ref.dtype)


def _maxpool_kernel(*refs):
    # refs = 9 input taps (tm, C) bf16 + 1 output: VPU maximum tree, lane-dense.
    o_ref = refs[-1]
    out = refs[0][...]
    for r in refs[1:-1]:
        out = jnp.maximum(out, r[...])
    o_ref[...] = out


def _head_kernel(x_ref, w_ref, b_ref, o_ref):
    # x_ref: (N, H*W, C) bf16: global average pool + final linear fused.
    pooled = jnp.mean(x_ref[...].astype(jnp.float32), axis=1)          # (N, C)
    o_ref[...] = jnp.dot(pooled, w_ref[...],
                         preferred_element_type=jnp.float32) + b_ref[...]


# ------------------------------------------------------------------- gridded matmul

def _matmul_fused(x, w, bias, *, residual=None, relu=False, relu_mask=None):
    """x: (M, K) bf16, w: (K, N) bf16, bias/(mask): (1, N) f32, residual: (M, N) bf16.

    Returns (M, N) bf16 with bias (+residual) (+ReLU / masked ReLU) fused into the epilogue.
    """
    m, k = x.shape
    k2, n = w.shape
    assert k == k2 and n % _LANE == 0 and k % _LANE == 0

    m_pad = _round_up(m, 16)                     # 16: bf16 sublane packing quantum
    if m_pad != m:
        x = jnp.pad(x, ((0, m_pad - m), (0, 0)))
        if residual is not None:
            residual = jnp.pad(residual, ((0, m_pad - m), (0, 0)))

    tn = _tile(n, 256, _LANE)
    tk = _tile(k, 512, _LANE)
    tm = _tile(m_pad, 256, 16)
    # v7x has 2 TensorCores: if the (M,N) parallel grid collapses to 1x1, halve tm so
    # both cores get a block (cheap on single-TC v5e/v6e at these sizes).
    if (m_pad // tm) * (n // tn) < 2 and m_pad % 32 == 0:
        tm = _tile(m_pad // 2, 256, 16)
    grid = (m_pad // tm, n // tn, k // tk)

    has_mask = relu_mask is not None
    has_res = residual is not None

    in_specs = [
        pl.BlockSpec((tm, tk), lambda i, j, kk: (i, kk)),
        pl.BlockSpec((tk, tn), lambda i, j, kk: (kk, j)),
        pl.BlockSpec((1, tn), lambda i, j, kk: (0, j)),
    ]
    args = [x, w, bias]
    if has_mask:
        in_specs.append(pl.BlockSpec((1, tn), lambda i, j, kk: (0, j)))
        args.append(relu_mask)
    if has_res:
        in_specs.append(pl.BlockSpec((tm, tn), lambda i, j, kk: (i, j)))
        args.append(residual)

    kernel = functools.partial(_mm_kernel, relu=relu,
                               has_mask=has_mask, has_res=has_res)

    # vmem budget derived from the actual double-buffered tile working set (+ headroom),
    # instead of a blanket 48 MiB (matters on v7x's 64 MiB VMEM).
    working = 2 * (tm * tk * 2 + tk * tn * 2 + 2 * tn * 4
                   + (tm * tn * 2 if has_res else 0)) \
        + 2 * tm * tn * 2 + tm * tn * 4
    vmem_limit = int(working) + 12 * 1024 * 1024

    out = pl.pallas_call(
        kernel,
        out_shape=jax.ShapeDtypeStruct((m_pad, n), jnp.bfloat16),
        grid_spec=pltpu.PrefetchScalarGridSpec(
            num_scalar_prefetch=0,
            grid=grid,
            in_specs=in_specs,
            out_specs=pl.BlockSpec((tm, tn), lambda i, j, kk: (i, j)),
            scratch_shapes=[pltpu.VMEM((tm, tn), jnp.float32)],
        ),
        compiler_params=pltpu.CompilerParams(
            dimension_semantics=("parallel", "parallel", "arbitrary"),
            vmem_limit_bytes=vmem_limit,
        ),
    )(*args)
    return out[:m] if m_pad != m else out


# -------------------------------------------------------------------------------- glue

def _im2col(x, kh, kw, stride, pad):
    """x: (N, H, W, C) NHWC bf16 -> cols (N*OH*OW, KH*KW*C), patch order (kh, kw, cin)."""
    # TODO(synk): replace with implicit GEMM (per-tap BlockSpec offsets / in-kernel window
    #             slicing) so the activation is read once instead of kh*kw times.
    if pad:
        x = jnp.pad(x, ((0, 0), (pad, pad), (pad, pad), (0, 0)))
    n, h, w, c = x.shape
    oh = (h - kh) // stride + 1
    ow = (w - kw) // stride + 1
    taps = []
    for i in range(kh):
        for j in range(kw):
            taps.append(
                x[:, i: i + stride * (oh - 1) + 1: stride,
                     j: j + stride * (ow - 1) + 1: stride, :])
    patches = jnp.stack(taps, axis=3)            # (N, OH, OW, KH*KW, C)
    return patches.reshape(n * oh * ow, kh * kw * c), (n, oh, ow)


def _conv_bn(x, layer, *, stride, pad, relu, residual=None, relu_mask=None):
    """Conv (prepped (K, Cout) bf16 weight, BN folded) + bias (+res) (+ReLU).

    Returns the flat (M, Cout) bf16 output and the output spatial dims.
    """
    kh, kw = layer["kh"], layer["kw"]
    cols, (n, oh, ow) = _im2col(x, kh, kw, stride, pad)
    m, k = cols.shape
    k_tgt = layer["w"].shape[0]
    if k_tgt != k:  # stem: K=147 zero-padded to 256 to keep the MXU feed 128-aligned
        cols = jnp.pad(cols, ((0, 0), (0, k_tgt - k)))
    res = None
    if residual is not None:
        res = residual.astype(jnp.bfloat16).reshape(m, -1)
    out = _matmul_fused(cols, layer["w"], layer["b"], residual=res,
                        relu=relu, relu_mask=relu_mask)
    return out, (n, oh, ow)


def _maxpool_3x3_s2_p1(x):
    """PyTorch MaxPool2d(kernel_size=3, stride=2, padding=1) on NHWC bf16, gridded."""
    xp = jnp.pad(x, ((0, 0), (1, 1), (1, 1), (0, 0)),
                 constant_values=float("-inf"))
    n, h, w, c = xp.shape
    oh = (h - 3) // 2 + 1
    ow = (w - 3) // 2 + 1
    m = n * oh * ow
    taps = [
        xp[:, i: i + 2 * (oh - 1) + 1: 2,
              j: j + 2 * (ow - 1) + 1: 2, :].reshape(m, c)
        for i in range(3) for j in range(3)
    ]
    m_pad = _round_up(m, 8)
    if m_pad != m:
        taps = [jnp.pad(t, ((0, m_pad - m), (0, 0))) for t in taps]
    tm = _tile(m_pad, 512, 8)
    out = pl.pallas_call(
        _maxpool_kernel,
        out_shape=jax.ShapeDtypeStruct((m_pad, c), x.dtype),
        grid_spec=pltpu.PrefetchScalarGridSpec(
            num_scalar_prefetch=0,
            grid=(m_pad // tm,),
            in_specs=[pl.BlockSpec((tm, c), lambda i: (i, 0))] * 9,
            out_specs=pl.BlockSpec((tm, c), lambda i: (i, 0)),
        ),
        compiler_params=pltpu.CompilerParams(
            dimension_semantics=("parallel",),
            vmem_limit_bytes=8 * 1024 * 1024,
        ),
    )(*taps)
    return out[:m].reshape(n, oh, ow, c)


def _head(x, fc_w, fc_b):
    # Global average pool + Linear fused; fc is padded to 128 lanes, slice the 2 logits
    # outside the kernel (avoids a 2-lane masked store / near-empty MXU op).
    n, h, w, c = x.shape
    feats = x.reshape(n, h * w, c)
    out = pl.pallas_call(
        _head_kernel,
        out_shape=jax.ShapeDtypeStruct((n, fc_w.shape[1]), jnp.float32),
        in_specs=[pl.BlockSpec(memory_space=pltpu.MemorySpace.VMEM)] * 3,
        out_specs=pl.BlockSpec(memory_space=pltpu.MemorySpace.VMEM),
        compiler_params=pltpu.CompilerParams(vmem_limit_bytes=8 * 1024 * 1024),
    )(feats, fc_w, fc_b)
    return out[:, :2]


# ------------------------------------------------------------------- parameter prep

def _fold_bn(bn):
    scale = bn["gamma"] / jnp.sqrt(bn["var"] + _EPS)
    bias = bn["beta"] - bn["mean"] * scale
    return scale, bias


def _prep_conv(w, bn, cin_phys, cout_phys):
    """Fold BN scale into the weight, lay it out as (K, Cout_phys) bf16, pad channels."""
    cout, cin, kh, kw = w.shape
    scale, bias = _fold_bn(bn)
    w = w * scale[:, None, None, None]                 # BN scale folded into weight
    w = jnp.transpose(w, (2, 3, 1, 0))                 # (kh, kw, cin, cout)
    w = jnp.pad(w, ((0, 0), (0, 0),
                    (0, cin_phys - cin), (0, cout_phys - cout)))
    w = w.reshape(kh * kw * cin_phys, cout_phys)
    k_pad = _round_up(w.shape[0], _LANE)
    if k_pad != w.shape[0]:
        w = jnp.pad(w, ((0, k_pad - w.shape[0]), (0, 0)))
    b = jnp.pad(bias, (0, cout_phys - cout))[None, :]
    return {"w": w.astype(jnp.bfloat16), "b": b.astype(jnp.float32),
            "kh": kh, "kw": kw}


def prepare_params(raw):
    """One-time prep: BN fold, (K, Cout) bf16 layout, channel padding, conv1+down fusion."""
    p = {"stem": _prep_conv(raw["conv1"], raw["bn1"], cin_phys=3, cout_phys=_phys(64))}
    in_planes = 64
    for li, (planes, blocks, stride) in enumerate(_CFG):
        for bi in range(blocks):
            s = stride if bi == 0 else 1
            rp = raw[f"layer{li + 1}_{bi}"]
            cinp, coutp = _phys(in_planes), _phys(planes)
            blk = {"stride": s, "cout_phys": coutp,
                   "conv2": _prep_conv(rp["conv2"], rp["bn2"], coutp, coutp)}
            c1 = _prep_conv(rp["conv1"], rp["bn1"], cinp, coutp)
            if "down_conv" in rp:
                # Embed the 1x1 downsample at the centre tap of a 3x3 kernel so it shares
                # conv1's im2col, and concatenate along output channels -> one matmul
                # produces both conv1(x) (masked ReLU) and the residual identity.
                wd = rp["down_conv"]
                cout, cin = wd.shape[0], wd.shape[1]
                w3 = jnp.zeros((cout, cin, 3, 3), wd.dtype)
                w3 = w3.at[:, :, 1, 1].set(wd[:, :, 0, 0])
                dn = _prep_conv(w3, rp["down_bn"], cinp, coutp)
                blk["fused1"] = {
                    "w": jnp.concatenate([c1["w"], dn["w"]], axis=1),
                    "b": jnp.concatenate([c1["b"], dn["b"]], axis=1),
                    "kh": 3, "kw": 3,
                }
                blk["relu_mask"] = jnp.concatenate(
                    [jnp.ones((1, coutp), jnp.float32),
                     jnp.zeros((1, coutp), jnp.float32)], axis=1)
            else:
                blk["conv1"] = c1
            p[f"layer{li + 1}_{bi}"] = blk
            in_planes = planes
    fc_w = jnp.transpose(raw["fc_w"]).astype(jnp.float32)            # (512, 2)
    p["fc_w"] = jnp.pad(fc_w, ((0, 0), (0, _LANE - fc_w.shape[1])))  # (512, 128)
    p["fc_b"] = jnp.pad(raw["fc_b"].astype(jnp.float32),
                        (0, _LANE - raw["fc_b"].shape[0]))[None, :]  # (1, 128)
    return p


# ----------------------------------------------------------------------------- network

def forgery_detector_forward(params, x_nchw):
    # layout: NCHW in, NHWC bf16 compute (channels on the 128-lane axis), (N, 2) f32 out.
    x = jnp.transpose(x_nchw, (0, 2, 3, 1)).astype(jnp.bfloat16)

    # stem: conv7x7/s2 + BN + ReLU, maxpool3x3/s2
    out, dims = _conv_bn(x, params["stem"], stride=2, pad=3, relu=True)
    x = out.reshape(*dims, -1)
    x = _maxpool_3x3_s2_p1(x)

    # 4 stages of 2 BasicBlocks each
    # TODO(synk): conv1 -> conv2 of a BasicBlock is still two pallas_calls; keeping the
    #             intermediate in VMEM needs in-kernel window handling (follow-up).
    for li, (planes, blocks, stride) in enumerate(_CFG):
        for bi in range(blocks):
            p = params[f"layer{li + 1}_{bi}"]
            s = p["stride"]
            if "fused1" in p:
                cp = p["cout_phys"]
                cat, dims = _conv_bn(x, p["fused1"], stride=s, pad=1,
                                     relu=False, relu_mask=p["relu_mask"])
                out1 = cat[:, :cp]
                identity = cat[:, cp:]            # downsampled residual, bf16 (M, cp)
            else:
                out1, dims = _conv_bn(x, p["conv1"], stride=s, pad=1, relu=True)
                identity = x                      # NHWC, same spatial & channels
            out1 = out1.reshape(*dims, -1)
            out2, dims2 = _conv_bn(out1, p["conv2"], stride=1, pad=1, relu=True,
                                   residual=identity)
            x = out2.reshape(*dims2, -1)

    # head: global average pool + Linear(512 -> 2), fused in one Pallas kernel
    return _head(x, params["fc_w"], params["fc_b"])


# ------------------------------------------------------------------------------ params

def _init_params(key):
    keys = iter(jax.random.split(key, 256))

    def conv(cout, cin, kh, kw):
        fan_in = cin * kh * kw
        return jax.random.normal(next(keys), (cout, cin, kh, kw), jnp.float32) * \
            (2.0 / fan_in) ** 0.5

    def bn(c):
        k1, k2, k3, k4 = jax.random.split(next(keys), 4)
        return dict(
            gamma=1.0 + 0.05 * jax.random.normal(k1, (c,), jnp.float32),
            beta=0.05 * jax.random.normal(k2, (c,), jnp.float32),
            mean=0.05 * jax.random.normal(k3, (c,), jnp.float32),
            var=1.0 + 0.05 * jnp.abs(jax.random.normal(k4, (c,), jnp.float32)),
        )

    params = {"conv1": conv(64, 3, 7, 7), "bn1": bn(64)}
    in_planes = 64
    for li, (planes, blocks, stride) in enumerate(_CFG):
        for bi in range(blocks):
            s = stride if bi == 0 else 1
            p = {
                "conv1": conv(planes, in_planes, 3, 3), "bn1": bn(planes),
                "conv2": conv(planes, planes, 3, 3),    "bn2": bn(planes),
            }
            if s != 1 or in_planes != planes:
                p["down_conv"] = conv(planes, in_planes, 1, 1)
                p["down_bn"] = bn(planes)
            params[f"layer{li + 1}_{bi}"] = p
            in_planes = planes
    params["fc_w"] = jax.random.normal(next(keys), (2, 512), jnp.float32) * (1.0 / 512) ** 0.5
    params["fc_b"] = jnp.zeros((2,), jnp.float32)
    return params


# -------------------------------------------------------------------------------- main

if __name__ == "__main__":
    root = jax.random.PRNGKey(0)
    pkey, xkey = jax.random.split(root)
    raw_params = _init_params(pkey)
    params = prepare_params(raw_params)   # one-time: BN fold, bf16 (K, Cout) weights

    # Small input consistent with the module: NCHW, 3 channels, 32x32 spatial.
    x = jax.random.normal(xkey, (2, 3, 32, 32), jnp.float32)

    fwd = jax.jit(functools.partial(forgery_detector_forward, params))
    logits = fwd(x)
    jax.block_until_ready(logits)
    assert logits.shape == (2, 2) and logits.dtype == jnp.float32
    assert bool(jnp.all(jnp.isfinite(logits)))
    print("KERNEL_OK")
</pallas_src>

<mosaic_0001>
module attributes {stable_mosaic.version = 11 : i64} {
  func.func @_mm_kernel(%arg0: i32, %arg1: i32, %arg2: i32, %arg3: memref<256x256xbf16, #tpu.memory_space<vmem>>, %arg4: memref<256x128xbf16, #tpu.memory_space<vmem>>, %arg5: memref<1x128xf32, #tpu.memory_space<vmem>>, %arg6: memref<256x128xbf16, #tpu.memory_space<vmem>>, %arg7: memref<256x128xf32, #tpu.memory_space<vmem>>) attributes {dimension_semantics = [#tpu.dimension_semantics<parallel>, #tpu.dimension_semantics<parallel>, #tpu.dimension_semantics<arbitrary>], iteration_bounds = array<i64: 2, 1, 1>, scalar_prefetch = 0 : i64, scratch_operands = 1 : i64, tpu.core_type = #tpu.core_type<tc>, window_params = [{transform_indices = @transform_0, window_bounds = array<i64: 256, 256>}, {transform_indices = @transform_1, window_bounds = array<i64: 256, 128>}, {transform_indices = @transform_2, window_bounds = array<i64: 1, 128>}, {transform_indices = @transform_3, window_bounds = array<i64: 256, 128>}]} {
    %c0_i32 = arith.constant 0 : i32
    %0 = arith.cmpi eq, %arg2, %c0_i32 : i32
    %1 = arith.extui %0 : i1 to i32
    %c0_i32_0 = arith.constant 0 : i32
    %2 = arith.cmpi ne, %1, %c0_i32_0 : i32
    scf.if %2 {
      %cst_10 = arith.constant 0.000000e+00 : f32
      %12 = vector.broadcast %cst_10 : f32 to vector<256x128xf32>
      %c0_11 = arith.constant 0 : index
      %c0_12 = arith.constant 0 : index
      %13 = vector.load %arg7[%c0_11, %c0_12] : memref<256x128xf32, #tpu.memory_space<vmem>>, vector<256x128xf32>
      tpu.vector_store %arg7[%c0_11, %c0_12], %12 {strides = array<i32>} : memref<256x128xf32, #tpu.memory_space<vmem>>, vector<256x128xf32>,
    } else {
    }
    %c0 = arith.constant 0 : index
    %c0_1 = arith.constant 0 : index
    %3 = vector.load %arg7[%c0, %c0_1] : memref<256x128xf32, #tpu.memory_space<vmem>>, vector<256x128xf32>
    %c0_2 = arith.constant 0 : index
    %c0_3 = arith.constant 0 : index
    %4 = vector.load %arg3[%c0_2, %c0_3] : memref<256x256xbf16, #tpu.memory_space<vmem>>, vector<256x256xbf16>
    %c0_4 = arith.constant 0 : index
    %c0_5 = arith.constant 0 : index
    %5 = vector.load %arg4[%c0_4, %c0_5] : memref<256x128xbf16, #tpu.memory_space<vmem>>, vector<256x128xbf16>
    %cst = arith.constant dense<0.000000e+00> : vector<256x128xf32>
    %6 = tpu.matmul %4, %5, %cst {dimension_numbers = #tpu.dot_dimension_numbers<[1], [0], [0], [1], [0, 0, 1, 1], [], []>} : vector<256x256xbf16>, vector<256x128xbf16>, vector<256x128xf32> -> vector<256x128xf32>
    %7 = arith.addf %3, %6 : vector<256x128xf32>
    %c0_6 = arith.constant 0 : index
    %c0_7 = arith.constant 0 : index
    %8 = vector.load %arg7[%c0_6, %c0_7] : memref<256x128xf32, #tpu.memory_space<vmem>>, vector<256x128xf32>
    tpu.vector_store %arg7[%c0_6, %c0_7], %7 {strides = array<i32>} : memref<256x128xf32, #tpu.memory_space<vmem>>, vector<256x128xf32>,
    %c0_i32_8 = arith.constant 0 : i32
    %9 = arith.cmpi eq, %arg2, %c0_i32_8 : i32
    %10 = arith.extui %9 : i1 to i32
    %c0_i32_9 = arith.constant 0 : i32
    %11 = arith.cmpi ne, %10, %c0_i32_9 : i32
    scf.if %11 {
      %c0_10 = arith.constant 0 : index
      %c0_11 = arith.constant 0 : index
      %12 = vector.load %arg7[%c0_10, %c0_11] : memref<256x128xf32, #tpu.memory_space<vmem>>, vector<256x128xf32>
      %c0_12 = arith.constant 0 : index
      %c0_13 = arith.constant 0 : index
      %13 = vector.load %arg5[%c0_12, %c0_13] : memref<1x128xf32, #tpu.memory_space<vmem>>, vector<1x128xf32>
      %14 = vector.broadcast %13 : vector<1x128xf32> to vector<256x128xf32>
      %15 = arith.addf %12, %14 : vector<256x128xf32>
      %cst_14 = arith.constant 0.000000e+00 : f32
      %16 = vector.broadcast %cst_14 : f32 to vector<256x128xf32>
      %17 = arith.maximumf %15, %16 : vector<256x128xf32>
      %18 = arith.truncf %17 : vector<256x128xf32> to vector<256x128xbf16>
      %c0_15 = arith.constant 0 : index
      %c0_16 = arith.constant 0 : index
      %19 = vector.load %arg6[%c0_15, %c0_16] : memref<256x128xbf16, #tpu.memory_space<vmem>>, vector<256x128xbf16>
      tpu.vector_store %arg6[%c0_15, %c0_16], %18 {strides = array<i32>} : memref<256x128xbf16, #tpu.memory_space<vmem>>, vector<256x128xbf16>,
    } else {
    }
    return
  }
  func.func @transform_0(%arg0: i32, %arg1: i32, %arg2: i32) -> (i32, i32) {
    %c0_i32 = arith.constant 0 : i32
    return %arg0, %arg2 : i32, i32
  }
  func.func @transform_1(%arg0: i32, %arg1: i32, %arg2: i32) -> (i32, i32) {
    %c0_i32 = arith.constant 0 : i32
    return %arg2, %arg1 : i32, i32
  }
  func.func @transform_2(%arg0: i32, %arg1: i32, %arg2: i32) -> (i32, i32) {
    %c0_i32 = arith.constant 0 : i32
    %c0_i32_0 = arith.constant 0 : i32
    return %c0_i32, %arg1 : i32, i32
  }
  func.func @transform_3(%arg0: i32, %arg1: i32, %arg2: i32) -> (i32, i32) {
    %c0_i32 = arith.constant 0 : i32
    return %arg0, %arg1 : i32, i32
  }
}

module attributes {stable_mosaic.version = 11 : i64} {
  func.func @_maxpool_kernel(%arg0: i32, %arg1: memref<128x128xbf16, #tpu.memory_space<vmem>>, %arg2: memref<128x128xbf16, #tpu.memory_space<vmem>>, %arg3: memref<128x128xbf16, #tpu.memory_space<vmem>>, %arg4: memref<128x128xbf16, #tpu.memory_space<vmem>>, %arg5: memref<128x128xbf16, #tpu.memory_space<vmem>>, %arg6: memref<128x128xbf16, #tpu.memory_space<vmem>>, %arg7: memref<128x128xbf16, #tpu.memory_space<vmem>>, %arg8: memref<128x128xbf16, #tpu.memory_space<vmem>>, %arg9: memref<128x128xbf16, #tpu.memory_space<vmem>>, %arg10: memref<128x128xbf16, #tpu.memory_space<vmem>>) attributes {dimension_semantics = [#tpu.dimension_semantics<parallel>], iteration_bounds = array<i64: 1>, scalar_prefetch = 0 : i64, scratch_operands = 0 : i64, tpu.core_type = #tpu.core_type<tc>, window_params = [{transform_indices = @transform_0, window_bounds = array<i64: 128, 128>}, {transform_indices = @transform_1, window_bounds = array<i64: 128, 128>}, {transform_indices = @transform_2, window_bounds = array<i64: 128, 128>}, {transform_indices = @transform_3, window_bounds = array<i64: 128, 128>}, {transform_indices = @transform_4, window_bounds = array<i64: 128, 128>}, {transform_indices = @transform_5, window_bounds = array<i64: 128, 128>}, {transform_indices = @transform_6, window_bounds = array<i64: 128, 128>}, {transform_indices = @transform_7, window_bounds = array<i64: 128, 128>}, {transform_indices = @transform_8, window_bounds = array<i64: 128, 128>}, {transform_indices = @transform_9, window_bounds = array<i64: 128, 128>}]} {
    %c0 = arith.constant 0 : index
    %c0_0 = arith.constant 0 : index
    %0 = vector.load %arg1[%c0, %c0_0] : memref<128x128xbf16, #tpu.memory_space<vmem>>, vector<128x128xbf16>
    %c0_1 = arith.constant 0 : index
    %c0_2 = arith.constant 0 : index
    %1 = vector.load %arg2[%c0_1, %c0_2] : memref<128x128xbf16, #tpu.memory_space<vmem>>, vector<128x128xbf16>
    %2 = arith.maximumf %0, %1 : vector<128x128xbf16>
    %c0_3 = arith.constant 0 : index
    %c0_4 = arith.constant 0 : index
    %3 = vector.load %arg3[%c0_3, %c0_4] : memref<128x128xbf16, #tpu.memory_space<vmem>>, vector<128x128xbf16>
    %4 = arith.maximumf %2, %3 : vector<128x128xbf16>
    %c0_5 = arith.constant 0 : index
    %c0_6 = arith.constant 0 : index
    %5 = vector.load %arg4[%c0_5, %c0_6] : memref<128x128xbf16, #tpu.memory_space<vmem>>, vector<128x128xbf16>
    %6 = arith.maximumf %4, %5 : vector<128x128xbf16>
    %c0_7 = arith.constant 0 : index
    %c0_8 = arith.constant 0 : index
    %7 = vector.load %arg5[%c0_7, %c0_8] : memref<128x128xbf16, #tpu.memory_space<vmem>>, vector<128x128xbf16>
    %8 = arith.maximumf %6, %7 : vector<128x128xbf16>
    %c0_9 = arith.constant 0 : index
    %c0_10 = arith.constant 0 : index
    %9 = vector.load %arg6[%c0_9, %c0_10] : memref<128x128xbf16, #tpu.memory_space<vmem>>, vector<128x128xbf16>
    %10 = arith.maximumf %8, %9 : vector<128x128xbf16>
    %c0_11 = arith.constant 0 : index
    %c0_12 = arith.constant 0 : index
    %11 = vector.load %arg7[%c0_11, %c0_12] : memref<128x128xbf16, #tpu.memory_space<vmem>>, vector<128x128xbf16>
    %12 = arith.maximumf %10, %11 : vector<128x128xbf16>
    %c0_13 = arith.constant 0 : index
    %c0_14 = arith.constant 0 : index
    %13 = vector.load %arg8[%c0_13, %c0_14] : memref<128x128xbf16, #tpu.memory_space<vmem>>, vector<128x128xbf16>
    %14 = arith.maximumf %12, %13 : vector<128x128xbf16>
    %c0_15 = arith.constant 0 : index
    %c0_16 = arith.constant 0 : index
    %15 = vector.load %arg9[%c0_15, %c0_16] : memref<128x128xbf16, #tpu.memory_space<vmem>>, vector<128x128xbf16>
    %16 = arith.maximumf %14, %15 : vector<128x128xbf16>
    %c0_17 = arith.constant 0 : index
    %c0_18 = arith.constant 0 : index
    %17 = vector.load %arg10[%c0_17, %c0_18] : memref<128x128xbf16, #tpu.memory_space<vmem>>, vector<128x128xbf16>
    tpu.vector_store %arg10[%c0_17, %c0_18], %16 {strides = array<i32>} : memref<128x128xbf16, #tpu.memory_space<vmem>>, vector<128x128xbf16>,
    return
  }
  func.func @transform_0(%arg0: i32) -> (i32, i32) {
    %c0_i32 = arith.constant 0 : i32
    %c0_i32_0 = arith.constant 0 : i32
    return %arg0, %c0_i32 : i32, i32
  }
  func.func @transform_1(%arg0: i32) -> (i32, i32) {
    %c0_i32 = arith.constant 0 : i32
    %c0_i32_0 = arith.constant 0 : i32
    return %arg0, %c0_i32 : i32, i32
  }
  func.func @transform_2(%arg0: i32) -> (i32, i32) {
    %c0_i32 = arith.constant 0 : i32
    %c0_i32_0 = arith.constant 0 : i32
    return %arg0, %c0_i32 : i32, i32
  }
  func.func @transform_3(%arg0: i32) -> (i32, i32) {
    %c0_i32 = arith.constant 0 : i32
    %c0_i32_0 = arith.constant 0 : i32
    return %arg0, %c0_i32 : i32, i32
  }
  func.func @transform_4(%arg0: i32) -> (i32, i32) {
    %c0_i32 = arith.constant 0 : i32
    %c0_i32_0 = arith.constant 0 : i32
    return %arg0, %c0_i32 : i32, i32
  }
  func.func @transform_5(%arg0: i32) -> (i32, i32) {
    %c0_i32 = arith.constant 0 : i32
    %c0_i32_0 = arith.constant 0 : i32
    return %arg0, %c0_i32 : i32, i32
  }
  func.func @transform_6(%arg0: i32) -> (i32, i32) {
    %c0_i32 = arith.constant 0 : i32
    %c0_i32_0 = arith.constant 0 : i32
    return %arg0, %c0_i32 : i32, i32
  }
  func.func @transform_7(%arg0: i32) -> (i32, i32) {
    %c0_i32 = arith.constant 0 : i32
    %c0_i32_0 = arith.constant 0 : i32
    return %arg0, %c0_i32 : i32, i32
  }
  func.func @transform_8(%arg0: i32) -> (i32, i32) {
    %c0_i32 = arith.constant 0 : i32
    %c0_i32_0 = arith.constant 0 : i32
    return %arg0, %c0_i32 : i32, i32
  }
  func.func @transform_9(%arg0: i32) -> (i32, i32) {
    %c0_i32 = arith.constant 0 : i32
    %c0_i32_0 = arith.constant 0 : i32
    return %arg0, %c0_i32 : i32, i32
  }
}

module attributes {stable_mosaic.version = 11 : i64} {
  func.func @_mm_kernel(%arg0: i32, %arg1: i32, %arg2: i32, %arg3: memref<64x384xbf16, #tpu.memory_space<vmem>>, %arg4: memref<384x128xbf16, #tpu.memory_space<vmem>>, %arg5: memref<1x128xf32, #tpu.memory_space<vmem>>, %arg6: memref<64x128xbf16, #tpu.memory_space<vmem>>, %arg7: memref<64x128xbf16, #tpu.memory_space<vmem>>, %arg8: memref<64x128xf32, #tpu.memory_space<vmem>>) attributes {dimension_semantics = [#tpu.dimension_semantics<parallel>, #tpu.dimension_semantics<parallel>, #tpu.dimension_semantics<arbitrary>], iteration_bounds = array<i64: 2, 1, 3>, scalar_prefetch = 0 : i64, scratch_operands = 1 : i64, tpu.core_type = #tpu.core_type<tc>, window_params = [{transform_indices = @transform_0, window_bounds = array<i64: 64, 384>}, {transform_indices = @transform_1, window_bounds = array<i64: 384, 128>}, {transform_indices = @transform_2, window_bounds = array<i64: 1, 128>}, {transform_indices = @transform_3, window_bounds = array<i64: 64, 128>}, {transform_indices = @transform_4, window_bounds = array<i64: 64, 128>}]} {
    %c0_i32 = arith.constant 0 : i32
    %0 = arith.cmpi eq, %arg2, %c0_i32 : i32
    %1 = arith.extui %0 : i1 to i32
    %c0_i32_0 = arith.constant 0 : i32
    %2 = arith.cmpi ne, %1, %c0_i32_0 : i32
    scf.if %2 {
      %cst_9 = arith.constant 0.000000e+00 : f32
      %12 = vector.broadcast %cst_9 : f32 to vector<64x128xf32>
      %c0_10 = arith.constant 0 : index
      %c0_11 = arith.constant 0 : index
      %13 = vector.load %arg8[%c0_10, %c0_11] : memref<64x128xf32, #tpu.memory_space<vmem>>, vector<64x128xf32>
      tpu.vector_store %arg8[%c0_10, %c0_11], %12 {strides = array<i32>} : memref<64x128xf32, #tpu.memory_space<vmem>>, vector<64x128xf32>,
    } else {
    }
    %c0 = arith.constant 0 : index
    %c0_1 = arith.constant 0 : index
    %3 = vector.load %arg8[%c0, %c0_1] : memref<64x128xf32, #tpu.memory_space<vmem>>, vector<64x128xf32>
    %c0_2 = arith.constant 0 : index
    %c0_3 = arith.constant 0 : index
    %4 = vector.load %arg3[%c0_2, %c0_3] : memref<64x384xbf16, #tpu.memory_space<vmem>>, vector<64x384xbf16>
    %c0_4 = arith.constant 0 : index
    %c0_5 = arith.constant 0 : index
    %5 = vector.load %arg4[%c0_4, %c0_5] : memref<384x128xbf16, #tpu.memory_space<vmem>>, vector<384x128xbf16>
    %cst = arith.constant dense<0.000000e+00> : vector<64x128xf32>
    %6 = tpu.matmul %4, %5, %cst {dimension_numbers = #tpu.dot_dimension_numbers<[1], [0], [0], [1], [0, 0, 1, 1], [], []>} : vector<64x384xbf16>, vector<384x128xbf16>, vector<64x128xf32> -> vector<64x128xf32>
    %7 = arith.addf %3, %6 : vector<64x128xf32>
    %c0_6 = arith.constant 0 : index
    %c0_7 = arith.constant 0 : index
    %8 = vector.load %arg8[%c0_6, %c0_7] : memref<64x128xf32, #tpu.memory_space<vmem>>, vector<64x128xf32>
    tpu.vector_store %arg8[%c0_6, %c0_7], %7 {strides = array<i32>} : memref<64x128xf32, #tpu.memory_space<vmem>>, vector<64x128xf32>,
    %c2_i32 = arith.constant 2 : i32
    %9 = arith.cmpi eq, %arg2, %c2_i32 : i32
    %10 = arith.extui %9 : i1 to i32
    %c0_i32_8 = arith.constant 0 : i32
    %11 = arith.cmpi ne, %10, %c0_i32_8 : i32
    scf.if %11 {
      %c0_9 = arith.constant 0 : index
      %c0_10 = arith.constant 0 : index
      %12 = vector.load %arg8[%c0_9, %c0_10] : memref<64x128xf32, #tpu.memory_space<vmem>>, vector<64x128xf32>
      %c0_11 = arith.constant 0 : index
      %c0_12 = arith.constant 0 : index
      %13 = vector.load %arg5[%c0_11, %c0_12] : memref<1x128xf32, #tpu.memory_space<vmem>>, vector<1x128xf32>
      %14 = vector.broadcast %13 : vector<1x128xf32> to vector<64x128xf32>
      %15 = arith.addf %12, %14 : vector<64x128xf32>
      %c0_13 = arith.constant 0 : index
      %c0_14 = arith.constant 0 : index
      %16 = vector.load %arg6[%c0_13, %c0_14] : memref<64x128xbf16, #tpu.memory_space<vmem>>, vector<64x128xbf16>
      %17 = arith.extf %16 : vector<64x128xbf16> to vector<64x128xf32>
      %18 = arith.addf %15, %17 : vector<64x128xf32>
      %cst_15 = arith.constant 0.000000e+00 : f32
      %19 = vector.broadcast %cst_15 : f32 to vector<64x128xf32>
      %20 = arith.maximumf %18, %19 : vector<64x128xf32>
      %21 = arith.truncf %20 : vector<64x128xf32> to vector<64x128xbf16>
      %c0_16 = arith.constant 0 : index
      %c0_17 = arith.constant 0 : index
      %22 = vector.load %arg7[%c0_16, %c0_17] : memref<64x128xbf16, #tpu.memory_space<vmem>>, vector<64x128xbf16>
      tpu.vector_store %arg7[%c0_16, %c0_17], %21 {strides = array<i32>} : memref<64x128xbf16, #tpu.memory_space<vmem>>, vector<64x128xbf16>,
    } else {
    }
    return
  }
  func.func @transform_0(%arg0: i32, %arg1: i32, %arg2: i32) -> (i32, i32) {
    %c0_i32 = arith.constant 0 : i32
    return %arg0, %arg2 : i32, i32
  }
  func.func @transform_1(%arg0: i32, %arg1: i32, %arg2: i32) -> (i32, i32) {
    %c0_i32 = arith.constant 0 : i32
    return %arg2, %arg1 : i32, i32
  }
  func.func @transform_2(%arg0: i32, %arg1: i32, %arg2: i32) -> (i32, i32) {
    %c0_i32 = arith.constant 0 : i32
    %c0_i32_0 = arith.constant 0 : i32
    return %c0_i32, %arg1 : i32, i32
  }
  func.func @transform_3(%arg0: i32, %arg1: i32, %arg2: i32) -> (i32, i32) {
    %c0_i32 = arith.constant 0 : i32
    return %arg0, %arg1 : i32, i32
  }
  func.func @transform_4(%arg0: i32, %arg1: i32, %arg2: i32) -> (i32, i32) {
    %c0_i32 = arith.constant 0 : i32
    return %arg0, %arg1 : i32, i32
  }
}

module attributes {stable_mosaic.version = 11 : i64} {
  func.func @_mm_kernel(%arg0: i32, %arg1: i32, %arg2: i32, %arg3: memref<64x384xbf16, #tpu.memory_space<vmem>>, %arg4: memref<384x128xbf16, #tpu.memory_space<vmem>>, %arg5: memref<1x128xf32, #tpu.memory_space<vmem>>, %arg6: memref<64x128xbf16, #tpu.memory_space<vmem>>, %arg7: memref<64x128xf32, #tpu.memory_space<vmem>>) attributes {dimension_semantics = [#tpu.dimension_semantics<parallel>, #tpu.dimension_semantics<parallel>, #tpu.dimension_semantics<arbitrary>], iteration_bounds = array<i64: 2, 1, 3>, scalar_prefetch = 0 : i64, scratch_operands = 1 : i64, tpu.core_type = #tpu.core_type<tc>, window_params = [{transform_indices = @transform_0, window_bounds = array<i64: 64, 384>}, {transform_indices = @transform_1, window_bounds = array<i64: 384, 128>}, {transform_indices = @transform_2, window_bounds = array<i64: 1, 128>}, {transform_indices = @transform_3, window_bounds = array<i64: 64, 128>}]} {
    %c0_i32 = arith.constant 0 : i32
    %0 = arith.cmpi eq, %arg2, %c0_i32 : i32
    %1 = arith.extui %0 : i1 to i32
    %c0_i32_0 = arith.constant 0 : i32
    %2 = arith.cmpi ne, %1, %c0_i32_0 : i32
    scf.if %2 {
      %cst_9 = arith.constant 0.000000e+00 : f32
      %12 = vector.broadcast %cst_9 : f32 to vector<64x128xf32>
      %c0_10 = arith.constant 0 : index
      %c0_11 = arith.constant 0 : index
      %13 = vector.load %arg7[%c0_10, %c0_11] : memref<64x128xf32, #tpu.memory_space<vmem>>, vector<64x128xf32>
      tpu.vector_store %arg7[%c0_10, %c0_11], %12 {strides = array<i32>} : memref<64x128xf32, #tpu.memory_space<vmem>>, vector<64x128xf32>,
    } else {
    }
    %c0 = arith.constant 0 : index
    %c0_1 = arith.constant 0 : index
    %3 = vector.load %arg7[%c0, %c0_1] : memref<64x128xf32, #tpu.memory_space<vmem>>, vector<64x128xf32>
    %c0_2 = arith.constant 0 : index
    %c0_3 = arith.constant 0 : index
    %4 = vector.load %arg3[%c0_2, %c0_3] : memref<64x384xbf16, #tpu.memory_space<vmem>>, vector<64x384xbf16>
    %c0_4 = arith.constant 0 : index
    %c0_5 = arith.constant 0 : index
    %5 = vector.load %arg4[%c0_4, %c0_5] : memref<384x128xbf16, #tpu.memory_space<vmem>>, vector<384x128xbf16>
    %cst = arith.constant dense<0.000000e+00> : vector<64x128xf32>
    %6 = tpu.matmul %4, %5, %cst {dimension_numbers = #tpu.dot_dimension_numbers<[1], [0], [0], [1], [0, 0, 1, 1], [], []>} : vector<64x384xbf16>, vector<384x128xbf16>, vector<64x128xf32> -> vector<64x128xf32>
    %7 = arith.addf %3, %6 : vector<64x128xf32>
    %c0_6 = arith.constant 0 : index
    %c0_7 = arith.constant 0 : index
    %8 = vector.load %arg7[%c0_6, %c0_7] : memref<64x128xf32, #tpu.memory_space<vmem>>, vector<64x128xf32>
    tpu.vector_store %arg7[%c0_6, %c0_7], %7 {strides = array<i32>} : memref<64x128xf32, #tpu.memory_space<vmem>>, vector<64x128xf32>,
    %c2_i32 = arith.constant 2 : i32
    %9 = arith.cmpi eq, %arg2, %c2_i32 : i32
    %10 = arith.extui %9 : i1 to i32
    %c0_i32_8 = arith.constant 0 : i32
    %11 = arith.cmpi ne, %10, %c0_i32_8 : i32
    scf.if %11 {
      %c0_9 = arith.constant 0 : index
      %c0_10 = arith.constant 0 : index
      %12 = vector.load %arg7[%c0_9, %c0_10] : memref<64x128xf32, #tpu.memory_space<vmem>>, vector<64x128xf32>
      %c0_11 = arith.constant 0 : index
      %c0_12 = arith.constant 0 : index
      %13 = vector.load %arg5[%c0_11, %c0_12] : memref<1x128xf32, #tpu.memory_space<vmem>>, vector<1x128xf32>
      %14 = vector.broadcast %13 : vector<1x128xf32> to vector<64x128xf32>
      %15 = arith.addf %12, %14 : vector<64x128xf32>
      %cst_13 = arith.constant 0.000000e+00 : f32
      %16 = vector.broadcast %cst_13 : f32 to vector<64x128xf32>
      %17 = arith.maximumf %15, %16 : vector<64x128xf32>
      %18 = arith.truncf %17 : vector<64x128xf32> to vector<64x128xbf16>
      %c0_14 = arith.constant 0 : index
      %c0_15 = arith.constant 0 : index
      %19 = vector.load %arg6[%c0_14, %c0_15] : memref<64x128xbf16, #tpu.memory_space<vmem>>, vector<64x128xbf16>
      tpu.vector_store %arg6[%c0_14, %c0_15], %18 {strides = array<i32>} : memref<64x128xbf16, #tpu.memory_space<vmem>>, vector<64x128xbf16>,
    } else {
    }
    return
  }
  func.func @transform_0(%arg0: i32, %arg1: i32, %arg2: i32) -> (i32, i32) {
    %c0_i32 = arith.constant 0 : i32
    return %arg0, %arg2 : i32, i32
  }
  func.func @transform_1(%arg0: i32, %arg1: i32, %arg2: i32) -> (i32, i32) {
    %c0_i32 = arith.constant 0 : i32
    return %arg2, %arg1 : i32, i32
  }
  func.func @transform_2(%arg0: i32, %arg1: i32, %arg2: i32) -> (i32, i32) {
    %c0_i32 = arith.constant 0 : i32
    %c0_i32_0 = arith.constant 0 : i32
    return %c0_i32, %arg1 : i32, i32
  }
  func.func @transform_3(%arg0: i32, %arg1: i32, %arg2: i32) -> (i32, i32) {
    %c0_i32 = arith.constant 0 : i32
    return %arg0, %arg1 : i32, i32
  }
}

module attributes {stable_mosaic.version = 11 : i64} {
  func.func @_mm_kernel(%arg0: i32, %arg1: i32, %arg2: i32, %arg3: memref<16x384xbf16, #tpu.memory_space<vmem>>, %arg4: memref<384x256xbf16, #tpu.memory_space<vmem>>, %arg5: memref<1x256xf32, #tpu.memory_space<vmem>>, %arg6: memref<1x256xf32, #tpu.memory_space<vmem>>, %arg7: memref<16x256xbf16, #tpu.memory_space<vmem>>, %arg8: memref<16x256xf32, #tpu.memory_space<vmem>>) attributes {dimension_semantics = [#tpu.dimension_semantics<parallel>, #tpu.dimension_semantics<parallel>, #tpu.dimension_semantics<arbitrary>], iteration_bounds = array<i64: 2, 1, 3>, scalar_prefetch = 0 : i64, scratch_operands = 1 : i64, tpu.core_type = #tpu.core_type<tc>, window_params = [{transform_indices = @transform_0, window_bounds = array<i64: 16, 384>}, {transform_indices = @transform_1, window_bounds = array<i64: 384, 256>}, {transform_indices = @transform_2, window_bounds = array<i64: 1, 256>}, {transform_indices = @transform_3, window_bounds = array<i64: 1, 256>}, {transform_indices = @transform_4, window_bounds = array<i64: 16, 256>}]} {
    %c0_i32 = arith.constant 0 : i32
    %0 = arith.cmpi eq, %arg2, %c0_i32 : i32
    %1 = arith.extui %0 : i1 to i32
    %c0_i32_0 = arith.constant 0 : i32
    %2 = arith.cmpi ne, %1, %c0_i32_0 : i32
    scf.if %2 {
      %cst_9 = arith.constant 0.000000e+00 : f32
      %12 = vector.broadcast %cst_9 : f32 to vector<16x256xf32>
      %c0_10 = arith.constant 0 : index
      %c0_11 = arith.constant 0 : index
      %13 = vector.load %arg8[%c0_10, %c0_11] : memref<16x256xf32, #tpu.memory_space<vmem>>, vector<16x256xf32>
      tpu.vector_store %arg8[%c0_10, %c0_11], %12 {strides = array<i32>} : memref<16x256xf32, #tpu.memory_space<vmem>>, vector<16x256xf32>,
    } else {
    }
    %c0 = arith.constant 0 : index
    %c0_1 = arith.constant 0 : index
    %3 = vector.load %arg8[%c0, %c0_1] : memref<16x256xf32, #tpu.memory_space<vmem>>, vector<16x256xf32>
    %c0_2 = arith.constant 0 : index
    %c0_3 = arith.constant 0 : index
    %4 = vector.load %arg3[%c0_2, %c0_3] : memref<16x384xbf16, #tpu.memory_space<vmem>>, vector<16x384xbf16>
    %c0_4 = arith.constant 0 : index
    %c0_5 = arith.constant 0 : index
    %5 = vector.load %arg4[%c0_4, %c0_5] : memref<384x256xbf16, #tpu.memory_space<vmem>>, vector<384x256xbf16>
    %cst = arith.constant dense<0.000000e+00> : vector<16x256xf32>
    %6 = tpu.matmul %4, %5, %cst {dimension_numbers = #tpu.dot_dimension_numbers<[1], [0], [0], [1], [0, 0, 1, 1], [], []>} : vector<16x384xbf16>, vector<384x256xbf16>, vector<16x256xf32> -> vector<16x256xf32>
    %7 = arith.addf %3, %6 : vector<16x256xf32>
    %c0_6 = arith.constant 0 : index
    %c0_7 = arith.constant 0 : index
    %8 = vector.load %arg8[%c0_6, %c0_7] : memref<16x256xf32, #tpu.memory_space<vmem>>, vector<16x256xf32>
    tpu.vector_store %arg8[%c0_6, %c0_7], %7 {strides = array<i32>} : memref<16x256xf32, #tpu.memory_space<vmem>>, vector<16x256xf32>,
    %c2_i32 = arith.constant 2 : i32
    %9 = arith.cmpi eq, %arg2, %c2_i32 : i32
    %10 = arith.extui %9 : i1 to i32
    %c0_i32_8 = arith.constant 0 : i32
    %11 = arith.cmpi ne, %10, %c0_i32_8 : i32
    scf.if %11 {
      %c0_9 = arith.constant 0 : index
      %c0_10 = arith.constant 0 : index
      %12 = vector.load %arg8[%c0_9, %c0_10] : memref<16x256xf32, #tpu.memory_space<vmem>>, vector<16x256xf32>
      %c0_11 = arith.constant 0 : index
      %c0_12 = arith.constant 0 : index
      %13 = vector.load %arg5[%c0_11, %c0_12] : memref<1x256xf32, #tpu.memory_space<vmem>>, vector<1x256xf32>
      %14 = vector.broadcast %13 : vector<1x256xf32> to vector<16x256xf32>
      %15 = arith.addf %12, %14 : vector<16x256xf32>
      %c0_13 = arith.constant 0 : index
      %c0_14 = arith.constant 0 : index
      %16 = vector.load %arg6[%c0_13, %c0_14] : memref<1x256xf32, #tpu.memory_space<vmem>>, vector<1x256xf32>
      %cst_15 = arith.constant 0.000000e+00 : f32
      %17 = vector.broadcast %cst_15 : f32 to vector<1x256xf32>
      %18 = arith.cmpf one, %16, %17 : vector<1x256xf32>
      %cst_16 = arith.constant 0.000000e+00 : f32
      %19 = vector.broadcast %cst_16 : f32 to vector<16x256xf32>
      %20 = arith.maximumf %15, %19 : vector<16x256xf32>
      %21 = vector.shape_cast %18 : vector<1x256xi1> to vector<1x256xi1>
      %22 = vector.broadcast %21 : vector<1x256xi1> to vector<16x256xi1>
      %23 = arith.select %22, %20, %15 : vector<16x256xi1>, vector<16x256xf32>
      %24 = arith.truncf %23 : vector<16x256xf32> to vector<16x256xbf16>
      %c0_17 = arith.constant 0 : index
      %c0_18 = arith.constant 0 : index
      %25 = vector.load %arg7[%c0_17, %c0_18] : memref<16x256xbf16, #tpu.memory_space<vmem>>, vector<16x256xbf16>
      tpu.vector_store %arg7[%c0_17, %c0_18], %24 {strides = array<i32>} : memref<16x256xbf16, #tpu.memory_space<vmem>>, vector<16x256xbf16>,
    } else {
    }
    return
  }
  func.func @transform_0(%arg0: i32, %arg1: i32, %arg2: i32) -> (i32, i32) {
    %c0_i32 = arith.constant 0 : i32
    return %arg0, %arg2 : i32, i32
  }
  func.func @transform_1(%arg0: i32, %arg1: i32, %arg2: i32) -> (i32, i32) {
    %c0_i32 = arith.constant 0 : i32
    return %arg2, %arg1 : i32, i32
  }
  func.func @transform_2(%arg0: i32, %arg1: i32, %arg2: i32) -> (i32, i32) {
    %c0_i32 = arith.constant 0 : i32
    %c0_i32_0 = arith.constant 0 : i32
    return %c0_i32, %arg1 : i32, i32
  }
  func.func @transform_3(%arg0: i32, %arg1: i32, %arg2: i32) -> (i32, i32) {
    %c0_i32 = arith.constant 0 : i32
    %c0_i32_0 = arith.constant 0 : i32
    return %c0_i32, %arg1 : i32, i32
  }
  func.func @transform_4(%arg0: i32, %arg1: i32, %arg2: i32) -> (i32, i32) {
    %c0_i32 = arith.constant 0 : i32
    return %arg0, %arg1 : i32, i32
  }
}

module attributes {stable_mosaic.version = 11 : i64} {
  func.func @_mm_kernel(%arg0: i32, %arg1: i32, %arg2: i32, %arg3: memref<16x384xbf16, #tpu.memory_space<vmem>>, %arg4: memref<384x128xbf16, #tpu.memory_space<vmem>>, %arg5: memref<1x128xf32, #tpu.memory_space<vmem>>, %arg6: memref<16x128xbf16, #tpu.memory_space<vmem>>, %arg7: memref<16x128xbf16, #tpu.memory_space<vmem>>, %arg8: memref<16x128xf32, #tpu.memory_space<vmem>>) attributes {dimension_semantics = [#tpu.dimension_semantics<parallel>, #tpu.dimension_semantics<parallel>, #tpu.dimension_semantics<arbitrary>], iteration_bounds = array<i64: 2, 1, 3>, scalar_prefetch = 0 : i64, scratch_operands = 1 : i64, tpu.core_type = #tpu.core_type<tc>, window_params = [{transform_indices = @transform_0, window_bounds = array<i64: 16, 384>}, {transform_indices = @transform_1, window_bounds = array<i64: 384, 128>}, {transform_indices = @transform_2, window_bounds = array<i64: 1, 128>}, {transform_indices = @transform_3, window_bounds = array<i64: 16, 128>}, {transform_indices = @transform_4, window_bounds = array<i64: 16, 128>}]} {
    %c0_i32 = arith.constant 0 : i32
    %0 = arith.cmpi eq, %arg2, %c0_i32 : i32
    %1 = arith.extui %0 : i1 to i32
    %c0_i32_0 = arith.constant 0 : i32
    %2 = arith.cmpi ne, %1, %c0_i32_0 : i32
    scf.if %2 {
      %cst_9 = arith.constant 0.000000e+00 : f32
      %12 = vector.broadcast %cst_9 : f32 to vector<16x128xf32>
      %c0_10 = arith.constant 0 : index
      %c0_11 = arith.constant 0 : index
      %13 = vector.load %arg8[%c0_10, %c0_11] : memref<16x128xf32, #tpu.memory_space<vmem>>, vector<16x128xf32>
      tpu.vector_store %arg8[%c0_10, %c0_11], %12 {strides = array<i32>} : memref<16x128xf32, #tpu.memory_space<vmem>>, vector<16x128xf32>,
    } else {
    }
    %c0 = arith.constant 0 : index
    %c0_1 = arith.constant 0 : index
    %3 = vector.load %arg8[%c0, %c0_1] : memref<16x128xf32, #tpu.memory_space<vmem>>, vector<16x128xf32>
    %c0_2 = arith.constant 0 : index
    %c0_3 = arith.constant 0 : index
    %4 = vector.load %arg3[%c0_2, %c0_3] : memref<16x384xbf16, #tpu.memory_space<vmem>>, vector<16x384xbf16>
    %c0_4 = arith.constant 0 : index
    %c0_5 = arith.constant 0 : index
    %5 = vector.load %arg4[%c0_4, %c0_5] : memref<384x128xbf16, #tpu.memory_space<vmem>>, vector<384x128xbf16>
    %cst = arith.constant dense<0.000000e+00> : vector<16x128xf32>
    %6 = tpu.matmul %4, %5, %cst {dimension_numbers = #tpu.dot_dimension_numbers<[1], [0], [0], [1], [0, 0, 1, 1], [], []>} : vector<16x384xbf16>, vector<384x128xbf16>, vector<16x128xf32> -> vector<16x128xf32>
    %7 = arith.addf %3, %6 : vector<16x128xf32>
    %c0_6 = arith.constant 0 : index
    %c0_7 = arith.constant 0 : index
    %8 = vector.load %arg8[%c0_6, %c0_7] : memref<16x128xf32, #tpu.memory_space<vmem>>, vector<16x128xf32>
    tpu.vector_store %arg8[%c0_6, %c0_7], %7 {strides = array<i32>} : memref<16x128xf32, #tpu.memory_space<vmem>>, vector<16x128xf32>,
    %c2_i32 = arith.constant 2 : i32
    %9 = arith.cmpi eq, %arg2, %c2_i32 : i32
    %10 = arith.extui %9 : i1 to i32
    %c0_i32_8 = arith.constant 0 : i32
    %11 = arith.cmpi ne, %10, %c0_i32_8 : i32
    scf.if %11 {
      %c0_9 = arith.constant 0 : index
      %c0_10 = arith.constant 0 : index
      %12 = vector.load %arg8[%c0_9, %c0_10] : memref<16x128xf32, #tpu.memory_space<vmem>>, vector<16x128xf32>
      %c0_11 = arith.constant 0 : index
      %c0_12 = arith.constant 0 : index
      %13 = vector.load %arg5[%c0_11, %c0_12] : memref<1x128xf32, #tpu.memory_space<vmem>>, vector<1x128xf32>
      %14 = vector.broadcast %13 : vector<1x128xf32> to vector<16x128xf32>
      %15 = arith.addf %12, %14 : vector<16x128xf32>
      %c0_13 = arith.constant 0 : index
      %c0_14 = arith.constant 0 : index
      %16 = vector.load %arg6[%c0_13, %c0_14] : memref<16x128xbf16, #tpu.memory_space<vmem>>, vector<16x128xbf16>
      %17 = arith.extf %16 : vector<16x128xbf16> to vector<16x128xf32>
      %18 = arith.addf %15, %17 : vector<16x128xf32>
      %cst_15 = arith.constant 0.000000e+00 : f32
      %19 = vector.broadcast %cst_15 : f32 to vector<16x128xf32>
      %20 = arith.maximumf %18, %19 : vector<16x128xf32>
      %21 = arith.truncf %20 : vector<16x128xf32> to vector<16x128xbf16>
      %c0_16 = arith.constant 0 : index
      %c0_17 = arith.constant 0 : index
      %22 = vector.load %arg7[%c0_16, %c0_17] : memref<16x128xbf16, #tpu.memory_space<vmem>>, vector<16x128xbf16>
      tpu.vector_store %arg7[%c0_16, %c0_17], %21 {strides = array<i32>} : memref<16x128xbf16, #tpu.memory_space<vmem>>, vector<16x128xbf16>,
    } else {
    }
    return
  }
  func.func @transform_0(%arg0: i32, %arg1: i32, %arg2: i32) -> (i32, i32) {
    %c0_i32 = arith.constant 0 : i32
    return %arg0, %arg2 : i32, i32
  }
  func.func @transform_1(%arg0: i32, %arg1: i32, %arg2: i32) -> (i32, i32) {
    %c0_i32 = arith.constant 0 : i32
    return %arg2, %arg1 : i32, i32
  }
  func.func @transform_2(%arg0: i32, %arg1: i32, %arg2: i32) -> (i32, i32) {
    %c0_i32 = arith.constant 0 : i32
    %c0_i32_0 = arith.constant 0 : i32
    return %c0_i32, %arg1 : i32, i32
  }
  func.func @transform_3(%arg0: i32, %arg1: i32, %arg2: i32) -> (i32, i32) {
    %c0_i32 = arith.constant 0 : i32
    return %arg0, %arg1 : i32, i32
  }
  func.func @transform_4(%arg0: i32, %arg1: i32, %arg2: i32) -> (i32, i32) {
    %c0_i32 = arith.constant 0 : i32
    return %arg0, %arg1 : i32, i32
  }
}

module attributes {stable_mosaic.version = 11 : i64} {
  func.func @_mm_kernel(%arg0: i32, %arg1: i32, %arg2: i32, %arg3: memref<16x384xbf16, #tpu.memory_space<vmem>>, %arg4: memref<384x128xbf16, #tpu.memory_space<vmem>>, %arg5: memref<1x128xf32, #tpu.memory_space<vmem>>, %arg6: memref<16x128xbf16, #tpu.memory_space<vmem>>, %arg7: memref<16x128xf32, #tpu.memory_space<vmem>>) attributes {dimension_semantics = [#tpu.dimension_semantics<parallel>, #tpu.dimension_semantics<parallel>, #tpu.dimension_semantics<arbitrary>], iteration_bounds = array<i64: 2, 1, 3>, scalar_prefetch = 0 : i64, scratch_operands = 1 : i64, tpu.core_type = #tpu.core_type<tc>, window_params = [{transform_indices = @transform_0, window_bounds = array<i64: 16, 384>}, {transform_indices = @transform_1, window_bounds = array<i64: 384, 128>}, {transform_indices = @transform_2, window_bounds = array<i64: 1, 128>}, {transform_indices = @transform_3, window_bounds = array<i64: 16, 128>}]} {
    %c0_i32 = arith.constant 0 : i32
    %0 = arith.cmpi eq, %arg2, %c0_i32 : i32
    %1 = arith.extui %0 : i1 to i32
    %c0_i32_0 = arith.constant 0 : i32
    %2 = arith.cmpi ne, %1, %c0_i32_0 : i32
    scf.if %2 {
      %cst_9 = arith.constant 0.000000e+00 : f32
      %12 = vector.broadcast %cst_9 : f32 to vector<16x128xf32>
      %c0_10 = arith.constant 0 : index
      %c0_11 = arith.constant 0 : index
      %13 = vector.load %arg7[%c0_10, %c0_11] : memref<16x128xf32, #tpu.memory_space<vmem>>, vector<16x128xf32>
      tpu.vector_store %arg7[%c0_10, %c0_11], %12 {strides = array<i32>} : memref<16x128xf32, #tpu.memory_space<vmem>>, vector<16x128xf32>,
    } else {
    }
    %c0 = arith.constant 0 : index
    %c0_1 = arith.constant 0 : index
    %3 = vector.load %arg7[%c0, %c0_1] : memref<16x128xf32, #tpu.memory_space<vmem>>, vector<16x128xf32>
    %c0_2 = arith.constant 0 : index
    %c0_3 = arith.constant 0 : index
    %4 = vector.load %arg3[%c0_2, %c0_3] : memref<16x384xbf16, #tpu.memory_space<vmem>>, vector<16x384xbf16>
    %c0_4 = arith.constant 0 : index
    %c0_5 = arith.constant 0 : index
    %5 = vector.load %arg4[%c0_4, %c0_5] : memref<384x128xbf16, #tpu.memory_space<vmem>>, vector<384x128xbf16>
    %cst = arith.constant dense<0.000000e+00> : vector<16x128xf32>
    %6 = tpu.matmul %4, %5, %cst {dimension_numbers = #tpu.dot_dimension_numbers<[1], [0], [0], [1], [0, 0, 1, 1], [], []>} : vector<16x384xbf16>, vector<384x128xbf16>, vector<16x128xf32> -> vector<16x128xf32>
    %7 = arith.addf %3, %6 : vector<16x128xf32>
    %c0_6 = arith.constant 0 : index
    %c0_7 = arith.constant 0 : index
    %8 = vector.load %arg7[%c0_6, %c0_7] : memref<16x128xf32, #tpu.memory_space<vmem>>, vector<16x128xf32>
    tpu.vector_store %arg7[%c0_6, %c0_7], %7 {strides = array<i32>} : memref<16x128xf32, #tpu.memory_space<vmem>>, vector<16x128xf32>,
    %c2_i32 = arith.constant 2 : i32
    %9 = arith.cmpi eq, %arg2, %c2_i32 : i32
    %10 = arith.extui %9 : i1 to i32
    %c0_i32_8 = arith.constant 0 : i32
    %11 = arith.cmpi ne, %10, %c0_i32_8 : i32
    scf.if %11 {
      %c0_9 = arith.constant 0 : index
      %c0_10 = arith.constant 0 : index
      %12 = vector.load %arg7[%c0_9, %c0_10] : memref<16x128xf32, #tpu.memory_space<vmem>>, vector<16x128xf32>
      %c0_11 = arith.constant 0 : index
      %c0_12 = arith.constant 0 : index
      %13 = vector.load %arg5[%c0_11, %c0_12] : memref<1x128xf32, #tpu.memory_space<vmem>>, vector<1x128xf32>
      %14 = vector.broadcast %13 : vector<1x128xf32> to vector<16x128xf32>
      %15 = arith.addf %12, %14 : vector<16x128xf32>
      %cst_13 = arith.constant 0.000000e+00 : f32
      %16 = vector.broadcast %cst_13 : f32 to vector<16x128xf32>
      %17 = arith.maximumf %15, %16 : vector<16x128xf32>
      %18 = arith.truncf %17 : vector<16x128xf32> to vector<16x128xbf16>
      %c0_14 = arith.constant 0 : index
      %c0_15 = arith.constant 0 : index
      %19 = vector.load %arg6[%c0_14, %c0_15] : memref<16x128xbf16, #tpu.memory_space<vmem>>, vector<16x128xbf16>
      tpu.vector_store %arg6[%c0_14, %c0_15], %18 {strides = array<i32>} : memref<16x128xbf16, #tpu.memory_space<vmem>>, vector<16x128xbf16>,
    } else {
    }
    return
  }
  func.func @transform_0(%arg0: i32, %arg1: i32, %arg2: i32) -> (i32, i32) {
    %c0_i32 = arith.constant 0 : i32
    return %arg0, %arg2 : i32, i32
  }
  func.func @transform_1(%arg0: i32, %arg1: i32, %arg2: i32) -> (i32, i32) {
    %c0_i32 = arith.constant 0 : i32
    return %arg2, %arg1 : i32, i32
  }
  func.func @transform_2(%arg0: i32, %arg1: i32, %arg2: i32) -> (i32, i32) {
    %c0_i32 = arith.constant 0 : i32
    %c0_i32_0 = arith.constant 0 : i32
    return %c0_i32, %arg1 : i32, i32
  }
  func.func @transform_3(%arg0: i32, %arg1: i32, %arg2: i32) -> (i32, i32) {
    %c0_i32 = arith.constant 0 : i32
    return %arg0, %arg1 : i32, i32
  }
}

module attributes {stable_mosaic.version = 11 : i64} {
  func.func @_mm_kernel(%arg0: i32, %arg1: i32, %arg2: i32, %arg3: memref<16x384xbf16, #tpu.memory_space<vmem>>, %arg4: memref<384x256xbf16, #tpu.memory_space<vmem>>, %arg5: memref<1x256xf32, #tpu.memory_space<vmem>>, %arg6: memref<1x256xf32, #tpu.memory_space<vmem>>, %arg7: memref<16x256xbf16, #tpu.memory_space<vmem>>, %arg8: memref<16x256xf32, #tpu.memory_space<vmem>>) attributes {dimension_semantics = [#tpu.dimension_semantics<parallel>, #tpu.dimension_semantics<parallel>, #tpu.dimension_semantics<arbitrary>], iteration_bounds = array<i64: 1, 2, 3>, scalar_prefetch = 0 : i64, scratch_operands = 1 : i64, tpu.core_type = #tpu.core_type<tc>, window_params = [{transform_indices = @transform_0, window_bounds = array<i64: 16, 384>}, {transform_indices = @transform_1, window_bounds = array<i64: 384, 256>}, {transform_indices = @transform_2, window_bounds = array<i64: 1, 256>}, {transform_indices = @transform_3, window_bounds = array<i64: 1, 256>}, {transform_indices = @transform_4, window_bounds = array<i64: 16, 256>}]} {
    %c0_i32 = arith.constant 0 : i32
    %0 = arith.cmpi eq, %arg2, %c0_i32 : i32
    %1 = arith.extui %0 : i1 to i32
    %c0_i32_0 = arith.constant 0 : i32
    %2 = arith.cmpi ne, %1, %c0_i32_0 : i32
    scf.if %2 {
      %cst_9 = arith.constant 0.000000e+00 : f32
      %12 = vector.broadcast %cst_9 : f32 to vector<16x256xf32>
      %c0_10 = arith.constant 0 : index
      %c0_11 = arith.constant 0 : index
      %13 = vector.load %arg8[%c0_10, %c0_11] : memref<16x256xf32, #tpu.memory_space<vmem>>, vector<16x256xf32>
      tpu.vector_store %arg8[%c0_10, %c0_11], %12 {strides = array<i32>} : memref<16x256xf32, #tpu.memory_space<vmem>>, vector<16x256xf32>,
    } else {
    }
    %c0 = arith.constant 0 : index
    %c0_1 = arith.constant 0 : index
    %3 = vector.load %arg8[%c0, %c0_1] : memref<16x256xf32, #tpu.memory_space<vmem>>, vector<16x256xf32>
    %c0_2 = arith.constant 0 : index
    %c0_3 = arith.constant 0 : index
    %4 = vector.load %arg3[%c0_2, %c0_3] : memref<16x384xbf16, #tpu.memory_space<vmem>>, vector<16x384xbf16>
    %c0_4 = arith.constant 0 : index
    %c0_5 = arith.constant 0 : index
    %5 = vector.load %arg4[%c0_4, %c0_5] : memref<384x256xbf16, #tpu.memory_space<vmem>>, vector<384x256xbf16>
    %cst = arith.constant dense<0.000000e+00> : vector<16x256xf32>
    %6 = tpu.matmul %4, %5, %cst {dimension_numbers = #tpu.dot_dimension_numbers<[1], [0], [0], [1], [0, 0, 1, 1], [], []>} : vector<16x384xbf16>, vector<384x256xbf16>, vector<16x256xf32> -> vector<16x256xf32>
    %7 = arith.addf %3, %6 : vector<16x256xf32>
    %c0_6 = arith.constant 0 : index
    %c0_7 = arith.constant 0 : index
    %8 = vector.load %arg8[%c0_6, %c0_7] : memref<16x256xf32, #tpu.memory_space<vmem>>, vector<16x256xf32>
    tpu.vector_store %arg8[%c0_6, %c0_7], %7 {strides = array<i32>} : memref<16x256xf32, #tpu.memory_space<vmem>>, vector<16x256xf32>,
    %c2_i32 = arith.constant 2 : i32
    %9 = arith.cmpi eq, %arg2, %c2_i32 : i32
    %10 = arith.extui %9 : i1 to i32
    %c0_i32_8 = arith.constant 0 : i32
    %11 = arith.cmpi ne, %10, %c0_i32_8 : i32
    scf.if %11 {
      %c0_9 = arith.constant 0 : index
      %c0_10 = arith.constant 0 : index
      %12 = vector.load %arg8[%c0_9, %c0_10] : memref<16x256xf32, #tpu.memory_space<vmem>>, vector<16x256xf32>
      %c0_11 = arith.constant 0 : index
      %c0_12 = arith.constant 0 : index
      %13 = vector.load %arg5[%c0_11, %c0_12] : memref<1x256xf32, #tpu.memory_space<vmem>>, vector<1x256xf32>
      %14 = vector.broadcast %13 : vector<1x256xf32> to vector<16x256xf32>
      %15 = arith.addf %12, %14 : vector<16x256xf32>
      %c0_13 = arith.constant 0 : index
      %c0_14 = arith.constant 0 : index
      %16 = vector.load %arg6[%c0_13, %c0_14] : memref<1x256xf32, #tpu.memory_space<vmem>>, vector<1x256xf32>
      %cst_15 = arith.constant 0.000000e+00 : f32
      %17 = vector.broadcast %cst_15 : f32 to vector<1x256xf32>
      %18 = arith.cmpf one, %16, %17 : vector<1x256xf32>
      %cst_16 = arith.constant 0.000000e+00 : f32
      %19 = vector.broadcast %cst_16 : f32 to vector<16x256xf32>
      %20 = arith.maximumf %15, %19 : vector<16x256xf32>
      %21 = vector.shape_cast %18 : vector<1x256xi1> to vector<1x256xi1>
      %22 = vector.broadcast %21 : vector<1x256xi1> to vector<16x256xi1>
      %23 = arith.select %22, %20, %15 : vector<16x256xi1>, vector<16x256xf32>
      %24 = arith.truncf %23 : vector<16x256xf32> to vector<16x256xbf16>
      %c0_17 = arith.constant 0 : index
      %c0_18 = arith.constant 0 : index
      %25 = vector.load %arg7[%c0_17, %c0_18] : memref<16x256xbf16, #tpu.memory_space<vmem>>, vector<16x256xbf16>
      tpu.vector_store %arg7[%c0_17, %c0_18], %24 {strides = array<i32>} : memref<16x256xbf16, #tpu.memory_space<vmem>>, vector<16x256xbf16>,
    } else {
    }
    return
  }
  func.func @transform_0(%arg0: i32, %arg1: i32, %arg2: i32) -> (i32, i32) {
    %c0_i32 = arith.constant 0 : i32
    return %arg0, %arg2 : i32, i32
  }
  func.func @transform_1(%arg0: i32, %arg1: i32, %arg2: i32) -> (i32, i32) {
    %c0_i32 = arith.constant 0 : i32
    return %arg2, %arg1 : i32, i32
  }
  func.func @transform_2(%arg0: i32, %arg1: i32, %arg2: i32) -> (i32, i32) {
    %c0_i32 = arith.constant 0 : i32
    %c0_i32_0 = arith.constant 0 : i32
    return %c0_i32, %arg1 : i32, i32
  }
  func.func @transform_3(%arg0: i32, %arg1: i32, %arg2: i32) -> (i32, i32) {
    %c0_i32 = arith.constant 0 : i32
    %c0_i32_0 = arith.constant 0 : i32
    return %c0_i32, %arg1 : i32, i32
  }
  func.func @transform_4(%arg0: i32, %arg1: i32, %arg2: i32) -> (i32, i32) {
    %c0_i32 = arith.constant 0 : i32
    return %arg0, %arg1 : i32, i32
  }
}

module attributes {stable_mosaic.version = 11 : i64} {
  func.func @_mm_kernel(%arg0: i32, %arg1: i32, %arg2: i32, %arg3: memref<16x384xbf16, #tpu.memory_space<vmem>>, %arg4: memref<384x256xbf16, #tpu.memory_space<vmem>>, %arg5: memref<1x256xf32, #tpu.memory_space<vmem>>, %arg6: memref<16x256xbf16, #tpu.memory_space<vmem>>, %arg7: memref<16x256xbf16, #tpu.memory_space<vmem>>, %arg8: memref<16x256xf32, #tpu.memory_space<vmem>>) attributes {dimension_semantics = [#tpu.dimension_semantics<parallel>, #tpu.dimension_semantics<parallel>, #tpu.dimension_semantics<arbitrary>], iteration_bounds = array<i64: 1, 1, 6>, scalar_prefetch = 0 : i64, scratch_operands = 1 : i64, tpu.core_type = #tpu.core_type<tc>, window_params = [{transform_indices = @transform_0, window_bounds = array<i64: 16, 384>}, {transform_indices = @transform_1, window_bounds = array<i64: 384, 256>}, {transform_indices = @transform_2, window_bounds = array<i64: 1, 256>}, {transform_indices = @transform_3, window_bounds = array<i64: 16, 256>}, {transform_indices = @transform_4, window_bounds = array<i64: 16, 256>}]} {
    %c0_i32 = arith.constant 0 : i32
    %0 = arith.cmpi eq, %arg2, %c0_i32 : i32
    %1 = arith.extui %0 : i1 to i32
    %c0_i32_0 = arith.constant 0 : i32
    %2 = arith.cmpi ne, %1, %c0_i32_0 : i32
    scf.if %2 {
      %cst_9 = arith.constant 0.000000e+00 : f32
      %12 = vector.broadcast %cst_9 : f32 to vector<16x256xf32>
      %c0_10 = arith.constant 0 : index
      %c0_11 = arith.constant 0 : index
      %13 = vector.load %arg8[%c0_10, %c0_11] : memref<16x256xf32, #tpu.memory_space<vmem>>, vector<16x256xf32>
      tpu.vector_store %arg8[%c0_10, %c0_11], %12 {strides = array<i32>} : memref<16x256xf32, #tpu.memory_space<vmem>>, vector<16x256xf32>,
    } else {
    }
    %c0 = arith.constant 0 : index
    %c0_1 = arith.constant 0 : index
    %3 = vector.load %arg8[%c0, %c0_1] : memref<16x256xf32, #tpu.memory_space<vmem>>, vector<16x256xf32>
    %c0_2 = arith.constant 0 : index
    %c0_3 = arith.constant 0 : index
    %4 = vector.load %arg3[%c0_2, %c0_3] : memref<16x384xbf16, #tpu.memory_space<vmem>>, vector<16x384xbf16>
    %c0_4 = arith.constant 0 : index
    %c0_5 = arith.constant 0 : index
    %5 = vector.load %arg4[%c0_4, %c0_5] : memref<384x256xbf16, #tpu.memory_space<vmem>>, vector<384x256xbf16>
    %cst = arith.constant dense<0.000000e+00> : vector<16x256xf32>
    %6 = tpu.matmul %4, %5, %cst {dimension_numbers = #tpu.dot_dimension_numbers<[1], [0], [0], [1], [0, 0, 1, 1], [], []>} : vector<16x384xbf16>, vector<384x256xbf16>, vector<16x256xf32> -> vector<16x256xf32>
    %7 = arith.addf %3, %6 : vector<16x256xf32>
    %c0_6 = arith.constant 0 : index
    %c0_7 = arith.constant 0 : index
    %8 = vector.load %arg8[%c0_6, %c0_7] : memref<16x256xf32, #tpu.memory_space<vmem>>, vector<16x256xf32>
    tpu.vector_store %arg8[%c0_6, %c0_7], %7 {strides = array<i32>} : memref<16x256xf32, #tpu.memory_space<vmem>>, vector<16x256xf32>,
    %c5_i32 = arith.constant 5 : i32
    %9 = arith.cmpi eq, %arg2, %c5_i32 : i32
    %10 = arith.extui %9 : i1 to i32
    %c0_i32_8 = arith.constant 0 : i32
    %11 = arith.cmpi ne, %10, %c0_i32_8 : i32
    scf.if %11 {
      %c0_9 = arith.constant 0 : index
      %c0_10 = arith.constant 0 : index
      %12 = vector.load %arg8[%c0_9, %c0_10] : memref<16x256xf32, #tpu.memory_space<vmem>>, vector<16x256xf32>
      %c0_11 = arith.constant 0 : index
      %c0_12 = arith.constant 0 : index
      %13 = vector.load %arg5[%c0_11, %c0_12] : memref<1x256xf32, #tpu.memory_space<vmem>>, vector<1x256xf32>
      %14 = vector.broadcast %13 : vector<1x256xf32> to vector<16x256xf32>
      %15 = arith.addf %12, %14 : vector<16x256xf32>
      %c0_13 = arith.constant 0 : index
      %c0_14 = arith.constant 0 : index
      %16 = vector.load %arg6[%c0_13, %c0_14] : memref<16x256xbf16, #tpu.memory_space<vmem>>, vector<16x256xbf16>
      %17 = arith.extf %16 : vector<16x256xbf16> to vector<16x256xf32>
      %18 = arith.addf %15, %17 : vector<16x256xf32>
      %cst_15 = arith.constant 0.000000e+00 : f32
      %19 = vector.broadcast %cst_15 : f32 to vector<16x256xf32>
      %20 = arith.maximumf %18, %19 : vector<16x256xf32>
      %21 = arith.truncf %20 : vector<16x256xf32> to vector<16x256xbf16>
      %c0_16 = arith.constant 0 : index
      %c0_17 = arith.constant 0 : index
      %22 = vector.load %arg7[%c0_16, %c0_17] : memref<16x256xbf16, #tpu.memory_space<vmem>>, vector<16x256xbf16>
      tpu.vector_store %arg7[%c0_16, %c0_17], %21 {strides = array<i32>} : memref<16x256xbf16, #tpu.memory_space<vmem>>, vector<16x256xbf16>,
    } else {
    }
    return
  }
  func.func @transform_0(%arg0: i32, %arg1: i32, %arg2: i32) -> (i32, i32) {
    %c0_i32 = arith.constant 0 : i32
    return %arg0, %arg2 : i32, i32
  }
  func.func @transform_1(%arg0: i32, %arg1: i32, %arg2: i32) -> (i32, i32) {
    %c0_i32 = arith.constant 0 : i32
    return %arg2, %arg1 : i32, i32
  }
  func.func @transform_2(%arg0: i32, %arg1: i32, %arg2: i32) -> (i32, i32) {
    %c0_i32 = arith.constant 0 : i32
    %c0_i32_0 = arith.constant 0 : i32
    return %c0_i32, %arg1 : i32, i32
  }
  func.func @transform_3(%arg0: i32, %arg1: i32, %arg2: i32) -> (i32, i32) {
    %c0_i32 = arith.constant 0 : i32
    return %arg0, %arg1 : i32, i32
  }
  func.func @transform_4(%arg0: i32, %arg1: i32, %arg2: i32) -> (i32, i32) {
    %c0_i32 = arith.constant 0 : i32
    return %arg0, %arg1 : i32, i32
  }
}

module attributes {stable_mosaic.version = 11 : i64} {
  func.func @_mm_kernel(%arg0: i32, %arg1: i32, %arg2: i32, %arg3: memref<16x384xbf16, #tpu.memory_space<vmem>>, %arg4: memref<384x256xbf16, #tpu.memory_space<vmem>>, %arg5: memref<1x256xf32, #tpu.memory_space<vmem>>, %arg6: memref<16x256xbf16, #tpu.memory_space<vmem>>, %arg7: memref<16x256xf32, #tpu.memory_space<vmem>>) attributes {dimension_semantics = [#tpu.dimension_semantics<parallel>, #tpu.dimension_semantics<parallel>, #tpu.dimension_semantics<arbitrary>], iteration_bounds = array<i64: 1, 1, 6>, scalar_prefetch = 0 : i64, scratch_operands = 1 : i64, tpu.core_type = #tpu.core_type<tc>, window_params = [{transform_indices = @transform_0, window_bounds = array<i64: 16, 384>}, {transform_indices = @transform_1, window_bounds = array<i64: 384, 256>}, {transform_indices = @transform_2, window_bounds = array<i64: 1, 256>}, {transform_indices = @transform_3, window_bounds = array<i64: 16, 256>}]} {
    %c0_i32 = arith.constant 0 : i32
    %0 = arith.cmpi eq, %arg2, %c0_i32 : i32
    %1 = arith.extui %0 : i1 to i32
    %c0_i32_0 = arith.constant 0 : i32
    %2 = arith.cmpi ne, %1, %c0_i32_0 : i32
    scf.if %2 {
      %cst_9 = arith.constant 0.000000e+00 : f32
      %12 = vector.broadcast %cst_9 : f32 to vector<16x256xf32>
      %c0_10 = arith.constant 0 : index
      %c0_11 = arith.constant 0 : index
      %13 = vector.load %arg7[%c0_10, %c0_11] : memref<16x256xf32, #tpu.memory_space<vmem>>, vector<16x256xf32>
      tpu.vector_store %arg7[%c0_10, %c0_11], %12 {strides = array<i32>} : memref<16x256xf32, #tpu.memory_space<vmem>>, vector<16x256xf32>,
    } else {
    }
    %c0 = arith.constant 0 : index
    %c0_1 = arith.constant 0 : index
    %3 = vector.load %arg7[%c0, %c0_1] : memref<16x256xf32, #tpu.memory_space<vmem>>, vector<16x256xf32>
    %c0_2 = arith.constant 0 : index
    %c0_3 = arith.constant 0 : index
    %4 = vector.load %arg3[%c0_2, %c0_3] : memref<16x384xbf16, #tpu.memory_space<vmem>>, vector<16x384xbf16>
    %c0_4 = arith.constant 0 : index
    %c0_5 = arith.constant 0 : index
    %5 = vector.load %arg4[%c0_4, %c0_5] : memref<384x256xbf16, #tpu.memory_space<vmem>>, vector<384x256xbf16>
    %cst = arith.constant dense<0.000000e+00> : vector<16x256xf32>
    %6 = tpu.matmul %4, %5, %cst {dimension_numbers = #tpu.dot_dimension_numbers<[1], [0], [0], [1], [0, 0, 1, 1], [], []>} : vector<16x384xbf16>, vector<384x256xbf16>, vector<16x256xf32> -> vector<16x256xf32>
    %7 = arith.addf %3, %6 : vector<16x256xf32>
    %c0_6 = arith.constant 0 : index
    %c0_7 = arith.constant 0 : index
    %8 = vector.load %arg7[%c0_6, %c0_7] : memref<16x256xf32, #tpu.memory_space<vmem>>, vector<16x256xf32>
    tpu.vector_store %arg7[%c0_6, %c0_7], %7 {strides = array<i32>} : memref<16x256xf32, #tpu.memory_space<vmem>>, vector<16x256xf32>,
    %c5_i32 = arith.constant 5 : i32
    %9 = arith.cmpi eq, %arg2, %c5_i32 : i32
    %10 = arith.extui %9 : i1 to i32
    %c0_i32_8 = arith.constant 0 : i32
    %11 = arith.cmpi ne, %10, %c0_i32_8 : i32
    scf.if %11 {
      %c0_9 = arith.constant 0 : index
      %c0_10 = arith.constant 0 : index
      %12 = vector.load %arg7[%c0_9, %c0_10] : memref<16x256xf32, #tpu.memory_space<vmem>>, vector<16x256xf32>
      %c0_11 = arith.constant 0 : index
      %c0_12 = arith.constant 0 : index
      %13 = vector.load %arg5[%c0_11, %c0_12] : memref<1x256xf32, #tpu.memory_space<vmem>>, vector<1x256xf32>
      %14 = vector.broadcast %13 : vector<1x256xf32> to vector<16x256xf32>
      %15 = arith.addf %12, %14 : vector<16x256xf32>
      %cst_13 = arith.constant 0.000000e+00 : f32
      %16 = vector.broadcast %cst_13 : f32 to vector<16x256xf32>
      %17 = arith.maximumf %15, %16 : vector<16x256xf32>
      %18 = arith.truncf %17 : vector<16x256xf32> to vector<16x256xbf16>
      %c0_14 = arith.constant 0 : index
      %c0_15 = arith.constant 0 : index
      %19 = vector.load %arg6[%c0_14, %c0_15] : memref<16x256xbf16, #tpu.memory_space<vmem>>, vector<16x256xbf16>
      tpu.vector_store %arg6[%c0_14, %c0_15], %18 {strides = array<i32>} : memref<16x256xbf16, #tpu.memory_space<vmem>>, vector<16x256xbf16>,
    } else {
    }
    return
  }
  func.func @transform_0(%arg0: i32, %arg1: i32, %arg2: i32) -> (i32, i32) {
    %c0_i32 = arith.constant 0 : i32
    return %arg0, %arg2 : i32, i32
  }
  func.func @transform_1(%arg0: i32, %arg1: i32, %arg2: i32) -> (i32, i32) {
    %c0_i32 = arith.constant 0 : i32
    return %arg2, %arg1 : i32, i32
  }
  func.func @transform_2(%arg0: i32, %arg1: i32, %arg2: i32) -> (i32, i32) {
    %c0_i32 = arith.constant 0 : i32
    %c0_i32_0 = arith.constant 0 : i32
    return %c0_i32, %arg1 : i32, i32
  }
  func.func @transform_3(%arg0: i32, %arg1: i32, %arg2: i32) -> (i32, i32) {
    %c0_i32 = arith.constant 0 : i32
    return %arg0, %arg1 : i32, i32
  }
}

module attributes {stable_mosaic.version = 11 : i64} {
  func.func @_mm_kernel(%arg0: i32, %arg1: i32, %arg2: i32, %arg3: memref<16x384xbf16, #tpu.memory_space<vmem>>, %arg4: memref<384x256xbf16, #tpu.memory_space<vmem>>, %arg5: memref<1x256xf32, #tpu.memory_space<vmem>>, %arg6: memref<1x256xf32, #tpu.memory_space<vmem>>, %arg7: memref<16x256xbf16, #tpu.memory_space<vmem>>, %arg8: memref<16x256xf32, #tpu.memory_space<vmem>>) attributes {dimension_semantics = [#tpu.dimension_semantics<parallel>, #tpu.dimension_semantics<parallel>, #tpu.dimension_semantics<arbitrary>], iteration_bounds = array<i64: 1, 4, 6>, scalar_prefetch = 0 : i64, scratch_operands = 1 : i64, tpu.core_type = #tpu.core_type<tc>, window_params = [{transform_indices = @transform_0, window_bounds = array<i64: 16, 384>}, {transform_indices = @transform_1, window_bounds = array<i64: 384, 256>}, {transform_indices = @transform_2, window_bounds = array<i64: 1, 256>}, {transform_indices = @transform_3, window_bounds = array<i64: 1, 256>}, {transform_indices = @transform_4, window_bounds = array<i64: 16, 256>}]} {
    %c0_i32 = arith.constant 0 : i32
    %0 = arith.cmpi eq, %arg2, %c0_i32 : i32
    %1 = arith.extui %0 : i1 to i32
    %c0_i32_0 = arith.constant 0 : i32
    %2 = arith.cmpi ne, %1, %c0_i32_0 : i32
    scf.if %2 {
      %cst_9 = arith.constant 0.000000e+00 : f32
      %12 = vector.broadcast %cst_9 : f32 to vector<16x256xf32>
      %c0_10 = arith.constant 0 : index
      %c0_11 = arith.constant 0 : index
      %13 = vector.load %arg8[%c0_10, %c0_11] : memref<16x256xf32, #tpu.memory_space<vmem>>, vector<16x256xf32>
      tpu.vector_store %arg8[%c0_10, %c0_11], %12 {strides = array<i32>} : memref<16x256xf32, #tpu.memory_space<vmem>>, vector<16x256xf32>,
    } else {
    }
    %c0 = arith.constant 0 : index
    %c0_1 = arith.constant 0 : index
    %3 = vector.load %arg8[%c0, %c0_1] : memref<16x256xf32, #tpu.memory_space<vmem>>, vector<16x256xf32>
    %c0_2 = arith.constant 0 : index
    %c0_3 = arith.constant 0 : index
    %4 = vector.load %arg3[%c0_2, %c0_3] : memref<16x384xbf16, #tpu.memory_space<vmem>>, vector<16x384xbf16>
    %c0_4 = arith.constant 0 : index
    %c0_5 = arith.constant 0 : index
    %5 = vector.load %arg4[%c0_4, %c0_5] : memref<384x256xbf16, #tpu.memory_space<vmem>>, vector<384x256xbf16>
    %cst = arith.constant dense<0.000000e+00> : vector<16x256xf32>
    %6 = tpu.matmul %4, %5, %cst {dimension_numbers = #tpu.dot_dimension_numbers<[1], [0], [0], [1], [0, 0, 1, 1], [], []>} : vector<16x384xbf16>, vector<384x256xbf16>, vector<16x256xf32> -> vector<16x256xf32>
    %7 = arith.addf %3, %6 : vector<16x256xf32>
    %c0_6 = arith.constant 0 : index
    %c0_7 = arith.constant 0 : index
    %8 = vector.load %arg8[%c0_6, %c0_7] : memref<16x256xf32, #tpu.memory_space<vmem>>, vector<16x256xf32>
    tpu.vector_store %arg8[%c0_6, %c0_7], %7 {strides = array<i32>} : memref<16x256xf32, #tpu.memory_space<vmem>>, vector<16x256xf32>,
    %c5_i32 = arith.constant 5 : i32
    %9 = arith.cmpi eq, %arg2, %c5_i32 : i32
    %10 = arith.extui %9 : i1 to i32
    %c0_i32_8 = arith.constant 0 : i32
    %11 = arith.cmpi ne, %10, %c0_i32_8 : i32
    scf.if %11 {
      %c0_9 = arith.constant 0 : index
      %c0_10 = arith.constant 0 : index
      %12 = vector.load %arg8[%c0_9, %c0_10] : memref<16x256xf32, #tpu.memory_space<vmem>>, vector<16x256xf32>
      %c0_11 = arith.constant 0 : index
      %c0_12 = arith.constant 0 : index
      %13 = vector.load %arg5[%c0_11, %c0_12] : memref<1x256xf32, #tpu.memory_space<vmem>>, vector<1x256xf32>
      %14 = vector.broadcast %13 : vector<1x256xf32> to vector<16x256xf32>
      %15 = arith.addf %12, %14 : vector<16x256xf32>
      %c0_13 = arith.constant 0 : index
      %c0_14 = arith.constant 0 : index
      %16 = vector.load %arg6[%c0_13, %c0_14] : memref<1x256xf32, #tpu.memory_space<vmem>>, vector<1x256xf32>
      %cst_15 = arith.constant 0.000000e+00 : f32
      %17 = vector.broadcast %cst_15 : f32 to vector<1x256xf32>
      %18 = arith.cmpf one, %16, %17 : vector<1x256xf32>
      %cst_16 = arith.constant 0.000000e+00 : f32
      %19 = vector.broadcast %cst_16 : f32 to vector<16x256xf32>
      %20 = arith.maximumf %15, %19 : vector<16x256xf32>
      %21 = vector.shape_cast %18 : vector<1x256xi1> to vector<1x256xi1>
      %22 = vector.broadcast %21 : vector<1x256xi1> to vector<16x256xi1>
      %23 = arith.select %22, %20, %15 : vector<16x256xi1>, vector<16x256xf32>
      %24 = arith.truncf %23 : vector<16x256xf32> to vector<16x256xbf16>
      %c0_17 = arith.constant 0 : index
      %c0_18 = arith.constant 0 : index
      %25 = vector.load %arg7[%c0_17, %c0_18] : memref<16x256xbf16, #tpu.memory_space<vmem>>, vector<16x256xbf16>
      tpu.vector_store %arg7[%c0_17, %c0_18], %24 {strides = array<i32>} : memref<16x256xbf16, #tpu.memory_space<vmem>>, vector<16x256xbf16>,
    } else {
    }
    return
  }
  func.func @transform_0(%arg0: i32, %arg1: i32, %arg2: i32) -> (i32, i32) {
    %c0_i32 = arith.constant 0 : i32
    return %arg0, %arg2 : i32, i32
  }
  func.func @transform_1(%arg0: i32, %arg1: i32, %arg2: i32) -> (i32, i32) {
    %c0_i32 = arith.constant 0 : i32
    return %arg2, %arg1 : i32, i32
  }
  func.func @transform_2(%arg0: i32, %arg1: i32, %arg2: i32) -> (i32, i32) {
    %c0_i32 = arith.constant 0 : i32
    %c0_i32_0 = arith.constant 0 : i32
    return %c0_i32, %arg1 : i32, i32
  }
  func.func @transform_3(%arg0: i32, %arg1: i32, %arg2: i32) -> (i32, i32) {
    %c0_i32 = arith.constant 0 : i32
    %c0_i32_0 = arith.constant 0 : i32
    return %c0_i32, %arg1 : i32, i32
  }
  func.func @transform_4(%arg0: i32, %arg1: i32, %arg2: i32) -> (i32, i32) {
    %c0_i32 = arith.constant 0 : i32
    return %arg0, %arg1 : i32, i32
  }
}

module attributes {stable_mosaic.version = 11 : i64} {
  func.func @_mm_kernel(%arg0: i32, %arg1: i32, %arg2: i32, %arg3: memref<16x512xbf16, #tpu.memory_space<vmem>>, %arg4: memref<512x256xbf16, #tpu.memory_space<vmem>>, %arg5: memref<1x256xf32, #tpu.memory_space<vmem>>, %arg6: memref<16x256xbf16, #tpu.memory_space<vmem>>, %arg7: memref<16x256xbf16, #tpu.memory_space<vmem>>, %arg8: memref<16x256xf32, #tpu.memory_space<vmem>>) attributes {dimension_semantics = [#tpu.dimension_semantics<parallel>, #tpu.dimension_semantics<parallel>, #tpu.dimension_semantics<arbitrary>], iteration_bounds = array<i64: 1, 2, 9>, scalar_prefetch = 0 : i64, scratch_operands = 1 : i64, tpu.core_type = #tpu.core_type<tc>, window_params = [{transform_indices = @transform_0, window_bounds = array<i64: 16, 512>}, {transform_indices = @transform_1, window_bounds = array<i64: 512, 256>}, {transform_indices = @transform_2, window_bounds = array<i64: 1, 256>}, {transform_indices = @transform_3, window_bounds = array<i64: 16, 256>}, {transform_indices = @transform_4, window_bounds = array<i64: 16, 256>}]} {
    %c0_i32 = arith.constant 0 : i32
    %0 = arith.cmpi eq, %arg2, %c0_i32 : i32
    %1 = arith.extui %0 : i1 to i32
    %c0_i32_0 = arith.constant 0 : i32
    %2 = arith.cmpi ne, %1, %c0_i32_0 : i32
    scf.if %2 {
      %cst_9 = arith.constant 0.000000e+00 : f32
      %12 = vector.broadcast %cst_9 : f32 to vector<16x256xf32>
      %c0_10 = arith.constant 0 : index
      %c0_11 = arith.constant 0 : index
      %13 = vector.load %arg8[%c0_10, %c0_11] : memref<16x256xf32, #tpu.memory_space<vmem>>, vector<16x256xf32>
      tpu.vector_store %arg8[%c0_10, %c0_11], %12 {strides = array<i32>} : memref<16x256xf32, #tpu.memory_space<vmem>>, vector<16x256xf32>,
    } else {
    }
    %c0 = arith.constant 0 : index
    %c0_1 = arith.constant 0 : index
    %3 = vector.load %arg8[%c0, %c0_1] : memref<16x256xf32, #tpu.memory_space<vmem>>, vector<16x256xf32>
    %c0_2 = arith.constant 0 : index
    %c0_3 = arith.constant 0 : index
    %4 = vector.load %arg3[%c0_2, %c0_3] : memref<16x512xbf16, #tpu.memory_space<vmem>>, vector<16x512xbf16>
    %c0_4 = arith.constant 0 : index
    %c0_5 = arith.constant 0 : index
    %5 = vector.load %arg4[%c0_4, %c0_5] : memref<512x256xbf16, #tpu.memory_space<vmem>>, vector<512x256xbf16>
    %cst = arith.constant dense<0.000000e+00> : vector<16x256xf32>
    %6 = tpu.matmul %4, %5, %cst {dimension_numbers = #tpu.dot_dimension_numbers<[1], [0], [0], [1], [0, 0, 1, 1], [], []>} : vector<16x512xbf16>, vector<512x256xbf16>, vector<16x256xf32> -> vector<16x256xf32>
    %7 = arith.addf %3, %6 : vector<16x256xf32>
    %c0_6 = arith.constant 0 : index
    %c0_7 = arith.constant 0 : index
    %8 = vector.load %arg8[%c0_6, %c0_7] : memref<16x256xf32, #tpu.memory_space<vmem>>, vector<16x256xf32>
    tpu.vector_store %arg8[%c0_6, %c0_7], %7 {strides = array<i32>} : memref<16x256xf32, #tpu.memory_space<vmem>>, vector<16x256xf32>,
    %c8_i32 = arith.constant 8 : i32
    %9 = arith.cmpi eq, %arg2, %c8_i32 : i32
    %10 = arith.extui %9 : i1 to i32
    %c0_i32_8 = arith.constant 0 : i32
    %11 = arith.cmpi ne, %10, %c0_i32_8 : i32
    scf.if %11 {
      %c0_9 = arith.constant 0 : index
      %c0_10 = arith.constant 0 : index
      %12 = vector.load %arg8[%c0_9, %c0_10] : memref<16x256xf32, #tpu.memory_space<vmem>>, vector<16x256xf32>
      %c0_11 = arith.constant 0 : index
      %c0_12 = arith.constant 0 : index
      %13 = vector.load %arg5[%c0_11, %c0_12] : memref<1x256xf32, #tpu.memory_space<vmem>>, vector<1x256xf32>
      %14 = vector.broadcast %13 : vector<1x256xf32> to vector<16x256xf32>
      %15 = arith.addf %12, %14 : vector<16x256xf32>
      %c0_13 = arith.constant 0 : index
      %c0_14 = arith.constant 0 : index
      %16 = vector.load %arg6[%c0_13, %c0_14] : memref<16x256xbf16, #tpu.memory_space<vmem>>, vector<16x256xbf16>
      %17 = arith.extf %16 : vector<16x256xbf16> to vector<16x256xf32>
      %18 = arith.addf %15, %17 : vector<16x256xf32>
      %cst_15 = arith.constant 0.000000e+00 : f32
      %19 = vector.broadcast %cst_15 : f32 to vector<16x256xf32>
      %20 = arith.maximumf %18, %19 : vector<16x256xf32>
      %21 = arith.truncf %20 : vector<16x256xf32> to vector<16x256xbf16>
      %c0_16 = arith.constant 0 : index
      %c0_17 = arith.constant 0 : index
      %22 = vector.load %arg7[%c0_16, %c0_17] : memref<16x256xbf16, #tpu.memory_space<vmem>>, vector<16x256xbf16>
      tpu.vector_store %arg7[%c0_16, %c0_17], %21 {strides = array<i32>} : memref<16x256xbf16, #tpu.memory_space<vmem>>, vector<16x256xbf16>,
    } else {
    }
    return
  }
  func.func @transform_0(%arg0: i32, %arg1: i32, %arg2: i32) -> (i32, i32) {
    %c0_i32 = arith.constant 0 : i32
    return %arg0, %arg2 : i32, i32
  }
  func.func @transform_1(%arg0: i32, %arg1: i32, %arg2: i32) -> (i32, i32) {
    %c0_i32 = arith.constant 0 : i32
    return %arg2, %arg1 : i32, i32
  }
  func.func @transform_2(%arg0: i32, %arg1: i32, %arg2: i32) -> (i32, i32) {
    %c0_i32 = arith.constant 0 : i32
    %c0_i32_0 = arith.constant 0 : i32
    return %c0_i32, %arg1 : i32, i32
  }
  func.func @transform_3(%arg0: i32, %arg1: i32, %arg2: i32) -> (i32, i32) {
    %c0_i32 = arith.constant 0 : i32
    return %arg0, %arg1 : i32, i32
  }
  func.func @transform_4(%arg0: i32, %arg1: i32, %arg2: i32) -> (i32, i32) {
    %c0_i32 = arith.constant 0 : i32
    return %arg0, %arg1 : i32, i32
  }
}

module attributes {stable_mosaic.version = 11 : i64} {
  func.func @_mm_kernel(%arg0: i32, %arg1: i32, %arg2: i32, %arg3: memref<16x512xbf16, #tpu.memory_space<vmem>>, %arg4: memref<512x256xbf16, #tpu.memory_space<vmem>>, %arg5: memref<1x256xf32, #tpu.memory_space<vmem>>, %arg6: memref<16x256xbf16, #tpu.memory_space<vmem>>, %arg7: memref<16x256xf32, #tpu.memory_space<vmem>>) attributes {dimension_semantics = [#tpu.dimension_semantics<parallel>, #tpu.dimension_semantics<parallel>, #tpu.dimension_semantics<arbitrary>], iteration_bounds = array<i64: 1, 2, 9>, scalar_prefetch = 0 : i64, scratch_operands = 1 : i64, tpu.core_type = #tpu.core_type<tc>, window_params = [{transform_indices = @transform_0, window_bounds = array<i64: 16, 512>}, {transform_indices = @transform_1, window_bounds = array<i64: 512, 256>}, {transform_indices = @transform_2, window_bounds = array<i64: 1, 256>}, {transform_indices = @transform_3, window_bounds = array<i64: 16, 256>}]} {
    %c0_i32 = arith.constant 0 : i32
    %0 = arith.cmpi eq, %arg2, %c0_i32 : i32
    %1 = arith.extui %0 : i1 to i32
    %c0_i32_0 = arith.constant 0 : i32
    %2 = arith.cmpi ne, %1, %c0_i32_0 : i32
    scf.if %2 {
      %cst_9 = arith.constant 0.000000e+00 : f32
      %12 = vector.broadcast %cst_9 : f32 to vector<16x256xf32>
      %c0_10 = arith.constant 0 : index
      %c0_11 = arith.constant 0 : index
      %13 = vector.load %arg7[%c0_10, %c0_11] : memref<16x256xf32, #tpu.memory_space<vmem>>, vector<16x256xf32>
      tpu.vector_store %arg7[%c0_10, %c0_11], %12 {strides = array<i32>} : memref<16x256xf32, #tpu.memory_space<vmem>>, vector<16x256xf32>,
    } else {
    }
    %c0 = arith.constant 0 : index
    %c0_1 = arith.constant 0 : index
    %3 = vector.load %arg7[%c0, %c0_1] : memref<16x256xf32, #tpu.memory_space<vmem>>, vector<16x256xf32>
    %c0_2 = arith.constant 0 : index
    %c0_3 = arith.constant 0 : index
    %4 = vector.load %arg3[%c0_2, %c0_3] : memref<16x512xbf16, #tpu.memory_space<vmem>>, vector<16x512xbf16>
    %c0_4 = arith.constant 0 : index
    %c0_5 = arith.constant 0 : index
    %5 = vector.load %arg4[%c0_4, %c0_5] : memref<512x256xbf16, #tpu.memory_space<vmem>>, vector<512x256xbf16>
    %cst = arith.constant dense<0.000000e+00> : vector<16x256xf32>
    %6 = tpu.matmul %4, %5, %cst {dimension_numbers = #tpu.dot_dimension_numbers<[1], [0], [0], [1], [0, 0, 1, 1], [], []>} : vector<16x512xbf16>, vector<512x256xbf16>, vector<16x256xf32> -> vector<16x256xf32>
    %7 = arith.addf %3, %6 : vector<16x256xf32>
    %c0_6 = arith.constant 0 : index
    %c0_7 = arith.constant 0 : index
    %8 = vector.load %arg7[%c0_6, %c0_7] : memref<16x256xf32, #tpu.memory_space<vmem>>, vector<16x256xf32>
    tpu.vector_store %arg7[%c0_6, %c0_7], %7 {strides = array<i32>} : memref<16x256xf32, #tpu.memory_space<vmem>>, vector<16x256xf32>,
    %c8_i32 = arith.constant 8 : i32
    %9 = arith.cmpi eq, %arg2, %c8_i32 : i32
    %10 = arith.extui %9 : i1 to i32
    %c0_i32_8 = arith.constant 0 : i32
    %11 = arith.cmpi ne, %10, %c0_i32_8 : i32
    scf.if %11 {
      %c0_9 = arith.constant 0 : index
      %c0_10 = arith.constant 0 : index
      %12 = vector.load %arg7[%c0_9, %c0_10] : memref<16x256xf32, #tpu.memory_space<vmem>>, vector<16x256xf32>
      %c0_11 = arith.constant 0 : index
      %c0_12 = arith.constant 0 : index
      %13 = vector.load %arg5[%c0_11, %c0_12] : memref<1x256xf32, #tpu.memory_space<vmem>>, vector<1x256xf32>
      %14 = vector.broadcast %13 : vector<1x256xf32> to vector<16x256xf32>
      %15 = arith.addf %12, %14 : vector<16x256xf32>
      %cst_13 = arith.constant 0.000000e+00 : f32
      %16 = vector.broadcast %cst_13 : f32 to vector<16x256xf32>
      %17 = arith.maximumf %15, %16 : vector<16x256xf32>
      %18 = arith.truncf %17 : vector<16x256xf32> to vector<16x256xbf16>
      %c0_14 = arith.constant 0 : index
      %c0_15 = arith.constant 0 : index
      %19 = vector.load %arg6[%c0_14, %c0_15] : memref<16x256xbf16, #tpu.memory_space<vmem>>, vector<16x256xbf16>
      tpu.vector_store %arg6[%c0_14, %c0_15], %18 {strides = array<i32>} : memref<16x256xbf16, #tpu.memory_space<vmem>>, vector<16x256xbf16>,
    } else {
    }
    return
  }
  func.func @transform_0(%arg0: i32, %arg1: i32, %arg2: i32) -> (i32, i32) {
    %c0_i32 = arith.constant 0 : i32
    return %arg0, %arg2 : i32, i32
  }
  func.func @transform_1(%arg0: i32, %arg1: i32, %arg2: i32) -> (i32, i32) {
    %c0_i32 = arith.constant 0 : i32
    return %arg2, %arg1 : i32, i32
  }
  func.func @transform_2(%arg0: i32, %arg1: i32, %arg2: i32) -> (i32, i32) {
    %c0_i32 = arith.constant 0 : i32
    %c0_i32_0 = arith.constant 0 : i32
    return %c0_i32, %arg1 : i32, i32
  }
  func.func @transform_3(%arg0: i32, %arg1: i32, %arg2: i32) -> (i32, i32) {
    %c0_i32 = arith.constant 0 : i32
    return %arg0, %arg1 : i32, i32
  }
}

module attributes {stable_mosaic.version = 11 : i64} {
  func.func @_head_kernel(%arg0: memref<2x1x512xbf16, #tpu.memory_space<vmem>>, %arg1: memref<512x128xf32, #tpu.memory_space<vmem>>, %arg2: memref<1x128xf32, #tpu.memory_space<vmem>>, %arg3: memref<2x128xf32, #tpu.memory_space<vmem>>) attributes {dimension_semantics = [], scalar_prefetch = 0 : i64, scratch_operands = 0 : i64, tpu.core_type = #tpu.core_type<tc>} {
    %c0 = arith.constant 0 : index
    %c0_0 = arith.constant 0 : index
    %c0_1 = arith.constant 0 : index
    %0 = vector.load %arg0[%c0, %c0_0, %c0_1] : memref<2x1x512xbf16, #tpu.memory_space<vmem>>, vector<2x1x512xbf16>
    %1 = arith.extf %0 : vector<2x1x512xbf16> to vector<2x1x512xf32>
    %cst = arith.constant dense<0.000000e+00> : vector<2x512xf32>
    %2 = vector.multi_reduction <add>, %1, %cst [1] : vector<2x1x512xf32> to vector<2x512xf32>
    %cst_2 = arith.constant 1.000000e+00 : f32
    %3 = vector.broadcast %cst_2 : f32 to vector<2x512xf32>
    %4 = arith.divf %2, %3 : vector<2x512xf32>
    %c0_3 = arith.constant 0 : index
    %c0_4 = arith.constant 0 : index
    %5 = vector.load %arg1[%c0_3, %c0_4] : memref<512x128xf32, #tpu.memory_space<vmem>>, vector<512x128xf32>
    %cst_5 = arith.constant dense<0.000000e+00> : vector<2x128xf32>
    %6 = tpu.matmul %4, %5, %cst_5 {dimension_numbers = #tpu.dot_dimension_numbers<[1], [0], [0], [1], [0, 0, 1, 1], [], []>} : vector<2x512xf32>, vector<512x128xf32>, vector<2x128xf32> -> vector<2x128xf32>
    %c0_6 = arith.constant 0 : index
    %c0_7 = arith.constant 0 : index
    %7 = vector.load %arg2[%c0_6, %c0_7] : memref<1x128xf32, #tpu.memory_space<vmem>>, vector<1x128xf32>
    %8 = vector.broadcast %7 : vector<1x128xf32> to vector<2x128xf32>
    %9 = arith.addf %6, %8 : vector<2x128xf32>
    %c0_8 = arith.constant 0 : index
    %c0_9 = arith.constant 0 : index
    %10 = vector.load %arg3[%c0_8, %c0_9] : memref<2x128xf32, #tpu.memory_space<vmem>>, vector<2x128xf32>
    tpu.vector_store %arg3[%c0_8, %c0_9], %9 {strides = array<i32>} : memref<2x128xf32, #tpu.memory_space<vmem>>, vector<2x128xf32>,
    return
  }
}

</mosaic_0001>

<bundles_post_ra>
// kernel: forgery_detector_forward.19
= control target key start
LH: loop header
LB: loop body
LE: loop exit
PB: predicated region body
PF: predicated region fallthrough
CT: control target
= control target key end

     0   :  { %s1744_s12 = smov 0   ;;  %s1746_s13 = smov 0   ;;  %s1918_s0 = inlined_call_operand.vmem [shape: bf16[512,256], index: 0, kind: input, shape index: {}]   ;;  %s1919_s1 = inlined_call_operand.vmem [shape: bf16[256,128], index: 1, kind: input, shape index: {}]   ;;  %s1920_s2 = inlined_call_operand.vmem [shape: f32[1,128], index: 2, kind: input, shape index: {}]   ;;  %s1921_s3 = inlined_call_operand.vmem [shape: bf16[512,128], index: 3, kind: output, shape index: {}]  }
   0x1   :  { %s1748_s14 = smov 0  }
   0x2 LB: > { %s32_s15 = sadd.s32 1, %s1718_s13  ;;  %p1267_p0 = scmp.ge.s32.totalorder %s1722_s14, 1  ;;  %s1722_s14 = sphi %s1748_s14, %s13_s14   ;;  %s1718_s13 = sphi %s1746_s13, %s1923_s13   ;;  %s1714_s12 = sphi %s1744_s12, %s1922_s12  }
   0x3   : > { %p34_p1 = scmp.ge.s32.totalorder %s32_s15, 2  ;;  %p191_p2 = scmp.lt.s32.totalorder %s1722_s14, 3 }
   0x5   : > { %s1925_s15 = smov (%p34_p1, %s32_s15), 0  ;;  %p192_p3 = pnand %p1267_p0, %p191_p2 }
   0x6   : > { %s1268_s18 = sshll.u32 (!%p192_p3), %s1714_s12, 5 }
   0x7   : > { %195 = sbr.rel (%p192_p3) target bundleno = 309 (0x135), region = 32  ;;  %p236_p4 = scmp.lt.s32.totalorder (!%p192_p3), %s1268_s18, 63 }
   0xc   : > { %v1636_v0 = vld [vmem:[%s1919_s1 + $0x78] sm:$0xff]   ;;  %v1638_v2 = vld [vmem:[%s1919_s1 + $0x70] sm:$0xff]   ;;  %v1640_v4 = vld [vmem:[%s1919_s1 + $0x68] sm:$0xff]   ;;  %s1927_s18 = smov (!%p236_p4, %s1268_s18), 63 }
   0xd   : > { %v1637_v1 = vld [vmem:[%s1919_s1 + $0x38] sm:$0xff]   ;;  %1484 = vmatprep.subr.bf16.mxu0 %v1636_v0  ;;  %1596 = vmatprep.subr.bf16.mxu1 %v1636_v0  ;;  %v1639_v3 = vld [vmem:[%s1919_s1 + $0x30] sm:$0xff]   ;;  %v1641_v5 = vld [vmem:[%s1919_s1 + $0x28] sm:$0xff]   ;;  %s1356_s6 = sshll.u32 %s1927_s18, 3  ;;  %s1272_s5 = sshll.u32 %s1927_s18, 2 }
   0xe   : > { %1485 = vmatpush3.bf16.msra.mxu0 %v1637_v1  ;;  %1604 = vmatpush3.bf16.msra.mxu1 %v1637_v1  ;;  %v1642_v6 = vld [vmem:[%s1919_s1 + $0x60] sm:$0xff]   ;;  %v1644_v8 = vld [vmem:[%s1919_s1 + $0x58] sm:$0xff]   ;;  %s1795_s11 = scalar_lea.vmem %s1918_s0, %s1356_s6  ;;  %v1646_v10 = vld [vmem:[%s1919_s1 + $0x50] sm:$0xff]   ;;  %s1863_s8 = scalar_lea.vmem %s1921_s3, %s1272_s5 }
   0xf   : > { %1486 = vmatprep.subr.bf16.mxu0 %v1638_v2  ;;  %1597 = vmatprep.subr.bf16.mxu1 %v1638_v2  ;;  %v1643_v7 = vld [vmem:[%s1919_s1 + $0x20] sm:$0xff]   ;;  %v1645_v9 = vld [vmem:[%s1919_s1 + $0x18] sm:$0xff]   ;;  %v1647_v13 = vld [vmem:[%s1919_s1 + $0x10] sm:$0xff]  }
  0x10   : > { %v1654_v11 = vld [vmem:[%s1795_s11 + $0x4] ss:$8 sps:$4 sm:$0xff]   ;;  %v1652_v18 = vld [vmem:[%s1795_s11] ss:$8 sps:$4 sm:$0xff]   ;;  %v1658_v20 = vld [vmem:[%s1795_s11 + $0x14] ss:$8 sps:$4 sm:$0xff]  }
  0x11   : > { %v1657_v12 = vld [vmem:[%s1795_s11 + $0x84] ss:$8 sps:$4 sm:$0xff]   ;;  %688 = vmatprep.mubr.bf16.mxu0 %v1654_v11  ;;  %v1655_v19 = vld [vmem:[%s1795_s11 + $0x80] ss:$8 sps:$4 sm:$0xff]   ;;  %v1660_v21 = vld [vmem:[%s1795_s11 + $0x94] ss:$8 sps:$4 sm:$0xff]  }
  0x12   : > { %1487 = vmatpush3.bf16.msra.mxu0 %v1639_v3  ;;  %1605 = vmatpush3.bf16.msra.mxu1 %v1639_v3  ;;  %v1648_v14 = vld [vmem:[%s1919_s1 + $0x48] sm:$0xff]   ;;  %v1650_v16 = vld [vmem:[%s1919_s1 + $0x40] sm:$0xff]   ;;  %v1662_v22 = vld [vmem:[%s1795_s11 + $0x10] ss:$8 sps:$4 sm:$0xff]  }
  0x13   : > { %1488 = vmatprep.subr.bf16.mxu0 %v1640_v4  ;;  %1598 = vmatprep.subr.bf16.mxu1 %v1640_v4  ;;  %v1649_v15 = vld [vmem:[%s1919_s1 + $0x8] sm:$0xff]   ;;  %v1651_v17 = vld [vmem:[%s1919_s1] sm:$0xff]   ;;  %v1663_v23 = vld [vmem:[%s1795_s11 + $0x90] ss:$8 sps:$4 sm:$0xff]  }
  0x14   : > { %752 = vmatprep.mubr.bf16.mxu1 %v1657_v12  ;;  %v1664_v24 = vld [vmem:[%s1795_s11 + $0x24] ss:$8 sps:$4 sm:$0xff]   ;;  %v1668_v26 = vld [vmem:[%s1795_s11 + $0x20] ss:$8 sps:$4 sm:$0xff]   ;;  %v1670_v28 = vld [vmem:[%s1795_s11 + $0x34] ss:$8 sps:$4 sm:$0xff]  }
  0x15   : > { %v1666_v25 = vld [vmem:[%s1795_s11 + $0xa4] ss:$8 sps:$4 sm:$0xff]   ;;  %v1669_v27 = vld [vmem:[%s1795_s11 + $0xa0] ss:$8 sps:$4 sm:$0xff]   ;;  %v1672_v29 = vld [vmem:[%s1795_s11 + $0xb4] ss:$8 sps:$4 sm:$0xff]  }
  0x16   : > { %1489 = vmatpush3.bf16.msra.mxu0 %v1641_v5  ;;  %1606 = vmatpush3.bf16.msra.mxu1 %v1641_v5  ;;  %v1674_v30 = vld [vmem:[%s1795_s11 + $0x30] ss:$8 sps:$4 sm:$0xff]   ;;  %v1676_v32 = vld [vmem:[%s1795_s11 + $0x44] ss:$8 sps:$4 sm:$0xff]   ;;  %v1680_v34 = vld [vmem:[%s1795_s11 + $0x40] ss:$8 sps:$4 sm:$0xff]  }
  0x17   : > { %1490 = vmatprep.subr.bf16.mxu0 %v1642_v6  ;;  %1599 = vmatprep.subr.bf16.mxu1 %v1642_v6  ;;  %v1675_v31 = vld [vmem:[%s1795_s11 + $0xb0] ss:$8 sps:$4 sm:$0xff]   ;;  %v1678_v33 = vld [vmem:[%s1795_s11 + $0xc4] ss:$8 sps:$4 sm:$0xff]   ;;  %v1681_v35 = vld [vmem:[%s1795_s11 + $0xc0] ss:$8 sps:$4 sm:$0xff]  }
  0x18   : > { %v1682_v36 = vld [vmem:[%s1795_s11 + $0x54] ss:$8 sps:$4 sm:$0xff]   ;;  %v1686_v38 = vld [vmem:[%s1795_s11 + $0x50] ss:$8 sps:$4 sm:$0xff]   ;;  %v1688_v40 = vld [vmem:[%s1795_s11 + $0x64] ss:$8 sps:$4 sm:$0xff]  }
  0x19   : > { %v1684_v37 = vld [vmem:[%s1795_s11 + $0xd4] ss:$8 sps:$4 sm:$0xff]   ;;  %v1687_v39 = vld [vmem:[%s1795_s11 + $0xd0] ss:$8 sps:$4 sm:$0xff]   ;;  %v1690_v41 = vld [vmem:[%s1795_s11 + $0xe4] ss:$8 sps:$4 sm:$0xff]  }
  0x1a   : > { %1491 = vmatpush3.bf16.msra.mxu0 %v1643_v7  ;;  %1607 = vmatpush3.bf16.msra.mxu1 %v1643_v7  ;;  %v1692_v42 = vld [vmem:[%s1795_s11 + $0x60] ss:$8 sps:$4 sm:$0xff]   ;;  %v1694_v44 = vld [vmem:[%s1795_s11 + $0x74] ss:$8 sps:$4 sm:$0xff]   ;;  %v1698_v46 = vld [vmem:[%s1795_s11 + $0x70] ss:$8 sps:$4 sm:$0xff]  }
  0x1b   : > { %1492 = vmatprep.subr.bf16.mxu0 %v1644_v8  ;;  %1600 = vmatprep.subr.bf16.mxu1 %v1644_v8  ;;  %v1693_v43 = vld [vmem:[%s1795_s11 + $0xe0] ss:$8 sps:$4 sm:$0xff]   ;;  %v1696_v45 = vld [vmem:[%s1795_s11 + $0xf4] ss:$8 sps:$4 sm:$0xff]   ;;  %v1699_v47 = vld [vmem:[%s1795_s11 + $0xf0] ss:$8 sps:$4 sm:$0xff]  }
  0x1c   : > { %v1853_v53 = vld [vmem:[%s1920_s2] ss:$0 sm:$0xff] }
  0x1e   : > { %1493 = vmatpush3.bf16.msra.mxu0 %v1645_v9  ;;  %1608 = vmatpush3.bf16.msra.mxu1 %v1645_v9 }
  0x1f   : > { %1494 = vmatprep.subr.bf16.mxu0 %v1646_v10  ;;  %1601 = vmatprep.subr.bf16.mxu1 %v1646_v10 }
  0x22   : > { %1495 = vmatpush3.bf16.msra.mxu0 %v1647_v13  ;;  %1609 = vmatpush3.bf16.msra.mxu1 %v1647_v13 }
  0x23   : > { %1496 = vmatprep.subr.bf16.mxu0 %v1648_v14  ;;  %1602 = vmatprep.subr.bf16.mxu1 %v1648_v14 }
  0x26   : > { %1497 = vmatpush3.bf16.msra.mxu0 %v1649_v15  ;;  %1610 = vmatpush3.bf16.msra.mxu1 %v1649_v15 }
  0x27   : > { %1498 = vmatprep.subr.bf16.mxu0 %v1650_v16  ;;  %1603 = vmatprep.subr.bf16.mxu1 %v1650_v16 }
  0x2a   : > { %1499 = vmatpush3.bf16.msra.mxu0 %v1651_v17  ;;  %1611 = vmatpush3.bf16.msra.mxu1 %v1651_v17 }
  0x2d   : > { %689 = vmatmul.mubr.bf16.vlgmr.msra.gmra.mxu0 %v1652_v18  ;;  %753 = vmatmul.mubr.bf16.vlgmr.msra.gmra.mxu1 %v1655_v19 }
  0x2e   : > { %696 = vmatprep.mubr.bf16.mxu0 %v1658_v20  ;;  %760 = vmatprep.mubr.bf16.mxu1 %v1660_v21 }
  0x35   : > { %697 = vmatmul.mubr.bf16.gmra.mxu0 %v1662_v22  ;;  %761 = vmatmul.mubr.bf16.gmra.mxu1 %v1663_v23 }
  0x36   : > { %704 = vmatprep.mubr.bf16.mxu0 %v1664_v24  ;;  %768 = vmatprep.mubr.bf16.mxu1 %v1666_v25 }
  0x3d   : > { %705 = vmatmul.mubr.bf16.gmra.mxu0 %v1668_v26  ;;  %769 = vmatmul.mubr.bf16.gmra.mxu1 %v1669_v27 }
  0x3e   : > { %712 = vmatprep.mubr.bf16.mxu0 %v1670_v28  ;;  %776 = vmatprep.mubr.bf16.mxu1 %v1672_v29 }
  0x45   : > { %713 = vmatmul.mubr.bf16.gmra.mxu0 %v1674_v30  ;;  %777 = vmatmul.mubr.bf16.gmra.mxu1 %v1675_v31 }
  0x46   : > { %720 = vmatprep.mubr.bf16.mxu0 %v1676_v32  ;;  %784 = vmatprep.mubr.bf16.mxu1 %v1678_v33 }
  0x4d   : > { %721 = vmatmul.mubr.bf16.gmra.mxu0 %v1680_v34  ;;  %785 = vmatmul.mubr.bf16.gmra.mxu1 %v1681_v35 }
  0x4e   : > { %728 = vmatprep.mubr.bf16.mxu0 %v1682_v36  ;;  %792 = vmatprep.mubr.bf16.mxu1 %v1684_v37 }
  0x55   : > { %729 = vmatmul.mubr.bf16.gmra.mxu0 %v1686_v38  ;;  %793 = vmatmul.mubr.bf16.gmra.mxu1 %v1687_v39 }
  0x56   : > { %736 = vmatprep.mubr.bf16.mxu0 %v1688_v40  ;;  %800 = vmatprep.mubr.bf16.mxu1 %v1690_v41 }
  0x5d   : > { %737 = vmatmul.mubr.bf16.gmra.mxu0 %v1692_v42  ;;  %801 = vmatmul.mubr.bf16.gmra.mxu1 %v1693_v43 }
  0x5e   : > { %744 = vmatprep.mubr.bf16.mxu0 %v1694_v44  ;;  %808 = vmatprep.mubr.bf16.mxu1 %v1696_v45 }
  0x65   : > { %745 = vmatmul.mubr.bf16.gmra.mxu0 %v1698_v46  ;;  %809 = vmatmul.mubr.bf16.gmra.mxu1 %v1699_v47 }
  0xed   : > { %v1500_v48 = vpop.f32.mrf.mxu0  ;;  %v1548_v49 = vpop.f32.mrf.mxu1 }
  0xef   : > { %v1501_v50 = vpop.f32.mrf.mxu0  ;;  %v1549_v51 = vpop.f32.mrf.mxu1 }
  0xf0   : > { %v1502_v52 = vadd.f32 %v1501_v50, %v1500_v48  ;;  %v1550_v54 = vadd.f32 %v1549_v51, %v1548_v49 }
  0xf1   : > { %v1503_v55 = vpop.f32.mrf.mxu0  ;;  %v1551_v56 = vpop.f32.mrf.mxu1 }
  0xf2   : > { %v923_v57 = vadd.f32 %v1502_v52, %v1853_v53  ;;  %v939_v58 = vadd.f32 %v1550_v54, %v1853_v53 }
  0xf3   : > { %v1504_v59 = vpop.f32.mrf.mxu0  ;;  %v1552_v60 = vpop.f32.mrf.mxu1 }
  0xf4   : > { %v1505_v61 = vadd.f32 %v1504_v59, %v1503_v55  ;;  %v1553_v62 = vadd.f32 %v1552_v60, %v1551_v56  ;;  %v955_v3 = vmax.f32 %v923_v57, 0.0  ;;  %v971_v4 = vmax.f32 %v939_v58, 0.0 }
  0xf5   : > { %v1506_v63 = vpop.f32.mrf.mxu0  ;;  %v1554_v0 = vpop.f32.mrf.mxu1 }
  0xf6   : > { %v924_v1 = vadd.f32 %v1505_v61, %v1853_v53  ;;  %v940_v2 = vadd.f32 %v1553_v62, %v1853_v53 }
  0xf7   : > { %v1507_v5 = vpop.f32.mrf.mxu0  ;;  %v1555_v6 = vpop.f32.mrf.mxu1 }
  0xf8   : > { %v956_v7 = vmax.f32 %v924_v1, 0.0  ;;  %v972_v8 = vmax.f32 %v940_v2, 0.0  ;;  %v1508_v9 = vadd.f32 %v1507_v5, %v1506_v63  ;;  %v1556_v10 = vadd.f32 %v1555_v6, %v1554_v0 }
  0xf9   : > { %v1509_v11 = vpop.f32.mrf.mxu0  ;;  %v1557_v12 = vpop.f32.mrf.mxu1 }
  0xfa   : > { %v1392_v13 = vpack.c.bf16 %v956_v7, %v955_v3  ;;  %v1432_v14 = vpack.c.bf16 %v972_v8, %v971_v4  ;;  %v925_v15 = vadd.f32 %v1508_v9, %v1853_v53  ;;  %v941_v16 = vadd.f32 %v1556_v10, %v1853_v53 }
  0xfb   : > { %v1510_v17 = vpop.f32.mrf.mxu0  ;;  %v1558_v18 = vpop.f32.mrf.mxu1 }
  0xfc   : > { %1393 = vst [vmem:[%s1863_s8] sm:$0xff] %v1392_v13   ;;  %1476 = vst [vmem:[%s1863_s8 + $0x40] sm:$0xff] %v1432_v14   ;;  %v1511_v19 = vadd.f32 %v1510_v17, %v1509_v11  ;;  %v1559_v20 = vadd.f32 %v1558_v18, %v1557_v12  ;;  %v957_v25 = vmax.f32 %v925_v15, 0.0  ;;  %v973_v26 = vmax.f32 %v941_v16, 0.0 }
  0xfd   : > { %v1512_v21 = vpop.f32.mrf.mxu0  ;;  %v1560_v22 = vpop.f32.mrf.mxu1 }
  0xfe   : > { %v926_v23 = vadd.f32 %v1511_v19, %v1853_v53  ;;  %v942_v24 = vadd.f32 %v1559_v20, %v1853_v53 }
  0xff   : > { %v1513_v27 = vpop.f32.mrf.mxu0  ;;  %v1561_v28 = vpop.f32.mrf.mxu1 }
 0x100   : > { %v958_v29 = vmax.f32 %v926_v23, 0.0  ;;  %v974_v30 = vmax.f32 %v942_v24, 0.0  ;;  %v1514_v31 = vadd.f32 %v1513_v27, %v1512_v21  ;;  %v1562_v32 = vadd.f32 %v1561_v28, %v1560_v22 }
 0x101   : > { %v1515_v33 = vpop.f32.mrf.mxu0  ;;  %v1563_v34 = vpop.f32.mrf.mxu1 }
 0x102   : > { %v1397_v35 = vpack.c.bf16 %v958_v29, %v957_v25  ;;  %v1437_v36 = vpack.c.bf16 %v974_v30, %v973_v26  ;;  %v927_v37 = vadd.f32 %v1514_v31, %v1853_v53  ;;  %v943_v38 = vadd.f32 %v1562_v32, %v1853_v53 }
 0x103   : > { %v1516_v39 = vpop.f32.mrf.mxu0  ;;  %v1564_v40 = vpop.f32.mrf.mxu1 }
 0x104   : > { %1469 = vst [vmem:[%s1863_s8 + $0x8] sm:$0xff] %v1397_v35   ;;  %1477 = vst [vmem:[%s1863_s8 + $0x48] sm:$0xff] %v1437_v36   ;;  %v1517_v41 = vadd.f32 %v1516_v39, %v1515_v33  ;;  %v1565_v42 = vadd.f32 %v1564_v40, %v1563_v34  ;;  %v959_v47 = vmax.f32 %v927_v37, 0.0  ;;  %v975_v48 = vmax.f32 %v943_v38, 0.0 }
 0x105   : > { %v1518_v43 = vpop.f32.mrf.mxu0  ;;  %v1566_v44 = vpop.f32.mrf.mxu1 }
 0x106   : > { %v928_v45 = vadd.f32 %v1517_v41, %v1853_v53  ;;  %v944_v46 = vadd.f32 %v1565_v42, %v1853_v53 }
 0x107   : > { %v1519_v49 = vpop.f32.mrf.mxu0  ;;  %v1567_v50 = vpop.f32.mrf.mxu1 }
 0x108   : > { %v960_v51 = vmax.f32 %v928_v45, 0.0  ;;  %v976_v52 = vmax.f32 %v944_v46, 0.0  ;;  %v1520_v54 = vadd.f32 %v1519_v49, %v1518_v43  ;;  %v1568_v55 = vadd.f32 %v1567_v50, %v1566_v44 }
 0x109   : > { %v1521_v56 = vpop.f32.mrf.mxu0  ;;  %v1569_v57 = vpop.f32.mrf.mxu1 }
 0x10a   : > { %v1402_v58 = vpack.c.bf16 %v960_v51, %v959_v47  ;;  %v1442_v59 = vpack.c.bf16 %v976_v52, %v975_v48  ;;  %v929_v60 = vadd.f32 %v1520_v54, %v1853_v53  ;;  %v945_v61 = vadd.f32 %v1568_v55, %v1853_v53 }
 0x10b   : > { %v1522_v62 = vpop.f32.mrf.mxu0  ;;  %v1570_v63 = vpop.f32.mrf.mxu1 }
 0x10c   : > { %1470 = vst [vmem:[%s1863_s8 + $0x10] sm:$0xff] %v1402_v58   ;;  %1478 = vst [vmem:[%s1863_s8 + $0x50] sm:$0xff] %v1442_v59   ;;  %v1523_v0 = vadd.f32 %v1522_v62, %v1521_v56  ;;  %v1571_v1 = vadd.f32 %v1570_v63, %v1569_v57  ;;  %v961_v6 = vmax.f32 %v929_v60, 0.0  ;;  %v977_v7 = vmax.f32 %v945_v61, 0.0 }
 0x10d   : > { %v1524_v2 = vpop.f32.mrf.mxu0  ;;  %v1572_v3 = vpop.f32.mrf.mxu1 }
 0x10e   : > { %v930_v4 = vadd.f32 %v1523_v0, %v1853_v53  ;;  %v946_v5 = vadd.f32 %v1571_v1, %v1853_v53 }
 0x10f   : > { %v1525_v8 = vpop.f32.mrf.mxu0  ;;  %v1573_v9 = vpop.f32.mrf.mxu1 }
 0x110   : > { %v962_v10 = vmax.f32 %v930_v4, 0.0  ;;  %v978_v11 = vmax.f32 %v946_v5, 0.0  ;;  %v1526_v12 = vadd.f32 %v1525_v8, %v1524_v2  ;;  %v1574_v13 = vadd.f32 %v1573_v9, %v1572_v3 }
 0x111   : > { %v1527_v14 = vpop.f32.mrf.mxu0  ;;  %v1575_v15 = vpop.f32.mrf.mxu1 }
 0x112   : > { %v1407_v16 = vpack.c.bf16 %v962_v10, %v961_v6  ;;  %v1447_v17 = vpack.c.bf16 %v978_v11, %v977_v7  ;;  %v931_v18 = vadd.f32 %v1526_v12, %v1853_v53  ;;  %v947_v19 = vadd.f32 %v1574_v13, %v1853_v53 }
 0x113   : > { %v1528_v20 = vpop.f32.mrf.mxu0  ;;  %v1576_v21 = vpop.f32.mrf.mxu1 }
 0x114   : > { %1471 = vst [vmem:[%s1863_s8 + $0x18] sm:$0xff] %v1407_v16   ;;  %1479 = vst [vmem:[%s1863_s8 + $0x58] sm:$0xff] %v1447_v17   ;;  %v1529_v22 = vadd.f32 %v1528_v20, %v1527_v14  ;;  %v1577_v23 = vadd.f32 %v1576_v21, %v1575_v15  ;;  %v963_v28 = vmax.f32 %v931_v18, 0.0  ;;  %v979_v29 = vmax.f32 %v947_v19, 0.0 }
 0x115   : > { %v1530_v24 = vpop.f32.mrf.mxu0  ;;  %v1578_v25 = vpop.f32.mrf.mxu1 }
 0x116   : > { %v932_v26 = vadd.f32 %v1529_v22, %v1853_v53  ;;  %v948_v27 = vadd.f32 %v1577_v23, %v1853_v53 }
 0x117   : > { %v1531_v30 = vpop.f32.mrf.mxu0  ;;  %v1579_v31 = vpop.f32.mrf.mxu1 }
 0x118   : > { %v964_v32 = vmax.f32 %v932_v26, 0.0  ;;  %v980_v33 = vmax.f32 %v948_v27, 0.0  ;;  %v1532_v34 = vadd.f32 %v1531_v30, %v1530_v24  ;;  %v1580_v35 = vadd.f32 %v1579_v31, %v1578_v25 }
 0x119   : > { %v1533_v36 = vpop.f32.mrf.mxu0  ;;  %v1581_v37 = vpop.f32.mrf.mxu1 }
 0x11a   : > { %v1412_v38 = vpack.c.bf16 %v964_v32, %v963_v28  ;;  %v1452_v39 = vpack.c.bf16 %v980_v33, %v979_v29  ;;  %v933_v40 = vadd.f32 %v1532_v34, %v1853_v53  ;;  %v949_v41 = vadd.f32 %v1580_v35, %v1853_v53 }
 0x11b   : > { %v1534_v42 = vpop.f32.mrf.mxu0  ;;  %v1582_v43 = vpop.f32.mrf.mxu1 }
 0x11c   : > { %1472 = vst [vmem:[%s1863_s8 + $0x20] sm:$0xff] %v1412_v38   ;;  %1480 = vst [vmem:[%s1863_s8 + $0x60] sm:$0xff] %v1452_v39   ;;  %v1535_v44 = vadd.f32 %v1534_v42, %v1533_v36  ;;  %v1583_v45 = vadd.f32 %v1582_v43, %v1581_v37  ;;  %v965_v50 = vmax.f32 %v933_v40, 0.0  ;;  %v981_v51 = vmax.f32 %v949_v41, 0.0 }
 0x11d   : > { %v1536_v46 = vpop.f32.mrf.mxu0  ;;  %v1584_v47 = vpop.f32.mrf.mxu1 }
 0x11e   : > { %v934_v48 = vadd.f32 %v1535_v44, %v1853_v53  ;;  %v950_v49 = vadd.f32 %v1583_v45, %v1853_v53 }
 0x11f   : > { %v1537_v52 = vpop.f32.mrf.mxu0  ;;  %v1585_v54 = vpop.f32.mrf.mxu1 }
 0x120   : > { %v966_v55 = vmax.f32 %v934_v48, 0.0  ;;  %v982_v56 = vmax.f32 %v950_v49, 0.0  ;;  %v1538_v57 = vadd.f32 %v1537_v52, %v1536_v46  ;;  %v1586_v58 = vadd.f32 %v1585_v54, %v1584_v47 }
 0x121   : > { %v1539_v59 = vpop.f32.mrf.mxu0  ;;  %v1587_v60 = vpop.f32.mrf.mxu1 }
 0x122   : > { %v1417_v61 = vpack.c.bf16 %v966_v55, %v965_v50  ;;  %v1457_v62 = vpack.c.bf16 %v982_v56, %v981_v51  ;;  %v935_v63 = vadd.f32 %v1538_v57, %v1853_v53  ;;  %v951_v0 = vadd.f32 %v1586_v58, %v1853_v53 }
 0x123   : > { %v1540_v1 = vpop.f32.mrf.mxu0  ;;  %v1588_v2 = vpop.f32.mrf.mxu1 }
 0x124   : > { %1473 = vst [vmem:[%s1863_s8 + $0x28] sm:$0xff] %v1417_v61   ;;  %1481 = vst [vmem:[%s1863_s8 + $0x68] sm:$0xff] %v1457_v62   ;;  %v1541_v3 = vadd.f32 %v1540_v1, %v1539_v59  ;;  %v1589_v4 = vadd.f32 %v1588_v2, %v1587_v60  ;;  %v967_v9 = vmax.f32 %v935_v63, 0.0  ;;  %v983_v10 = vmax.f32 %v951_v0, 0.0 }
 0x125   : > { %v1542_v5 = vpop.f32.mrf.mxu0  ;;  %v1590_v6 = vpop.f32.mrf.mxu1 }
 0x126   : > { %v936_v7 = vadd.f32 %v1541_v3, %v1853_v53  ;;  %v952_v8 = vadd.f32 %v1589_v4, %v1853_v53 }
 0x127   : > { %v1543_v11 = vpop.f32.mrf.mxu0  ;;  %v1591_v12 = vpop.f32.mrf.mxu1 }
 0x128   : > { %v968_v13 = vmax.f32 %v936_v7, 0.0  ;;  %v984_v14 = vmax.f32 %v952_v8, 0.0  ;;  %v1544_v15 = vadd.f32 %v1543_v11, %v1542_v5  ;;  %v1592_v16 = vadd.f32 %v1591_v12, %v1590_v6 }
 0x129   : > { %v1545_v17 = vpop.f32.mrf.mxu0  ;;  %v1593_v18 = vpop.f32.mrf.mxu1 }
 0x12a   : > { %v1422_v19 = vpack.c.bf16 %v968_v13, %v967_v9  ;;  %v1462_v20 = vpack.c.bf16 %v984_v14, %v983_v10  ;;  %v937_v23 = vadd.f32 %v1544_v15, %v1853_v53  ;;  %v953_v24 = vadd.f32 %v1592_v16, %v1853_v53 }
 0x12b   : > { %v1546_v21 = vpop.f32.mrf.mxu0  ;;  %v1594_v22 = vpop.f32.mrf.mxu1 }
 0x12c   : > { %1474 = vst [vmem:[%s1863_s8 + $0x30] sm:$0xff] %v1422_v19   ;;  %1482 = vst [vmem:[%s1863_s8 + $0x70] sm:$0xff] %v1462_v20   ;;  %v1547_v25 = vadd.f32 %v1546_v21, %v1545_v17  ;;  %v1595_v26 = vadd.f32 %v1594_v22, %v1593_v18  ;;  %v969_v29 = vmax.f32 %v937_v23, 0.0  ;;  %v985_v30 = vmax.f32 %v953_v24, 0.0 }
 0x12e   : > { %v938_v27 = vadd.f32 %v1547_v25, %v1853_v53  ;;  %v954_v28 = vadd.f32 %v1595_v26, %v1853_v53 }
 0x130   : > { %v970_v31 = vmax.f32 %v938_v27, 0.0  ;;  %v986_v32 = vmax.f32 %v954_v28, 0.0 }
 0x132   : > { %v1427_v33 = vpack.c.bf16 %v970_v31, %v969_v29  ;;  %v1467_v34 = vpack.c.bf16 %v986_v32, %v985_v30 }
 0x134   : > { %1475 = vst [vmem:[%s1863_s8 + $0x38] sm:$0xff] %v1427_v33   ;;  %1483 = vst [vmem:[%s1863_s8 + $0x78] sm:$0xff] %v1467_v34  }
 0x135 PF: > { %s13_s14 = sadd.s32 1, %s1722_s14   ;;  %s1922_s12 = smov %s1718_s13 }
 0x136   : > { %p10_p5 = scmp.ge.s32.totalorder %s13_s14, 4   ;;  %s1923_s13 = smov %s1925_s15 }
 0x138   :  { %12 = sbr.rel (!%p10_p5) target bundleno = 2 (0x2), region = 76 }

// kernel: forgery_detector_forward.20
= control target key start
LH: loop header
LB: loop body
LE: loop exit
PB: predicated region body
PF: predicated region fallthrough
CT: control target
= control target key end

     0   :  { %s885_s0 = inlined_call_operand.vmem [shape: bf16[128,128], index: 0, kind: input, shape index: {}]   ;;  %s886_s1 = inlined_call_operand.vmem [shape: bf16[128,128], index: 1, kind: input, shape index: {}]   ;;  %s887_s2 = inlined_call_operand.vmem [shape: bf16[128,128], index: 2, kind: input, shape index: {}]   ;;  %s888_s3 = inlined_call_operand.vmem [shape: bf16[128,128], index: 3, kind: input, shape index: {}]   ;;  %s889_s4 = inlined_call_operand.vmem [shape: bf16[128,128], index: 4, kind: input, shape index: {}]   ;;  %s890_s5 = inlined_call_operand.vmem [shape: bf16[128,128], index: 5, kind: input, shape index: {}]   ;;  %s891_s6 = inlined_call_operand.vmem [shape: bf16[128,128], index: 6, kind: input, shape index: {}]   ;;  %s892_s7 = inlined_call_operand.vmem [shape: bf16[128,128], index: 7, kind: input, shape index: {}]   ;;  %s893_s8 = inlined_call_operand.vmem [shape: bf16[128,128], index: 8, kind: input, shape index: {}]   ;;  %s894_s9 = inlined_call_operand.vmem [shape: bf16[128,128], index: 9, kind: output, shape index: {}]  }
   0x1   :  { %v32_v0 = vld [vmem:[%s885_s0] sm:$0xf]  ;;  %v33_v1 = vld [vmem:[%s885_s0 + $0x4] sm:$0xf]  ;;  %v34_v18 = vld [vmem:[%s885_s0 + $0x8] sm:$0xf] }
   0x2   :  { %v48_v2 = vld [vmem:[%s886_s1] sm:$0xf]  ;;  %v49_v3 = vld [vmem:[%s886_s1 + $0x4] sm:$0xf]  ;;  %v35_v19 = vld [vmem:[%s885_s0 + $0xc] sm:$0xf] }
   0x3   :  { %v64_v4 = vmax.bf16 %v48_v2, %v32_v0  ;;  %v80_v5 = vld [vmem:[%s887_s2] sm:$0xf]  ;;  %v81_v6 = vld [vmem:[%s887_s2 + $0x4] sm:$0xf]  ;;  %v65_v7 = vmax.bf16 %v49_v3, %v33_v1  ;;  %v50_v20 = vld [vmem:[%s886_s1 + $0x8] sm:$0xf] }
   0x4   :  { %v112_v8 = vld [vmem:[%s888_s3] sm:$0xf]  ;;  %v113_v10 = vld [vmem:[%s888_s3 + $0x4] sm:$0xf]  ;;  %v51_v22 = vld [vmem:[%s886_s1 + $0xc] sm:$0xf]  ;;  %v66_v23 = vmax.bf16 %v50_v20, %v34_v18 }
   0x5   :  { %v96_v9 = vmax.bf16 %v80_v5, %v64_v4  ;;  %v97_v11 = vmax.bf16 %v81_v6, %v65_v7  ;;  %v144_v12 = vld [vmem:[%s889_s4] sm:$0xf]  ;;  %v145_v14 = vld [vmem:[%s889_s4 + $0x4] sm:$0xf]  ;;  %v82_v24 = vld [vmem:[%s887_s2 + $0x8] sm:$0xf]  ;;  %v67_v28 = vmax.bf16 %v51_v22, %v35_v19 }
   0x6   :  { %v176_v15 = vld [vmem:[%s890_s5] sm:$0xf]  ;;  %v177_v16 = vld [vmem:[%s890_s5 + $0x4] sm:$0xf]  ;;  %v83_v25 = vld [vmem:[%s887_s2 + $0xc] sm:$0xf]  ;;  %v98_v33 = vmax.bf16 %v82_v24, %v66_v23 }
   0x7   :  { %v128_v13 = vmax.bf16 %v112_v8, %v96_v9  ;;  %v129_v17 = vmax.bf16 %v113_v10, %v97_v11  ;;  %v208_v27 = vld [vmem:[%s891_s6] sm:$0xf]  ;;  %v114_v29 = vld [vmem:[%s888_s3 + $0x8] sm:$0xf]  ;;  %v209_v31 = vld [vmem:[%s891_s6 + $0x4] sm:$0xf]  ;;  %v99_v38 = vmax.bf16 %v83_v25, %v67_v28 }
   0x8   :  { %v240_v32 = vld [vmem:[%s892_s7] sm:$0xf]  ;;  %v115_v34 = vld [vmem:[%s888_s3 + $0xc] sm:$0xf]  ;;  %v241_v36 = vld [vmem:[%s892_s7 + $0x4] sm:$0xf]  ;;  %v130_v42 = vmax.bf16 %v114_v29, %v98_v33 }
   0x9   :  { %v160_v21 = vmax.bf16 %v144_v12, %v128_v13  ;;  %v161_v26 = vmax.bf16 %v145_v14, %v129_v17  ;;  %v272_v37 = vld [vmem:[%s893_s8] sm:$0xf]  ;;  %v146_v39 = vld [vmem:[%s889_s4 + $0x8] sm:$0xf]  ;;  %v273_v41 = vld [vmem:[%s893_s8 + $0x4] sm:$0xf]  ;;  %v131_v47 = vmax.bf16 %v115_v34, %v99_v38 }
   0xa   :  { %v147_v43 = vld [vmem:[%s889_s4 + $0xc] sm:$0xf]  ;;  %v178_v44 = vld [vmem:[%s890_s5 + $0x8] sm:$0xf]  ;;  %v36_v48 = vld [vmem:[%s885_s0 + $0x10] sm:$0xf]  ;;  %v162_v52 = vmax.bf16 %v146_v39, %v130_v42 }
   0xb   :  { %v192_v30 = vmax.bf16 %v176_v15, %v160_v21  ;;  %v193_v35 = vmax.bf16 %v177_v16, %v161_v26  ;;  %v179_v45 = vld [vmem:[%s890_s5 + $0xc] sm:$0xf]  ;;  %v37_v49 = vld [vmem:[%s885_s0 + $0x14] sm:$0xf]  ;;  %v52_v50 = vld [vmem:[%s886_s1 + $0x10] sm:$0xf]  ;;  %v163_v58 = vmax.bf16 %v147_v43, %v131_v47 }
   0xc   :  { %v53_v53 = vld [vmem:[%s886_s1 + $0x14] sm:$0xf]  ;;  %v68_v54 = vmax.bf16 %v52_v50, %v36_v48  ;;  %v84_v55 = vld [vmem:[%s887_s2 + $0x10] sm:$0xf]  ;;  %v210_v59 = vld [vmem:[%s891_s6 + $0x8] sm:$0xf]  ;;  %v194_v63 = vmax.bf16 %v178_v44, %v162_v52 }
   0xd   :  { %v224_v40 = vmax.bf16 %v208_v27, %v192_v30  ;;  %v225_v46 = vmax.bf16 %v209_v31, %v193_v35  ;;  %v85_v56 = vld [vmem:[%s887_s2 + $0x14] sm:$0xf]  ;;  %v69_v60 = vmax.bf16 %v53_v53, %v37_v49  ;;  %v116_v61 = vld [vmem:[%s888_s3 + $0x10] sm:$0xf]  ;;  %v211_v0 = vld [vmem:[%s891_s6 + $0xc] sm:$0xf]  ;;  %v195_v5 = vmax.bf16 %v179_v45, %v163_v58 }
   0xe   :  { %v242_v1 = vld [vmem:[%s892_s7 + $0x8] sm:$0xf]  ;;  %v100_v2 = vmax.bf16 %v84_v55, %v68_v54  ;;  %v117_v3 = vld [vmem:[%s888_s3 + $0x14] sm:$0xf]  ;;  %v243_v6 = vld [vmem:[%s892_s7 + $0xc] sm:$0xf]  ;;  %v226_v10 = vmax.bf16 %v210_v59, %v194_v63 }
   0xf   :  { %v256_v51 = vmax.bf16 %v240_v32, %v224_v40  ;;  %v257_v57 = vmax.bf16 %v241_v36, %v225_v46  ;;  %v274_v7 = vld [vmem:[%s893_s8 + $0x8] sm:$0xf]  ;;  %v101_v8 = vmax.bf16 %v85_v56, %v69_v60  ;;  %v148_v9 = vld [vmem:[%s889_s4 + $0x10] sm:$0xf]  ;;  %v275_v11 = vld [vmem:[%s893_s8 + $0xc] sm:$0xf]  ;;  %v227_v17 = vmax.bf16 %v211_v0, %v195_v5 }
  0x10   :  { %v132_v12 = vmax.bf16 %v116_v61, %v100_v2  ;;  %v149_v13 = vld [vmem:[%s889_s4 + $0x14] sm:$0xf]  ;;  %v180_v14 = vld [vmem:[%s890_s5 + $0x10] sm:$0xf]  ;;  %v38_v19 = vld [vmem:[%s885_s0 + $0x18] sm:$0xf]  ;;  %v258_v22 = vmax.bf16 %v242_v1, %v226_v10 }
  0x11   :  { %v288_v62 = vmax.bf16 %v272_v37, %v256_v51  ;;  %v289_v4 = vmax.bf16 %v273_v41, %v257_v57  ;;  %v181_v15 = vld [vmem:[%s890_s5 + $0x14] sm:$0xf]  ;;  %v133_v18 = vmax.bf16 %v117_v3, %v101_v8  ;;  %v39_v20 = vld [vmem:[%s885_s0 + $0x1c] sm:$0xf]  ;;  %v54_v21 = vld [vmem:[%s886_s1 + $0x18] sm:$0xf]  ;;  %v259_v28 = vmax.bf16 %v243_v6, %v227_v17 }
  0x12   :  { %v164_v23 = vmax.bf16 %v148_v9, %v132_v12  ;;  %v55_v24 = vld [vmem:[%s886_s1 + $0x1c] sm:$0xf]  ;;  %v70_v25 = vmax.bf16 %v54_v21, %v38_v19  ;;  %v86_v26 = vld [vmem:[%s887_s2 + $0x18] sm:$0xf]  ;;  %v212_v30 = vld [vmem:[%s891_s6 + $0x10] sm:$0xf]  ;;  %v290_v33 = vmax.bf16 %v274_v7, %v258_v22 }
  0x13   :  { %v364_v16 = vcombine.low %v288_v62, %v289_v4  ;;  %v87_v27 = vld [vmem:[%s887_s2 + $0x1c] sm:$0xf]  ;;  %v165_v29 = vmax.bf16 %v149_v13, %v133_v18  ;;  %v71_v31 = vmax.bf16 %v55_v24, %v39_v20  ;;  %v118_v32 = vld [vmem:[%s888_s3 + $0x18] sm:$0xf]  ;;  %v213_v35 = vld [vmem:[%s891_s6 + $0x14] sm:$0xf]  ;;  %v291_v39 = vmax.bf16 %v275_v11, %v259_v28 }
  0x14   :  { %v196_v34 = vmax.bf16 %v180_v14, %v164_v23  ;;  %v244_v36 = vld [vmem:[%s892_s7 + $0x10] sm:$0xf]  ;;  %v102_v37 = vmax.bf16 %v86_v26, %v70_v25  ;;  %v119_v38 = vld [vmem:[%s888_s3 + $0x1c] sm:$0xf]  ;;  %v245_v41 = vld [vmem:[%s892_s7 + $0x14] sm:$0xf] }
  0x15   :  { %328 = vst [vmem:[%s894_s9] sm:$0xff] %v364_v16   ;;  %v197_v40 = vmax.bf16 %v181_v15, %v165_v29  ;;  %v276_v42 = vld [vmem:[%s893_s8 + $0x10] sm:$0xf]  ;;  %v103_v43 = vmax.bf16 %v87_v27, %v71_v31  ;;  %v150_v44 = vld [vmem:[%s889_s4 + $0x18] sm:$0xf]  ;;  %v277_v46 = vld [vmem:[%s893_s8 + $0x14] sm:$0xf]  ;;  %v365_v51 = vcombine.low %v290_v33, %v291_v39 }
  0x16   :  { %v228_v45 = vmax.bf16 %v212_v30, %v196_v34  ;;  %v134_v47 = vmax.bf16 %v118_v32, %v102_v37  ;;  %v151_v48 = vld [vmem:[%s889_s4 + $0x1c] sm:$0xf]  ;;  %v182_v49 = vld [vmem:[%s890_s5 + $0x18] sm:$0xf]  ;;  %v40_v54 = vld [vmem:[%s885_s0 + $0x20] sm:$0xf] }
  0x17   :  { %v183_v50 = vld [vmem:[%s890_s5 + $0x1c] sm:$0xf]  ;;  %v229_v52 = vmax.bf16 %v213_v35, %v197_v40  ;;  %v135_v53 = vmax.bf16 %v119_v38, %v103_v43  ;;  %v41_v55 = vld [vmem:[%s885_s0 + $0x24] sm:$0xf]  ;;  %v56_v56 = vld [vmem:[%s886_s1 + $0x20] sm:$0xf] }
  0x18   :  { %v260_v57 = vmax.bf16 %v244_v36, %v228_v45  ;;  %v166_v58 = vmax.bf16 %v150_v44, %v134_v47  ;;  %v57_v59 = vld [vmem:[%s886_s1 + $0x24] sm:$0xf]  ;;  %v72_v60 = vmax.bf16 %v56_v56, %v40_v54  ;;  %v88_v61 = vld [vmem:[%s887_s2 + $0x20] sm:$0xf]  ;;  %366 = vst [vmem:[%s894_s9 + $0x8] sm:$0xff] %v365_v51  }
  0x19   :  { %v89_v62 = vld [vmem:[%s887_s2 + $0x24] sm:$0xf]  ;;  %v261_v63 = vmax.bf16 %v245_v41, %v229_v52  ;;  %v167_v0 = vmax.bf16 %v151_v48, %v135_v53  ;;  %v214_v1 = vld [vmem:[%s891_s6 + $0x18] sm:$0xf]  ;;  %v73_v2 = vmax.bf16 %v57_v59, %v41_v55  ;;  %v120_v3 = vld [vmem:[%s888_s3 + $0x20] sm:$0xf] }
  0x1a   :  { %v292_v4 = vmax.bf16 %v276_v42, %v260_v57  ;;  %v198_v5 = vmax.bf16 %v182_v49, %v166_v58  ;;  %v215_v6 = vld [vmem:[%s891_s6 + $0x1c] sm:$0xf]  ;;  %v246_v7 = vld [vmem:[%s892_s7 + $0x18] sm:$0xf]  ;;  %v104_v8 = vmax.bf16 %v88_v61, %v72_v60  ;;  %v121_v9 = vld [vmem:[%s888_s3 + $0x24] sm:$0xf] }
  0x1b   :  { %v293_v10 = vmax.bf16 %v277_v46, %v261_v63  ;;  %v199_v11 = vmax.bf16 %v183_v50, %v167_v0  ;;  %v247_v12 = vld [vmem:[%s892_s7 + $0x1c] sm:$0xf]  ;;  %v278_v13 = vld [vmem:[%s893_s8 + $0x18] sm:$0xf]  ;;  %v105_v14 = vmax.bf16 %v89_v62, %v73_v2  ;;  %v152_v15 = vld [vmem:[%s889_s4 + $0x20] sm:$0xf] }
  0x1c   :  { %v230_v16 = vmax.bf16 %v214_v1, %v198_v5  ;;  %v279_v17 = vld [vmem:[%s893_s8 + $0x1c] sm:$0xf]  ;;  %v136_v18 = vmax.bf16 %v120_v3, %v104_v8  ;;  %v153_v19 = vld [vmem:[%s889_s4 + $0x24] sm:$0xf]  ;;  %v184_v20 = vld [vmem:[%s890_s5 + $0x20] sm:$0xf] }
  0x1d   :  { %v185_v21 = vld [vmem:[%s890_s5 + $0x24] sm:$0xf]  ;;  %v367_v22 = vcombine.low %v292_v4, %v293_v10  ;;  %v231_v23 = vmax.bf16 %v215_v6, %v199_v11  ;;  %v137_v24 = vmax.bf16 %v121_v9, %v105_v14  ;;  %v42_v25 = vld [vmem:[%s885_s0 + $0x28] sm:$0xf]  ;;  %v43_v26 = vld [vmem:[%s885_s0 + $0x2c] sm:$0xf] }
  0x1e   :  { %v58_v27 = vld [vmem:[%s886_s1 + $0x28] sm:$0xf]  ;;  %v262_v28 = vmax.bf16 %v246_v7, %v230_v16  ;;  %v168_v29 = vmax.bf16 %v152_v15, %v136_v18  ;;  %v59_v30 = vld [vmem:[%s886_s1 + $0x2c] sm:$0xf]  ;;  %v216_v36 = vld [vmem:[%s891_s6 + $0x20] sm:$0xf] }
  0x1f   :  { %v74_v31 = vmax.bf16 %v58_v27, %v42_v25  ;;  %v90_v32 = vld [vmem:[%s887_s2 + $0x28] sm:$0xf]  ;;  %v91_v33 = vld [vmem:[%s887_s2 + $0x2c] sm:$0xf]  ;;  %368 = vst [vmem:[%s894_s9 + $0x10] sm:$0xff] %v367_v22   ;;  %v263_v34 = vmax.bf16 %v247_v12, %v231_v23  ;;  %v169_v35 = vmax.bf16 %v153_v19, %v137_v24  ;;  %v75_v37 = vmax.bf16 %v59_v30, %v43_v26 }
  0x20   :  { %v122_v38 = vld [vmem:[%s888_s3 + $0x28] sm:$0xf]  ;;  %v294_v39 = vmax.bf16 %v278_v13, %v262_v28  ;;  %v200_v40 = vmax.bf16 %v184_v20, %v168_v29  ;;  %v217_v41 = vld [vmem:[%s891_s6 + $0x24] sm:$0xf]  ;;  %v248_v42 = vld [vmem:[%s892_s7 + $0x20] sm:$0xf] }
  0x21   :  { %v106_v43 = vmax.bf16 %v90_v32, %v74_v31  ;;  %v123_v44 = vld [vmem:[%s888_s3 + $0x2c] sm:$0xf]  ;;  %v295_v45 = vmax.bf16 %v279_v17, %v263_v34  ;;  %v201_v46 = vmax.bf16 %v185_v21, %v169_v35  ;;  %v249_v47 = vld [vmem:[%s892_s7 + $0x24] sm:$0xf]  ;;  %v280_v48 = vld [vmem:[%s893_s8 + $0x20] sm:$0xf]  ;;  %v107_v49 = vmax.bf16 %v91_v33, %v75_v37 }
  0x22   :  { %v154_v50 = vld [vmem:[%s889_s4 + $0x28] sm:$0xf]  ;;  %v232_v51 = vmax.bf16 %v216_v36, %v200_v40  ;;  %v281_v52 = vld [vmem:[%s893_s8 + $0x24] sm:$0xf]  ;;  %v155_v54 = vld [vmem:[%s889_s4 + $0x2c] sm:$0xf] }
  0x23   :  { %v138_v53 = vmax.bf16 %v122_v38, %v106_v43  ;;  %v186_v55 = vld [vmem:[%s890_s5 + $0x28] sm:$0xf]  ;;  %v187_v56 = vld [vmem:[%s890_s5 + $0x2c] sm:$0xf]  ;;  %v369_v57 = vcombine.low %v294_v39, %v295_v45  ;;  %v233_v58 = vmax.bf16 %v217_v41, %v201_v46  ;;  %v139_v59 = vmax.bf16 %v123_v44, %v107_v49  ;;  %v44_v60 = vld [vmem:[%s885_s0 + $0x30] sm:$0xf] }
  0x24   :  { %v45_v61 = vld [vmem:[%s885_s0 + $0x34] sm:$0xf]  ;;  %v60_v62 = vld [vmem:[%s886_s1 + $0x30] sm:$0xf]  ;;  %v264_v63 = vmax.bf16 %v248_v42, %v232_v51  ;;  %v218_v7 = vld [vmem:[%s891_s6 + $0x28] sm:$0xf] }
  0x25   :  { %v170_v0 = vmax.bf16 %v154_v50, %v138_v53  ;;  %v61_v1 = vld [vmem:[%s886_s1 + $0x34] sm:$0xf]  ;;  %v76_v2 = vmax.bf16 %v60_v62, %v44_v60  ;;  %v92_v3 = vld [vmem:[%s887_s2 + $0x30] sm:$0xf]  ;;  %370 = vst [vmem:[%s894_s9 + $0x18] sm:$0xff] %v369_v57   ;;  %v265_v5 = vmax.bf16 %v249_v47, %v233_v58  ;;  %v171_v6 = vmax.bf16 %v155_v54, %v139_v59 }
  0x26   :  { %v93_v4 = vld [vmem:[%s887_s2 + $0x34] sm:$0xf]  ;;  %v77_v8 = vmax.bf16 %v61_v1, %v45_v61  ;;  %v124_v9 = vld [vmem:[%s888_s3 + $0x30] sm:$0xf]  ;;  %v296_v10 = vmax.bf16 %v280_v48, %v264_v63  ;;  %v219_v12 = vld [vmem:[%s891_s6 + $0x2c] sm:$0xf] }
  0x27   :  { %v202_v11 = vmax.bf16 %v186_v55, %v170_v0  ;;  %v250_v13 = vld [vmem:[%s892_s7 + $0x28] sm:$0xf]  ;;  %v108_v14 = vmax.bf16 %v92_v3, %v76_v2  ;;  %v125_v15 = vld [vmem:[%s888_s3 + $0x34] sm:$0xf]  ;;  %v297_v16 = vmax.bf16 %v281_v52, %v265_v5  ;;  %v203_v17 = vmax.bf16 %v187_v56, %v171_v6  ;;  %v251_v18 = vld [vmem:[%s892_s7 + $0x2c] sm:$0xf] }
  0x28   :  { %v282_v19 = vld [vmem:[%s893_s8 + $0x28] sm:$0xf]  ;;  %v109_v20 = vmax.bf16 %v93_v4, %v77_v8  ;;  %v156_v21 = vld [vmem:[%s889_s4 + $0x30] sm:$0xf]  ;;  %v283_v23 = vld [vmem:[%s893_s8 + $0x2c] sm:$0xf] }
  0x29   :  { %v234_v22 = vmax.bf16 %v218_v7, %v202_v11  ;;  %v140_v24 = vmax.bf16 %v124_v9, %v108_v14  ;;  %v157_v25 = vld [vmem:[%s889_s4 + $0x34] sm:$0xf]  ;;  %v188_v26 = vld [vmem:[%s890_s5 + $0x30] sm:$0xf]  ;;  %v371_v28 = vcombine.low %v296_v10, %v297_v16  ;;  %v235_v29 = vmax.bf16 %v219_v12, %v203_v17  ;;  %v46_v31 = vld [vmem:[%s885_s0 + $0x38] sm:$0xf] }
  0x2a   :  { %v189_v27 = vld [vmem:[%s890_s5 + $0x34] sm:$0xf]  ;;  %v141_v30 = vmax.bf16 %v125_v15, %v109_v20  ;;  %v47_v32 = vld [vmem:[%s885_s0 + $0x3c] sm:$0xf]  ;;  %v62_v33 = vld [vmem:[%s886_s1 + $0x38] sm:$0xf] }
  0x2b   :  { %v266_v34 = vmax.bf16 %v250_v13, %v234_v22  ;;  %v172_v35 = vmax.bf16 %v156_v21, %v140_v24  ;;  %v63_v36 = vld [vmem:[%s886_s1 + $0x3c] sm:$0xf]  ;;  %v78_v37 = vmax.bf16 %v62_v33, %v46_v31  ;;  %v94_v38 = vld [vmem:[%s887_s2 + $0x38] sm:$0xf]  ;;  %372 = vst [vmem:[%s894_s9 + $0x20] sm:$0xff] %v371_v28   ;;  %v267_v40 = vmax.bf16 %v251_v18, %v235_v29 }
  0x2c   :  { %v95_v39 = vld [vmem:[%s887_s2 + $0x3c] sm:$0xf]  ;;  %v173_v41 = vmax.bf16 %v157_v25, %v141_v30  ;;  %v220_v42 = vld [vmem:[%s891_s6 + $0x30] sm:$0xf]  ;;  %v79_v43 = vmax.bf16 %v63_v36, %v47_v32  ;;  %v126_v44 = vld [vmem:[%s888_s3 + $0x38] sm:$0xf] }
  0x2d   :  { %v298_v45 = vmax.bf16 %v282_v19, %v266_v34  ;;  %v204_v46 = vmax.bf16 %v188_v26, %v172_v35  ;;  %v221_v47 = vld [vmem:[%s891_s6 + $0x34] sm:$0xf]  ;;  %v110_v48 = vmax.bf16 %v94_v38, %v78_v37  ;;  %v127_v49 = vld [vmem:[%s888_s3 + $0x3c] sm:$0xf]  ;;  %v299_v50 = vmax.bf16 %v283_v23, %v267_v40  ;;  %v252_v52 = vld [vmem:[%s892_s7 + $0x30] sm:$0xf] }
  0x2e   :  { %v205_v51 = vmax.bf16 %v189_v27, %v173_v41  ;;  %v111_v53 = vmax.bf16 %v95_v39, %v79_v43  ;;  %v158_v54 = vld [vmem:[%s889_s4 + $0x38] sm:$0xf]  ;;  %v253_v56 = vld [vmem:[%s892_s7 + $0x34] sm:$0xf]  ;;  %v159_v58 = vld [vmem:[%s889_s4 + $0x3c] sm:$0xf] }
  0x2f   :  { %v236_v55 = vmax.bf16 %v220_v42, %v204_v46  ;;  %v142_v57 = vmax.bf16 %v126_v44, %v110_v48  ;;  %v373_v59 = vcombine.low %v298_v45, %v299_v50  ;;  %v284_v61 = vld [vmem:[%s893_s8 + $0x30] sm:$0xf]  ;;  %v190_v63 = vld [vmem:[%s890_s5 + $0x38] sm:$0xf]  ;;  %v285_v1 = vld [vmem:[%s893_s8 + $0x34] sm:$0xf] }
  0x30   :  { %v237_v60 = vmax.bf16 %v221_v47, %v205_v51  ;;  %v143_v62 = vmax.bf16 %v127_v49, %v111_v53  ;;  %v191_v3 = vld [vmem:[%s890_s5 + $0x3c] sm:$0xf]  ;;  %v222_v6 = vld [vmem:[%s891_s6 + $0x38] sm:$0xf] }
  0x31   :  { %v268_v0 = vmax.bf16 %v252_v52, %v236_v55  ;;  %v174_v2 = vmax.bf16 %v158_v54, %v142_v57  ;;  %374 = vst [vmem:[%s894_s9 + $0x28] sm:$0xff] %v373_v59   ;;  %v223_v9 = vld [vmem:[%s891_s6 + $0x3c] sm:$0xf]  ;;  %v254_v12 = vld [vmem:[%s892_s7 + $0x38] sm:$0xf] }
  0x32   :  { %v269_v4 = vmax.bf16 %v253_v56, %v237_v60  ;;  %v175_v5 = vmax.bf16 %v159_v58, %v143_v62  ;;  %v255_v14 = vld [vmem:[%s892_s7 + $0x3c] sm:$0xf]  ;;  %v286_v17 = vld [vmem:[%s893_s8 + $0x38] sm:$0xf] }
  0x33   :  { %v300_v7 = vmax.bf16 %v284_v61, %v268_v0  ;;  %v206_v8 = vmax.bf16 %v190_v63, %v174_v2  ;;  %v287_v19 = vld [vmem:[%s893_s8 + $0x3c] sm:$0xf] }
  0x34   :  { %v301_v10 = vmax.bf16 %v285_v1, %v269_v4  ;;  %v207_v11 = vmax.bf16 %v191_v3, %v175_v5 }
  0x35   :  { %v238_v13 = vmax.bf16 %v222_v6, %v206_v8 }
  0x36   :  { %v375_v15 = vcombine.low %v300_v7, %v301_v10  ;;  %v239_v16 = vmax.bf16 %v223_v9, %v207_v11 }
  0x37   :  { %v270_v18 = vmax.bf16 %v254_v12, %v238_v13 }
  0x38   :  { %376 = vst [vmem:[%s894_s9 + $0x30] sm:$0xff] %v375_v15   ;;  %v271_v20 = vmax.bf16 %v255_v14, %v239_v16 }
  0x39   :  { %v302_v21 = vmax.bf16 %v286_v17, %v270_v18 }
  0x3a   :  { %v303_v22 = vmax.bf16 %v287_v19, %v271_v20 }
  0x3c   :  { %v377_v23 = vcombine.low %v302_v21, %v303_v22 }
  0x3e   :  { %378 = vst [vmem:[%s894_s9 + $0x38] sm:$0xff] %v377_v23  }

// kernel: forgery_detector_forward.21
= control target key start
LH: loop header
LB: loop body
LE: loop exit
PB: predicated region body
PF: predicated region fallthrough
CT: control target
= control target key end

     0   :  { %s1309_s12 = smov 0   ;;  %s1311_s13 = smov 0   ;;  %s1470_s0 = inlined_call_operand.vmem [shape: bf16[128,1152], index: 0, kind: input, shape index: {}]   ;;  %s1471_s1 = inlined_call_operand.vmem [shape: bf16[1152,128], index: 1, kind: input, shape index: {}]   ;;  %s1472_s2 = inlined_call_operand.vmem [shape: f32[1,128], index: 2, kind: input, shape index: {}]   ;;  %s1473_s3 = inlined_call_operand.vmem [shape: bf16[128,128], index: 3, kind: output, shape index: {}]  }
   0x1   :  { %s1313_s14 = smov 0   ;;  %s1315_s15 = smov 0  }
   0x2   :  { %s1317_s16 = smov 0   ;;  %s1319_s17 = smov 0  }
   0x3   :  { %s1321_s18 = smov 0  }
   0x4 LB: > { %s25_s19 = sadd.s32 1, %s1278_s16  ;;  %s32_s20 = sadd.s32 1, %s1282_s17  ;;  %s1286_s18 = sphi %s1321_s18, %s13_s18   ;;  %s1282_s17 = sphi %s1319_s17, %s1479_s17   ;;  %s1278_s16 = sphi %s1317_s16, %s1478_s16   ;;  %s1274_s15 = sphi %s1315_s15, %s1477_s15   ;;  %s1270_s14 = sphi %s1313_s14, %s1476_s14   ;;  %s1266_s13 = sphi %s1311_s13, %s1475_s13   ;;  %s1262_s12 = sphi %s1309_s12, %s1474_s12  }
   0x5   : > { %p26_p0 = scmp.ge.s32.totalorder %s25_s19, 3  ;;  %p48_p1 = scmp.ne.s32.totalorder %s1266_s13, %s1262_s12 }
   0x6   : > { %p49_p2 = scmp.eq.s32.totalorder %s1286_s18, 0  ;;  %s41_s24 = sadd.s32 1, %s1266_s13 }
   0x7   : > { %s1481_s19 = smov (%p26_p0, %s25_s19), 0  ;;  %s1483_s20 = smov (!%p26_p0, %s32_s20), %s1282_s17 }
   0x8   : > { %p50_p3 = por %p49_p2, %p48_p1  ;;  %p34_p4 = scmp.ge.s32.totalorder %s1483_s20, 2 }
   0x9   : > { %s37_s21 = ssub.s32 %s1278_s16, %s1481_s19  ;;  %p952_p6 = scmp.ge.s32.totalorder %s1286_s18, 6 }
   0xa   : > { %s1485_s20 = smov (%p34_p4, %s1483_s20), 0 }
   0xb   : > { %s36_s22 = ssub.s32 %s1282_s17, %s1485_s20  ;;  %162 = sbr.rel (%p952_p6) target bundleno = 34 (0x22), region = 20 }
   0xc   : > { %s38_s23 = sor.u32 %s37_s21, %s36_s22 }
   0xd   : > { %p39_p5 = scmp.eq.s32.totalorder %s38_s23, 0 }
   0xf   : > { %s1360_s25 = scalar_select %p39_p5, %s1266_s13, %s41_s24  }
  0x10   : > { %165 = sbr.rel (!%p50_p3) target bundleno = 34 (0x22), region = 24  ;;  %s167_s26 = sand.u32 (%p50_p3), 1, %s1266_s13  }
  0x11   : > { %s171_s27 = smul.u32 (%p50_p3), 3, %s1278_s16 }
  0x12   : > { %s1132_s28 = smul.u32 (%p50_p3), 96, %s167_s26 }
  0x13   : > { %s1133_s29 = smul.u32 (%p50_p3), 72, %s1282_s17 }
  0x14   : > { %s169_s8 = scalar_lea.vmem (%p50_p3), [#allocation3], %s1132_s28 }
  0x15   : > { %s173_s30 = sadd.s32 %s1133_s29, %s171_s27 }
  0x16   : > { %s955_s4 = sshll.u32 %s173_s30, 2 }
  0x17   : > { %s1369_s7 = scalar_lea.vmem %s1470_s0, %s955_s4 }
  0x18   : > { %v190_v0 = vld [vmem:[%s1369_s7] sm:$0xff]  ;;  %v194_v2 = vld [vmem:[%s1369_s7 + $0x48] sm:$0xff]  ;;  %v198_v4 = vld [vmem:[%s1369_s7 + $0x90] sm:$0xff] }
  0x19   : > { %v192_v1 = vld [vmem:[%s1369_s7 + $0x24] sm:$0xff]  ;;  %191 = vst [vmem:[%s169_s8] sm:$0xff] %v190_v0  ;;  %195 = vst [vmem:[%s169_s8 + $0x18] sm:$0xff] %v194_v2  ;;  %v196_v3 = vld [vmem:[%s1369_s7 + $0x6c] sm:$0xff] }
  0x1a   : > { %193 = vst [vmem:[%s169_s8 + $0xc] sm:$0xff] %v192_v1  ;;  %v200_v5 = vld [vmem:[%s1369_s7 + $0xb4] sm:$0xff]  ;;  %197 = vst [vmem:[%s169_s8 + $0x24] sm:$0xff] %v196_v3  ;;  %v204_v7 = vld [vmem:[%s1369_s7 + $0xfc] sm:$0xff] }
  0x1b   : > { %199 = vst [vmem:[%s169_s8 + $0x30] sm:$0xff] %v198_v4  ;;  %201 = vst [vmem:[%s169_s8 + $0x3c] sm:$0xff] %v200_v5  ;;  %v202_v6 = vld [vmem:[%s1369_s7 + $0xd8] sm:$0xff]  ;;  %v956_v8 = vld [vmem:[%s1369_s7 + $0x8] sm:$0xf] }
  0x1c   : > { %203 = vst [vmem:[%s169_s8 + $0x48] sm:$0xff] %v202_v6  ;;  %205 = vst [vmem:[%s169_s8 + $0x54] sm:$0xff] %v204_v7  ;;  %v958_v9 = vld [vmem:[%s1369_s7 + $0x2c] sm:$0xf]  ;;  %v960_v10 = vld [vmem:[%s1369_s7 + $0x50] sm:$0xf] }
  0x1d   : > { %957 = vst [vmem:[%s169_s8 + $0x8] sm:$0xf] %v956_v8  ;;  %v962_v11 = vld [vmem:[%s1369_s7 + $0x74] sm:$0xf]  ;;  %959 = vst [vmem:[%s169_s8 + $0x14] sm:$0xf] %v958_v9 }
  0x1e   : > { %961 = vst [vmem:[%s169_s8 + $0x20] sm:$0xf] %v960_v10  ;;  %963 = vst [vmem:[%s169_s8 + $0x2c] sm:$0xf] %v962_v11  ;;  %v964_v12 = vld [vmem:[%s1369_s7 + $0x98] sm:$0xf] }
  0x1f   : > { %v966_v13 = vld [vmem:[%s1369_s7 + $0xbc] sm:$0xf]  ;;  %v968_v14 = vld [vmem:[%s1369_s7 + $0xe0] sm:$0xf]  ;;  %965 = vst [vmem:[%s169_s8 + $0x38] sm:$0xf] %v964_v12 }
  0x20   : > { %967 = vst [vmem:[%s169_s8 + $0x44] sm:$0xf] %v966_v13  ;;  %969 = vst [vmem:[%s169_s8 + $0x50] sm:$0xf] %v968_v14  ;;  %v970_v15 = vld [vmem:[%s1369_s7 + $0x104] sm:$0xf] }
  0x21   : > { %971 = vst [vmem:[%s169_s8 + $0x5c] sm:$0xf] %v970_v15 }
  0x22 PF: > { %p972_p7 = scmp.ge.s32.totalorder %s1286_s18, 1  ;;  %p246_p8 = scmp.lt.s32.totalorder %s1286_s18, 7 }
  0x24   : > { %p247_p9 = pnand %p972_p7, %p246_p8 }
  0x25   : > { %s253_s9 = sand.u32 (!%p247_p9), 1, %s1262_s12   ;;  %s292_s10 = smul.u32 (!%p247_p9), 48, %s1270_s14 }
  0x26   : > { %250 = sbr.rel (%p247_p9) target bundleno = 333 (0x14d), region = 54  ;;  %s974_s21 = sshll.u32 (!%p247_p9), %s1274_s15, 3 }
  0x27   : > { %s1134_s11 = smul.u32 (!%p247_p9), 96, %s253_s9  ;;  %p293_p10 = scmp.lt.s32.totalorder (!%p247_p9), %s292_s10, 143 }
  0x28   : > { %p305_p11 = scmp.lt.s32.totalorder (!%p247_p9), %s974_s21, 15  ;;  %p976_p12 = scmp.ne.s32.totalorder (!%p247_p9), %s1270_s14, 0 }
  0x29   : > { %s1402_s12 = scalar_lea.vmem (!%p247_p9), [#allocation3], %s1134_s11 }
  0x2b   : > { %s1487_s10 = smov (!%p293_p10, %s292_s10), 143  ;;  %s1489_s21 = smov (!%p305_p11, %s974_s21), 15 }
  0x2c   : > { %s973_s22 = sshll.u32 %s1487_s10, 2  ;;  %s975_s27 = sshll.u32 %s1489_s21, 2 }
  0x2d   : > { %s1395_s26 = scalar_lea.vmem %s1471_s1, %s973_s22  ;;  %s1400_s30 = scalar_lea.vmem %s1473_s3, %s975_s27 }
  0x2e   : > { %317 = sbr.rel (%p976_p12) target bundleno = 56 (0x38), region = 62 }
  0x33   : > { %v1288_v16 = vmov 0.0  }
  0x34   : > { %318 = vst [vmem:[#allocation2 + $0x30] sm:$0xff] %v1288_v16  ;;  %319 = vst [vmem:[#allocation2] sm:$0xff] %v1288_v16 }
  0x35   : > { %320 = vst [vmem:[#allocation2 + $0x18] sm:$0xff] %v1288_v16  ;;  %321 = vst [vmem:[#allocation2 + $0x10] sm:$0xff] %v1288_v16 }
  0x36   : > { %322 = vst [vmem:[#allocation2 + $0x8] sm:$0xff] %v1288_v16  ;;  %323 = vst [vmem:[#allocation2 + $0x20] sm:$0xff] %v1288_v16 }
  0x37   : > { %324 = vst [vmem:[#allocation2 + $0x28] sm:$0xff] %v1288_v16  ;;  %325 = vst [vmem:[#allocation2 + $0x38] sm:$0xff] %v1288_v16 }
  0x38 PF: > { %v1192_v17 = vld [vmem:[%s1395_s26 + $0x78] sm:$0xff]   ;;  %v1195_v20 = vld [vmem:[%s1395_s26 + $0x70] sm:$0xff]   ;;  %v1198_v23 = vld [vmem:[%s1395_s26 + $0x68] sm:$0xff]   ;;  %p1013_p13 = scmp.ne.s32.totalorder %s1270_s14, 2 }
  0x39   : > { %v1193_v18 = vld [vmem:[%s1395_s26 + $0x38] sm:$0xff]   ;;  %1056 = vmatprep.subr.bf16.mxu0 %v1192_v17  ;;  %v1196_v21 = vld [vmem:[%s1395_s26 + $0x30] sm:$0xff]   ;;  %v1199_v24 = vld [vmem:[%s1395_s26 + $0x28] sm:$0xff]  }
  0x3a   : > { %v1194_v19 = vld [vmem:[%s1395_s26 + $0xb8] sm:$0xff]   ;;  %1057 = vmatpush3.bf16.msra.mxu0 %v1193_v18  ;;  %v1197_v22 = vld [vmem:[%s1395_s26 + $0xb0] sm:$0xff]   ;;  %v1200_v25 = vld [vmem:[%s1395_s26 + $0xa8] sm:$0xff]  }
  0x3b   : > { %1108 = vmatprep.subr.bf16.mxu1 %v1194_v19  ;;  %1058 = vmatprep.subr.bf16.mxu0 %v1195_v20  ;;  %v1201_v26 = vld [vmem:[%s1395_s26 + $0x60] sm:$0xff]   ;;  %v1204_v29 = vld [vmem:[%s1395_s26 + $0x58] sm:$0xff]   ;;  %v1207_v32 = vld [vmem:[%s1395_s26 + $0x50] sm:$0xff]  }
  0x3c   : > { %1109 = vmatpush3.bf16.msra.mxu1 %v1194_v19  ;;  %v1202_v27 = vld [vmem:[%s1395_s26 + $0x20] sm:$0xff]   ;;  %v1206_v30 = vld [vmem:[%s1395_s26 + $0x98] sm:$0xff]   ;;  %v1209_v33 = vld [vmem:[%s1395_s26 + $0x90] sm:$0xff]  }
  0x3d   : > { %1110 = vmatprep.subr.bf16.mxu1 %v1197_v22  ;;  %v1203_v28 = vld [vmem:[%s1395_s26 + $0xa0] sm:$0xff]   ;;  %v1205_v31 = vld [vmem:[%s1395_s26 + $0x18] sm:$0xff]   ;;  %v1208_v34 = vld [vmem:[%s1395_s26 + $0x10] sm:$0xff]  }
  0x3e   : > { %1059 = vmatpush3.bf16.msra.mxu0 %v1196_v21  ;;  %v1210_v35 = vld [vmem:[%s1395_s26 + $0x48] sm:$0xff]   ;;  %v1213_v38 = vld [vmem:[%s1395_s26 + $0x40] sm:$0xff]   ;;  %v1228_v49 = vld [vmem:[%s1402_s12 + $0x50] ss:$12 sps:$4 sm:$0xff]  }
  0x3f   : > { %1060 = vmatprep.subr.bf16.mxu0 %v1198_v23  ;;  %v1211_v36 = vld [vmem:[%s1395_s26 + $0x8] sm:$0xff]   ;;  %v1215_v39 = vld [vmem:[%s1395_s26 + $0x80] sm:$0xff]   ;;  %v1226_v50 = vld [vmem:[%s1402_s12 + $0x30] ss:$12 sps:$4 sm:$0xff]  }
  0x40   : > { %1111 = vmatpush3.bf16.msra.mxu1 %v1197_v22  ;;  %v1212_v37 = vld [vmem:[%s1395_s26 + $0x88] sm:$0xff]   ;;  %v1218_v40 = vld [vmem:[%s1402_s12 + $0x4] ss:$12 sps:$4 sm:$0xff]   ;;  %v1224_v48 = vld [vmem:[%s1402_s12 + $0x34] ss:$12 sps:$4 sm:$0xff]  }
  0x41   : > { %1112 = vmatprep.subr.bf16.mxu1 %v1200_v25  ;;  %v1219_v41 = vld [vmem:[%s1402_s12 + $0x8] ss:$12 sps:$4 sm:$0xff]   ;;  %v1214_v42 = vld [vmem:[%s1395_s26] sm:$0xff]   ;;  %638 = vmatprep.mubr.bf16.mxu0 %v1218_v40  ;;  %v1229_v51 = vld [vmem:[%s1402_s12 + $0x4c] ss:$12 sps:$4 sm:$0xff]  }
  0x42   : > { %1061 = vmatpush3.bf16.msra.mxu0 %v1199_v24  ;;  %1124 = vmatprep.mubr.bf16.mxu1 %v1219_v41  ;;  %v1216_v43 = vld [vmem:[%s1402_s12] ss:$12 sps:$4 sm:$0xff]   ;;  %v1221_v44 = vld [vmem:[%s1402_s12 + $0x1c] ss:$12 sps:$4 sm:$0xff]   ;;  %v1227_v46 = vld [vmem:[%s1402_s12 + $0x38] ss:$12 sps:$4 sm:$0xff]  }
  0x43   : > { %1062 = vmatprep.subr.bf16.mxu0 %v1201_v26  ;;  %v1220_v45 = vld [vmem:[%s1402_s12 + $0x20] ss:$12 sps:$4 sm:$0xff]   ;;  %v1223_v47 = vld [vmem:[%s1402_s12 + $0x18] ss:$12 sps:$4 sm:$0xff]   ;;  %v1231_v52 = vld [vmem:[%s1402_s12 + $0x48] ss:$12 sps:$4 sm:$0xff]  }
  0x44   : > { %1113 = vmatpush3.bf16.msra.mxu1 %v1200_v25  ;;  %v326_v58 = vld [vmem:[#allocation2 + $0x30] sm:$0xff]  ;;  %v327_v2 = vld [vmem:[#allocation2] sm:$0xff]  ;;  %v328_v9 = vld [vmem:[#allocation2 + $0x18] sm:$0xff] }
  0x45   : > { %1114 = vmatprep.subr.bf16.mxu1 %v1203_v28  ;;  %v329_v16 = vld [vmem:[#allocation2 + $0x10] sm:$0xff]  ;;  %v330_v24 = vld [vmem:[#allocation2 + $0x8] sm:$0xff] }
  0x46   : > { %1063 = vmatpush3.bf16.msra.mxu0 %v1202_v27 }
  0x47   : > { %1064 = vmatprep.subr.bf16.mxu0 %v1204_v29 }
  0x48   : > { %1115 = vmatpush3.bf16.msra.mxu1 %v1203_v28 }
  0x49   : > { %1116 = vmatprep.subr.bf16.mxu1 %v1206_v30 }
  0x4a   : > { %1065 = vmatpush3.bf16.msra.mxu0 %v1205_v31  ;;  %v331_v31 = vld [vmem:[#allocation2 + $0x20] sm:$0xff] }
  0x4b   : > { %1066 = vmatprep.subr.bf16.mxu0 %v1207_v32 }
  0x4c   : > { %1117 = vmatpush3.bf16.msra.mxu1 %v1206_v30 }
  0x4d   : > { %1118 = vmatprep.subr.bf16.mxu1 %v1209_v33 }
  0x4e   : > { %1067 = vmatpush3.bf16.msra.mxu0 %v1208_v34 }
  0x4f   : > { %1068 = vmatprep.subr.bf16.mxu0 %v1210_v35 }
  0x50   : > { %1119 = vmatpush3.bf16.msra.mxu1 %v1209_v33 }
  0x51   : > { %1120 = vmatprep.subr.bf16.mxu1 %v1212_v37 }
  0x52   : > { %1069 = vmatpush3.bf16.msra.mxu0 %v1211_v36  ;;  %v332_v36 = vld [vmem:[#allocation2 + $0x28] sm:$0xff] }
  0x53   : > { %1070 = vmatprep.subr.bf16.mxu0 %v1213_v38 }
  0x54   : > { %1121 = vmatpush3.bf16.msra.mxu1 %v1212_v37 }
  0x55   : > { %1122 = vmatprep.subr.bf16.mxu1 %v1215_v39 }
  0x56   : > { %1071 = vmatpush3.bf16.msra.mxu0 %v1214_v42  ;;  %v333_v42 = vld [vmem:[#allocation2 + $0x38] sm:$0xff] }
  0x58   : > { %1123 = vmatpush3.bf16.msra.mxu1 %v1215_v39 }
  0x59   : > { %639 = vmatmul.mubr.bf16.vlgmr.msra.gmra.mxu0 %v1216_v43 }
  0x5a   : > { %646 = vmatprep.mubr.bf16.mxu0 %v1221_v44 }
  0x5b   : > { %1125 = vmatmul.mubr.bf16.vlgmr.msra.gmra.mxu1 %v1220_v45 }
  0x5c   : > { %1128 = vmatprep.mubr.bf16.mxu1 %v1227_v46 }
  0x61   : > { %647 = vmatmul.mubr.bf16.gmra.mxu0 %v1223_v47 }
  0x62   : > { %654 = vmatprep.mubr.bf16.mxu0 %v1224_v48 }
  0x63   : > { %1129 = vmatmul.mubr.bf16.gmra.mxu1 %v1228_v49 }
  0x69   : > { %655 = vmatmul.mubr.bf16.gmra.mxu0 %v1226_v50 }
  0x6a   : > { %662 = vmatprep.mubr.bf16.mxu0 %v1229_v51 }
  0x71   : > { %663 = vmatmul.mubr.bf16.gmra.mxu0 %v1231_v52 }
 0x119   : > { %v1072_v53 = vpop.f32.mrf.mxu0 }
 0x11b   : > { %v1073_v54 = vpop.f32.mrf.mxu0  ;;  %v1126_v55 = vpop.f32.mrf.mxu1 }
 0x11c   : > { %v1074_v56 = vadd.f32 %v1073_v54, %v1072_v53 }
 0x11d   : > { %v1075_v57 = vpop.f32.mrf.mxu0  ;;  %v705_v59 = vpop.f32.mrf.mxu1 }
 0x11e   : > { %v706_v60 = vadd.f32 %v1074_v56, %v705_v59 }
 0x11f   : > { %v1076_v61 = vpop.f32.mrf.mxu0  ;;  %v1127_v62 = vpop.f32.mrf.mxu1 }
 0x120   : > { %v736_v63 = vadd.f32 %v706_v60, %v326_v58  ;;  %v1077_v0 = vadd.f32 %v1076_v61, %v1075_v57 }
 0x121   : > { %v1078_v1 = vpop.f32.mrf.mxu0  ;;  %v708_v3 = vpop.f32.mrf.mxu1 }
 0x122   : > { %744 = vst [vmem:[#allocation2 + $0x30] sm:$0xff] %v736_v63  ;;  %v709_v4 = vadd.f32 %v1077_v0, %v708_v3 }
 0x123   : > { %v1079_v5 = vpop.f32.mrf.mxu0  ;;  %v1130_v6 = vpop.f32.mrf.mxu1 }
 0x124   : > { %v737_v7 = vadd.f32 %v709_v4, %v327_v2  ;;  %v1080_v8 = vadd.f32 %v1079_v5, %v1078_v1 }
 0x125   : > { %v1081_v10 = vpop.f32.mrf.mxu0  ;;  %v721_v13 = vpop.f32.mrf.mxu1 }
 0x126   : > { %745 = vst [vmem:[#allocation2] sm:$0xff] %v737_v7  ;;  %v714_v11 = vadd.f32 %v1126_v55, %v1080_v8 }
 0x127   : > { %v1082_v12 = vpop.f32.mrf.mxu0  ;;  %v1131_v20 = vpop.f32.mrf.mxu1 }
 0x128   : > { %v738_v14 = vadd.f32 %v714_v11, %v328_v9  ;;  %v1083_v15 = vadd.f32 %v1082_v12, %v1081_v10 }
 0x129   : > { %v1084_v17 = vpop.f32.mrf.mxu0  ;;  %v724_v27 = vpop.f32.mrf.mxu1 }
 0x12a   : > { %746 = vst [vmem:[#allocation2 + $0x18] sm:$0xff] %v738_v14  ;;  %v717_v18 = vadd.f32 %v1127_v62, %v1083_v15 }
 0x12b   : > { %v1085_v19 = vpop.f32.mrf.mxu0 }
 0x12c   : > { %v739_v21 = vadd.f32 %v717_v18, %v329_v16  ;;  %v1086_v22 = vadd.f32 %v1085_v19, %v1084_v17 }
 0x12d   : > { %v1087_v23 = vpop.f32.mrf.mxu0 }
 0x12e   : > { %747 = vst [vmem:[#allocation2 + $0x10] sm:$0xff] %v739_v21  ;;  %v722_v25 = vadd.f32 %v1086_v22, %v721_v13 }
 0x12f   : > { %v1088_v26 = vpop.f32.mrf.mxu0 }
 0x130   : > { %v740_v28 = vadd.f32 %v722_v25, %v330_v24  ;;  %v1089_v29 = vadd.f32 %v1088_v26, %v1087_v23 }
 0x131   : > { %v1090_v30 = vpop.f32.mrf.mxu0 }
 0x132   : > { %748 = vst [vmem:[#allocation2 + $0x8] sm:$0xff] %v740_v28  ;;  %v725_v32 = vadd.f32 %v1089_v29, %v724_v27 }
 0x133   : > { %v1091_v33 = vpop.f32.mrf.mxu0 }
 0x134   : > { %v741_v34 = vadd.f32 %v725_v32, %v331_v31  ;;  %v1092_v35 = vadd.f32 %v1091_v33, %v1090_v30 }
 0x135   : > { %v1093_v37 = vpop.f32.mrf.mxu0 }
 0x136   : > { %749 = vst [vmem:[#allocation2 + $0x20] sm:$0xff] %v741_v34  ;;  %v730_v38 = vadd.f32 %v1130_v6, %v1092_v35 }
 0x137   : > { %v1094_v39 = vpop.f32.mrf.mxu0 }
 0x138   : > { %v742_v40 = vadd.f32 %v730_v38, %v332_v36  ;;  %v1095_v41 = vadd.f32 %v1094_v39, %v1093_v37 }
 0x13a   : > { %750 = vst [vmem:[#allocation2 + $0x28] sm:$0xff] %v742_v40  ;;  %v733_v43 = vadd.f32 %v1131_v20, %v1095_v41  ;;  %755 = sbr.rel (%p1013_p13) target bundleno = 333 (0x14d), region = 66 }
 0x13c   : > { %v743_v44 = vadd.f32 %v733_v43, %v333_v42 }
 0x13e   : > { %751 = vst [vmem:[#allocation2 + $0x38] sm:$0xff] %v743_v44 }
 0x13f   : > { %v756_v45 = vld [vmem:[#allocation2 + $0x30] sm:$0xff]  ;;  %v757_v46 = vld [vmem:[#allocation2] sm:$0xff]  ;;  %v758_v50 = vld [vmem:[#allocation2 + $0x18] sm:$0xff] }
 0x140   : > { %v1014_v47 = vld [vmem:[%s1472_s2] ss:$0 sm:$0xff]  ;;  %v759_v51 = vld [vmem:[#allocation2 + $0x10] sm:$0xff]  ;;  %v760_v52 = vld [vmem:[#allocation2 + $0x8] sm:$0xff] }
 0x141   : > { %v771_v48 = vadd.f32 %v1014_v47, %v756_v45  ;;  %v772_v49 = vadd.f32 %v1014_v47, %v757_v46  ;;  %v773_v53 = vadd.f32 %v1014_v47, %v758_v50  ;;  %v774_v54 = vadd.f32 %v1014_v47, %v759_v51  ;;  %v761_v55 = vld [vmem:[#allocation2 + $0x20] sm:$0xff]  ;;  %v762_v57 = vld [vmem:[#allocation2 + $0x28] sm:$0xff] }
 0x142   : > { %v775_v56 = vadd.f32 %v1014_v47, %v760_v52  ;;  %v776_v61 = vadd.f32 %v1014_v47, %v761_v55  ;;  %v777_v62 = vadd.f32 %v1014_v47, %v762_v57 }
 0x143   : > { %v779_v59 = vmax.f32 %v771_v48, 0.0  ;;  %v780_v60 = vmax.f32 %v772_v49, 0.0  ;;  %v781_v63 = vmax.f32 %v773_v53, 0.0  ;;  %v782_v0 = vmax.f32 %v774_v54, 0.0 }
 0x144   : > { %v783_v1 = vmax.f32 %v775_v56, 0.0  ;;  %v784_v4 = vmax.f32 %v776_v61, 0.0  ;;  %v785_v5 = vmax.f32 %v777_v62, 0.0 }
 0x145   : > { %v763_v58 = vld [vmem:[#allocation2 + $0x38] sm:$0xff]  ;;  %v1036_v3 = vpack.c.bf16 %v780_v60, %v779_v59  ;;  %v1041_v6 = vpack.c.bf16 %v782_v0, %v781_v63 }
 0x146   : > { %v778_v2 = vadd.f32 %v1014_v47, %v763_v58  ;;  %v1046_v8 = vpack.c.bf16 %v784_v4, %v783_v1 }
 0x147   : > { %1037 = vst [vmem:[%s1400_s30] sm:$0xff] %v1036_v3   ;;  %1053 = vst [vmem:[%s1400_s30 + $0x8] sm:$0xff] %v1041_v6  }
 0x148   : > { %v786_v7 = vmax.f32 %v778_v2, 0.0  ;;  %1054 = vst [vmem:[%s1400_s30 + $0x10] sm:$0xff] %v1046_v8  }
 0x14a   : > { %v1051_v9 = vpack.c.bf16 %v786_v7, %v785_v5 }
 0x14c   : > { %1055 = vst [vmem:[%s1400_s30 + $0x18] sm:$0xff] %v1051_v9  }
 0x14d PF: > { %s13_s18 = sadd.s32 1, %s1286_s18   ;;  %s1474_s12 = smov %s1266_s13 }
 0x14e   : > { %p10_p0 = scmp.ge.s32.totalorder %s13_s18, 8   ;;  %s1475_s13 = smov %s1360_s25 }
 0x14f   : > { %s1476_s14 = smov %s1278_s16  ;;  %s1477_s15 = smov %s1282_s17 }
 0x150   : > { %s1478_s16 = smov %s1481_s19  ;;  %s1479_s17 = smov %s1485_s20 }
 0x151   :  { %12 = sbr.rel (!%p10_p0) target bundleno = 4 (0x4), region = 113 }

// kernel: forgery_detector_forward.22
= control target key start
LH: loop header
LB: loop body
LE: loop exit
PB: predicated region body
PF: predicated region fallthrough
CT: control target
= control target key end

     0   :  { %s1434_s15 = smov 0   ;;  %s1436_s16 = smov 0   ;;  %s1604_s0 = inlined_call_operand.vmem [shape: bf16[128,1152], index: 0, kind: input, shape index: {}]   ;;  %s1605_s1 = inlined_call_operand.vmem [shape: bf16[1152,128], index: 1, kind: input, shape index: {}]   ;;  %s1606_s2 = inlined_call_operand.vmem [shape: f32[1,128], index: 2, kind: input, shape index: {}]   ;;  %s1607_s3 = inlined_call_operand.vmem [shape: bf16[128,128], index: 3, kind: input, shape index: {}]   ;;  %s1608_s4 = inlined_call_operand.vmem [shape: bf16[128,128], index: 4, kind: output, shape index: {}]  }
   0x1   :  { %s1438_s17 = smov 0   ;;  %s1440_s18 = smov 0  }
   0x2   :  { %s1442_s19 = smov 0   ;;  %s1444_s20 = smov 0  }
   0x3   :  { %s1446_s21 = smov 0  }
   0x4 LB: > { %s26_s22 = sadd.s32 1, %s1398_s19  ;;  %s33_s23 = sadd.s32 1, %s1402_s20  ;;  %s1406_s21 = sphi %s1446_s21, %s14_s21   ;;  %s1402_s20 = sphi %s1444_s20, %s1614_s20   ;;  %s1398_s19 = sphi %s1442_s19, %s1613_s19   ;;  %s1394_s18 = sphi %s1440_s18, %s1612_s18   ;;  %s1390_s17 = sphi %s1438_s17, %s1611_s17   ;;  %s1386_s16 = sphi %s1436_s16, %s1610_s16   ;;  %s1382_s15 = sphi %s1434_s15, %s1609_s15  }
   0x5   : > { %p27_p0 = scmp.ge.s32.totalorder %s26_s22, 3  ;;  %p49_p1 = scmp.ne.s32.totalorder %s1386_s16, %s1382_s15 }
   0x6   : > { %p50_p2 = scmp.eq.s32.totalorder %s1406_s21, 0  ;;  %s42_s27 = sadd.s32 1, %s1386_s16 }
   0x7   : > { %s1616_s22 = smov (%p27_p0, %s26_s22), 0  ;;  %s1618_s23 = smov (!%p27_p0, %s33_s23), %s1402_s20 }
   0x8   : > { %p51_p3 = por %p50_p2, %p49_p1  ;;  %p35_p4 = scmp.ge.s32.totalorder %s1618_s23, 2 }
   0x9   : > { %s38_s24 = ssub.s32 %s1398_s19, %s1616_s22  ;;  %p1051_p6 = scmp.ge.s32.totalorder %s1406_s21, 6 }
   0xa   : > { %s1620_s23 = smov (%p35_p4, %s1618_s23), 0 }
   0xb   : > { %s37_s25 = ssub.s32 %s1402_s20, %s1620_s23  ;;  %191 = sbr.rel (%p1051_p6) target bundleno = 34 (0x22), region = 20 }
   0xc   : > { %s39_s26 = sor.u32 %s38_s24, %s37_s25 }
   0xd   : > { %p40_p5 = scmp.eq.s32.totalorder %s39_s26, 0 }
   0xf   : > { %s1485_s28 = scalar_select %p40_p5, %s1386_s16, %s42_s27  }
  0x10   : > { %194 = sbr.rel (!%p51_p3) target bundleno = 34 (0x22), region = 24  ;;  %s196_s29 = sand.u32 (%p51_p3), 1, %s1386_s16  }
  0x11   : > { %s200_s30 = smul.u32 (%p51_p3), 3, %s1398_s19 }
  0x12   : > { %s1252_s5 = smul.u32 (%p51_p3), 96, %s196_s29 }
  0x13   : > { %s1253_s6 = smul.u32 (%p51_p3), 72, %s1402_s20 }
  0x14   : > { %s198_s12 = scalar_lea.vmem (%p51_p3), [#allocation3], %s1252_s5 }
  0x15   : > { %s202_s7 = sadd.s32 %s1253_s6, %s200_s30 }
  0x16   : > { %s1054_s8 = sshll.u32 %s202_s7, 2 }
  0x17   : > { %s1494_s11 = scalar_lea.vmem %s1604_s0, %s1054_s8 }
  0x18   : > { %v219_v0 = vld [vmem:[%s1494_s11] sm:$0xff]  ;;  %v223_v2 = vld [vmem:[%s1494_s11 + $0x48] sm:$0xff]  ;;  %v227_v4 = vld [vmem:[%s1494_s11 + $0x90] sm:$0xff] }
  0x19   : > { %v221_v1 = vld [vmem:[%s1494_s11 + $0x24] sm:$0xff]  ;;  %220 = vst [vmem:[%s198_s12] sm:$0xff] %v219_v0  ;;  %224 = vst [vmem:[%s198_s12 + $0x18] sm:$0xff] %v223_v2  ;;  %v225_v3 = vld [vmem:[%s1494_s11 + $0x6c] sm:$0xff] }
  0x1a   : > { %222 = vst [vmem:[%s198_s12 + $0xc] sm:$0xff] %v221_v1  ;;  %v229_v5 = vld [vmem:[%s1494_s11 + $0xb4] sm:$0xff]  ;;  %226 = vst [vmem:[%s198_s12 + $0x24] sm:$0xff] %v225_v3  ;;  %v233_v7 = vld [vmem:[%s1494_s11 + $0xfc] sm:$0xff] }
  0x1b   : > { %228 = vst [vmem:[%s198_s12 + $0x30] sm:$0xff] %v227_v4  ;;  %230 = vst [vmem:[%s198_s12 + $0x3c] sm:$0xff] %v229_v5  ;;  %v231_v6 = vld [vmem:[%s1494_s11 + $0xd8] sm:$0xff]  ;;  %v1055_v8 = vld [vmem:[%s1494_s11 + $0x8] sm:$0xf] }
  0x1c   : > { %232 = vst [vmem:[%s198_s12 + $0x48] sm:$0xff] %v231_v6  ;;  %234 = vst [vmem:[%s198_s12 + $0x54] sm:$0xff] %v233_v7  ;;  %v1057_v9 = vld [vmem:[%s1494_s11 + $0x2c] sm:$0xf]  ;;  %v1059_v10 = vld [vmem:[%s1494_s11 + $0x50] sm:$0xf] }
  0x1d   : > { %1056 = vst [vmem:[%s198_s12 + $0x8] sm:$0xf] %v1055_v8  ;;  %v1061_v11 = vld [vmem:[%s1494_s11 + $0x74] sm:$0xf]  ;;  %1058 = vst [vmem:[%s198_s12 + $0x14] sm:$0xf] %v1057_v9 }
  0x1e   : > { %1060 = vst [vmem:[%s198_s12 + $0x20] sm:$0xf] %v1059_v10  ;;  %1062 = vst [vmem:[%s198_s12 + $0x2c] sm:$0xf] %v1061_v11  ;;  %v1063_v12 = vld [vmem:[%s1494_s11 + $0x98] sm:$0xf] }
  0x1f   : > { %v1065_v13 = vld [vmem:[%s1494_s11 + $0xbc] sm:$0xf]  ;;  %v1067_v14 = vld [vmem:[%s1494_s11 + $0xe0] sm:$0xf]  ;;  %1064 = vst [vmem:[%s198_s12 + $0x38] sm:$0xf] %v1063_v12 }
  0x20   : > { %1066 = vst [vmem:[%s198_s12 + $0x44] sm:$0xf] %v1065_v13  ;;  %1068 = vst [vmem:[%s198_s12 + $0x50] sm:$0xf] %v1067_v14  ;;  %v1069_v15 = vld [vmem:[%s1494_s11 + $0x104] sm:$0xf] }
  0x21   : > { %1070 = vst [vmem:[%s198_s12 + $0x5c] sm:$0xf] %v1069_v15 }
  0x22 PF: > { %p1071_p7 = scmp.ge.s32.totalorder %s1406_s21, 1  ;;  %p287_p8 = scmp.lt.s32.totalorder %s1406_s21, 7 }
  0x24   : > { %p288_p9 = pnand %p1071_p7, %p287_p8 }
  0x25   : > { %s294_s13 = sand.u32 (!%p288_p9), 1, %s1382_s15   ;;  %s343_s14 = smul.u32 (!%p288_p9), 48, %s1390_s17 }
  0x26   : > { %291 = sbr.rel (%p288_p9) target bundleno = 336 (0x150), region = 58  ;;  %s1073_s25 = sshll.u32 (!%p288_p9), %s1394_s18, 3 }
  0x27   : > { %s1254_s24 = smul.u32 (!%p288_p9), 96, %s294_s13  ;;  %p344_p10 = scmp.lt.s32.totalorder (!%p288_p9), %s343_s14, 143 }
  0x28   : > { %p356_p11 = scmp.lt.s32.totalorder (!%p288_p9), %s1073_s25, 15  ;;  %p1077_p12 = scmp.ne.s32.totalorder (!%p288_p9), %s1390_s17, 0 }
  0x29   : > { %s1532_s10 = scalar_lea.vmem (!%p288_p9), [#allocation3], %s1254_s24 }
  0x2b   : > { %s1622_s14 = smov (!%p344_p10, %s343_s14), 143  ;;  %s1624_s25 = smov (!%p356_p11, %s1073_s25), 15 }
  0x2c   : > { %s1072_s26 = sshll.u32 %s1622_s14, 2  ;;  %s1074_s5 = sshll.u32 %s1624_s25, 2 }
  0x2d   : > { %s1520_s30 = scalar_lea.vmem %s1605_s1, %s1072_s26  ;;  %s1525_s8 = scalar_lea.vmem %s1607_s3, %s1074_s5 }
  0x2e   : > { %s1530_s18 = scalar_lea.vmem %s1608_s4, %s1074_s5  ;;  %377 = sbr.rel (%p1077_p12) target bundleno = 56 (0x38), region = 66 }
  0x33   : > { %v1408_v16 = vmov 0.0  }
  0x34   : > { %378 = vst [vmem:[#allocation2 + $0x30] sm:$0xff] %v1408_v16  ;;  %379 = vst [vmem:[#allocation2] sm:$0xff] %v1408_v16 }
  0x35   : > { %380 = vst [vmem:[#allocation2 + $0x18] sm:$0xff] %v1408_v16  ;;  %381 = vst [vmem:[#allocation2 + $0x10] sm:$0xff] %v1408_v16 }
  0x36   : > { %382 = vst [vmem:[#allocation2 + $0x8] sm:$0xff] %v1408_v16  ;;  %383 = vst [vmem:[#allocation2 + $0x20] sm:$0xff] %v1408_v16 }
  0x37   : > { %384 = vst [vmem:[#allocation2 + $0x28] sm:$0xff] %v1408_v16  ;;  %385 = vst [vmem:[#allocation2 + $0x38] sm:$0xff] %v1408_v16 }
  0x38 PF: > { %v1312_v17 = vld [vmem:[%s1520_s30 + $0x78] sm:$0xff]   ;;  %v1315_v20 = vld [vmem:[%s1520_s30 + $0x70] sm:$0xff]   ;;  %v1318_v23 = vld [vmem:[%s1520_s30 + $0x68] sm:$0xff]   ;;  %p1114_p13 = scmp.ne.s32.totalorder %s1390_s17, 2 }
  0x39   : > { %v1313_v18 = vld [vmem:[%s1520_s30 + $0x38] sm:$0xff]   ;;  %1176 = vmatprep.subr.bf16.mxu0 %v1312_v17  ;;  %v1316_v21 = vld [vmem:[%s1520_s30 + $0x30] sm:$0xff]   ;;  %v1319_v24 = vld [vmem:[%s1520_s30 + $0x28] sm:$0xff]  }
  0x3a   : > { %v1314_v19 = vld [vmem:[%s1520_s30 + $0xb8] sm:$0xff]   ;;  %1177 = vmatpush3.bf16.msra.mxu0 %v1313_v18  ;;  %v1317_v22 = vld [vmem:[%s1520_s30 + $0xb0] sm:$0xff]   ;;  %v1320_v25 = vld [vmem:[%s1520_s30 + $0xa8] sm:$0xff]  }
  0x3b   : > { %1228 = vmatprep.subr.bf16.mxu1 %v1314_v19  ;;  %1178 = vmatprep.subr.bf16.mxu0 %v1315_v20  ;;  %v1321_v26 = vld [vmem:[%s1520_s30 + $0x60] sm:$0xff]   ;;  %v1324_v29 = vld [vmem:[%s1520_s30 + $0x58] sm:$0xff]   ;;  %v1327_v32 = vld [vmem:[%s1520_s30 + $0x50] sm:$0xff]  }
  0x3c   : > { %1229 = vmatpush3.bf16.msra.mxu1 %v1314_v19  ;;  %v1322_v27 = vld [vmem:[%s1520_s30 + $0x20] sm:$0xff]   ;;  %v1326_v30 = vld [vmem:[%s1520_s30 + $0x98] sm:$0xff]   ;;  %v1329_v33 = vld [vmem:[%s1520_s30 + $0x90] sm:$0xff]  }
  0x3d   : > { %1230 = vmatprep.subr.bf16.mxu1 %v1317_v22  ;;  %v1323_v28 = vld [vmem:[%s1520_s30 + $0xa0] sm:$0xff]   ;;  %v1325_v31 = vld [vmem:[%s1520_s30 + $0x18] sm:$0xff]   ;;  %v1328_v34 = vld [vmem:[%s1520_s30 + $0x10] sm:$0xff]  }
  0x3e   : > { %1179 = vmatpush3.bf16.msra.mxu0 %v1316_v21  ;;  %v1330_v35 = vld [vmem:[%s1520_s30 + $0x48] sm:$0xff]   ;;  %v1333_v38 = vld [vmem:[%s1520_s30 + $0x40] sm:$0xff]   ;;  %v1348_v49 = vld [vmem:[%s1532_s10 + $0x50] ss:$12 sps:$4 sm:$0xff]  }
  0x3f   : > { %1180 = vmatprep.subr.bf16.mxu0 %v1318_v23  ;;  %v1331_v36 = vld [vmem:[%s1520_s30 + $0x8] sm:$0xff]   ;;  %v1335_v39 = vld [vmem:[%s1520_s30 + $0x80] sm:$0xff]   ;;  %v1346_v50 = vld [vmem:[%s1532_s10 + $0x30] ss:$12 sps:$4 sm:$0xff]  }
  0x40   : > { %1231 = vmatpush3.bf16.msra.mxu1 %v1317_v22  ;;  %v1332_v37 = vld [vmem:[%s1520_s30 + $0x88] sm:$0xff]   ;;  %v1338_v40 = vld [vmem:[%s1532_s10 + $0x4] ss:$12 sps:$4 sm:$0xff]   ;;  %v1344_v48 = vld [vmem:[%s1532_s10 + $0x34] ss:$12 sps:$4 sm:$0xff]  }
  0x41   : > { %1232 = vmatprep.subr.bf16.mxu1 %v1320_v25  ;;  %v1339_v41 = vld [vmem:[%s1532_s10 + $0x8] ss:$12 sps:$4 sm:$0xff]   ;;  %v1334_v42 = vld [vmem:[%s1520_s30] sm:$0xff]   ;;  %698 = vmatprep.mubr.bf16.mxu0 %v1338_v40  ;;  %v1349_v51 = vld [vmem:[%s1532_s10 + $0x4c] ss:$12 sps:$4 sm:$0xff]  }
  0x42   : > { %1181 = vmatpush3.bf16.msra.mxu0 %v1319_v24  ;;  %1244 = vmatprep.mubr.bf16.mxu1 %v1339_v41  ;;  %v1336_v43 = vld [vmem:[%s1532_s10] ss:$12 sps:$4 sm:$0xff]   ;;  %v1341_v44 = vld [vmem:[%s1532_s10 + $0x1c] ss:$12 sps:$4 sm:$0xff]   ;;  %v1347_v46 = vld [vmem:[%s1532_s10 + $0x38] ss:$12 sps:$4 sm:$0xff]  }
  0x43   : > { %1182 = vmatprep.subr.bf16.mxu0 %v1321_v26  ;;  %v1340_v45 = vld [vmem:[%s1532_s10 + $0x20] ss:$12 sps:$4 sm:$0xff]   ;;  %v1343_v47 = vld [vmem:[%s1532_s10 + $0x18] ss:$12 sps:$4 sm:$0xff]   ;;  %v1351_v52 = vld [vmem:[%s1532_s10 + $0x48] ss:$12 sps:$4 sm:$0xff]  }
  0x44   : > { %1233 = vmatpush3.bf16.msra.mxu1 %v1320_v25  ;;  %v386_v58 = vld [vmem:[#allocation2 + $0x30] sm:$0xff]  ;;  %v387_v2 = vld [vmem:[#allocation2] sm:$0xff]  ;;  %v388_v9 = vld [vmem:[#allocation2 + $0x18] sm:$0xff] }
  0x45   : > { %1234 = vmatprep.subr.bf16.mxu1 %v1323_v28  ;;  %v389_v16 = vld [vmem:[#allocation2 + $0x10] sm:$0xff]  ;;  %v390_v24 = vld [vmem:[#allocation2 + $0x8] sm:$0xff] }
  0x46   : > { %1183 = vmatpush3.bf16.msra.mxu0 %v1322_v27 }
  0x47   : > { %1184 = vmatprep.subr.bf16.mxu0 %v1324_v29 }
  0x48   : > { %1235 = vmatpush3.bf16.msra.mxu1 %v1323_v28 }
  0x49   : > { %1236 = vmatprep.subr.bf16.mxu1 %v1326_v30 }
  0x4a   : > { %1185 = vmatpush3.bf16.msra.mxu0 %v1325_v31  ;;  %v391_v31 = vld [vmem:[#allocation2 + $0x20] sm:$0xff] }
  0x4b   : > { %1186 = vmatprep.subr.bf16.mxu0 %v1327_v32 }
  0x4c   : > { %1237 = vmatpush3.bf16.msra.mxu1 %v1326_v30 }
  0x4d   : > { %1238 = vmatprep.subr.bf16.mxu1 %v1329_v33 }
  0x4e   : > { %1187 = vmatpush3.bf16.msra.mxu0 %v1328_v34 }
  0x4f   : > { %1188 = vmatprep.subr.bf16.mxu0 %v1330_v35 }
  0x50   : > { %1239 = vmatpush3.bf16.msra.mxu1 %v1329_v33 }
  0x51   : > { %1240 = vmatprep.subr.bf16.mxu1 %v1332_v37 }
  0x52   : > { %1189 = vmatpush3.bf16.msra.mxu0 %v1331_v36  ;;  %v392_v36 = vld [vmem:[#allocation2 + $0x28] sm:$0xff] }
  0x53   : > { %1190 = vmatprep.subr.bf16.mxu0 %v1333_v38 }
  0x54   : > { %1241 = vmatpush3.bf16.msra.mxu1 %v1332_v37 }
  0x55   : > { %1242 = vmatprep.subr.bf16.mxu1 %v1335_v39 }
  0x56   : > { %1191 = vmatpush3.bf16.msra.mxu0 %v1334_v42  ;;  %v393_v42 = vld [vmem:[#allocation2 + $0x38] sm:$0xff] }
  0x58   : > { %1243 = vmatpush3.bf16.msra.mxu1 %v1335_v39 }
  0x59   : > { %699 = vmatmul.mubr.bf16.vlgmr.msra.gmra.mxu0 %v1336_v43 }
  0x5a   : > { %706 = vmatprep.mubr.bf16.mxu0 %v1341_v44 }
  0x5b   : > { %1245 = vmatmul.mubr.bf16.vlgmr.msra.gmra.mxu1 %v1340_v45 }
  0x5c   : > { %1248 = vmatprep.mubr.bf16.mxu1 %v1347_v46 }
  0x61   : > { %707 = vmatmul.mubr.bf16.gmra.mxu0 %v1343_v47 }
  0x62   : > { %714 = vmatprep.mubr.bf16.mxu0 %v1344_v48 }
  0x63   : > { %1249 = vmatmul.mubr.bf16.gmra.mxu1 %v1348_v49 }
  0x69   : > { %715 = vmatmul.mubr.bf16.gmra.mxu0 %v1346_v50 }
  0x6a   : > { %722 = vmatprep.mubr.bf16.mxu0 %v1349_v51 }
  0x71   : > { %723 = vmatmul.mubr.bf16.gmra.mxu0 %v1351_v52 }
 0x119   : > { %v1192_v53 = vpop.f32.mrf.mxu0 }
 0x11b   : > { %v1193_v54 = vpop.f32.mrf.mxu0  ;;  %v1246_v55 = vpop.f32.mrf.mxu1 }
 0x11c   : > { %v1194_v56 = vadd.f32 %v1193_v54, %v1192_v53 }
 0x11d   : > { %v1195_v57 = vpop.f32.mrf.mxu0  ;;  %v765_v59 = vpop.f32.mrf.mxu1 }
 0x11e   : > { %v766_v60 = vadd.f32 %v1194_v56, %v765_v59 }
 0x11f   : > { %v1196_v61 = vpop.f32.mrf.mxu0  ;;  %v1247_v62 = vpop.f32.mrf.mxu1 }
 0x120   : > { %v796_v63 = vadd.f32 %v766_v60, %v386_v58  ;;  %v1197_v0 = vadd.f32 %v1196_v61, %v1195_v57 }
 0x121   : > { %v1198_v1 = vpop.f32.mrf.mxu0  ;;  %v768_v3 = vpop.f32.mrf.mxu1 }
 0x122   : > { %804 = vst [vmem:[#allocation2 + $0x30] sm:$0xff] %v796_v63  ;;  %v769_v4 = vadd.f32 %v1197_v0, %v768_v3 }
 0x123   : > { %v1199_v5 = vpop.f32.mrf.mxu0  ;;  %v1250_v6 = vpop.f32.mrf.mxu1 }
 0x124   : > { %v797_v7 = vadd.f32 %v769_v4, %v387_v2  ;;  %v1200_v8 = vadd.f32 %v1199_v5, %v1198_v1 }
 0x125   : > { %v1201_v10 = vpop.f32.mrf.mxu0  ;;  %v781_v13 = vpop.f32.mrf.mxu1 }
 0x126   : > { %805 = vst [vmem:[#allocation2] sm:$0xff] %v797_v7  ;;  %v774_v11 = vadd.f32 %v1246_v55, %v1200_v8 }
 0x127   : > { %v1202_v12 = vpop.f32.mrf.mxu0  ;;  %v1251_v20 = vpop.f32.mrf.mxu1 }
 0x128   : > { %v798_v14 = vadd.f32 %v774_v11, %v388_v9  ;;  %v1203_v15 = vadd.f32 %v1202_v12, %v1201_v10 }
 0x129   : > { %v1204_v17 = vpop.f32.mrf.mxu0  ;;  %v784_v27 = vpop.f32.mrf.mxu1 }
 0x12a   : > { %806 = vst [vmem:[#allocation2 + $0x18] sm:$0xff] %v798_v14  ;;  %v777_v18 = vadd.f32 %v1247_v62, %v1203_v15 }
 0x12b   : > { %v1205_v19 = vpop.f32.mrf.mxu0 }
 0x12c   : > { %v799_v21 = vadd.f32 %v777_v18, %v389_v16  ;;  %v1206_v22 = vadd.f32 %v1205_v19, %v1204_v17 }
 0x12d   : > { %v1207_v23 = vpop.f32.mrf.mxu0 }
 0x12e   : > { %807 = vst [vmem:[#allocation2 + $0x10] sm:$0xff] %v799_v21  ;;  %v782_v25 = vadd.f32 %v1206_v22, %v781_v13 }
 0x12f   : > { %v1208_v26 = vpop.f32.mrf.mxu0 }
 0x130   : > { %v800_v28 = vadd.f32 %v782_v25, %v390_v24  ;;  %v1209_v29 = vadd.f32 %v1208_v26, %v1207_v23 }
 0x131   : > { %v1210_v30 = vpop.f32.mrf.mxu0 }
 0x132   : > { %808 = vst [vmem:[#allocation2 + $0x8] sm:$0xff] %v800_v28  ;;  %v785_v32 = vadd.f32 %v1209_v29, %v784_v27 }
 0x133   : > { %v1211_v33 = vpop.f32.mrf.mxu0 }
 0x134   : > { %v801_v34 = vadd.f32 %v785_v32, %v391_v31  ;;  %v1212_v35 = vadd.f32 %v1211_v33, %v1210_v30 }
 0x135   : > { %v1213_v37 = vpop.f32.mrf.mxu0 }
 0x136   : > { %809 = vst [vmem:[#allocation2 + $0x20] sm:$0xff] %v801_v34  ;;  %v790_v38 = vadd.f32 %v1250_v6, %v1212_v35 }
 0x137   : > { %v1214_v39 = vpop.f32.mrf.mxu0 }
 0x138   : > { %v802_v40 = vadd.f32 %v790_v38, %v392_v36  ;;  %v1215_v41 = vadd.f32 %v1214_v39, %v1213_v37 }
 0x13a   : > { %810 = vst [vmem:[#allocation2 + $0x28] sm:$0xff] %v802_v40  ;;  %v793_v43 = vadd.f32 %v1251_v20, %v1215_v41  ;;  %815 = sbr.rel (%p1114_p13) target bundleno = 336 (0x150), region = 70 }
 0x13c   : > { %v803_v44 = vadd.f32 %v793_v43, %v393_v42 }
 0x13e   : > { %811 = vst [vmem:[#allocation2 + $0x38] sm:$0xff] %v803_v44 }
 0x13f   : > { %v816_v45 = vld [vmem:[#allocation2 + $0x30] sm:$0xff]  ;;  %v817_v46 = vld [vmem:[#allocation2] sm:$0xff]  ;;  %v818_v51 = vld [vmem:[#allocation2 + $0x18] sm:$0xff] }
 0x140   : > { %v1115_v47 = vld [vmem:[%s1606_s2] ss:$0 sm:$0xff]  ;;  %v819_v52 = vld [vmem:[#allocation2 + $0x10] sm:$0xff]  ;;  %v1170_v57 = vld [vmem:[%s1525_s8 + $0x8] sm:$0xff]  }
 0x141   : > { %v831_v48 = vadd.f32 %v1115_v47, %v816_v45  ;;  %v832_v49 = vadd.f32 %v1115_v47, %v817_v46  ;;  %v1135_v50 = vld [vmem:[%s1525_s8] sm:$0xff]   ;;  %v833_v55 = vadd.f32 %v1115_v47, %v818_v51  ;;  %v834_v56 = vadd.f32 %v1115_v47, %v819_v52  ;;  %v820_v58 = vld [vmem:[#allocation2 + $0x8] sm:$0xff]  ;;  %v1171_v0 = vld [vmem:[%s1525_s8 + $0x10] sm:$0xff]  }
 0x142   : > { %v1136_v53 = vunpack.c.l.bf16 %v1135_v50  ;;  %v1137_v54 = vunpack.c.h.bf16 %v1135_v50  ;;  %v821_v59 = vld [vmem:[#allocation2 + $0x20] sm:$0xff]  ;;  %v1140_v60 = vunpack.c.l.bf16 %v1170_v57  ;;  %v1141_v61 = vunpack.c.h.bf16 %v1170_v57  ;;  %v822_v1 = vld [vmem:[#allocation2 + $0x28] sm:$0xff]  ;;  %v1172_v7 = vld [vmem:[%s1525_s8 + $0x18] sm:$0xff]  }
 0x143   : > { %v835_v62 = vadd.f32 %v1115_v47, %v820_v58  ;;  %v836_v63 = vadd.f32 %v1115_v47, %v821_v59  ;;  %v1144_v5 = vunpack.c.l.bf16 %v1171_v0  ;;  %v1145_v6 = vunpack.c.h.bf16 %v1171_v0 }
 0x144   : > { %v855_v3 = vadd.f32 %v1136_v53, %v831_v48  ;;  %v856_v4 = vadd.f32 %v1137_v54, %v832_v49  ;;  %v857_v8 = vadd.f32 %v1140_v60, %v833_v55  ;;  %v858_v9 = vadd.f32 %v1141_v61, %v834_v56 }
 0x145   : > { %v823_v2 = vld [vmem:[#allocation2 + $0x38] sm:$0xff]  ;;  %v837_v10 = vadd.f32 %v1115_v47, %v822_v1  ;;  %v859_v14 = vadd.f32 %v1144_v5, %v835_v62  ;;  %v860_v15 = vadd.f32 %v1145_v6, %v836_v63  ;;  %v1148_v18 = vunpack.c.l.bf16 %v1172_v7 }
 0x146   : > { %v838_v11 = vadd.f32 %v1115_v47, %v823_v2  ;;  %v863_v12 = vmax.f32 %v855_v3, 0.0  ;;  %v864_v13 = vmax.f32 %v856_v4, 0.0  ;;  %v865_v16 = vmax.f32 %v857_v8, 0.0 }
 0x147   : > { %v866_v17 = vmax.f32 %v858_v9, 0.0  ;;  %v1149_v19 = vunpack.c.h.bf16 %v1172_v7  ;;  %v867_v21 = vmax.f32 %v859_v14, 0.0  ;;  %v868_v22 = vmax.f32 %v860_v15, 0.0 }
 0x148   : > { %v1153_v20 = vpack.c.bf16 %v864_v13, %v863_v12  ;;  %v861_v24 = vadd.f32 %v1148_v18, %v837_v10 }
 0x149   : > { %v1158_v23 = vpack.c.bf16 %v866_v17, %v865_v16  ;;  %v862_v25 = vadd.f32 %v1149_v19, %v838_v11  ;;  %v1163_v26 = vpack.c.bf16 %v868_v22, %v867_v21 }
 0x14a   : > { %1154 = vst [vmem:[%s1530_s18] sm:$0xff] %v1153_v20   ;;  %v869_v27 = vmax.f32 %v861_v24, 0.0 }
 0x14b   : > { %1173 = vst [vmem:[%s1530_s18 + $0x8] sm:$0xff] %v1158_v23   ;;  %v870_v28 = vmax.f32 %v862_v25, 0.0  ;;  %1174 = vst [vmem:[%s1530_s18 + $0x10] sm:$0xff] %v1163_v26  }
 0x14d   : > { %v1168_v29 = vpack.c.bf16 %v870_v28, %v869_v27 }
 0x14f   : > { %1175 = vst [vmem:[%s1530_s18 + $0x18] sm:$0xff] %v1168_v29  }
 0x150 PF: > { %s14_s21 = sadd.s32 1, %s1406_s21   ;;  %s1609_s15 = smov %s1386_s16 }
 0x151   : > { %p11_p0 = scmp.ge.s32.totalorder %s14_s21, 8   ;;  %s1610_s16 = smov %s1485_s28 }
 0x152   : > { %s1611_s17 = smov %s1398_s19  ;;  %s1612_s18 = smov %s1402_s20 }
 0x153   : > { %s1613_s19 = smov %s1616_s22  ;;  %s1614_s20 = smov %s1620_s23 }
 0x154   :  { %13 = sbr.rel (!%p11_p0) target bundleno = 4 (0x4), region = 120 }

// kernel: forgery_detector_forward.25
= control target key start
LH: loop header
LB: loop body
LE: loop exit
PB: predicated region body
PF: predicated region fallthrough
CT: control target
= control target key end

     0   :  { %s1274_s15 = smov 0   ;;  %s1276_s16 = smov 0   ;;  %s1433_s0 = inlined_call_operand.vmem [shape: bf16[32,1152], index: 0, kind: input, shape index: {}]   ;;  %s1434_s1 = inlined_call_operand.vmem [shape: bf16[1152,256], index: 1, kind: input, shape index: {}]   ;;  %s1435_s2 = inlined_call_operand.vmem [shape: f32[1,256], index: 2, kind: input, shape index: {}]   ;;  %s1436_s3 = inlined_call_operand.vmem [shape: f32[1,256], index: 3, kind: input, shape index: {}]   ;;  %s1437_s4 = inlined_call_operand.vmem [shape: bf16[32,256], index: 4, kind: output, shape index: {}]  }
   0x1   :  { %s1278_s17 = smov 0   ;;  %s1280_s18 = smov 0  }
   0x2   :  { %s1282_s19 = smov 0   ;;  %s1284_s20 = smov 0  }
   0x3   :  { %s1286_s21 = smov 0  }
   0x4 LB: > { %s26_s22 = sadd.s32 1, %s1236_s19  ;;  %s33_s23 = sadd.s32 1, %s1240_s20  ;;  %s1244_s21 = sphi %s1286_s21, %s14_s21   ;;  %s1240_s20 = sphi %s1284_s20, %s1443_s20   ;;  %s1236_s19 = sphi %s1282_s19, %s1442_s19   ;;  %s1232_s18 = sphi %s1280_s18, %s1441_s18   ;;  %s1228_s17 = sphi %s1278_s17, %s1440_s17   ;;  %s1224_s16 = sphi %s1276_s16, %s1439_s16   ;;  %s1220_s15 = sphi %s1274_s15, %s1438_s15  }
   0x5   : > { %p27_p0 = scmp.ge.s32.totalorder %s26_s22, 3  ;;  %p49_p1 = scmp.ne.s32.totalorder %s1224_s16, %s1220_s15 }
   0x6   : > { %p50_p2 = scmp.eq.s32.totalorder %s1244_s21, 0  ;;  %s42_s27 = sadd.s32 1, %s1224_s16 }
   0x7   : > { %s1445_s22 = smov (%p27_p0, %s26_s22), 0  ;;  %s1447_s23 = smov (!%p27_p0, %s33_s23), %s1240_s20 }
   0x8   : > { %p51_p3 = por %p50_p2, %p49_p1  ;;  %p35_p4 = scmp.ge.s32.totalorder %s1447_s23, 2 }
   0x9   : > { %s38_s24 = ssub.s32 %s1236_s19, %s1445_s22  ;;  %p977_p6 = scmp.ge.s32.totalorder %s1244_s21, 6 }
   0xa   : > { %s1449_s23 = smov (%p35_p4, %s1447_s23), 0 }
   0xb   : > { %s37_s25 = ssub.s32 %s1240_s20, %s1449_s23  ;;  %199 = sbr.rel (%p977_p6) target bundleno = 27 (0x1b), region = 24 }
   0xc   : > { %s39_s26 = sor.u32 %s38_s24, %s37_s25 }
   0xd   : > { %p40_p5 = scmp.eq.s32.totalorder %s39_s26, 0 }
   0xf   : > { %s1325_s28 = scalar_select %p40_p5, %s1224_s16, %s42_s27  }
  0x10   : > { %202 = sbr.rel (!%p51_p3) target bundleno = 27 (0x1b), region = 28  ;;  %s204_s29 = sand.u32 (%p51_p3), 1, %s1224_s16  }
  0x11   : > { %s208_s30 = smul.u32 (%p51_p3), 3, %s1236_s19 }
  0x12   : > { %s1052_s5 = smul.u32 (%p51_p3), 24, %s204_s29 }
  0x13   : > { %s1053_s6 = smul.u32 (%p51_p3), 18, %s1240_s20 }
  0x14   : > { %s206_s12 = scalar_lea.vmem (%p51_p3), [#allocation3], %s1052_s5 }
  0x15   : > { %s210_s7 = sadd.s32 %s1053_s6, %s208_s30 }
  0x16   : > { %s980_s8 = sshll.u32 %s210_s7, 2 }
  0x17   : > { %s212_s11 = scalar_lea.vmem %s1433_s0, %s980_s8 }
  0x18   : > { %v227_v0 = vld [vmem:[%s212_s11] sm:$0xff]  ;;  %v981_v2 = vld [vmem:[%s212_s11 + $0x8] sm:$0xf]  ;;  %v983_v3 = vld [vmem:[%s212_s11 + $0x2c] sm:$0xf] }
  0x19   : > { %v229_v1 = vld [vmem:[%s212_s11 + $0x24] sm:$0xff]  ;;  %228 = vst [vmem:[%s206_s12] sm:$0xff] %v227_v0  ;;  %982 = vst [vmem:[%s206_s12 + $0x8] sm:$0xf] %v981_v2 }
  0x1a   : > { %230 = vst [vmem:[%s206_s12 + $0xc] sm:$0xff] %v229_v1  ;;  %984 = vst [vmem:[%s206_s12 + $0x14] sm:$0xf] %v983_v3 }
  0x1b PF: > { %p985_p7 = scmp.ge.s32.totalorder %s1244_s21, 1  ;;  %p262_p8 = scmp.lt.s32.totalorder %s1244_s21, 7 }
  0x1d   : > { %p263_p9 = pnand %p985_p7, %p262_p8 }
  0x1e   : > { %s269_s13 = sand.u32 (!%p263_p9), 1, %s1220_s15   ;;  %s319_s14 = smul.u32 (!%p263_p9), 48, %s1228_s17 }
  0x1f   : > { %266 = sbr.rel (%p263_p9) target bundleno = 333 (0x14d), region = 58  ;;  %s988_s25 = sshll.u32 (!%p263_p9), %s1232_s18, 1 }
  0x20   : > { %s1054_s24 = smul.u32 (!%p263_p9), 24, %s269_s13  ;;  %p321_p10 = scmp.lt.s32.totalorder (!%p263_p9), %s319_s14, 143 }
  0x21   : > { %p343_p11 = scmp.lt.s32.totalorder (!%p263_p9), %s988_s25, 3  ;;  %p991_p12 = scmp.ne.s32.totalorder (!%p263_p9), %s1228_s17, 0 }
  0x22   : > { %s1349_s15 = scalar_lea.vmem (!%p263_p9), [#allocation3], %s1054_s24 }
  0x24   : > { %s1451_s14 = smov (!%p321_p10, %s319_s14), 143  ;;  %s1453_s25 = smov (!%p343_p11, %s988_s25), 3 }
  0x25   : > { %s1048_s26 = sshll.u32 %s1451_s14, 3  ;;  %s1049_s5 = sshll.u32 %s1453_s25, 3 }
  0x26   : > { %s1342_s30 = scalar_lea.vmem %s1434_s1, %s1048_s26  ;;  %s1347_s8 = scalar_lea.vmem %s1437_s4, %s1049_s5 }
  0x27   : > { %357 = sbr.rel (%p991_p12) target bundleno = 47 (0x2f), region = 66 }
  0x2c   : > { %v1246_v4 = vmov 0.0  }
  0x2d   : > { %358 = vst [vmem:[#allocation2 + $0x10] sm:$0xff] %v1246_v4  ;;  %359 = vst [vmem:[#allocation2] sm:$0xff] %v1246_v4 }
  0x2e   : > { %360 = vst [vmem:[#allocation2 + $0x18] sm:$0xff] %v1246_v4  ;;  %361 = vst [vmem:[#allocation2 + $0x8] sm:$0xff] %v1246_v4 }
  0x2f PF: > { %v1114_v5 = vld [vmem:[%s1342_s30 + $0x74] ss:$8 sps:$4 sm:$0xff]   ;;  %v1116_v6 = vld [vmem:[%s1342_s30 + $0x70] ss:$8 sps:$4 sm:$0xff]   ;;  %v1247_v7 = vmov 0   ;;  %p1043_p13 = scmp.ne.s32.totalorder %s1228_s17, 2 }
  0x30   : > { %749 = vmatprep.mubr.bf16.mxu1 %v1247_v7  ;;  %674 = vmatprep.subr.bf16.mxu0 %v1114_v5  ;;  %v1117_v8 = vld [vmem:[%s1342_s30 + $0x64] ss:$8 sps:$4 sm:$0xff]   ;;  %v1119_v9 = vld [vmem:[%s1342_s30 + $0x60] ss:$8 sps:$4 sm:$0xff]   ;;  %v1120_v10 = vld [vmem:[%s1342_s30 + $0x54] ss:$8 sps:$4 sm:$0xff]  }
  0x31   : > { %675 = vmatpush1.bf16.msra.mxu0 %v1116_v6  ;;  %v1122_v11 = vld [vmem:[%s1342_s30 + $0x50] ss:$8 sps:$4 sm:$0xff]   ;;  %v1123_v12 = vld [vmem:[%s1342_s30 + $0x44] ss:$8 sps:$4 sm:$0xff]   ;;  %v1135_v13 = vld [vmem:[%s1342_s30 + $0x174] ss:$8 sps:$4 sm:$0xff]  }
  0x32   : > { %676 = vmatprep.subr.bf16.mxu0 %v1117_v8  ;;  %v1137_v14 = vld [vmem:[%s1342_s30 + $0x170] ss:$8 sps:$4 sm:$0xff]   ;;  %v1125_v15 = vld [vmem:[%s1342_s30 + $0x40] ss:$8 sps:$4 sm:$0xff]   ;;  %v1126_v16 = vld [vmem:[%s1342_s30 + $0x34] ss:$8 sps:$4 sm:$0xff]   ;;  %717 = vmatprep.subr.bf16.mxu1 %v1135_v13 }
  0x33   : > { %v1141_v17 = vld [vmem:[%s1342_s30 + $0x164] ss:$8 sps:$4 sm:$0xff]   ;;  %718 = vmatpush1.bf16.msra.mxu1 %v1137_v14  ;;  %v1143_v18 = vld [vmem:[%s1342_s30 + $0x160] ss:$8 sps:$4 sm:$0xff]   ;;  %v1128_v19 = vld [vmem:[%s1342_s30 + $0x30] ss:$8 sps:$4 sm:$0xff]  }
  0x34   : > { %719 = vmatprep.subr.bf16.mxu1 %v1141_v17  ;;  %v1147_v20 = vld [vmem:[%s1342_s30 + $0x154] ss:$8 sps:$4 sm:$0xff]   ;;  %v1129_v21 = vld [vmem:[%s1342_s30 + $0x24] ss:$8 sps:$4 sm:$0xff]   ;;  %v1149_v22 = vld [vmem:[%s1342_s30 + $0x150] ss:$8 sps:$4 sm:$0xff]  }
  0x35   : > { %677 = vmatpush1.bf16.msra.mxu0 %v1119_v9  ;;  %v1153_v23 = vld [vmem:[%s1342_s30 + $0x144] ss:$8 sps:$4 sm:$0xff]   ;;  %v1131_v24 = vld [vmem:[%s1342_s30 + $0x20] ss:$8 sps:$4 sm:$0xff]   ;;  %v1132_v25 = vld [vmem:[%s1342_s30 + $0x14] ss:$8 sps:$4 sm:$0xff]  }
  0x36   : > { %678 = vmatprep.subr.bf16.mxu0 %v1120_v10  ;;  %v1155_v26 = vld [vmem:[%s1342_s30 + $0x140] ss:$8 sps:$4 sm:$0xff]   ;;  %v1159_v27 = vld [vmem:[%s1342_s30 + $0x134] ss:$8 sps:$4 sm:$0xff]   ;;  %v1134_v28 = vld [vmem:[%s1342_s30 + $0x10] ss:$8 sps:$4 sm:$0xff]  }
  0x37   : > { %720 = vmatpush1.bf16.msra.mxu1 %v1143_v18  ;;  %v1138_v29 = vld [vmem:[%s1342_s30 + $0x4] ss:$8 sps:$4 sm:$0xff]   ;;  %v1161_v30 = vld [vmem:[%s1342_s30 + $0x130] ss:$8 sps:$4 sm:$0xff]   ;;  %v1140_v32 = vld [vmem:[%s1342_s30] ss:$8 sps:$4 sm:$0xff]  }
  0x38   : > { %721 = vmatprep.subr.bf16.mxu1 %v1147_v20  ;;  %v1165_v31 = vld [vmem:[%s1342_s30 + $0x124] ss:$8 sps:$4 sm:$0xff]   ;;  %v1144_v33 = vld [vmem:[%s1342_s30 + $0xf4] ss:$8 sps:$4 sm:$0xff]   ;;  %v1167_v34 = vld [vmem:[%s1342_s30 + $0x120] ss:$8 sps:$4 sm:$0xff]  }
  0x39   : > { %679 = vmatpush1.bf16.msra.mxu0 %v1122_v11  ;;  %v1171_v35 = vld [vmem:[%s1342_s30 + $0x114] ss:$8 sps:$4 sm:$0xff]   ;;  %v1146_v36 = vld [vmem:[%s1342_s30 + $0xf0] ss:$8 sps:$4 sm:$0xff]   ;;  %v1150_v37 = vld [vmem:[%s1342_s30 + $0xe4] ss:$8 sps:$4 sm:$0xff]  }
  0x3a   : > { %680 = vmatprep.subr.bf16.mxu0 %v1123_v12  ;;  %v1173_v38 = vld [vmem:[%s1342_s30 + $0x110] ss:$8 sps:$4 sm:$0xff]   ;;  %v1177_v39 = vld [vmem:[%s1342_s30 + $0x104] ss:$8 sps:$4 sm:$0xff]   ;;  %v1152_v41 = vld [vmem:[%s1342_s30 + $0xe0] ss:$8 sps:$4 sm:$0xff]  }
  0x3b   : > { %722 = vmatpush1.bf16.msra.mxu1 %v1149_v22  ;;  %v1189_v40 = vld [vmem:[%s1349_s15 + $0x4] ss:$12 sps:$4 sm:$0xff]   ;;  %v1183_v46 = vld [vmem:[%s1349_s15 + $0x8] ss:$12 sps:$4 sm:$0xff]   ;;  %v1187_v56 = vld [vmem:[%s1349_s15] ss:$12 sps:$4 sm:$0xff]  }
  0x3c   : > { %723 = vmatprep.subr.bf16.mxu1 %v1153_v23  ;;  %v1156_v42 = vld [vmem:[%s1342_s30 + $0xd4] ss:$8 sps:$4 sm:$0xff]   ;;  %706 = vmatprep.mubr.bf16.mxu0 %v1189_v40  ;;  %v1179_v43 = vld [vmem:[%s1342_s30 + $0x100] ss:$8 sps:$4 sm:$0xff]   ;;  %v1158_v44 = vld [vmem:[%s1342_s30 + $0xd0] ss:$8 sps:$4 sm:$0xff]  }
  0x3d   : > { %681 = vmatpush1.bf16.msra.mxu0 %v1125_v15  ;;  %v1162_v45 = vld [vmem:[%s1342_s30 + $0xc4] ss:$8 sps:$4 sm:$0xff]   ;;  %v1164_v47 = vld [vmem:[%s1342_s30 + $0xc0] ss:$8 sps:$4 sm:$0xff]   ;;  %v1168_v48 = vld [vmem:[%s1342_s30 + $0xb4] ss:$8 sps:$4 sm:$0xff]  }
  0x3e   : > { %682 = vmatprep.subr.bf16.mxu0 %v1126_v16  ;;  %v1170_v49 = vld [vmem:[%s1342_s30 + $0xb0] ss:$8 sps:$4 sm:$0xff]   ;;  %v1174_v50 = vld [vmem:[%s1342_s30 + $0xa4] ss:$8 sps:$4 sm:$0xff]   ;;  %v1176_v51 = vld [vmem:[%s1342_s30 + $0xa0] ss:$8 sps:$4 sm:$0xff]  }
  0x3f   : > { %724 = vmatpush1.bf16.msra.mxu1 %v1155_v26  ;;  %v1180_v52 = vld [vmem:[%s1342_s30 + $0x94] ss:$8 sps:$4 sm:$0xff]   ;;  %v1182_v53 = vld [vmem:[%s1342_s30 + $0x90] ss:$8 sps:$4 sm:$0xff]   ;;  %v1184_v54 = vld [vmem:[%s1342_s30 + $0x84] ss:$8 sps:$4 sm:$0xff]  }
  0x40   : > { %725 = vmatprep.subr.bf16.mxu1 %v1159_v27  ;;  %v1186_v55 = vld [vmem:[%s1342_s30 + $0x80] ss:$8 sps:$4 sm:$0xff]   ;;  %v362_v59 = vld [vmem:[#allocation2 + $0x10] sm:$0xff]  ;;  %v364_v3 = vld [vmem:[#allocation2 + $0x18] sm:$0xff] }
  0x41   : > { %683 = vmatpush1.bf16.msra.mxu0 %v1128_v19  ;;  %v363_v63 = vld [vmem:[#allocation2] sm:$0xff]  ;;  %v365_v8 = vld [vmem:[#allocation2 + $0x8] sm:$0xff] }
  0x42   : > { %684 = vmatprep.subr.bf16.mxu0 %v1129_v21 }
  0x43   : > { %726 = vmatpush1.bf16.msra.mxu1 %v1161_v30 }
  0x44   : > { %727 = vmatprep.subr.bf16.mxu1 %v1165_v31 }
  0x45   : > { %685 = vmatpush1.bf16.msra.mxu0 %v1131_v24 }
  0x46   : > { %686 = vmatprep.subr.bf16.mxu0 %v1132_v25 }
  0x47   : > { %728 = vmatpush1.bf16.msra.mxu1 %v1167_v34 }
  0x48   : > { %729 = vmatprep.subr.bf16.mxu1 %v1171_v35 }
  0x49   : > { %687 = vmatpush1.bf16.msra.mxu0 %v1134_v28 }
  0x4a   : > { %688 = vmatprep.subr.bf16.mxu0 %v1138_v29 }
  0x4b   : > { %730 = vmatpush1.bf16.msra.mxu1 %v1173_v38 }
  0x4c   : > { %731 = vmatprep.subr.bf16.mxu1 %v1177_v39 }
  0x4d   : > { %689 = vmatpush1.bf16.msra.mxu0 %v1140_v32 }
  0x4e   : > { %690 = vmatprep.subr.bf16.mxu0 %v1144_v33 }
  0x4f   : > { %732 = vmatpush1.bf16.msra.mxu1 %v1179_v43 }
  0x51   : > { %691 = vmatpush2.bf16.msra.mxu0 %v1146_v36 }
  0x52   : > { %692 = vmatprep.subr.bf16.mxu0 %v1150_v37  ;;  %750 = vmatmul.mubr.bf16.vlgmr.msra.gmra.mxu1 %v1183_v46 }
  0x55   : > { %693 = vmatpush2.bf16.msra.mxu0 %v1152_v41 }
  0x56   : > { %694 = vmatprep.subr.bf16.mxu0 %v1156_v42 }
  0x59   : > { %695 = vmatpush2.bf16.msra.mxu0 %v1158_v44 }
  0x5a   : > { %696 = vmatprep.subr.bf16.mxu0 %v1162_v45 }
  0x5d   : > { %697 = vmatpush2.bf16.msra.mxu0 %v1164_v47 }
  0x5e   : > { %698 = vmatprep.subr.bf16.mxu0 %v1168_v48 }
  0x61   : > { %699 = vmatpush2.bf16.msra.mxu0 %v1170_v49 }
  0x62   : > { %700 = vmatprep.subr.bf16.mxu0 %v1174_v50 }
  0x65   : > { %701 = vmatpush2.bf16.msra.mxu0 %v1176_v51 }
  0x66   : > { %702 = vmatprep.subr.bf16.mxu0 %v1180_v52 }
  0x69   : > { %703 = vmatpush2.bf16.msra.mxu0 %v1182_v53 }
  0x6a   : > { %704 = vmatprep.subr.bf16.mxu0 %v1184_v54 }
  0x6d   : > { %705 = vmatpush2.bf16.msra.mxu0 %v1186_v55 }
  0x70   : > { %707 = vmatmul.mubr.bf16.vlgmr.msra.gmra.mxu0 %v1187_v56 }
 0x112   : > { %v751_v57 = vpop.f32.mrf.mxu1 }
 0x114   : > { %v753_v58 = vpop.f32.mrf.mxu1 }
 0x116   : > { %v755_v62 = vpop.f32.mrf.mxu1 }
 0x118   : > { %v757_v7 = vpop.f32.mrf.mxu1 }
 0x130   : > { %v708_v60 = vpop.f32.mrf.mxu0 }
 0x131   : > { %v752_v61 = vadd.f32 %v751_v57, %v708_v60 }
 0x132   : > { %v710_v0 = vpop.f32.mrf.mxu0 }
 0x133   : > { %v760_v1 = vadd.f32 %v752_v61, %v362_v59  ;;  %v754_v2 = vadd.f32 %v753_v58, %v710_v0 }
 0x134   : > { %v712_v4 = vpop.f32.mrf.mxu0 }
 0x135   : > { %764 = vst [vmem:[#allocation2 + $0x10] sm:$0xff] %v760_v1  ;;  %v761_v5 = vadd.f32 %v754_v2, %v363_v63  ;;  %v756_v6 = vadd.f32 %v755_v62, %v712_v4 }
 0x136   : > { %v714_v9 = vpop.f32.mrf.mxu0 }
 0x137   : > { %765 = vst [vmem:[#allocation2] sm:$0xff] %v761_v5  ;;  %v762_v10 = vadd.f32 %v756_v6, %v364_v3  ;;  %v758_v11 = vadd.f32 %v757_v7, %v714_v9  ;;  %771 = sbr.rel (%p1043_p13) target bundleno = 333 (0x14d), region = 70 }
 0x139   : > { %766 = vst [vmem:[#allocation2 + $0x18] sm:$0xff] %v762_v10  ;;  %v763_v12 = vadd.f32 %v758_v11, %v365_v8 }
 0x13b   : > { %767 = vst [vmem:[#allocation2 + $0x8] sm:$0xff] %v763_v12 }
 0x13c   : > { %v778_v13 = vlaneseq  ;;  %v792_v14 = vld [vmem:[%s1436_s3] sm:$0x3]  ;;  %v1248_v17 = vmov 0   ;;  %v772_v21 = vld [vmem:[#allocation2 + $0x10] sm:$0xff] }
 0x13d   : > { %vm793_vm0 = vcmp.ne.f32.partialorder %v792_v14, 0.0  ;;  %v776_v16 = vld [vmem:[%s1435_s2] sm:$0x3] }
 0x13e   : > { %v779_v15 = vshrl.u32 %v778_v13, 7  ;;  %v798_v18 = vsel %vm793_vm0, 1, %v1248_v17  ;;  %v773_v22 = vld [vmem:[#allocation2] sm:$0xff] }
 0x140   : > { %v780_v19 = vsub.s32 0, %v779_v15  ;;  %v784_v20 = vsub.s32 1, %v779_v15  ;;  %v774_v27 = vld [vmem:[#allocation2 + $0x18] sm:$0xff] }
 0x142   : > { %v781_v23 = vrot.slane %v776_v16, %v780_v19  ;;  %v785_v24 = vrot.slane %v776_v16, %v784_v20  ;;  %v802_v25 = vrot.slane %v798_v18, %v780_v19  ;;  %v806_v26 = vrot.slane %v798_v18, %v784_v20  ;;  %v775_v28 = vld [vmem:[#allocation2 + $0x8] sm:$0xff] }
 0x144   : > { %v788_v29 = vadd.f32 %v781_v23, %v772_v21  ;;  %v789_v30 = vadd.f32 %v785_v24, %v773_v22  ;;  %vm807_vm1 = vcmp.eq.s32.totalorder %v802_v25, 1  ;;  %vm808_vm2 = vcmp.eq.s32.totalorder %v806_v26, 1 }
 0x145   : > { %v790_v31 = vadd.f32 %v781_v23, %v774_v27  ;;  %v791_v32 = vadd.f32 %v785_v24, %v775_v28 }
 0x146   : > { %v794_v33 = vmax.f32 %v788_v29, 0.0  ;;  %v795_v34 = vmax.f32 %v789_v30, 0.0 }
 0x147   : > { %v796_v35 = vmax.f32 %v790_v31, 0.0  ;;  %v797_v36 = vmax.f32 %v791_v32, 0.0 }
 0x148   : > { %v809_v37 = vsel %vm807_vm1, %v794_v33, %v788_v29  ;;  %v810_v38 = vsel %vm808_vm2, %v795_v34, %v789_v30 }
 0x149   : > { %v1050_v39 = vpack.c.bf16 %v810_v38, %v809_v37  ;;  %v811_v40 = vsel %vm807_vm1, %v796_v35, %v790_v31  ;;  %v812_v41 = vsel %vm808_vm2, %v797_v36, %v791_v32 }
 0x14a   : > { %v1051_v42 = vpack.c.bf16 %v812_v41, %v811_v40 }
 0x14b   : > { %825 = vst [vmem:[%s1347_s8] sm:$0xff] %v1050_v39 }
 0x14c   : > { %826 = vst [vmem:[%s1347_s8 + $0x8] sm:$0xff] %v1051_v42 }
 0x14d PF: > { %s14_s21 = sadd.s32 1, %s1244_s21   ;;  %s1438_s15 = smov %s1224_s16 }
 0x14e   : > { %p11_p0 = scmp.ge.s32.totalorder %s14_s21, 8   ;;  %s1439_s16 = smov %s1325_s28 }
 0x14f   : > { %s1440_s17 = smov %s1236_s19  ;;  %s1441_s18 = smov %s1240_s20 }
 0x150   : > { %s1442_s19 = smov %s1445_s22  ;;  %s1443_s20 = smov %s1449_s23 }
 0x151   :  { %13 = sbr.rel (!%p11_p0) target bundleno = 4 (0x4), region = 120 }

// kernel: forgery_detector_forward.26
= control target key start
LH: loop header
LB: loop body
LE: loop exit
PB: predicated region body
PF: predicated region fallthrough
CT: control target
= control target key end

     0   :  { %s1113_s15 = smov 0   ;;  %s1115_s16 = smov 0   ;;  %s1250_s0 = inlined_call_operand.vmem [shape: bf16[32,1152], index: 0, kind: input, shape index: {}]   ;;  %s1251_s1 = inlined_call_operand.vmem [shape: bf16[1152,128], index: 1, kind: input, shape index: {}]   ;;  %s1252_s2 = inlined_call_operand.vmem [shape: f32[1,128], index: 2, kind: input, shape index: {}]   ;;  %s1253_s3 = inlined_call_operand.vmem [shape: bf16[32,128], index: 3, kind: input, shape index: {}]   ;;  %s1254_s4 = inlined_call_operand.vmem [shape: bf16[32,128], index: 4, kind: output, shape index: {}]  }
   0x1   :  { %s1117_s17 = smov 0   ;;  %s1119_s18 = smov 0  }
   0x2   :  { %s1121_s19 = smov 0   ;;  %s1123_s20 = smov 0  }
   0x3   :  { %s1125_s21 = smov 0  }
   0x4 LB: > { %s26_s22 = sadd.s32 1, %s1075_s19  ;;  %s33_s23 = sadd.s32 1, %s1079_s20  ;;  %s1083_s21 = sphi %s1125_s21, %s14_s21   ;;  %s1079_s20 = sphi %s1123_s20, %s1260_s20   ;;  %s1075_s19 = sphi %s1121_s19, %s1259_s19   ;;  %s1071_s18 = sphi %s1119_s18, %s1258_s18   ;;  %s1067_s17 = sphi %s1117_s17, %s1257_s17   ;;  %s1063_s16 = sphi %s1115_s16, %s1256_s16   ;;  %s1059_s15 = sphi %s1113_s15, %s1255_s15  }
   0x5   : > { %p27_p0 = scmp.ge.s32.totalorder %s26_s22, 3  ;;  %p49_p1 = scmp.ne.s32.totalorder %s1063_s16, %s1059_s15 }
   0x6   : > { %p50_p2 = scmp.eq.s32.totalorder %s1083_s21, 0  ;;  %s42_s27 = sadd.s32 1, %s1063_s16 }
   0x7   : > { %s1262_s22 = smov (%p27_p0, %s26_s22), 0  ;;  %s1264_s23 = smov (!%p27_p0, %s33_s23), %s1079_s20 }
   0x8   : > { %p51_p3 = por %p50_p2, %p49_p1  ;;  %p35_p4 = scmp.ge.s32.totalorder %s1264_s23, 2 }
   0x9   : > { %s38_s24 = ssub.s32 %s1075_s19, %s1262_s22  ;;  %p829_p6 = scmp.ge.s32.totalorder %s1083_s21, 6 }
   0xa   : > { %s1266_s23 = smov (%p35_p4, %s1264_s23), 0 }
   0xb   : > { %s37_s25 = ssub.s32 %s1079_s20, %s1266_s23  ;;  %191 = sbr.rel (%p829_p6) target bundleno = 27 (0x1b), region = 20 }
   0xc   : > { %s39_s26 = sor.u32 %s38_s24, %s37_s25 }
   0xd   : > { %p40_p5 = scmp.eq.s32.totalorder %s39_s26, 0 }
   0xf   : > { %s1164_s28 = scalar_select %p40_p5, %s1063_s16, %s42_s27  }
  0x10   : > { %194 = sbr.rel (!%p51_p3) target bundleno = 27 (0x1b), region = 24  ;;  %s196_s29 = sand.u32 (%p51_p3), 1, %s1063_s16  }
  0x11   : > { %s200_s30 = smul.u32 (%p51_p3), 3, %s1075_s19 }
  0x12   : > { %s939_s5 = smul.u32 (%p51_p3), 24, %s196_s29 }
  0x13   : > { %s940_s6 = smul.u32 (%p51_p3), 18, %s1079_s20 }
  0x14   : > { %s198_s12 = scalar_lea.vmem (%p51_p3), [#allocation3], %s939_s5 }
  0x15   : > { %s202_s7 = sadd.s32 %s940_s6, %s200_s30 }
  0x16   : > { %s832_s8 = sshll.u32 %s202_s7, 2 }
  0x17   : > { %s204_s11 = scalar_lea.vmem %s1250_s0, %s832_s8 }
  0x18   : > { %v219_v0 = vld [vmem:[%s204_s11] sm:$0xff]  ;;  %v833_v2 = vld [vmem:[%s204_s11 + $0x8] sm:$0xf]  ;;  %v835_v3 = vld [vmem:[%s204_s11 + $0x2c] sm:$0xf] }
  0x19   : > { %v221_v1 = vld [vmem:[%s204_s11 + $0x24] sm:$0xff]  ;;  %220 = vst [vmem:[%s198_s12] sm:$0xff] %v219_v0  ;;  %834 = vst [vmem:[%s198_s12 + $0x8] sm:$0xf] %v833_v2 }
  0x1a   : > { %222 = vst [vmem:[%s198_s12 + $0xc] sm:$0xff] %v221_v1  ;;  %836 = vst [vmem:[%s198_s12 + $0x14] sm:$0xf] %v835_v3 }
  0x1b PF: > { %p837_p7 = scmp.ge.s32.totalorder %s1083_s21, 1  ;;  %p263_p8 = scmp.lt.s32.totalorder %s1083_s21, 7 }
  0x1d   : > { %p264_p9 = pnand %p837_p7, %p263_p8 }
  0x1e   : > { %s270_s13 = sand.u32 (!%p264_p9), 1, %s1059_s15   ;;  %s319_s14 = smul.u32 (!%p264_p9), 48, %s1067_s17 }
  0x1f   : > { %267 = sbr.rel (%p264_p9) target bundleno = 302 (0x12e), region = 58  ;;  %s839_s25 = sshll.u32 (!%p264_p9), %s1071_s18, 1 }
  0x20   : > { %s941_s24 = smul.u32 (!%p264_p9), 24, %s270_s13  ;;  %p320_p10 = scmp.lt.s32.totalorder (!%p264_p9), %s319_s14, 143 }
  0x21   : > { %p332_p11 = scmp.lt.s32.totalorder (!%p264_p9), %s839_s25, 3  ;;  %p843_p12 = scmp.ne.s32.totalorder (!%p264_p9), %s1067_s17, 0 }
  0x22   : > { %s1193_s10 = scalar_lea.vmem (!%p264_p9), [#allocation3], %s941_s24 }
  0x24   : > { %s1268_s14 = smov (!%p320_p10, %s319_s14), 143  ;;  %s1270_s25 = smov (!%p332_p11, %s839_s25), 3 }
  0x25   : > { %s838_s26 = sshll.u32 %s1268_s14, 2  ;;  %s840_s5 = sshll.u32 %s1270_s25, 2 }
  0x26   : > { %s1181_s30 = scalar_lea.vmem %s1251_s1, %s838_s26  ;;  %s1186_s8 = scalar_lea.vmem %s1253_s3, %s840_s5 }
  0x27   : > { %s1191_s18 = scalar_lea.vmem %s1254_s4, %s840_s5  ;;  %353 = sbr.rel (%p843_p12) target bundleno = 46 (0x2e), region = 66 }
  0x2c   : > { %v1085_v4 = vmov 0.0  }
  0x2d   : > { %354 = vst [vmem:[#allocation2] sm:$0xff] %v1085_v4  ;;  %355 = vst [vmem:[#allocation2 + $0x8] sm:$0xff] %v1085_v4 }
  0x2e PF: > { %v1001_v5 = vld [vmem:[%s1181_s30 + $0x78] sm:$0xff]   ;;  %v1086_v6 = vmov 0.0   ;;  %vm1087_vm0 = vmmov 0   ;;  %v1004_v9 = vld [vmem:[%s1181_s30 + $0x70] sm:$0xff]   ;;  %v1007_v12 = vld [vmem:[%s1181_s30 + $0x68] sm:$0xff]   ;;  %p871_p13 = scmp.ne.s32.totalorder %s1067_s17, 2 }
  0x2f   : > { %919 = vmatprep.subr.bf16.mxu1 %v1086_v6  ;;  %v1002_v7 = vld [vmem:[%s1181_s30 + $0xb8] sm:$0xff]   ;;  %888 = vmatprep.subr.bf16.mxu0 %v1001_v5  ;;  %v1005_v10 = vld [vmem:[%s1181_s30 + $0xb0] sm:$0xff]   ;;  %v1008_v13 = vld [vmem:[%s1181_s30 + $0xa8] sm:$0xff]  }
  0x30   : > { %v1003_v8 = vld [vmem:[%s1181_s30 + $0x38] sm:$0xff]   ;;  %935 = vmatprep.mubr.msk.bf16.mxu1 %vm1087_vm0, %v1086_v6  ;;  %920 = vmatpush3.bf16.msra.mxu1 %v1002_v7  ;;  %v1006_v11 = vld [vmem:[%s1181_s30 + $0x30] sm:$0xff]   ;;  %v1009_v14 = vld [vmem:[%s1181_s30 + $0x28] sm:$0xff]  }
  0x31   : > { %889 = vmatpush3.bf16.msra.mxu0 %v1003_v8  ;;  %921 = vmatprep.subr.bf16.mxu1 %v1086_v6  ;;  %v1010_v15 = vld [vmem:[%s1181_s30 + $0x60] sm:$0xff]   ;;  %v1013_v18 = vld [vmem:[%s1181_s30 + $0x58] sm:$0xff]   ;;  %v1016_v21 = vld [vmem:[%s1181_s30 + $0x50] sm:$0xff]  }
  0x32   : > { %890 = vmatprep.subr.bf16.mxu0 %v1004_v9  ;;  %v1011_v16 = vld [vmem:[%s1181_s30 + $0xa0] sm:$0xff]   ;;  %v1014_v19 = vld [vmem:[%s1181_s30 + $0x98] sm:$0xff]   ;;  %v1017_v22 = vld [vmem:[%s1181_s30 + $0x90] sm:$0xff]  }
  0x33   : > { %v1012_v17 = vld [vmem:[%s1181_s30 + $0x20] sm:$0xff]   ;;  %v1015_v20 = vld [vmem:[%s1181_s30 + $0x18] sm:$0xff]   ;;  %v1018_v23 = vld [vmem:[%s1181_s30 + $0x10] sm:$0xff]  }
  0x34   : > { %922 = vmatpush3.bf16.msra.mxu1 %v1005_v10  ;;  %v1019_v24 = vld [vmem:[%s1181_s30 + $0x48] sm:$0xff]   ;;  %v1022_v27 = vld [vmem:[%s1181_s30 + $0x40] sm:$0xff]  }
  0x35   : > { %891 = vmatpush3.bf16.msra.mxu0 %v1006_v11  ;;  %923 = vmatprep.subr.bf16.mxu1 %v1086_v6  ;;  %v1020_v25 = vld [vmem:[%s1181_s30 + $0x88] sm:$0xff]   ;;  %v1023_v29 = vld [vmem:[%s1181_s30 + $0x80] sm:$0xff]  }
  0x36   : > { %892 = vmatprep.subr.bf16.mxu0 %v1007_v12  ;;  %v1021_v26 = vld [vmem:[%s1181_s30 + $0x8] sm:$0xff]   ;;  %v1024_v30 = vld [vmem:[%s1181_s30] sm:$0xff]  }
  0x37   : > { %v1027_v28 = vld [vmem:[%s1193_s10 + $0x4] ss:$12 sps:$4 sm:$0xff]   ;;  %v1028_v31 = vld [vmem:[%s1193_s10 + $0x8] ss:$12 sps:$4 sm:$0xff]   ;;  %v1025_v32 = vld [vmem:[%s1193_s10] ss:$12 sps:$4 sm:$0xff]  }
  0x38   : > { %924 = vmatpush3.bf16.msra.mxu1 %v1008_v13  ;;  %602 = vmatprep.mubr.bf16.mxu0 %v1027_v28  ;;  %v356_v39 = vld [vmem:[#allocation2] sm:$0xff]  ;;  %v357_v46 = vld [vmem:[#allocation2 + $0x8] sm:$0xff] }
  0x39   : > { %893 = vmatpush3.bf16.msra.mxu0 %v1009_v14  ;;  %925 = vmatprep.subr.bf16.mxu1 %v1086_v6 }
  0x3a   : > { %894 = vmatprep.subr.bf16.mxu0 %v1010_v15 }
  0x3c   : > { %926 = vmatpush3.bf16.msra.mxu1 %v1011_v16 }
  0x3d   : > { %895 = vmatpush3.bf16.msra.mxu0 %v1012_v17  ;;  %927 = vmatprep.subr.bf16.mxu1 %v1086_v6 }
  0x3e   : > { %896 = vmatprep.subr.bf16.mxu0 %v1013_v18 }
  0x40   : > { %928 = vmatpush3.bf16.msra.mxu1 %v1014_v19 }
  0x41   : > { %897 = vmatpush3.bf16.msra.mxu0 %v1015_v20  ;;  %929 = vmatprep.subr.bf16.mxu1 %v1086_v6 }
  0x42   : > { %898 = vmatprep.subr.bf16.mxu0 %v1016_v21 }
  0x44   : > { %930 = vmatpush3.bf16.msra.mxu1 %v1017_v22 }
  0x45   : > { %899 = vmatpush3.bf16.msra.mxu0 %v1018_v23  ;;  %931 = vmatprep.subr.bf16.mxu1 %v1086_v6 }
  0x46   : > { %900 = vmatprep.subr.bf16.mxu0 %v1019_v24 }
  0x48   : > { %932 = vmatpush3.bf16.msra.mxu1 %v1020_v25 }
  0x49   : > { %901 = vmatpush3.bf16.msra.mxu0 %v1021_v26  ;;  %933 = vmatprep.subr.bf16.mxu1 %v1086_v6 }
  0x4a   : > { %902 = vmatprep.subr.bf16.mxu0 %v1022_v27 }
  0x4c   : > { %934 = vmatpush3.bf16.msra.mxu1 %v1023_v29 }
  0x4d   : > { %903 = vmatpush3.bf16.msra.mxu0 %v1024_v30 }
  0x4f   : > { %936 = vmatmul.mubr.bf16.vlgmr.msra.gmra.mxu1 %v1028_v31 }
  0x50   : > { %603 = vmatmul.mubr.bf16.vlgmr.msra.gmra.mxu0 %v1025_v32 }
 0x10f   : > { %v645_v33 = vpop.f32.mrf.mxu1 }
 0x110   : > { %v904_v34 = vpop.f32.mrf.mxu0 }
 0x111   : > { %v937_v35 = vpop.f32.mrf.mxu1 }
 0x112   : > { %v905_v36 = vpop.f32.mrf.mxu0 }
 0x113   : > { %v906_v37 = vadd.f32 %v905_v36, %v904_v34  ;;  %v648_v38 = vpop.f32.mrf.mxu1 }
 0x114   : > { %v907_v40 = vpop.f32.mrf.mxu0 }
 0x115   : > { %v646_v41 = vadd.f32 %v906_v37, %v645_v33  ;;  %v938_v42 = vpop.f32.mrf.mxu1 }
 0x116   : > { %v908_v43 = vpop.f32.mrf.mxu0 }
 0x117   : > { %v652_v44 = vadd.f32 %v646_v41, %v356_v39  ;;  %v909_v45 = vadd.f32 %v908_v43, %v907_v40 }
 0x119   : > { %654 = vst [vmem:[#allocation2] sm:$0xff] %v652_v44  ;;  %v649_v47 = vadd.f32 %v909_v45, %v648_v38  ;;  %659 = sbr.rel (%p871_p13) target bundleno = 302 (0x12e), region = 70 }
 0x11b   : > { %v653_v48 = vadd.f32 %v649_v47, %v357_v46 }
 0x11d   : > { %655 = vst [vmem:[#allocation2 + $0x8] sm:$0xff] %v653_v48 }
 0x11e   : > { %v872_v51 = vld [vmem:[%s1252_s2] ss:$0 sm:$0xff] }
 0x11f   : > { %v880_v54 = vld [vmem:[%s1186_s8] sm:$0xff]  }
 0x120   : > { %v660_v49 = vld [vmem:[#allocation2] sm:$0xff]  ;;  %v881_v55 = vunpack.c.l.bf16 %v880_v54  ;;  %v882_v56 = vunpack.c.h.bf16 %v880_v54 }
 0x121   : > { %v669_v52 = vadd.f32 %v872_v51, %v660_v49 }
 0x123   : > { %v675_v57 = vadd.f32 %v881_v55, %v669_v52 }
 0x124   : > { %v661_v50 = vld [vmem:[#allocation2 + $0x8] sm:$0xff] }
 0x125   : > { %v670_v53 = vadd.f32 %v872_v51, %v661_v50  ;;  %v677_v59 = vmax.f32 %v675_v57, 0.0 }
 0x127   : > { %v676_v58 = vadd.f32 %v882_v56, %v670_v53 }
 0x129   : > { %v678_v60 = vmax.f32 %v676_v58, 0.0 }
 0x12b   : > { %v886_v61 = vpack.c.bf16 %v678_v60, %v677_v59 }
 0x12d   : > { %887 = vst [vmem:[%s1191_s18] sm:$0xff] %v886_v61  }
 0x12e PF: > { %s14_s21 = sadd.s32 1, %s1083_s21   ;;  %s1255_s15 = smov %s1063_s16 }
 0x12f   : > { %p11_p0 = scmp.ge.s32.totalorder %s14_s21, 8   ;;  %s1256_s16 = smov %s1164_s28 }
 0x130   : > { %s1257_s17 = smov %s1075_s19  ;;  %s1258_s18 = smov %s1079_s20 }
 0x131   : > { %s1259_s19 = smov %s1262_s22  ;;  %s1260_s20 = smov %s1266_s23 }
 0x132   :  { %13 = sbr.rel (!%p11_p0) target bundleno = 4 (0x4), region = 120 }

// kernel: forgery_detector_forward.27
= control target key start
LH: loop header
LB: loop body
LE: loop exit
PB: predicated region body
PF: predicated region fallthrough
CT: control target
= control target key end

     0   :  { %s1021_s12 = smov 0   ;;  %s1023_s13 = smov 0   ;;  %s1152_s0 = inlined_call_operand.vmem [shape: bf16[32,1152], index: 0, kind: input, shape index: {}]   ;;  %s1153_s1 = inlined_call_operand.vmem [shape: bf16[1152,128], index: 1, kind: input, shape index: {}]   ;;  %s1154_s2 = inlined_call_operand.vmem [shape: f32[1,128], index: 2, kind: input, shape index: {}]   ;;  %s1155_s3 = inlined_call_operand.vmem [shape: bf16[32,128], index: 3, kind: output, shape index: {}]  }
   0x1   :  { %s1025_s14 = smov 0   ;;  %s1027_s15 = smov 0  }
   0x2   :  { %s1029_s16 = smov 0   ;;  %s1031_s17 = smov 0  }
   0x3   :  { %s1033_s18 = smov 0  }
   0x4 LB: > { %s25_s19 = sadd.s32 1, %s988_s16  ;;  %s32_s20 = sadd.s32 1, %s992_s17  ;;  %s996_s18 = sphi %s1033_s18, %s13_s18   ;;  %s992_s17 = sphi %s1031_s17, %s1161_s17   ;;  %s988_s16 = sphi %s1029_s16, %s1160_s16   ;;  %s984_s15 = sphi %s1027_s15, %s1159_s15   ;;  %s980_s14 = sphi %s1025_s14, %s1158_s14   ;;  %s976_s13 = sphi %s1023_s13, %s1157_s13   ;;  %s972_s12 = sphi %s1021_s12, %s1156_s12  }
   0x5   : > { %p26_p0 = scmp.ge.s32.totalorder %s25_s19, 3  ;;  %p48_p1 = scmp.ne.s32.totalorder %s976_s13, %s972_s12 }
   0x6   : > { %p49_p2 = scmp.eq.s32.totalorder %s996_s18, 0  ;;  %s41_s24 = sadd.s32 1, %s976_s13 }
   0x7   : > { %s1163_s19 = smov (%p26_p0, %s25_s19), 0  ;;  %s1165_s20 = smov (!%p26_p0, %s32_s20), %s992_s17 }
   0x8   : > { %p50_p3 = por %p49_p2, %p48_p1  ;;  %p34_p4 = scmp.ge.s32.totalorder %s1165_s20, 2 }
   0x9   : > { %s37_s21 = ssub.s32 %s988_s16, %s1163_s19  ;;  %p748_p6 = scmp.ge.s32.totalorder %s996_s18, 6 }
   0xa   : > { %s1167_s20 = smov (%p34_p4, %s1165_s20), 0 }
   0xb   : > { %s36_s22 = ssub.s32 %s992_s17, %s1167_s20  ;;  %162 = sbr.rel (%p748_p6) target bundleno = 27 (0x1b), region = 20 }
   0xc   : > { %s38_s23 = sor.u32 %s37_s21, %s36_s22 }
   0xd   : > { %p39_p5 = scmp.eq.s32.totalorder %s38_s23, 0 }
   0xf   : > { %s1072_s25 = scalar_select %p39_p5, %s976_s13, %s41_s24  }
  0x10   : > { %165 = sbr.rel (!%p50_p3) target bundleno = 27 (0x1b), region = 24  ;;  %s167_s26 = sand.u32 (%p50_p3), 1, %s976_s13  }
  0x11   : > { %s171_s27 = smul.u32 (%p50_p3), 3, %s988_s16 }
  0x12   : > { %s852_s28 = smul.u32 (%p50_p3), 24, %s167_s26 }
  0x13   : > { %s853_s29 = smul.u32 (%p50_p3), 18, %s992_s17 }
  0x14   : > { %s169_s8 = scalar_lea.vmem (%p50_p3), [#allocation3], %s852_s28 }
  0x15   : > { %s173_s30 = sadd.s32 %s853_s29, %s171_s27 }
  0x16   : > { %s751_s4 = sshll.u32 %s173_s30, 2 }
  0x17   : > { %s175_s7 = scalar_lea.vmem %s1152_s0, %s751_s4 }
  0x18   : > { %v190_v0 = vld [vmem:[%s175_s7] sm:$0xff]  ;;  %v752_v2 = vld [vmem:[%s175_s7 + $0x8] sm:$0xf]  ;;  %v754_v3 = vld [vmem:[%s175_s7 + $0x2c] sm:$0xf] }
  0x19   : > { %v192_v1 = vld [vmem:[%s175_s7 + $0x24] sm:$0xff]  ;;  %191 = vst [vmem:[%s169_s8] sm:$0xff] %v190_v0  ;;  %753 = vst [vmem:[%s169_s8 + $0x8] sm:$0xf] %v752_v2 }
  0x1a   : > { %193 = vst [vmem:[%s169_s8 + $0xc] sm:$0xff] %v192_v1  ;;  %755 = vst [vmem:[%s169_s8 + $0x14] sm:$0xf] %v754_v3 }
  0x1b PF: > { %p756_p7 = scmp.ge.s32.totalorder %s996_s18, 1  ;;  %p222_p8 = scmp.lt.s32.totalorder %s996_s18, 7 }
  0x1d   : > { %p223_p9 = pnand %p756_p7, %p222_p8 }
  0x1e   : > { %s229_s9 = sand.u32 (!%p223_p9), 1, %s972_s12   ;;  %s268_s10 = smul.u32 (!%p223_p9), 48, %s980_s14 }
  0x1f   : > { %226 = sbr.rel (%p223_p9) target bundleno = 300 (0x12c), region = 54  ;;  %s758_s21 = sshll.u32 (!%p223_p9), %s984_s15, 1 }
  0x20   : > { %s854_s11 = smul.u32 (!%p223_p9), 24, %s229_s9  ;;  %p269_p10 = scmp.lt.s32.totalorder (!%p223_p9), %s268_s10, 143 }
  0x21   : > { %p281_p11 = scmp.lt.s32.totalorder (!%p223_p9), %s758_s21, 3  ;;  %p760_p12 = scmp.ne.s32.totalorder (!%p223_p9), %s980_s14, 0 }
  0x22   : > { %s1096_s12 = scalar_lea.vmem (!%p223_p9), [#allocation3], %s854_s11 }
  0x24   : > { %s1169_s10 = smov (!%p269_p10, %s268_s10), 143  ;;  %s1171_s21 = smov (!%p281_p11, %s758_s21), 3 }
  0x25   : > { %s757_s22 = sshll.u32 %s1169_s10, 2  ;;  %s759_s27 = sshll.u32 %s1171_s21, 2 }
  0x26   : > { %s1089_s26 = scalar_lea.vmem %s1153_s1, %s757_s22  ;;  %s1094_s30 = scalar_lea.vmem %s1155_s3, %s759_s27 }
  0x27   : > { %293 = sbr.rel (%p760_p12) target bundleno = 46 (0x2e), region = 62 }
  0x2c   : > { %v998_v4 = vmov 0.0  }
  0x2d   : > { %294 = vst [vmem:[#allocation2] sm:$0xff] %v998_v4  ;;  %295 = vst [vmem:[#allocation2 + $0x8] sm:$0xff] %v998_v4 }
  0x2e PF: > { %v914_v5 = vld [vmem:[%s1089_s26 + $0x78] sm:$0xff]   ;;  %v999_v6 = vmov 0.0   ;;  %vm1000_vm0 = vmmov 0   ;;  %v917_v9 = vld [vmem:[%s1089_s26 + $0x70] sm:$0xff]   ;;  %v920_v12 = vld [vmem:[%s1089_s26 + $0x68] sm:$0xff]   ;;  %p788_p13 = scmp.ne.s32.totalorder %s980_s14, 2 }
  0x2f   : > { %832 = vmatprep.subr.bf16.mxu1 %v999_v6  ;;  %v915_v7 = vld [vmem:[%s1089_s26 + $0xb8] sm:$0xff]   ;;  %801 = vmatprep.subr.bf16.mxu0 %v914_v5  ;;  %v918_v10 = vld [vmem:[%s1089_s26 + $0xb0] sm:$0xff]   ;;  %v921_v13 = vld [vmem:[%s1089_s26 + $0xa8] sm:$0xff]  }
  0x30   : > { %v916_v8 = vld [vmem:[%s1089_s26 + $0x38] sm:$0xff]   ;;  %848 = vmatprep.mubr.msk.bf16.mxu1 %vm1000_vm0, %v999_v6  ;;  %833 = vmatpush3.bf16.msra.mxu1 %v915_v7  ;;  %v919_v11 = vld [vmem:[%s1089_s26 + $0x30] sm:$0xff]   ;;  %v922_v14 = vld [vmem:[%s1089_s26 + $0x28] sm:$0xff]  }
  0x31   : > { %802 = vmatpush3.bf16.msra.mxu0 %v916_v8  ;;  %834 = vmatprep.subr.bf16.mxu1 %v999_v6  ;;  %v923_v15 = vld [vmem:[%s1089_s26 + $0x60] sm:$0xff]   ;;  %v926_v18 = vld [vmem:[%s1089_s26 + $0x58] sm:$0xff]   ;;  %v929_v21 = vld [vmem:[%s1089_s26 + $0x50] sm:$0xff]  }
  0x32   : > { %803 = vmatprep.subr.bf16.mxu0 %v917_v9  ;;  %v924_v16 = vld [vmem:[%s1089_s26 + $0xa0] sm:$0xff]   ;;  %v927_v19 = vld [vmem:[%s1089_s26 + $0x98] sm:$0xff]   ;;  %v930_v22 = vld [vmem:[%s1089_s26 + $0x90] sm:$0xff]  }
  0x33   : > { %v925_v17 = vld [vmem:[%s1089_s26 + $0x20] sm:$0xff]   ;;  %v928_v20 = vld [vmem:[%s1089_s26 + $0x18] sm:$0xff]   ;;  %v931_v23 = vld [vmem:[%s1089_s26 + $0x10] sm:$0xff]  }
  0x34   : > { %835 = vmatpush3.bf16.msra.mxu1 %v918_v10  ;;  %v932_v24 = vld [vmem:[%s1089_s26 + $0x48] sm:$0xff]   ;;  %v935_v27 = vld [vmem:[%s1089_s26 + $0x40] sm:$0xff]  }
  0x35   : > { %804 = vmatpush3.bf16.msra.mxu0 %v919_v11  ;;  %836 = vmatprep.subr.bf16.mxu1 %v999_v6  ;;  %v933_v25 = vld [vmem:[%s1089_s26 + $0x88] sm:$0xff]   ;;  %v936_v29 = vld [vmem:[%s1089_s26 + $0x80] sm:$0xff]  }
  0x36   : > { %805 = vmatprep.subr.bf16.mxu0 %v920_v12  ;;  %v934_v26 = vld [vmem:[%s1089_s26 + $0x8] sm:$0xff]   ;;  %v937_v30 = vld [vmem:[%s1089_s26] sm:$0xff]  }
  0x37   : > { %v940_v28 = vld [vmem:[%s1096_s12 + $0x4] ss:$12 sps:$4 sm:$0xff]   ;;  %v941_v31 = vld [vmem:[%s1096_s12 + $0x8] ss:$12 sps:$4 sm:$0xff]   ;;  %v938_v32 = vld [vmem:[%s1096_s12] ss:$12 sps:$4 sm:$0xff]  }
  0x38   : > { %837 = vmatpush3.bf16.msra.mxu1 %v921_v13  ;;  %542 = vmatprep.mubr.bf16.mxu0 %v940_v28  ;;  %v296_v39 = vld [vmem:[#allocation2] sm:$0xff]  ;;  %v297_v46 = vld [vmem:[#allocation2 + $0x8] sm:$0xff] }
  0x39   : > { %806 = vmatpush3.bf16.msra.mxu0 %v922_v14  ;;  %838 = vmatprep.subr.bf16.mxu1 %v999_v6 }
  0x3a   : > { %807 = vmatprep.subr.bf16.mxu0 %v923_v15 }
  0x3c   : > { %839 = vmatpush3.bf16.msra.mxu1 %v924_v16 }
  0x3d   : > { %808 = vmatpush3.bf16.msra.mxu0 %v925_v17  ;;  %840 = vmatprep.subr.bf16.mxu1 %v999_v6 }
  0x3e   : > { %809 = vmatprep.subr.bf16.mxu0 %v926_v18 }
  0x40   : > { %841 = vmatpush3.bf16.msra.mxu1 %v927_v19 }
  0x41   : > { %810 = vmatpush3.bf16.msra.mxu0 %v928_v20  ;;  %842 = vmatprep.subr.bf16.mxu1 %v999_v6 }
  0x42   : > { %811 = vmatprep.subr.bf16.mxu0 %v929_v21 }
  0x44   : > { %843 = vmatpush3.bf16.msra.mxu1 %v930_v22 }
  0x45   : > { %812 = vmatpush3.bf16.msra.mxu0 %v931_v23  ;;  %844 = vmatprep.subr.bf16.mxu1 %v999_v6 }
  0x46   : > { %813 = vmatprep.subr.bf16.mxu0 %v932_v24 }
  0x48   : > { %845 = vmatpush3.bf16.msra.mxu1 %v933_v25 }
  0x49   : > { %814 = vmatpush3.bf16.msra.mxu0 %v934_v26  ;;  %846 = vmatprep.subr.bf16.mxu1 %v999_v6 }
  0x4a   : > { %815 = vmatprep.subr.bf16.mxu0 %v935_v27 }
  0x4c   : > { %847 = vmatpush3.bf16.msra.mxu1 %v936_v29 }
  0x4d   : > { %816 = vmatpush3.bf16.msra.mxu0 %v937_v30 }
  0x4f   : > { %849 = vmatmul.mubr.bf16.vlgmr.msra.gmra.mxu1 %v941_v31 }
  0x50   : > { %543 = vmatmul.mubr.bf16.vlgmr.msra.gmra.mxu0 %v938_v32 }
 0x10f   : > { %v585_v33 = vpop.f32.mrf.mxu1 }
 0x110   : > { %v817_v34 = vpop.f32.mrf.mxu0 }
 0x111   : > { %v850_v35 = vpop.f32.mrf.mxu1 }
 0x112   : > { %v818_v36 = vpop.f32.mrf.mxu0 }
 0x113   : > { %v819_v37 = vadd.f32 %v818_v36, %v817_v34  ;;  %v588_v38 = vpop.f32.mrf.mxu1 }
 0x114   : > { %v820_v40 = vpop.f32.mrf.mxu0 }
 0x115   : > { %v586_v41 = vadd.f32 %v819_v37, %v585_v33  ;;  %v851_v42 = vpop.f32.mrf.mxu1 }
 0x116   : > { %v821_v43 = vpop.f32.mrf.mxu0 }
 0x117   : > { %v592_v44 = vadd.f32 %v586_v41, %v296_v39  ;;  %v822_v45 = vadd.f32 %v821_v43, %v820_v40 }
 0x119   : > { %594 = vst [vmem:[#allocation2] sm:$0xff] %v592_v44  ;;  %v589_v47 = vadd.f32 %v822_v45, %v588_v38  ;;  %599 = sbr.rel (%p788_p13) target bundleno = 300 (0x12c), region = 66 }
 0x11b   : > { %v593_v48 = vadd.f32 %v589_v47, %v297_v46 }
 0x11d   : > { %595 = vst [vmem:[#allocation2 + $0x8] sm:$0xff] %v593_v48 }
 0x11e   : > { %v789_v51 = vld [vmem:[%s1154_s2] ss:$0 sm:$0xff] }
 0x120   : > { %v600_v49 = vld [vmem:[#allocation2] sm:$0xff] }
 0x121   : > { %v609_v52 = vadd.f32 %v789_v51, %v600_v49 }
 0x123   : > { %v611_v54 = vmax.f32 %v609_v52, 0.0 }
 0x124   : > { %v601_v50 = vld [vmem:[#allocation2 + $0x8] sm:$0xff] }
 0x125   : > { %v610_v53 = vadd.f32 %v789_v51, %v601_v50 }
 0x127   : > { %v612_v55 = vmax.f32 %v610_v53, 0.0 }
 0x129   : > { %v799_v56 = vpack.c.bf16 %v612_v55, %v611_v54 }
 0x12b   : > { %800 = vst [vmem:[%s1094_s30] sm:$0xff] %v799_v56  }
 0x12c PF: > { %s13_s18 = sadd.s32 1, %s996_s18   ;;  %s1156_s12 = smov %s976_s13 }
 0x12d   : > { %p10_p0 = scmp.ge.s32.totalorder %s13_s18, 8   ;;  %s1157_s13 = smov %s1072_s25 }
 0x12e   : > { %s1158_s14 = smov %s988_s16  ;;  %s1159_s15 = smov %s992_s17 }
 0x12f   : > { %s1160_s16 = smov %s1163_s19  ;;  %s1161_s17 = smov %s1167_s20 }
 0x130   :  { %12 = sbr.rel (!%p10_p0) target bundleno = 4 (0x4), region = 113 }

// kernel: forgery_detector_forward.29
= control target key start
LH: loop header
LB: loop body
LE: loop exit
PB: predicated region body
PF: predicated region fallthrough
CT: control target
= control target key end

     0   :  { %s1901_s0 = inlined_call_operand.vmem [shape: bf16[16,1152], index: 0, kind: input, shape index: {}]   ;;  %s1902_s1 = inlined_call_operand.vmem [shape: bf16[1152,512], index: 1, kind: input, shape index: {}]   ;;  %s1903_s2 = inlined_call_operand.vmem [shape: f32[1,512], index: 2, kind: input, shape index: {}]   ;;  %s1904_s3 = inlined_call_operand.vmem [shape: f32[1,512], index: 3, kind: input, shape index: {}]   ;;  %s1905_s4 = inlined_call_operand.vmem [shape: bf16[16,512], index: 4, kind: output, shape index: {}]  }
   0x1   :  { %1908 = sst [smem:[#allocation8_spill]] %s1901_s0 }
   0x2   :  { %1909 = sst [smem:[#allocation9_spill]] %s1902_s1 }
   0x3   :  { %s1559_s15 = smov 0   ;;  %s1561_s16 = smov 0  }
   0x4   :  { %s1563_s17 = smov 0   ;;  %s1565_s18 = smov 0  }
   0x5   :  { %s1567_s19 = smov 0   ;;  %s1569_s20 = smov 0  }
   0x6   :  { %s1571_s21 = smov 0   ;;  %s1573_s22 = smov 0  }
   0x7   :  { %s1575_s23 = smov 0   ;;  %s1577_s24 = smov 0  }
   0x8   :  { %s1579_s25 = smov 0  }
   0x9 LB: > { %s1191_s26 = sadd.s32 4294967295, %s1529_s25   ;;  %s26_s27 = sadd.s32 1, %s1521_s23  ;;  %s1529_s25 = sphi %s1579_s25, %s14_s25   ;;  %s1525_s24 = sphi %s1577_s24, %s1928_s24   ;;  %s1521_s23 = sphi %s1575_s23, %s1927_s23   ;;  %s1517_s22 = sphi %s1573_s22, %s1926_s22   ;;  %s1513_s21 = sphi %s1571_s21, %s1925_s21   ;;  %s1509_s20 = sphi %s1569_s20, %s1924_s20   ;;  %s1505_s19 = sphi %s1567_s19, %s1923_s19   ;;  %s1501_s18 = sphi %s1565_s18, %s1922_s18   ;;  %s1497_s17 = sphi %s1563_s17, %s1921_s17   ;;  %s1493_s16 = sphi %s1561_s16, %s1920_s16   ;;  %s1489_s15 = sphi %s1559_s15, %s1919_s15  }
   0xa   : > { %p27_p0 = scmp.ge.s32.totalorder %s26_s27, 3  ;;  %s29_s28 = sadd.s32 1, %s1525_s24 }
   0xb   : > { %s42_s29 = sadd.s32 1, %s1509_s20  ;;  %p49_p1 = scmp.ne.s32.totalorder %s1509_s20, %s1505_s19 }
   0xc   : > { %s1930_s27 = smov (%p27_p0, %s26_s27), 0  ;;  %s1932_s28 = smov (!%p27_p0, %s29_s28), %s1525_s24 }
   0xd   : > { %1910 = sst [smem:[#allocation6_spill]] %s1930_s27  ;;  %s38_s30 = ssub.s32 %s1521_s23, %s1930_s27 }
   0xe   : > { %p50_p2 = scmp.eq.s32.totalorder %s1529_s25, 0  ;;  %p31_p3 = scmp.ge.s32.totalorder %s1932_s28, 2 }
   0xf   : > { %p40_p4 = scmp.eq.s32.totalorder %s38_s30, 0  ;;  %s70_s6 = sadd.s32 1, %s1501_s18 }
  0x10   : > { %p1626_p5 = por %p50_p2, %p49_p1  ;;  %s1934_s28 = smov (%p31_p3, %s1932_s28), 0 }
  0x11   : > { %1912 = sst [smem:[#allocation7_spill]] %s1934_s28  ;;  %s66_s8 = ssub.s32 %s1525_s24, %s1934_s28 }
  0x12   : > { %s1634_s7 = scalar_select %p40_p4, %s1509_s20, %s42_s29  }
  0x13   : > { %p77_p6 = scmp.ne.s32.totalorder %s1501_s18, %s1497_s17  ;;  %s67_s9 = sor.u32 %s66_s8, %s38_s30 }
  0x14   : > { %p148_p7 = scmp.eq.s32.totalorder %s66_s8, 0  ;;  %p68_p8 = scmp.eq.s32.totalorder %s67_s9, 0 }
  0x15   : > { %p1640_p9 = por %p77_p6, %p50_p2  ;;  %s150_s11 = sadd.s32 1, %s1493_s16 }
  0x16   : > { %p160_p10 = scmp.ne.s32.totalorder %s1493_s16, %s1489_s15  ;;  %p161_p11 = scmp.eq.s32.totalorder %s1191_s26, 5 }
  0x17   : > { %s1648_s12 = scalar_select %p68_p8, %s1501_s18, %s70_s6  }
  0x18   : > { %s1651_s13 = scalar_select %p148_p7, %s1493_s16, %s150_s11  }
  0x19   : > { %p1653_p12 = por %p161_p11, %p160_p10  ;;  %p1194_p13 = scmp.ge.s32.totalorder %s1529_s25, 6 }
  0x1b   : > { %183 = sbr.rel (%p1194_p13) target bundleno = 77 (0x4d), region = 16 }
  0x20   : > { %186 = sbr.rel (!%p1626_p5) target bundleno = 43 (0x2b), region = 20  ;;  %s188_s29 = sand.u32 (%p1626_p5), 1, %s1509_s20  }
  0x21   : > { %s1267_s30 = smul.u32 (%p1626_p5), 12, %s1521_s23  ;;  %s1915_s0 = sld [smem:[#allocation8_spill]] (%p1626_p5) }
  0x22   : > { %s1272_s8 = smul.u32 (%p1626_p5), 24, %s188_s29 }
  0x24   : > { %s190_s26 = scalar_lea.vmem (%p1626_p5), [#allocation3], %s1272_s8 }
  0x27   : > { %s196_s11 = scalar_lea.vmem %s1915_s0, %s1267_s30 }
  0x28   : > { %v211_v0 = vld [vmem:[%s196_s11] sm:$0xff]  ;;  %v1196_v2 = vld [vmem:[%s196_s11 + $0x8] sm:$0xf]  ;;  %v1198_v3 = vld [vmem:[%s196_s11 + $0x2c] sm:$0xf] }
  0x29   : > { %v213_v1 = vld [vmem:[%s196_s11 + $0x24] sm:$0xff]  ;;  %212 = vst [vmem:[%s190_s26] sm:$0xff] %v211_v0  ;;  %1197 = vst [vmem:[%s190_s26 + $0x8] sm:$0xf] %v1196_v2 }
  0x2a   : > { %214 = vst [vmem:[%s190_s26 + $0xc] sm:$0xff] %v213_v1  ;;  %1199 = vst [vmem:[%s190_s26 + $0x14] sm:$0xf] %v1198_v3 }
  0x2b PF: > { %232 = sbr.rel (!%p1640_p9) target bundleno = 77 (0x4d), region = 46  ;;  %s234_s5 = sand.u32 (%p1640_p9), 1, %s1501_s18  }
  0x2c   : > { %s1273_s29 = smul.u32 (%p1640_p9), 384, %s234_s5  ;;  %s1200_s6 = sshll.u32 (%p1640_p9), %s1525_s24, 1 }
  0x2d   : > { %s1268_s30 = smul.u32 (%p1640_p9), 192, %s1521_s23  ;;  %s1916_s1 = sld [smem:[#allocation9_spill]] (%p1640_p9) }
  0x2e   : > { %s1678_s10 = scalar_lea.vmem (%p1640_p9), [#allocation4], %s1273_s29 }
  0x2f   : > { %s240_s9 = sadd.s32 (%p1640_p9), %s1268_s30, %s1200_s6 }
  0x30   : > { %s1202_s0 = sshll.u32 %s240_s9, 2 }
  0x33   : > { %s1673_s27 = scalar_lea.vmem %s1916_s1, %s1202_s0 }
  0x34   : > { %v365_v4 = vld [vmem:[%s1673_s27] sm:$0xff]  ;;  %v367_v5 = vld [vmem:[%s1673_s27 + $0x10] sm:$0xff] }
  0x35   : > { %v369_v6 = vld [vmem:[%s1673_s27 + $0x20] sm:$0xff]  ;;  %366 = vst [vmem:[%s1678_s10] sm:$0xff] %v365_v4  ;;  %368 = vst [vmem:[%s1678_s10 + $0x8] sm:$0xff] %v367_v5  ;;  %v371_v7 = vld [vmem:[%s1673_s27 + $0x30] sm:$0xff] }
  0x36   : > { %370 = vst [vmem:[%s1678_s10 + $0x10] sm:$0xff] %v369_v6  ;;  %v373_v8 = vld [vmem:[%s1673_s27 + $0x40] sm:$0xff]  ;;  %v375_v9 = vld [vmem:[%s1673_s27 + $0x50] sm:$0xff]  ;;  %372 = vst [vmem:[%s1678_s10 + $0x18] sm:$0xff] %v371_v7 }
  0x37   : > { %374 = vst [vmem:[%s1678_s10 + $0x20] sm:$0xff] %v373_v8  ;;  %376 = vst [vmem:[%s1678_s10 + $0x28] sm:$0xff] %v375_v9  ;;  %v377_v10 = vld [vmem:[%s1673_s27 + $0x60] sm:$0xff]  ;;  %v379_v11 = vld [vmem:[%s1673_s27 + $0x70] sm:$0xff] }
  0x38   : > { %v381_v12 = vld [vmem:[%s1673_s27 + $0x80] sm:$0xff]  ;;  %378 = vst [vmem:[%s1678_s10 + $0x30] sm:$0xff] %v377_v10  ;;  %380 = vst [vmem:[%s1678_s10 + $0x38] sm:$0xff] %v379_v11  ;;  %v383_v13 = vld [vmem:[%s1673_s27 + $0x90] sm:$0xff] }
  0x39   : > { %382 = vst [vmem:[%s1678_s10 + $0x40] sm:$0xff] %v381_v12  ;;  %v385_v14 = vld [vmem:[%s1673_s27 + $0xa0] sm:$0xff]  ;;  %v387_v15 = vld [vmem:[%s1673_s27 + $0xb0] sm:$0xff]  ;;  %384 = vst [vmem:[%s1678_s10 + $0x48] sm:$0xff] %v383_v13 }
  0x3a   : > { %386 = vst [vmem:[%s1678_s10 + $0x50] sm:$0xff] %v385_v14  ;;  %388 = vst [vmem:[%s1678_s10 + $0x58] sm:$0xff] %v387_v15  ;;  %v389_v16 = vld [vmem:[%s1673_s27 + $0xc0] sm:$0xff]  ;;  %v391_v17 = vld [vmem:[%s1673_s27 + $0xd0] sm:$0xff] }
  0x3b   : > { %v393_v18 = vld [vmem:[%s1673_s27 + $0xe0] sm:$0xff]  ;;  %390 = vst [vmem:[%s1678_s10 + $0x60] sm:$0xff] %v389_v16  ;;  %392 = vst [vmem:[%s1678_s10 + $0x68] sm:$0xff] %v391_v17  ;;  %v395_v19 = vld [vmem:[%s1673_s27 + $0xf0] sm:$0xff] }
  0x3c   : > { %394 = vst [vmem:[%s1678_s10 + $0x70] sm:$0xff] %v393_v18  ;;  %v397_v20 = vld [vmem:[%s1673_s27 + $0x100] sm:$0xff]  ;;  %v399_v21 = vld [vmem:[%s1673_s27 + $0x110] sm:$0xff]  ;;  %396 = vst [vmem:[%s1678_s10 + $0x78] sm:$0xff] %v395_v19 }
  0x3d   : > { %398 = vst [vmem:[%s1678_s10 + $0x80] sm:$0xff] %v397_v20  ;;  %400 = vst [vmem:[%s1678_s10 + $0x88] sm:$0xff] %v399_v21  ;;  %v401_v22 = vld [vmem:[%s1673_s27 + $0x120] sm:$0xff]  ;;  %v403_v23 = vld [vmem:[%s1673_s27 + $0x130] sm:$0xff] }
  0x3e   : > { %v405_v24 = vld [vmem:[%s1673_s27 + $0x140] sm:$0xff]  ;;  %402 = vst [vmem:[%s1678_s10 + $0x90] sm:$0xff] %v401_v22  ;;  %404 = vst [vmem:[%s1678_s10 + $0x98] sm:$0xff] %v403_v23  ;;  %v407_v25 = vld [vmem:[%s1673_s27 + $0x150] sm:$0xff] }
  0x3f   : > { %406 = vst [vmem:[%s1678_s10 + $0xa0] sm:$0xff] %v405_v24  ;;  %v409_v26 = vld [vmem:[%s1673_s27 + $0x160] sm:$0xff]  ;;  %v411_v27 = vld [vmem:[%s1673_s27 + $0x170] sm:$0xff]  ;;  %408 = vst [vmem:[%s1678_s10 + $0xa8] sm:$0xff] %v407_v25 }
  0x40   : > { %410 = vst [vmem:[%s1678_s10 + $0xb0] sm:$0xff] %v409_v26  ;;  %412 = vst [vmem:[%s1678_s10 + $0xb8] sm:$0xff] %v411_v27  ;;  %v413_v28 = vld [vmem:[%s1673_s27 + $0x180] sm:$0xff]  ;;  %v415_v29 = vld [vmem:[%s1673_s27 + $0x190] sm:$0xff] }
  0x41   : > { %v417_v30 = vld [vmem:[%s1673_s27 + $0x1a0] sm:$0xff]  ;;  %414 = vst [vmem:[%s1678_s10 + $0xc0] sm:$0xff] %v413_v28  ;;  %416 = vst [vmem:[%s1678_s10 + $0xc8] sm:$0xff] %v415_v29  ;;  %v419_v31 = vld [vmem:[%s1673_s27 + $0x1b0] sm:$0xff] }
  0x42   : > { %418 = vst [vmem:[%s1678_s10 + $0xd0] sm:$0xff] %v417_v30  ;;  %v421_v32 = vld [vmem:[%s1673_s27 + $0x1c0] sm:$0xff]  ;;  %v423_v33 = vld [vmem:[%s1673_s27 + $0x1d0] sm:$0xff]  ;;  %420 = vst [vmem:[%s1678_s10 + $0xd8] sm:$0xff] %v419_v31 }
  0x43   : > { %422 = vst [vmem:[%s1678_s10 + $0xe0] sm:$0xff] %v421_v32  ;;  %424 = vst [vmem:[%s1678_s10 + $0xe8] sm:$0xff] %v423_v33  ;;  %v425_v34 = vld [vmem:[%s1673_s27 + $0x1e0] sm:$0xff]  ;;  %v427_v35 = vld [vmem:[%s1673_s27 + $0x1f0] sm:$0xff] }
  0x44   : > { %v429_v36 = vld [vmem:[%s1673_s27 + $0x200] sm:$0xff]  ;;  %426 = vst [vmem:[%s1678_s10 + $0xf0] sm:$0xff] %v425_v34  ;;  %428 = vst [vmem:[%s1678_s10 + $0xf8] sm:$0xff] %v427_v35  ;;  %v431_v37 = vld [vmem:[%s1673_s27 + $0x210] sm:$0xff] }
  0x45   : > { %430 = vst [vmem:[%s1678_s10 + $0x100] sm:$0xff] %v429_v36  ;;  %v433_v38 = vld [vmem:[%s1673_s27 + $0x220] sm:$0xff]  ;;  %v435_v39 = vld [vmem:[%s1673_s27 + $0x230] sm:$0xff]  ;;  %432 = vst [vmem:[%s1678_s10 + $0x108] sm:$0xff] %v431_v37 }
  0x46   : > { %434 = vst [vmem:[%s1678_s10 + $0x110] sm:$0xff] %v433_v38  ;;  %436 = vst [vmem:[%s1678_s10 + $0x118] sm:$0xff] %v435_v39  ;;  %v437_v40 = vld [vmem:[%s1673_s27 + $0x240] sm:$0xff]  ;;  %v439_v41 = vld [vmem:[%s1673_s27 + $0x250] sm:$0xff] }
  0x47   : > { %v441_v42 = vld [vmem:[%s1673_s27 + $0x260] sm:$0xff]  ;;  %438 = vst [vmem:[%s1678_s10 + $0x120] sm:$0xff] %v437_v40  ;;  %440 = vst [vmem:[%s1678_s10 + $0x128] sm:$0xff] %v439_v41  ;;  %v443_v43 = vld [vmem:[%s1673_s27 + $0x270] sm:$0xff] }
  0x48   : > { %442 = vst [vmem:[%s1678_s10 + $0x130] sm:$0xff] %v441_v42  ;;  %v445_v44 = vld [vmem:[%s1673_s27 + $0x280] sm:$0xff]  ;;  %v447_v45 = vld [vmem:[%s1673_s27 + $0x290] sm:$0xff]  ;;  %444 = vst [vmem:[%s1678_s10 + $0x138] sm:$0xff] %v443_v43 }
  0x49   : > { %446 = vst [vmem:[%s1678_s10 + $0x140] sm:$0xff] %v445_v44  ;;  %448 = vst [vmem:[%s1678_s10 + $0x148] sm:$0xff] %v447_v45  ;;  %v449_v46 = vld [vmem:[%s1673_s27 + $0x2a0] sm:$0xff]  ;;  %v451_v47 = vld [vmem:[%s1673_s27 + $0x2b0] sm:$0xff] }
  0x4a   : > { %v453_v48 = vld [vmem:[%s1673_s27 + $0x2c0] sm:$0xff]  ;;  %450 = vst [vmem:[%s1678_s10 + $0x150] sm:$0xff] %v449_v46  ;;  %452 = vst [vmem:[%s1678_s10 + $0x158] sm:$0xff] %v451_v47  ;;  %v455_v49 = vld [vmem:[%s1673_s27 + $0x2d0] sm:$0xff] }
  0x4b   : > { %454 = vst [vmem:[%s1678_s10 + $0x160] sm:$0xff] %v453_v48  ;;  %v457_v50 = vld [vmem:[%s1673_s27 + $0x2e0] sm:$0xff]  ;;  %v459_v51 = vld [vmem:[%s1673_s27 + $0x2f0] sm:$0xff]  ;;  %456 = vst [vmem:[%s1678_s10 + $0x168] sm:$0xff] %v455_v49 }
  0x4c   : > { %458 = vst [vmem:[%s1678_s10 + $0x170] sm:$0xff] %v457_v50  ;;  %460 = vst [vmem:[%s1678_s10 + $0x178] sm:$0xff] %v459_v51 }
  0x4d PF: > { %p1203_p0 = scmp.ge.s32.totalorder %s1529_s25, 1  ;;  %p481_p1 = scmp.lt.s32.totalorder %s1529_s25, 7 }
  0x4f   : > { %p482_p2 = pnand %p1203_p0, %p481_p1 }
  0x50   : > { %s488_s0 = sand.u32 (!%p482_p2), 1, %s1505_s19   ;;  %s495_s28 = sand.u32 (!%p482_p2), 1, %s1497_s17  }
  0x51   : > { %485 = sbr.rel (%p482_p2) target bundleno = 390 (0x186), region = 92  ;;  %s528_s26 = sand.u32 (!%p482_p2), 1, %s1489_s15  }
  0x52   : > { %s1274_s11 = smul.u32 (!%p482_p2), 24, %s488_s0  ;;  %s1204_s5 = sshll.u32 (!%p482_p2), %s528_s26, 4 }
  0x53   : > { %s1275_s27 = smul.u32 (!%p482_p2), 384, %s495_s28  ;;  %s1205_s29 = sshll.u32 (!%p482_p2), %s1517_s22, 1 }
  0x54   : > { %p536_p3 = scmp.lt.s32.totalorder (!%p482_p2), %s1205_s29, 3  ;;  %s1789_s19 = scalar_lea.vmem (!%p482_p2), [#allocation3], %s1274_s11 }
  0x55   : > { %s1791_s17 = scalar_lea.vmem (!%p482_p2), [#allocation4], %s1275_s27  ;;  %s1793_s15 = scalar_lea.vmem (!%p482_p2), [#allocation5], %s1204_s5 }
  0x56   : > { %s1936_s29 = smov (!%p536_p3, %s1205_s29), 3  ;;  %p1207_p4 = scmp.ne.s32.totalorder %s1513_s21, 0 }
  0x57   : > { %s538_s9 = scalar_lea.vmem %s1903_s2, %s1936_s29  ;;  %s543_s1 = scalar_lea.vmem %s1904_s3, %s1936_s29 }
  0x58   : > { %551 = sbr.rel (%p1207_p4) target bundleno = 96 (0x60), region = 104 }
  0x5d   : > { %v1531_v52 = vmov 0.0  }
  0x5e   : > { %552 = vst [vmem:[#allocation2 + $0x10] sm:$0xff] %v1531_v52  ;;  %553 = vst [vmem:[#allocation2] sm:$0xff] %v1531_v52 }
  0x5f   : > { %554 = vst [vmem:[#allocation2 + $0x18] sm:$0xff] %v1531_v52  ;;  %555 = vst [vmem:[#allocation2 + $0x8] sm:$0xff] %v1531_v52 }
  0x60 PF: > { %v1367_v53 = vld [vmem:[%s1791_s17 + $0x74] ss:$8 sps:$4 sm:$0xff]   ;;  %v1369_v54 = vld [vmem:[%s1791_s17 + $0x70] ss:$8 sps:$4 sm:$0xff]   ;;  %v1532_v55 = vmov 0   ;;  %p1259_p5 = scmp.ne.s32.totalorder %s1513_s21, 2 }
  0x61   : > { %943 = vmatprep.mubr.bf16.mxu1 %v1532_v55  ;;  %868 = vmatprep.subr.bf16.mxu0 %v1367_v53  ;;  %v1370_v56 = vld [vmem:[%s1791_s17 + $0x64] ss:$8 sps:$4 sm:$0xff]   ;;  %v1372_v57 = vld [vmem:[%s1791_s17 + $0x60] ss:$8 sps:$4 sm:$0xff]   ;;  %v1373_v58 = vld [vmem:[%s1791_s17 + $0x54] ss:$8 sps:$4 sm:$0xff]  }
  0x62   : > { %869 = vmatpush1.bf16.msra.mxu0 %v1369_v54  ;;  %v1375_v59 = vld [vmem:[%s1791_s17 + $0x50] ss:$8 sps:$4 sm:$0xff]   ;;  %v1376_v60 = vld [vmem:[%s1791_s17 + $0x44] ss:$8 sps:$4 sm:$0xff]   ;;  %v1388_v61 = vld [vmem:[%s1791_s17 + $0x174] ss:$8 sps:$4 sm:$0xff]  }
  0x63   : > { %870 = vmatprep.subr.bf16.mxu0 %v1370_v56  ;;  %v1390_v62 = vld [vmem:[%s1791_s17 + $0x170] ss:$8 sps:$4 sm:$0xff]   ;;  %v1378_v63 = vld [vmem:[%s1791_s17 + $0x40] ss:$8 sps:$4 sm:$0xff]   ;;  %v1379_v0 = vld [vmem:[%s1791_s17 + $0x34] ss:$8 sps:$4 sm:$0xff]   ;;  %911 = vmatprep.subr.bf16.mxu1 %v1388_v61 }
  0x64   : > { %v1394_v1 = vld [vmem:[%s1791_s17 + $0x164] ss:$8 sps:$4 sm:$0xff]   ;;  %912 = vmatpush1.bf16.msra.mxu1 %v1390_v62  ;;  %v1396_v2 = vld [vmem:[%s1791_s17 + $0x160] ss:$8 sps:$4 sm:$0xff]   ;;  %v1381_v3 = vld [vmem:[%s1791_s17 + $0x30] ss:$8 sps:$4 sm:$0xff]  }
  0x65   : > { %913 = vmatprep.subr.bf16.mxu1 %v1394_v1  ;;  %v1400_v4 = vld [vmem:[%s1791_s17 + $0x154] ss:$8 sps:$4 sm:$0xff]   ;;  %v1382_v5 = vld [vmem:[%s1791_s17 + $0x24] ss:$8 sps:$4 sm:$0xff]   ;;  %v1402_v6 = vld [vmem:[%s1791_s17 + $0x150] ss:$8 sps:$4 sm:$0xff]  }
  0x66   : > { %871 = vmatpush1.bf16.msra.mxu0 %v1372_v57  ;;  %v1406_v7 = vld [vmem:[%s1791_s17 + $0x144] ss:$8 sps:$4 sm:$0xff]   ;;  %v1384_v8 = vld [vmem:[%s1791_s17 + $0x20] ss:$8 sps:$4 sm:$0xff]   ;;  %v1385_v9 = vld [vmem:[%s1791_s17 + $0x14] ss:$8 sps:$4 sm:$0xff]  }
  0x67   : > { %872 = vmatprep.subr.bf16.mxu0 %v1373_v58  ;;  %v1408_v10 = vld [vmem:[%s1791_s17 + $0x140] ss:$8 sps:$4 sm:$0xff]   ;;  %v1412_v11 = vld [vmem:[%s1791_s17 + $0x134] ss:$8 sps:$4 sm:$0xff]   ;;  %v1387_v12 = vld [vmem:[%s1791_s17 + $0x10] ss:$8 sps:$4 sm:$0xff]  }
  0x68   : > { %914 = vmatpush1.bf16.msra.mxu1 %v1396_v2  ;;  %v1391_v13 = vld [vmem:[%s1791_s17 + $0x4] ss:$8 sps:$4 sm:$0xff]   ;;  %v1414_v14 = vld [vmem:[%s1791_s17 + $0x130] ss:$8 sps:$4 sm:$0xff]   ;;  %v1393_v16 = vld [vmem:[%s1791_s17] ss:$8 sps:$4 sm:$0xff]  }
  0x69   : > { %915 = vmatprep.subr.bf16.mxu1 %v1400_v4  ;;  %v1418_v15 = vld [vmem:[%s1791_s17 + $0x124] ss:$8 sps:$4 sm:$0xff]   ;;  %v1397_v17 = vld [vmem:[%s1791_s17 + $0xf4] ss:$8 sps:$4 sm:$0xff]   ;;  %v1420_v18 = vld [vmem:[%s1791_s17 + $0x120] ss:$8 sps:$4 sm:$0xff]  }
  0x6a   : > { %873 = vmatpush1.bf16.msra.mxu0 %v1375_v59  ;;  %v1424_v19 = vld [vmem:[%s1791_s17 + $0x114] ss:$8 sps:$4 sm:$0xff]   ;;  %v1399_v20 = vld [vmem:[%s1791_s17 + $0xf0] ss:$8 sps:$4 sm:$0xff]   ;;  %v1403_v21 = vld [vmem:[%s1791_s17 + $0xe4] ss:$8 sps:$4 sm:$0xff]  }
  0x6b   : > { %874 = vmatprep.subr.bf16.mxu0 %v1376_v60  ;;  %v1426_v22 = vld [vmem:[%s1791_s17 + $0x110] ss:$8 sps:$4 sm:$0xff]   ;;  %v1430_v23 = vld [vmem:[%s1791_s17 + $0x104] ss:$8 sps:$4 sm:$0xff]   ;;  %v1405_v25 = vld [vmem:[%s1791_s17 + $0xe0] ss:$8 sps:$4 sm:$0xff]  }
  0x6c   : > { %916 = vmatpush1.bf16.msra.mxu1 %v1402_v6  ;;  %v1442_v24 = vld [vmem:[%s1789_s19 + $0x4] ss:$12 sps:$4 sm:$0xff]   ;;  %v1436_v30 = vld [vmem:[%s1789_s19 + $0x8] ss:$12 sps:$4 sm:$0xff]   ;;  %v1440_v40 = vld [vmem:[%s1789_s19] ss:$12 sps:$4 sm:$0xff]  }
  0x6d   : > { %917 = vmatprep.subr.bf16.mxu1 %v1406_v7  ;;  %v1409_v26 = vld [vmem:[%s1791_s17 + $0xd4] ss:$8 sps:$4 sm:$0xff]   ;;  %900 = vmatprep.mubr.bf16.mxu0 %v1442_v24  ;;  %v1432_v27 = vld [vmem:[%s1791_s17 + $0x100] ss:$8 sps:$4 sm:$0xff]   ;;  %v1411_v28 = vld [vmem:[%s1791_s17 + $0xd0] ss:$8 sps:$4 sm:$0xff]  }
  0x6e   : > { %875 = vmatpush1.bf16.msra.mxu0 %v1378_v63  ;;  %v1415_v29 = vld [vmem:[%s1791_s17 + $0xc4] ss:$8 sps:$4 sm:$0xff]   ;;  %v1417_v31 = vld [vmem:[%s1791_s17 + $0xc0] ss:$8 sps:$4 sm:$0xff]   ;;  %v1421_v32 = vld [vmem:[%s1791_s17 + $0xb4] ss:$8 sps:$4 sm:$0xff]  }
  0x6f   : > { %876 = vmatprep.subr.bf16.mxu0 %v1379_v0  ;;  %v1423_v33 = vld [vmem:[%s1791_s17 + $0xb0] ss:$8 sps:$4 sm:$0xff]   ;;  %v1427_v34 = vld [vmem:[%s1791_s17 + $0xa4] ss:$8 sps:$4 sm:$0xff]   ;;  %v1429_v35 = vld [vmem:[%s1791_s17 + $0xa0] ss:$8 sps:$4 sm:$0xff]  }
  0x70   : > { %918 = vmatpush1.bf16.msra.mxu1 %v1408_v10  ;;  %v1433_v36 = vld [vmem:[%s1791_s17 + $0x94] ss:$8 sps:$4 sm:$0xff]   ;;  %v1435_v37 = vld [vmem:[%s1791_s17 + $0x90] ss:$8 sps:$4 sm:$0xff]   ;;  %v1437_v38 = vld [vmem:[%s1791_s17 + $0x84] ss:$8 sps:$4 sm:$0xff]  }
  0x71   : > { %919 = vmatprep.subr.bf16.mxu1 %v1412_v11  ;;  %v1439_v39 = vld [vmem:[%s1791_s17 + $0x80] ss:$8 sps:$4 sm:$0xff]   ;;  %v557_v47 = vld [vmem:[#allocation2] sm:$0xff]  ;;  %v559_v56 = vld [vmem:[#allocation2 + $0x8] sm:$0xff] }
  0x72   : > { %877 = vmatpush1.bf16.msra.mxu0 %v1381_v3  ;;  %v556_v43 = vld [vmem:[#allocation2 + $0x10] sm:$0xff]  ;;  %v558_v51 = vld [vmem:[#allocation2 + $0x18] sm:$0xff] }
  0x73   : > { %878 = vmatprep.subr.bf16.mxu0 %v1382_v5 }
  0x74   : > { %920 = vmatpush1.bf16.msra.mxu1 %v1414_v14 }
  0x75   : > { %921 = vmatprep.subr.bf16.mxu1 %v1418_v15 }
  0x76   : > { %879 = vmatpush1.bf16.msra.mxu0 %v1384_v8 }
  0x77   : > { %880 = vmatprep.subr.bf16.mxu0 %v1385_v9 }
  0x78   : > { %922 = vmatpush1.bf16.msra.mxu1 %v1420_v18 }
  0x79   : > { %923 = vmatprep.subr.bf16.mxu1 %v1424_v19 }
  0x7a   : > { %881 = vmatpush1.bf16.msra.mxu0 %v1387_v12 }
  0x7b   : > { %882 = vmatprep.subr.bf16.mxu0 %v1391_v13 }
  0x7c   : > { %924 = vmatpush1.bf16.msra.mxu1 %v1426_v22 }
  0x7d   : > { %925 = vmatprep.subr.bf16.mxu1 %v1430_v23 }
  0x7e   : > { %883 = vmatpush1.bf16.msra.mxu0 %v1393_v16 }
  0x7f   : > { %884 = vmatprep.subr.bf16.mxu0 %v1397_v17 }
  0x80   : > { %926 = vmatpush1.bf16.msra.mxu1 %v1432_v27 }
  0x82   : > { %885 = vmatpush2.bf16.msra.mxu0 %v1399_v20 }
  0x83   : > { %886 = vmatprep.subr.bf16.mxu0 %v1403_v21  ;;  %944 = vmatmul.mubr.bf16.vlgmr.msra.gmra.mxu1 %v1436_v30 }
  0x86   : > { %887 = vmatpush2.bf16.msra.mxu0 %v1405_v25 }
  0x87   : > { %888 = vmatprep.subr.bf16.mxu0 %v1409_v26 }
  0x8a   : > { %889 = vmatpush2.bf16.msra.mxu0 %v1411_v28 }
  0x8b   : > { %890 = vmatprep.subr.bf16.mxu0 %v1415_v29 }
  0x8e   : > { %891 = vmatpush2.bf16.msra.mxu0 %v1417_v31 }
  0x8f   : > { %892 = vmatprep.subr.bf16.mxu0 %v1421_v32 }
  0x92   : > { %893 = vmatpush2.bf16.msra.mxu0 %v1423_v33 }
  0x93   : > { %894 = vmatprep.subr.bf16.mxu0 %v1427_v34 }
  0x96   : > { %895 = vmatpush2.bf16.msra.mxu0 %v1429_v35 }
  0x97   : > { %896 = vmatprep.subr.bf16.mxu0 %v1433_v36 }
  0x9a   : > { %897 = vmatpush2.bf16.msra.mxu0 %v1435_v37 }
  0x9b   : > { %898 = vmatprep.subr.bf16.mxu0 %v1437_v38 }
  0x9e   : > { %899 = vmatpush2.bf16.msra.mxu0 %v1439_v39 }
  0xa1   : > { %901 = vmatmul.mubr.bf16.vlgmr.msra.gmra.mxu0 %v1440_v40 }
 0x143   : > { %v945_v41 = vpop.f32.mrf.mxu1 }
 0x145   : > { %v947_v42 = vpop.f32.mrf.mxu1 }
 0x147   : > { %v949_v46 = vpop.f32.mrf.mxu1 }
 0x149   : > { %v951_v55 = vpop.f32.mrf.mxu1 }
 0x161   : > { %v902_v44 = vpop.f32.mrf.mxu0 }
 0x162   : > { %v946_v45 = vadd.f32 %v945_v41, %v902_v44 }
 0x163   : > { %v904_v48 = vpop.f32.mrf.mxu0 }
 0x164   : > { %v954_v49 = vadd.f32 %v946_v45, %v556_v43  ;;  %v948_v50 = vadd.f32 %v947_v42, %v904_v48 }
 0x165   : > { %v906_v52 = vpop.f32.mrf.mxu0 }
 0x166   : > { %958 = vst [vmem:[#allocation2 + $0x10] sm:$0xff] %v954_v49  ;;  %v955_v53 = vadd.f32 %v948_v50, %v557_v47  ;;  %v950_v54 = vadd.f32 %v949_v46, %v906_v52 }
 0x167   : > { %v908_v57 = vpop.f32.mrf.mxu0 }
 0x168   : > { %959 = vst [vmem:[#allocation2] sm:$0xff] %v955_v53  ;;  %v956_v58 = vadd.f32 %v950_v54, %v558_v51  ;;  %v952_v59 = vadd.f32 %v951_v55, %v908_v57  ;;  %965 = sbr.rel (%p1259_p5) target bundleno = 382 (0x17e), region = 108 }
 0x16a   : > { %960 = vst [vmem:[#allocation2 + $0x18] sm:$0xff] %v956_v58  ;;  %v957_v60 = vadd.f32 %v952_v59, %v559_v56 }
 0x16c   : > { %961 = vst [vmem:[#allocation2 + $0x8] sm:$0xff] %v957_v60 }
 0x16d   : > { %v972_v61 = vlaneseq  ;;  %v986_v62 = vld [vmem:[%s543_s1] sm:$0x3]  ;;  %v1533_v1 = vmov 0   ;;  %v966_v5 = vld [vmem:[#allocation2 + $0x10] sm:$0xff] }
 0x16e   : > { %vm987_vm0 = vcmp.ne.f32.partialorder %v986_v62, 0.0  ;;  %v970_v0 = vld [vmem:[%s538_s9] sm:$0x3] }
 0x16f   : > { %v973_v63 = vshrl.u32 %v972_v61, 7  ;;  %v992_v2 = vsel %vm987_vm0, 1, %v1533_v1  ;;  %v967_v6 = vld [vmem:[#allocation2] sm:$0xff] }
 0x171   : > { %v974_v3 = vsub.s32 0, %v973_v63  ;;  %v978_v4 = vsub.s32 1, %v973_v63  ;;  %v968_v11 = vld [vmem:[#allocation2 + $0x18] sm:$0xff] }
 0x173   : > { %v975_v7 = vrot.slane %v970_v0, %v974_v3  ;;  %v979_v8 = vrot.slane %v970_v0, %v978_v4  ;;  %v996_v9 = vrot.slane %v992_v2, %v974_v3  ;;  %v1000_v10 = vrot.slane %v992_v2, %v978_v4  ;;  %v969_v12 = vld [vmem:[#allocation2 + $0x8] sm:$0xff] }
 0x175   : > { %v982_v13 = vadd.f32 %v975_v7, %v966_v5  ;;  %v983_v14 = vadd.f32 %v979_v8, %v967_v6  ;;  %vm1001_vm1 = vcmp.eq.s32.totalorder %v996_v9, 1  ;;  %vm1002_vm2 = vcmp.eq.s32.totalorder %v1000_v10, 1 }
 0x176   : > { %v984_v15 = vadd.f32 %v975_v7, %v968_v11  ;;  %v985_v16 = vadd.f32 %v979_v8, %v969_v12 }
 0x177   : > { %v988_v17 = vmax.f32 %v982_v13, 0.0  ;;  %v989_v18 = vmax.f32 %v983_v14, 0.0 }
 0x178   : > { %v990_v19 = vmax.f32 %v984_v15, 0.0  ;;  %v991_v20 = vmax.f32 %v985_v16, 0.0 }
 0x179   : > { %v1003_v21 = vsel %vm1001_vm1, %v988_v17, %v982_v13  ;;  %v1004_v22 = vsel %vm1002_vm2, %v989_v18, %v983_v14 }
 0x17a   : > { %v1269_v23 = vpack.c.bf16 %v1004_v22, %v1003_v21  ;;  %v1005_v24 = vsel %vm1001_vm1, %v990_v19, %v984_v15  ;;  %v1006_v25 = vsel %vm1002_vm2, %v991_v20, %v985_v16 }
 0x17b   : > { %v1270_v26 = vpack.c.bf16 %v1006_v25, %v1005_v24 }
 0x17c   : > { %1019 = vst [vmem:[%s1793_s15] sm:$0xff] %v1269_v23 }
 0x17d   : > { %1020 = vst [vmem:[%s1793_s15 + $0x8] sm:$0xff] %v1270_v26 }
 0x17e PF: > { %1027 = sbr.rel (!%p1653_p12) target bundleno = 390 (0x186), region = 112  ;;  %s1271_s1 = sshll.u32 (%p1653_p12), %s1517_s22, 3 }
 0x17f   : > { %s1033_s5 = scalar_lea.vmem (%p1653_p12), %s1905_s4, %s1271_s1 }
 0x183   : > { %v1064_v27 = vld [vmem:[%s1793_s15] sm:$0xff] }
 0x184   : > { %v1066_v28 = vld [vmem:[%s1793_s15 + $0x8] sm:$0xff]  ;;  %1065 = vst [vmem:[%s1033_s5] sm:$0xff] %v1064_v27 }
 0x185   : > { %1067 = vst [vmem:[%s1033_s5 + $0x10] sm:$0xff] %v1066_v28 }
 0x186 PF: > { %s14_s25 = sadd.s32 1, %s1529_s25   ;;  %s1917_s14 = sld [smem:[#allocation6_spill]] }
 0x187   : > { %p11_p6 = scmp.ge.s32.totalorder %s14_s25, 8   ;;  %s1918_s29 = sld [smem:[#allocation7_spill]] }
 0x188   : > { %s1919_s15 = smov %s1493_s16  ;;  %s1920_s16 = smov %s1651_s13 }
 0x189   : > { %s1921_s17 = smov %s1501_s18  ;;  %s1922_s18 = smov %s1648_s12 }
 0x18a   : > { %s1923_s19 = smov %s1509_s20  ;;  %s1924_s20 = smov %s1634_s7 }
 0x18b   : > { %s1925_s21 = smov %s1521_s23  ;;  %s1926_s22 = smov %s1525_s24 }
 0x18c   : > { %s1927_s23 = smov %s1917_s14  ;;  %13 = sbr.rel (!%p11_p6) target bundleno = 9 (0x9), region = 201 }
 0x18d   : > { %s1928_s24 = smov %s1918_s29 }

// kernel: forgery_detector_forward.30
= control target key start
LH: loop header
LB: loop body
LE: loop exit
PB: predicated region body
PF: predicated region fallthrough
CT: control target
= control target key end

     0   :  { %s1253_s15 = smov 0   ;;  %s1255_s16 = smov 0   ;;  %s1390_s0 = inlined_call_operand.vmem [shape: bf16[16,2304], index: 0, kind: input, shape index: {}]   ;;  %s1391_s1 = inlined_call_operand.vmem [shape: bf16[2304,256], index: 1, kind: input, shape index: {}]   ;;  %s1392_s2 = inlined_call_operand.vmem [shape: f32[1,256], index: 2, kind: input, shape index: {}]   ;;  %s1393_s3 = inlined_call_operand.vmem [shape: bf16[16,256], index: 3, kind: input, shape index: {}]   ;;  %s1394_s4 = inlined_call_operand.vmem [shape: bf16[16,256], index: 4, kind: output, shape index: {}]  }
   0x1   :  { %s1257_s17 = smov 0   ;;  %s1259_s18 = smov 0  }
   0x2   :  { %s1261_s19 = smov 0  }
   0x3 LB: > { %s26_s20 = sadd.s32 1, %s1220_s18  ;;  %p49_p1 = scmp.ne.s32.totalorder %s1212_s16, %s1208_s15  ;;  %s1224_s19 = sphi %s1261_s19, %s14_s19   ;;  %s1220_s18 = sphi %s1259_s18, %s1398_s18   ;;  %s1216_s17 = sphi %s1257_s17, %s1397_s17   ;;  %s1212_s16 = sphi %s1255_s16, %s1396_s16   ;;  %s1208_s15 = sphi %s1253_s15, %s1395_s15  }
   0x4   : > { %p27_p0 = scmp.ge.s32.totalorder %s26_s20, 6  ;;  %p50_p2 = scmp.eq.s32.totalorder %s1224_s19, 0 }
   0x5   : > { %s42_s22 = sadd.s32 1, %s1212_s16  ;;  %p994_p5 = scmp.ge.s32.totalorder %s1224_s19, 6 }
   0x6   : > { %s1400_s20 = smov (%p27_p0, %s26_s20), 0  ;;  %p51_p3 = por %p50_p2, %p49_p1 }
   0x7   : > { %s38_s21 = ssub.s32 %s1220_s18, %s1400_s20  ;;  %208 = sbr.rel (%p994_p5) target bundleno = 19 (0x13), region = 24 }
   0x8   : > { %p40_p4 = scmp.eq.s32.totalorder %s38_s21, 0 }
   0xa   : > { %s1288_s23 = scalar_select %p40_p4, %s1212_s16, %s42_s22  }
   0xc   : > { %211 = sbr.rel (!%p51_p3) target bundleno = 19 (0x13), region = 28  ;;  %s213_s24 = sand.u32 (%p51_p3), 1, %s1212_s16  }
   0xd   : > { %s1062_s25 = smul.u32 (%p51_p3), 12, %s1220_s18 }
   0xe   : > { %s1066_s26 = smul.u32 (%p51_p3), 24, %s213_s24 }
   0xf   : > { %s221_s29 = scalar_lea.vmem (%p51_p3), %s1390_s0, %s1062_s25 }
  0x10   : > { %v236_v0 = vld [vmem:[%s221_s29] sm:$0xff] (%p51_p3)  ;;  %v238_v1 = vld [vmem:[%s221_s29 + $0x48] sm:$0xff] (%p51_p3)  ;;  %s215_s30 = scalar_lea.vmem (%p51_p3), [#allocation3], %s1066_s26  ;;  %v998_v3 = vld [vmem:[%s221_s29 + $0x50] sm:$0xf] (%p51_p3) }
  0x11   : > { %v996_v2 = vld [vmem:[%s221_s29 + $0x8] sm:$0xf]  ;;  %237 = vst [vmem:[%s215_s30] sm:$0xff] %v236_v0  ;;  %239 = vst [vmem:[%s215_s30 + $0xc] sm:$0xff] %v238_v1 }
  0x12   : > { %997 = vst [vmem:[%s215_s30 + $0x8] sm:$0xf] %v996_v2  ;;  %999 = vst [vmem:[%s215_s30 + $0x14] sm:$0xf] %v998_v3 }
  0x13 PF: > { %p1000_p6 = scmp.ge.s32.totalorder %s1224_s19, 1  ;;  %p271_p7 = scmp.lt.s32.totalorder %s1224_s19, 7 }
  0x15   : > { %p272_p8 = pnand %p1000_p6, %p271_p7 }
  0x16   : > { %s278_s5 = sand.u32 (!%p272_p8), 1, %s1208_s15   ;;  %s334_s6 = smul.u32 (!%p272_p8), 48, %s1216_s17 }
  0x17   : > { %275 = sbr.rel (%p272_p8) target bundleno = 322 (0x142), region = 58  ;;  %p1003_p10 = scmp.ne.s32.totalorder (!%p272_p8), %s1216_s17, 0 }
  0x18   : > { %s1067_s7 = smul.u32 (!%p272_p8), 24, %s278_s5  ;;  %p336_p9 = scmp.lt.s32.totalorder (!%p272_p8), %s334_s6, 287 }
  0x1a   : > { %s1305_s12 = scalar_lea.vmem (!%p272_p8), [#allocation3], %s1067_s7 }
  0x1c   : > { %s1402_s6 = smov (!%p336_p9, %s334_s6), 287  ;;  %379 = sbr.rel (%p1003_p10) target bundleno = 36 (0x24), region = 66 }
  0x1d   : > { %s1063_s8 = sshll.u32 %s1402_s6, 3 }
  0x1e   : > { %s1303_s11 = scalar_lea.vmem %s1391_s1, %s1063_s8 }
  0x21   : > { %v1226_v4 = vmov 0.0  }
  0x22   : > { %380 = vst [vmem:[#allocation2 + $0x10] sm:$0xff] %v1226_v4  ;;  %381 = vst [vmem:[#allocation2] sm:$0xff] %v1226_v4 }
  0x23   : > { %382 = vst [vmem:[#allocation2 + $0x18] sm:$0xff] %v1226_v4  ;;  %383 = vst [vmem:[#allocation2 + $0x8] sm:$0xff] %v1226_v4 }
  0x24 PF: > { %v1110_v5 = vld [vmem:[%s1303_s11 + $0x74] ss:$8 sps:$4 sm:$0xff]   ;;  %v1112_v6 = vld [vmem:[%s1303_s11 + $0x70] ss:$8 sps:$4 sm:$0xff]   ;;  %v1227_v7 = vmov 0   ;;  %p1055_p11 = scmp.ne.s32.totalorder %s1216_s17, 5 }
  0x25   : > { %771 = vmatprep.mubr.bf16.mxu1 %v1227_v7  ;;  %696 = vmatprep.subr.bf16.mxu0 %v1110_v5  ;;  %v1113_v8 = vld [vmem:[%s1303_s11 + $0x64] ss:$8 sps:$4 sm:$0xff]   ;;  %v1115_v9 = vld [vmem:[%s1303_s11 + $0x60] ss:$8 sps:$4 sm:$0xff]   ;;  %v1116_v10 = vld [vmem:[%s1303_s11 + $0x54] ss:$8 sps:$4 sm:$0xff]  }
  0x26   : > { %697 = vmatpush1.bf16.msra.mxu0 %v1112_v6  ;;  %v1118_v11 = vld [vmem:[%s1303_s11 + $0x50] ss:$8 sps:$4 sm:$0xff]   ;;  %v1119_v12 = vld [vmem:[%s1303_s11 + $0x44] ss:$8 sps:$4 sm:$0xff]   ;;  %v1131_v13 = vld [vmem:[%s1303_s11 + $0x174] ss:$8 sps:$4 sm:$0xff]  }
  0x27   : > { %698 = vmatprep.subr.bf16.mxu0 %v1113_v8  ;;  %v1133_v14 = vld [vmem:[%s1303_s11 + $0x170] ss:$8 sps:$4 sm:$0xff]   ;;  %v1121_v15 = vld [vmem:[%s1303_s11 + $0x40] ss:$8 sps:$4 sm:$0xff]   ;;  %v1122_v16 = vld [vmem:[%s1303_s11 + $0x34] ss:$8 sps:$4 sm:$0xff]   ;;  %739 = vmatprep.subr.bf16.mxu1 %v1131_v13 }
  0x28   : > { %v1137_v17 = vld [vmem:[%s1303_s11 + $0x164] ss:$8 sps:$4 sm:$0xff]   ;;  %740 = vmatpush1.bf16.msra.mxu1 %v1133_v14  ;;  %v1139_v18 = vld [vmem:[%s1303_s11 + $0x160] ss:$8 sps:$4 sm:$0xff]   ;;  %v1124_v19 = vld [vmem:[%s1303_s11 + $0x30] ss:$8 sps:$4 sm:$0xff]  }
  0x29   : > { %741 = vmatprep.subr.bf16.mxu1 %v1137_v17  ;;  %v1143_v20 = vld [vmem:[%s1303_s11 + $0x154] ss:$8 sps:$4 sm:$0xff]   ;;  %v1125_v21 = vld [vmem:[%s1303_s11 + $0x24] ss:$8 sps:$4 sm:$0xff]   ;;  %v1145_v22 = vld [vmem:[%s1303_s11 + $0x150] ss:$8 sps:$4 sm:$0xff]  }
  0x2a   : > { %699 = vmatpush1.bf16.msra.mxu0 %v1115_v9  ;;  %v1149_v23 = vld [vmem:[%s1303_s11 + $0x144] ss:$8 sps:$4 sm:$0xff]   ;;  %v1127_v24 = vld [vmem:[%s1303_s11 + $0x20] ss:$8 sps:$4 sm:$0xff]   ;;  %v1128_v25 = vld [vmem:[%s1303_s11 + $0x14] ss:$8 sps:$4 sm:$0xff]  }
  0x2b   : > { %700 = vmatprep.subr.bf16.mxu0 %v1116_v10  ;;  %v1151_v26 = vld [vmem:[%s1303_s11 + $0x140] ss:$8 sps:$4 sm:$0xff]   ;;  %v1155_v27 = vld [vmem:[%s1303_s11 + $0x134] ss:$8 sps:$4 sm:$0xff]   ;;  %v1130_v28 = vld [vmem:[%s1303_s11 + $0x10] ss:$8 sps:$4 sm:$0xff]  }
  0x2c   : > { %742 = vmatpush1.bf16.msra.mxu1 %v1139_v18  ;;  %v1134_v29 = vld [vmem:[%s1303_s11 + $0x4] ss:$8 sps:$4 sm:$0xff]   ;;  %v1157_v30 = vld [vmem:[%s1303_s11 + $0x130] ss:$8 sps:$4 sm:$0xff]   ;;  %v1136_v32 = vld [vmem:[%s1303_s11] ss:$8 sps:$4 sm:$0xff]  }
  0x2d   : > { %743 = vmatprep.subr.bf16.mxu1 %v1143_v20  ;;  %v1161_v31 = vld [vmem:[%s1303_s11 + $0x124] ss:$8 sps:$4 sm:$0xff]   ;;  %v1140_v33 = vld [vmem:[%s1303_s11 + $0xf4] ss:$8 sps:$4 sm:$0xff]   ;;  %v1163_v34 = vld [vmem:[%s1303_s11 + $0x120] ss:$8 sps:$4 sm:$0xff]  }
  0x2e   : > { %701 = vmatpush1.bf16.msra.mxu0 %v1118_v11  ;;  %v1167_v35 = vld [vmem:[%s1303_s11 + $0x114] ss:$8 sps:$4 sm:$0xff]   ;;  %v1142_v36 = vld [vmem:[%s1303_s11 + $0xf0] ss:$8 sps:$4 sm:$0xff]   ;;  %v1146_v37 = vld [vmem:[%s1303_s11 + $0xe4] ss:$8 sps:$4 sm:$0xff]  }
  0x2f   : > { %702 = vmatprep.subr.bf16.mxu0 %v1119_v12  ;;  %v1169_v38 = vld [vmem:[%s1303_s11 + $0x110] ss:$8 sps:$4 sm:$0xff]   ;;  %v1173_v39 = vld [vmem:[%s1303_s11 + $0x104] ss:$8 sps:$4 sm:$0xff]   ;;  %v1148_v41 = vld [vmem:[%s1303_s11 + $0xe0] ss:$8 sps:$4 sm:$0xff]  }
  0x30   : > { %744 = vmatpush1.bf16.msra.mxu1 %v1145_v22  ;;  %v1185_v40 = vld [vmem:[%s1305_s12 + $0x4] ss:$12 sps:$4 sm:$0xff]   ;;  %v1179_v46 = vld [vmem:[%s1305_s12 + $0x8] ss:$12 sps:$4 sm:$0xff]   ;;  %v1183_v56 = vld [vmem:[%s1305_s12] ss:$12 sps:$4 sm:$0xff]  }
  0x31   : > { %745 = vmatprep.subr.bf16.mxu1 %v1149_v23  ;;  %v1152_v42 = vld [vmem:[%s1303_s11 + $0xd4] ss:$8 sps:$4 sm:$0xff]   ;;  %728 = vmatprep.mubr.bf16.mxu0 %v1185_v40  ;;  %v1175_v43 = vld [vmem:[%s1303_s11 + $0x100] ss:$8 sps:$4 sm:$0xff]   ;;  %v1154_v44 = vld [vmem:[%s1303_s11 + $0xd0] ss:$8 sps:$4 sm:$0xff]  }
  0x32   : > { %703 = vmatpush1.bf16.msra.mxu0 %v1121_v15  ;;  %v1158_v45 = vld [vmem:[%s1303_s11 + $0xc4] ss:$8 sps:$4 sm:$0xff]   ;;  %v1160_v47 = vld [vmem:[%s1303_s11 + $0xc0] ss:$8 sps:$4 sm:$0xff]   ;;  %v1164_v48 = vld [vmem:[%s1303_s11 + $0xb4] ss:$8 sps:$4 sm:$0xff]  }
  0x33   : > { %704 = vmatprep.subr.bf16.mxu0 %v1122_v16  ;;  %v1166_v49 = vld [vmem:[%s1303_s11 + $0xb0] ss:$8 sps:$4 sm:$0xff]   ;;  %v1170_v50 = vld [vmem:[%s1303_s11 + $0xa4] ss:$8 sps:$4 sm:$0xff]   ;;  %v1172_v51 = vld [vmem:[%s1303_s11 + $0xa0] ss:$8 sps:$4 sm:$0xff]  }
  0x34   : > { %746 = vmatpush1.bf16.msra.mxu1 %v1151_v26  ;;  %v1176_v52 = vld [vmem:[%s1303_s11 + $0x94] ss:$8 sps:$4 sm:$0xff]   ;;  %v1178_v53 = vld [vmem:[%s1303_s11 + $0x90] ss:$8 sps:$4 sm:$0xff]   ;;  %v1180_v54 = vld [vmem:[%s1303_s11 + $0x84] ss:$8 sps:$4 sm:$0xff]  }
  0x35   : > { %747 = vmatprep.subr.bf16.mxu1 %v1155_v27  ;;  %v1182_v55 = vld [vmem:[%s1303_s11 + $0x80] ss:$8 sps:$4 sm:$0xff]   ;;  %v384_v59 = vld [vmem:[#allocation2 + $0x10] sm:$0xff]  ;;  %v386_v3 = vld [vmem:[#allocation2 + $0x18] sm:$0xff] }
  0x36   : > { %705 = vmatpush1.bf16.msra.mxu0 %v1124_v19  ;;  %v385_v63 = vld [vmem:[#allocation2] sm:$0xff]  ;;  %v387_v8 = vld [vmem:[#allocation2 + $0x8] sm:$0xff] }
  0x37   : > { %706 = vmatprep.subr.bf16.mxu0 %v1125_v21 }
  0x38   : > { %748 = vmatpush1.bf16.msra.mxu1 %v1157_v30 }
  0x39   : > { %749 = vmatprep.subr.bf16.mxu1 %v1161_v31 }
  0x3a   : > { %707 = vmatpush1.bf16.msra.mxu0 %v1127_v24 }
  0x3b   : > { %708 = vmatprep.subr.bf16.mxu0 %v1128_v25 }
  0x3c   : > { %750 = vmatpush1.bf16.msra.mxu1 %v1163_v34 }
  0x3d   : > { %751 = vmatprep.subr.bf16.mxu1 %v1167_v35 }
  0x3e   : > { %709 = vmatpush1.bf16.msra.mxu0 %v1130_v28 }
  0x3f   : > { %710 = vmatprep.subr.bf16.mxu0 %v1134_v29 }
  0x40   : > { %752 = vmatpush1.bf16.msra.mxu1 %v1169_v38 }
  0x41   : > { %753 = vmatprep.subr.bf16.mxu1 %v1173_v39 }
  0x42   : > { %711 = vmatpush1.bf16.msra.mxu0 %v1136_v32 }
  0x43   : > { %712 = vmatprep.subr.bf16.mxu0 %v1140_v33 }
  0x44   : > { %754 = vmatpush1.bf16.msra.mxu1 %v1175_v43 }
  0x46   : > { %713 = vmatpush2.bf16.msra.mxu0 %v1142_v36 }
  0x47   : > { %714 = vmatprep.subr.bf16.mxu0 %v1146_v37  ;;  %772 = vmatmul.mubr.bf16.vlgmr.msra.gmra.mxu1 %v1179_v46 }
  0x4a   : > { %715 = vmatpush2.bf16.msra.mxu0 %v1148_v41 }
  0x4b   : > { %716 = vmatprep.subr.bf16.mxu0 %v1152_v42 }
  0x4e   : > { %717 = vmatpush2.bf16.msra.mxu0 %v1154_v44 }
  0x4f   : > { %718 = vmatprep.subr.bf16.mxu0 %v1158_v45 }
  0x52   : > { %719 = vmatpush2.bf16.msra.mxu0 %v1160_v47 }
  0x53   : > { %720 = vmatprep.subr.bf16.mxu0 %v1164_v48 }
  0x56   : > { %721 = vmatpush2.bf16.msra.mxu0 %v1166_v49 }
  0x57   : > { %722 = vmatprep.subr.bf16.mxu0 %v1170_v50 }
  0x5a   : > { %723 = vmatpush2.bf16.msra.mxu0 %v1172_v51 }
  0x5b   : > { %724 = vmatprep.subr.bf16.mxu0 %v1176_v52 }
  0x5e   : > { %725 = vmatpush2.bf16.msra.mxu0 %v1178_v53 }
  0x5f   : > { %726 = vmatprep.subr.bf16.mxu0 %v1180_v54 }
  0x62   : > { %727 = vmatpush2.bf16.msra.mxu0 %v1182_v55 }
  0x65   : > { %729 = vmatmul.mubr.bf16.vlgmr.msra.gmra.mxu0 %v1183_v56 }
 0x107   : > { %v773_v57 = vpop.f32.mrf.mxu1 }
 0x109   : > { %v775_v58 = vpop.f32.mrf.mxu1 }
 0x10b   : > { %v777_v62 = vpop.f32.mrf.mxu1 }
 0x10d   : > { %v779_v7 = vpop.f32.mrf.mxu1 }
 0x125   : > { %v730_v60 = vpop.f32.mrf.mxu0 }
 0x126   : > { %v774_v61 = vadd.f32 %v773_v57, %v730_v60 }
 0x127   : > { %v732_v0 = vpop.f32.mrf.mxu0 }
 0x128   : > { %v782_v1 = vadd.f32 %v774_v61, %v384_v59  ;;  %v776_v2 = vadd.f32 %v775_v58, %v732_v0 }
 0x129   : > { %v734_v4 = vpop.f32.mrf.mxu0 }
 0x12a   : > { %786 = vst [vmem:[#allocation2 + $0x10] sm:$0xff] %v782_v1  ;;  %v783_v5 = vadd.f32 %v776_v2, %v385_v63  ;;  %v778_v6 = vadd.f32 %v777_v62, %v734_v4 }
 0x12b   : > { %v736_v9 = vpop.f32.mrf.mxu0 }
 0x12c   : > { %787 = vst [vmem:[#allocation2] sm:$0xff] %v783_v5  ;;  %v784_v10 = vadd.f32 %v778_v6, %v386_v3  ;;  %v780_v11 = vadd.f32 %v779_v7, %v736_v9  ;;  %793 = sbr.rel (%p1055_p11) target bundleno = 322 (0x142), region = 70 }
 0x12e   : > { %788 = vst [vmem:[#allocation2 + $0x18] sm:$0xff] %v784_v10  ;;  %v785_v12 = vadd.f32 %v780_v11, %v387_v8 }
 0x130   : > { %789 = vst [vmem:[#allocation2 + $0x8] sm:$0xff] %v785_v12 }
 0x131   : > { %v800_v13 = vlaneseq  ;;  %v814_v15 = vld [vmem:[%s1393_s3] sm:$0xff]  ;;  %v815_v17 = vld [vmem:[%s1393_s3 + $0x8] sm:$0xff]  ;;  %v794_v18 = vld [vmem:[#allocation2 + $0x10] sm:$0xff] }
 0x132   : > { %v798_v16 = vld [vmem:[%s1392_s2] sm:$0x3]  ;;  %v816_v22 = vunpack.c.l.bf16 %v814_v15  ;;  %v817_v23 = vunpack.c.h.bf16 %v814_v15  ;;  %v818_v28 = vunpack.c.l.bf16 %v815_v17  ;;  %v819_v29 = vunpack.c.h.bf16 %v815_v17 }
 0x133   : > { %v801_v14 = vshrl.u32 %v800_v13, 7  ;;  %v795_v21 = vld [vmem:[#allocation2] sm:$0xff] }
 0x135   : > { %v802_v19 = vsub.s32 0, %v801_v14  ;;  %v806_v20 = vsub.s32 1, %v801_v14  ;;  %v796_v24 = vld [vmem:[#allocation2 + $0x18] sm:$0xff] }
 0x137   : > { %v797_v25 = vld [vmem:[#allocation2 + $0x8] sm:$0xff]  ;;  %v803_v26 = vrot.slane %v798_v16, %v802_v19  ;;  %v807_v27 = vrot.slane %v798_v16, %v806_v20 }
 0x139   : > { %v810_v30 = vadd.f32 %v803_v26, %v794_v18  ;;  %v811_v31 = vadd.f32 %v807_v27, %v795_v21  ;;  %v812_v32 = vadd.f32 %v803_v26, %v796_v24  ;;  %v813_v33 = vadd.f32 %v807_v27, %v797_v25 }
 0x13b   : > { %v820_v34 = vadd.f32 %v816_v22, %v810_v30  ;;  %v821_v35 = vadd.f32 %v817_v23, %v811_v31  ;;  %v822_v36 = vadd.f32 %v818_v28, %v812_v32  ;;  %v823_v37 = vadd.f32 %v819_v29, %v813_v33 }
 0x13d   : > { %v824_v38 = vmax.f32 %v820_v34, 0.0  ;;  %v825_v39 = vmax.f32 %v821_v35, 0.0  ;;  %v826_v40 = vmax.f32 %v822_v36, 0.0  ;;  %v827_v41 = vmax.f32 %v823_v37, 0.0 }
 0x13f   : > { %v1064_v42 = vpack.c.bf16 %v825_v39, %v824_v38  ;;  %v1065_v43 = vpack.c.bf16 %v827_v41, %v826_v40 }
 0x141   : > { %840 = vst [vmem:[%s1394_s4] sm:$0xff] %v1064_v42  ;;  %841 = vst [vmem:[%s1394_s4 + $0x8] sm:$0xff] %v1065_v43 }
 0x142 PF: > { %s14_s19 = sadd.s32 1, %s1224_s19   ;;  %s1395_s15 = smov %s1212_s16 }
 0x143   : > { %p11_p12 = scmp.ge.s32.totalorder %s14_s19, 8   ;;  %s1396_s16 = smov %s1288_s23 }
 0x144   : > { %s1397_s17 = smov %s1220_s18  ;;  %s1398_s18 = smov %s1400_s20 }
 0x145   :  { %13 = sbr.rel (!%p11_p12) target bundleno = 3 (0x3), region = 120 }

// kernel: forgery_detector_forward.31
= control target key start
LH: loop header
LB: loop body
LE: loop exit
PB: predicated region body
PF: predicated region fallthrough
CT: control target
= control target key end

     0   :  { %s1148_s12 = smov 0   ;;  %s1150_s13 = smov 0   ;;  %s1279_s0 = inlined_call_operand.vmem [shape: bf16[16,2304], index: 0, kind: input, shape index: {}]   ;;  %s1280_s1 = inlined_call_operand.vmem [shape: bf16[2304,256], index: 1, kind: input, shape index: {}]   ;;  %s1281_s2 = inlined_call_operand.vmem [shape: f32[1,256], index: 2, kind: input, shape index: {}]   ;;  %s1282_s3 = inlined_call_operand.vmem [shape: bf16[16,256], index: 3, kind: output, shape index: {}]  }
   0x1   :  { %s1152_s14 = smov 0   ;;  %s1154_s15 = smov 0  }
   0x2   :  { %s1156_s16 = smov 0  }
   0x3 LB: > { %s25_s17 = sadd.s32 1, %s1120_s15  ;;  %p48_p1 = scmp.ne.s32.totalorder %s1112_s13, %s1108_s12  ;;  %s1124_s16 = sphi %s1156_s16, %s13_s16   ;;  %s1120_s15 = sphi %s1154_s15, %s1286_s15   ;;  %s1116_s14 = sphi %s1152_s14, %s1285_s14   ;;  %s1112_s13 = sphi %s1150_s13, %s1284_s13   ;;  %s1108_s12 = sphi %s1148_s12, %s1283_s12  }
   0x4   : > { %p26_p0 = scmp.ge.s32.totalorder %s25_s17, 6  ;;  %p49_p2 = scmp.eq.s32.totalorder %s1124_s16, 0 }
   0x5   : > { %s41_s19 = sadd.s32 1, %s1112_s13  ;;  %p894_p5 = scmp.ge.s32.totalorder %s1124_s16, 6 }
   0x6   : > { %s1288_s17 = smov (%p26_p0, %s25_s17), 0  ;;  %p50_p3 = por %p49_p2, %p48_p1 }
   0x7   : > { %s37_s18 = ssub.s32 %s1120_s15, %s1288_s17  ;;  %164 = sbr.rel (%p894_p5) target bundleno = 19 (0x13), region = 20 }
   0x8   : > { %p39_p4 = scmp.eq.s32.totalorder %s37_s18, 0 }
   0xa   : > { %s1183_s20 = scalar_select %p39_p4, %s1112_s13, %s41_s19  }
   0xc   : > { %167 = sbr.rel (!%p50_p3) target bundleno = 19 (0x13), region = 24  ;;  %s169_s21 = sand.u32 (%p50_p3), 1, %s1112_s13  }
   0xd   : > { %s962_s22 = smul.u32 (%p50_p3), 12, %s1120_s15 }
   0xe   : > { %s966_s23 = smul.u32 (%p50_p3), 24, %s169_s21 }
   0xf   : > { %s177_s26 = scalar_lea.vmem (%p50_p3), %s1279_s0, %s962_s22 }
  0x10   : > { %v192_v0 = vld [vmem:[%s177_s26] sm:$0xff] (%p50_p3)  ;;  %v194_v1 = vld [vmem:[%s177_s26 + $0x48] sm:$0xff] (%p50_p3)  ;;  %s171_s27 = scalar_lea.vmem (%p50_p3), [#allocation3], %s966_s23  ;;  %v898_v3 = vld [vmem:[%s177_s26 + $0x50] sm:$0xf] (%p50_p3) }
  0x11   : > { %v896_v2 = vld [vmem:[%s177_s26 + $0x8] sm:$0xf]  ;;  %193 = vst [vmem:[%s171_s27] sm:$0xff] %v192_v0  ;;  %195 = vst [vmem:[%s171_s27 + $0xc] sm:$0xff] %v194_v1 }
  0x12   : > { %897 = vst [vmem:[%s171_s27 + $0x8] sm:$0xf] %v896_v2  ;;  %899 = vst [vmem:[%s171_s27 + $0x14] sm:$0xf] %v898_v3 }
  0x13 PF: > { %p900_p6 = scmp.ge.s32.totalorder %s1124_s16, 1  ;;  %p227_p7 = scmp.lt.s32.totalorder %s1124_s16, 7 }
  0x15   : > { %p228_p8 = pnand %p900_p6, %p227_p7 }
  0x16   : > { %s234_s28 = sand.u32 (!%p228_p8), 1, %s1108_s12   ;;  %s278_s29 = smul.u32 (!%p228_p8), 48, %s1116_s14 }
  0x17   : > { %231 = sbr.rel (%p228_p8) target bundleno = 320 (0x140), region = 54  ;;  %p903_p10 = scmp.ne.s32.totalorder (!%p228_p8), %s1116_s14, 0 }
  0x18   : > { %s967_s30 = smul.u32 (!%p228_p8), 24, %s234_s28  ;;  %p280_p9 = scmp.lt.s32.totalorder (!%p228_p8), %s278_s29, 287 }
  0x1a   : > { %s1200_s8 = scalar_lea.vmem (!%p228_p8), [#allocation3], %s967_s30 }
  0x1c   : > { %s1290_s29 = smov (!%p280_p9, %s278_s29), 287  ;;  %311 = sbr.rel (%p903_p10) target bundleno = 36 (0x24), region = 62 }
  0x1d   : > { %s963_s4 = sshll.u32 %s1290_s29, 3 }
  0x1e   : > { %s1198_s7 = scalar_lea.vmem %s1280_s1, %s963_s4 }
  0x21   : > { %v1126_v4 = vmov 0.0  }
  0x22   : > { %312 = vst [vmem:[#allocation2 + $0x10] sm:$0xff] %v1126_v4  ;;  %313 = vst [vmem:[#allocation2] sm:$0xff] %v1126_v4 }
  0x23   : > { %314 = vst [vmem:[#allocation2 + $0x18] sm:$0xff] %v1126_v4  ;;  %315 = vst [vmem:[#allocation2 + $0x8] sm:$0xff] %v1126_v4 }
  0x24 PF: > { %v1010_v5 = vld [vmem:[%s1198_s7 + $0x74] ss:$8 sps:$4 sm:$0xff]   ;;  %v1012_v6 = vld [vmem:[%s1198_s7 + $0x70] ss:$8 sps:$4 sm:$0xff]   ;;  %v1127_v7 = vmov 0   ;;  %p955_p11 = scmp.ne.s32.totalorder %s1116_s14, 5 }
  0x25   : > { %703 = vmatprep.mubr.bf16.mxu1 %v1127_v7  ;;  %628 = vmatprep.subr.bf16.mxu0 %v1010_v5  ;;  %v1013_v8 = vld [vmem:[%s1198_s7 + $0x64] ss:$8 sps:$4 sm:$0xff]   ;;  %v1015_v9 = vld [vmem:[%s1198_s7 + $0x60] ss:$8 sps:$4 sm:$0xff]   ;;  %v1016_v10 = vld [vmem:[%s1198_s7 + $0x54] ss:$8 sps:$4 sm:$0xff]  }
  0x26   : > { %629 = vmatpush1.bf16.msra.mxu0 %v1012_v6  ;;  %v1018_v11 = vld [vmem:[%s1198_s7 + $0x50] ss:$8 sps:$4 sm:$0xff]   ;;  %v1019_v12 = vld [vmem:[%s1198_s7 + $0x44] ss:$8 sps:$4 sm:$0xff]   ;;  %v1031_v13 = vld [vmem:[%s1198_s7 + $0x174] ss:$8 sps:$4 sm:$0xff]  }
  0x27   : > { %630 = vmatprep.subr.bf16.mxu0 %v1013_v8  ;;  %v1033_v14 = vld [vmem:[%s1198_s7 + $0x170] ss:$8 sps:$4 sm:$0xff]   ;;  %v1021_v15 = vld [vmem:[%s1198_s7 + $0x40] ss:$8 sps:$4 sm:$0xff]   ;;  %v1022_v16 = vld [vmem:[%s1198_s7 + $0x34] ss:$8 sps:$4 sm:$0xff]   ;;  %671 = vmatprep.subr.bf16.mxu1 %v1031_v13 }
  0x28   : > { %v1037_v17 = vld [vmem:[%s1198_s7 + $0x164] ss:$8 sps:$4 sm:$0xff]   ;;  %672 = vmatpush1.bf16.msra.mxu1 %v1033_v14  ;;  %v1039_v18 = vld [vmem:[%s1198_s7 + $0x160] ss:$8 sps:$4 sm:$0xff]   ;;  %v1024_v19 = vld [vmem:[%s1198_s7 + $0x30] ss:$8 sps:$4 sm:$0xff]  }
  0x29   : > { %673 = vmatprep.subr.bf16.mxu1 %v1037_v17  ;;  %v1043_v20 = vld [vmem:[%s1198_s7 + $0x154] ss:$8 sps:$4 sm:$0xff]   ;;  %v1025_v21 = vld [vmem:[%s1198_s7 + $0x24] ss:$8 sps:$4 sm:$0xff]   ;;  %v1045_v22 = vld [vmem:[%s1198_s7 + $0x150] ss:$8 sps:$4 sm:$0xff]  }
  0x2a   : > { %631 = vmatpush1.bf16.msra.mxu0 %v1015_v9  ;;  %v1049_v23 = vld [vmem:[%s1198_s7 + $0x144] ss:$8 sps:$4 sm:$0xff]   ;;  %v1027_v24 = vld [vmem:[%s1198_s7 + $0x20] ss:$8 sps:$4 sm:$0xff]   ;;  %v1028_v25 = vld [vmem:[%s1198_s7 + $0x14] ss:$8 sps:$4 sm:$0xff]  }
  0x2b   : > { %632 = vmatprep.subr.bf16.mxu0 %v1016_v10  ;;  %v1051_v26 = vld [vmem:[%s1198_s7 + $0x140] ss:$8 sps:$4 sm:$0xff]   ;;  %v1055_v27 = vld [vmem:[%s1198_s7 + $0x134] ss:$8 sps:$4 sm:$0xff]   ;;  %v1030_v28 = vld [vmem:[%s1198_s7 + $0x10] ss:$8 sps:$4 sm:$0xff]  }
  0x2c   : > { %674 = vmatpush1.bf16.msra.mxu1 %v1039_v18  ;;  %v1034_v29 = vld [vmem:[%s1198_s7 + $0x4] ss:$8 sps:$4 sm:$0xff]   ;;  %v1057_v30 = vld [vmem:[%s1198_s7 + $0x130] ss:$8 sps:$4 sm:$0xff]   ;;  %v1036_v32 = vld [vmem:[%s1198_s7] ss:$8 sps:$4 sm:$0xff]  }
  0x2d   : > { %675 = vmatprep.subr.bf16.mxu1 %v1043_v20  ;;  %v1061_v31 = vld [vmem:[%s1198_s7 + $0x124] ss:$8 sps:$4 sm:$0xff]   ;;  %v1040_v33 = vld [vmem:[%s1198_s7 + $0xf4] ss:$8 sps:$4 sm:$0xff]   ;;  %v1063_v34 = vld [vmem:[%s1198_s7 + $0x120] ss:$8 sps:$4 sm:$0xff]  }
  0x2e   : > { %633 = vmatpush1.bf16.msra.mxu0 %v1018_v11  ;;  %v1067_v35 = vld [vmem:[%s1198_s7 + $0x114] ss:$8 sps:$4 sm:$0xff]   ;;  %v1042_v36 = vld [vmem:[%s1198_s7 + $0xf0] ss:$8 sps:$4 sm:$0xff]   ;;  %v1046_v37 = vld [vmem:[%s1198_s7 + $0xe4] ss:$8 sps:$4 sm:$0xff]  }
  0x2f   : > { %634 = vmatprep.subr.bf16.mxu0 %v1019_v12  ;;  %v1069_v38 = vld [vmem:[%s1198_s7 + $0x110] ss:$8 sps:$4 sm:$0xff]   ;;  %v1073_v39 = vld [vmem:[%s1198_s7 + $0x104] ss:$8 sps:$4 sm:$0xff]   ;;  %v1048_v41 = vld [vmem:[%s1198_s7 + $0xe0] ss:$8 sps:$4 sm:$0xff]  }
  0x30   : > { %676 = vmatpush1.bf16.msra.mxu1 %v1045_v22  ;;  %v1085_v40 = vld [vmem:[%s1200_s8 + $0x4] ss:$12 sps:$4 sm:$0xff]   ;;  %v1079_v46 = vld [vmem:[%s1200_s8 + $0x8] ss:$12 sps:$4 sm:$0xff]   ;;  %v1083_v56 = vld [vmem:[%s1200_s8] ss:$12 sps:$4 sm:$0xff]  }
  0x31   : > { %677 = vmatprep.subr.bf16.mxu1 %v1049_v23  ;;  %v1052_v42 = vld [vmem:[%s1198_s7 + $0xd4] ss:$8 sps:$4 sm:$0xff]   ;;  %660 = vmatprep.mubr.bf16.mxu0 %v1085_v40  ;;  %v1075_v43 = vld [vmem:[%s1198_s7 + $0x100] ss:$8 sps:$4 sm:$0xff]   ;;  %v1054_v44 = vld [vmem:[%s1198_s7 + $0xd0] ss:$8 sps:$4 sm:$0xff]  }
  0x32   : > { %635 = vmatpush1.bf16.msra.mxu0 %v1021_v15  ;;  %v1058_v45 = vld [vmem:[%s1198_s7 + $0xc4] ss:$8 sps:$4 sm:$0xff]   ;;  %v1060_v47 = vld [vmem:[%s1198_s7 + $0xc0] ss:$8 sps:$4 sm:$0xff]   ;;  %v1064_v48 = vld [vmem:[%s1198_s7 + $0xb4] ss:$8 sps:$4 sm:$0xff]  }
  0x33   : > { %636 = vmatprep.subr.bf16.mxu0 %v1022_v16  ;;  %v1066_v49 = vld [vmem:[%s1198_s7 + $0xb0] ss:$8 sps:$4 sm:$0xff]   ;;  %v1070_v50 = vld [vmem:[%s1198_s7 + $0xa4] ss:$8 sps:$4 sm:$0xff]   ;;  %v1072_v51 = vld [vmem:[%s1198_s7 + $0xa0] ss:$8 sps:$4 sm:$0xff]  }
  0x34   : > { %678 = vmatpush1.bf16.msra.mxu1 %v1051_v26  ;;  %v1076_v52 = vld [vmem:[%s1198_s7 + $0x94] ss:$8 sps:$4 sm:$0xff]   ;;  %v1078_v53 = vld [vmem:[%s1198_s7 + $0x90] ss:$8 sps:$4 sm:$0xff]   ;;  %v1080_v54 = vld [vmem:[%s1198_s7 + $0x84] ss:$8 sps:$4 sm:$0xff]  }
  0x35   : > { %679 = vmatprep.subr.bf16.mxu1 %v1055_v27  ;;  %v1082_v55 = vld [vmem:[%s1198_s7 + $0x80] ss:$8 sps:$4 sm:$0xff]   ;;  %v316_v59 = vld [vmem:[#allocation2 + $0x10] sm:$0xff]  ;;  %v318_v3 = vld [vmem:[#allocation2 + $0x18] sm:$0xff] }
  0x36   : > { %637 = vmatpush1.bf16.msra.mxu0 %v1024_v19  ;;  %v317_v63 = vld [vmem:[#allocation2] sm:$0xff]  ;;  %v319_v8 = vld [vmem:[#allocation2 + $0x8] sm:$0xff] }
  0x37   : > { %638 = vmatprep.subr.bf16.mxu0 %v1025_v21 }
  0x38   : > { %680 = vmatpush1.bf16.msra.mxu1 %v1057_v30 }
  0x39   : > { %681 = vmatprep.subr.bf16.mxu1 %v1061_v31 }
  0x3a   : > { %639 = vmatpush1.bf16.msra.mxu0 %v1027_v24 }
  0x3b   : > { %640 = vmatprep.subr.bf16.mxu0 %v1028_v25 }
  0x3c   : > { %682 = vmatpush1.bf16.msra.mxu1 %v1063_v34 }
  0x3d   : > { %683 = vmatprep.subr.bf16.mxu1 %v1067_v35 }
  0x3e   : > { %641 = vmatpush1.bf16.msra.mxu0 %v1030_v28 }
  0x3f   : > { %642 = vmatprep.subr.bf16.mxu0 %v1034_v29 }
  0x40   : > { %684 = vmatpush1.bf16.msra.mxu1 %v1069_v38 }
  0x41   : > { %685 = vmatprep.subr.bf16.mxu1 %v1073_v39 }
  0x42   : > { %643 = vmatpush1.bf16.msra.mxu0 %v1036_v32 }
  0x43   : > { %644 = vmatprep.subr.bf16.mxu0 %v1040_v33 }
  0x44   : > { %686 = vmatpush1.bf16.msra.mxu1 %v1075_v43 }
  0x46   : > { %645 = vmatpush2.bf16.msra.mxu0 %v1042_v36 }
  0x47   : > { %646 = vmatprep.subr.bf16.mxu0 %v1046_v37  ;;  %704 = vmatmul.mubr.bf16.vlgmr.msra.gmra.mxu1 %v1079_v46 }
  0x4a   : > { %647 = vmatpush2.bf16.msra.mxu0 %v1048_v41 }
  0x4b   : > { %648 = vmatprep.subr.bf16.mxu0 %v1052_v42 }
  0x4e   : > { %649 = vmatpush2.bf16.msra.mxu0 %v1054_v44 }
  0x4f   : > { %650 = vmatprep.subr.bf16.mxu0 %v1058_v45 }
  0x52   : > { %651 = vmatpush2.bf16.msra.mxu0 %v1060_v47 }
  0x53   : > { %652 = vmatprep.subr.bf16.mxu0 %v1064_v48 }
  0x56   : > { %653 = vmatpush2.bf16.msra.mxu0 %v1066_v49 }
  0x57   : > { %654 = vmatprep.subr.bf16.mxu0 %v1070_v50 }
  0x5a   : > { %655 = vmatpush2.bf16.msra.mxu0 %v1072_v51 }
  0x5b   : > { %656 = vmatprep.subr.bf16.mxu0 %v1076_v52 }
  0x5e   : > { %657 = vmatpush2.bf16.msra.mxu0 %v1078_v53 }
  0x5f   : > { %658 = vmatprep.subr.bf16.mxu0 %v1080_v54 }
  0x62   : > { %659 = vmatpush2.bf16.msra.mxu0 %v1082_v55 }
  0x65   : > { %661 = vmatmul.mubr.bf16.vlgmr.msra.gmra.mxu0 %v1083_v56 }
 0x107   : > { %v705_v57 = vpop.f32.mrf.mxu1 }
 0x109   : > { %v707_v58 = vpop.f32.mrf.mxu1 }
 0x10b   : > { %v709_v62 = vpop.f32.mrf.mxu1 }
 0x10d   : > { %v711_v7 = vpop.f32.mrf.mxu1 }
 0x125   : > { %v662_v60 = vpop.f32.mrf.mxu0 }
 0x126   : > { %v706_v61 = vadd.f32 %v705_v57, %v662_v60 }
 0x127   : > { %v664_v0 = vpop.f32.mrf.mxu0 }
 0x128   : > { %v714_v1 = vadd.f32 %v706_v61, %v316_v59  ;;  %v708_v2 = vadd.f32 %v707_v58, %v664_v0 }
 0x129   : > { %v666_v4 = vpop.f32.mrf.mxu0 }
 0x12a   : > { %718 = vst [vmem:[#allocation2 + $0x10] sm:$0xff] %v714_v1  ;;  %v715_v5 = vadd.f32 %v708_v2, %v317_v63  ;;  %v710_v6 = vadd.f32 %v709_v62, %v666_v4 }
 0x12b   : > { %v668_v9 = vpop.f32.mrf.mxu0 }
 0x12c   : > { %719 = vst [vmem:[#allocation2] sm:$0xff] %v715_v5  ;;  %v716_v10 = vadd.f32 %v710_v6, %v318_v3  ;;  %v712_v11 = vadd.f32 %v711_v7, %v668_v9  ;;  %725 = sbr.rel (%p955_p11) target bundleno = 320 (0x140), region = 66 }
 0x12e   : > { %720 = vst [vmem:[#allocation2 + $0x18] sm:$0xff] %v716_v10  ;;  %v717_v12 = vadd.f32 %v712_v11, %v319_v8 }
 0x130   : > { %721 = vst [vmem:[#allocation2 + $0x8] sm:$0xff] %v717_v12 }
 0x131   : > { %v732_v13 = vlaneseq  ;;  %v730_v15 = vld [vmem:[%s1281_s2] sm:$0x3]  ;;  %v726_v16 = vld [vmem:[#allocation2 + $0x10] sm:$0xff] }
 0x133   : > { %v733_v14 = vshrl.u32 %v732_v13, 7  ;;  %v727_v19 = vld [vmem:[#allocation2] sm:$0xff] }
 0x135   : > { %v734_v17 = vsub.s32 0, %v733_v14  ;;  %v738_v18 = vsub.s32 1, %v733_v14  ;;  %v728_v20 = vld [vmem:[#allocation2 + $0x18] sm:$0xff] }
 0x137   : > { %v729_v21 = vld [vmem:[#allocation2 + $0x8] sm:$0xff]  ;;  %v735_v22 = vrot.slane %v730_v15, %v734_v17  ;;  %v739_v23 = vrot.slane %v730_v15, %v738_v18 }
 0x139   : > { %v742_v24 = vadd.f32 %v735_v22, %v726_v16  ;;  %v743_v25 = vadd.f32 %v739_v23, %v727_v19  ;;  %v744_v26 = vadd.f32 %v735_v22, %v728_v20  ;;  %v745_v27 = vadd.f32 %v739_v23, %v729_v21 }
 0x13b   : > { %v746_v28 = vmax.f32 %v742_v24, 0.0  ;;  %v747_v29 = vmax.f32 %v743_v25, 0.0  ;;  %v748_v30 = vmax.f32 %v744_v26, 0.0  ;;  %v749_v31 = vmax.f32 %v745_v27, 0.0 }
 0x13d   : > { %v964_v32 = vpack.c.bf16 %v747_v29, %v746_v28  ;;  %v965_v33 = vpack.c.bf16 %v749_v31, %v748_v30 }
 0x13f   : > { %762 = vst [vmem:[%s1282_s3] sm:$0xff] %v964_v32  ;;  %763 = vst [vmem:[%s1282_s3 + $0x8] sm:$0xff] %v965_v33 }
 0x140 PF: > { %s13_s16 = sadd.s32 1, %s1124_s16   ;;  %s1283_s12 = smov %s1112_s13 }
 0x141   : > { %p10_p12 = scmp.ge.s32.totalorder %s13_s16, 8   ;;  %s1284_s13 = smov %s1183_s20 }
 0x142   : > { %s1285_s14 = smov %s1120_s15  ;;  %s1286_s15 = smov %s1288_s17 }
 0x143   :  { %12 = sbr.rel (!%p10_p12) target bundleno = 3 (0x3), region = 113 }

// kernel: forgery_detector_forward.33
= control target key start
LH: loop header
LB: loop body
LE: loop exit
PB: predicated region body
PF: predicated region fallthrough
CT: control target
= control target key end

     0   :  { %s1901_s0 = inlined_call_operand.vmem [shape: bf16[16,2304], index: 0, kind: input, shape index: {}]   ;;  %s1902_s1 = inlined_call_operand.vmem [shape: bf16[2304,1024], index: 1, kind: input, shape index: {}]   ;;  %s1903_s2 = inlined_call_operand.vmem [shape: f32[1,1024], index: 2, kind: input, shape index: {}]   ;;  %s1904_s3 = inlined_call_operand.vmem [shape: f32[1,1024], index: 3, kind: input, shape index: {}]   ;;  %s1905_s4 = inlined_call_operand.vmem [shape: bf16[16,1024], index: 4, kind: output, shape index: {}]  }
   0x1   :  { %1908 = sst [smem:[#allocation8_spill]] %s1901_s0 }
   0x2   :  { %1909 = sst [smem:[#allocation9_spill]] %s1902_s1 }
   0x3   :  { %s1559_s15 = smov 0   ;;  %s1561_s16 = smov 0  }
   0x4   :  { %s1563_s17 = smov 0   ;;  %s1565_s18 = smov 0  }
   0x5   :  { %s1567_s19 = smov 0   ;;  %s1569_s20 = smov 0  }
   0x6   :  { %s1571_s21 = smov 0   ;;  %s1573_s22 = smov 0  }
   0x7   :  { %s1575_s23 = smov 0   ;;  %s1577_s24 = smov 0  }
   0x8   :  { %s1579_s25 = smov 0  }
   0x9 LB: > { %s1191_s26 = sadd.s32 4294967295, %s1529_s25   ;;  %s26_s27 = sadd.s32 1, %s1521_s23  ;;  %s1529_s25 = sphi %s1579_s25, %s14_s25   ;;  %s1525_s24 = sphi %s1577_s24, %s1928_s24   ;;  %s1521_s23 = sphi %s1575_s23, %s1927_s23   ;;  %s1517_s22 = sphi %s1573_s22, %s1926_s22   ;;  %s1513_s21 = sphi %s1571_s21, %s1925_s21   ;;  %s1509_s20 = sphi %s1569_s20, %s1924_s20   ;;  %s1505_s19 = sphi %s1567_s19, %s1923_s19   ;;  %s1501_s18 = sphi %s1565_s18, %s1922_s18   ;;  %s1497_s17 = sphi %s1563_s17, %s1921_s17   ;;  %s1493_s16 = sphi %s1561_s16, %s1920_s16   ;;  %s1489_s15 = sphi %s1559_s15, %s1919_s15  }
   0xa   : > { %p27_p0 = scmp.ge.s32.totalorder %s26_s27, 6  ;;  %s29_s28 = sadd.s32 1, %s1525_s24 }
   0xb   : > { %s42_s29 = sadd.s32 1, %s1509_s20  ;;  %p49_p1 = scmp.ne.s32.totalorder %s1509_s20, %s1505_s19 }
   0xc   : > { %s1930_s27 = smov (%p27_p0, %s26_s27), 0  ;;  %s1932_s28 = smov (!%p27_p0, %s29_s28), %s1525_s24 }
   0xd   : > { %1910 = sst [smem:[#allocation6_spill]] %s1930_s27  ;;  %s38_s30 = ssub.s32 %s1521_s23, %s1930_s27 }
   0xe   : > { %p50_p2 = scmp.eq.s32.totalorder %s1529_s25, 0  ;;  %p31_p3 = scmp.ge.s32.totalorder %s1932_s28, 4 }
   0xf   : > { %p40_p4 = scmp.eq.s32.totalorder %s38_s30, 0  ;;  %s70_s6 = sadd.s32 1, %s1501_s18 }
  0x10   : > { %p1626_p5 = por %p50_p2, %p49_p1  ;;  %s1934_s28 = smov (%p31_p3, %s1932_s28), 0 }
  0x11   : > { %1912 = sst [smem:[#allocation7_spill]] %s1934_s28  ;;  %s66_s8 = ssub.s32 %s1525_s24, %s1934_s28 }
  0x12   : > { %s1634_s7 = scalar_select %p40_p4, %s1509_s20, %s42_s29  }
  0x13   : > { %p77_p6 = scmp.ne.s32.totalorder %s1501_s18, %s1497_s17  ;;  %s67_s9 = sor.u32 %s66_s8, %s38_s30 }
  0x14   : > { %p148_p7 = scmp.eq.s32.totalorder %s66_s8, 0  ;;  %p68_p8 = scmp.eq.s32.totalorder %s67_s9, 0 }
  0x15   : > { %p1640_p9 = por %p77_p6, %p50_p2  ;;  %s150_s11 = sadd.s32 1, %s1493_s16 }
  0x16   : > { %p160_p10 = scmp.ne.s32.totalorder %s1493_s16, %s1489_s15  ;;  %p161_p11 = scmp.eq.s32.totalorder %s1191_s26, 23 }
  0x17   : > { %s1648_s12 = scalar_select %p68_p8, %s1501_s18, %s70_s6  }
  0x18   : > { %s1651_s13 = scalar_select %p148_p7, %s1493_s16, %s150_s11  }
  0x19   : > { %p1653_p12 = por %p161_p11, %p160_p10  ;;  %p1194_p13 = scmp.ge.s32.totalorder %s1529_s25, 24 }
  0x1b   : > { %183 = sbr.rel (%p1194_p13) target bundleno = 101 (0x65), region = 16 }
  0x20   : > { %186 = sbr.rel (!%p1626_p5) target bundleno = 43 (0x2b), region = 20  ;;  %s188_s29 = sand.u32 (%p1626_p5), 1, %s1509_s20  }
  0x21   : > { %s1267_s30 = smul.u32 (%p1626_p5), 12, %s1521_s23  ;;  %s1915_s0 = sld [smem:[#allocation8_spill]] (%p1626_p5) }
  0x22   : > { %s1272_s8 = smul.u32 (%p1626_p5), 24, %s188_s29 }
  0x24   : > { %s190_s26 = scalar_lea.vmem (%p1626_p5), [#allocation3], %s1272_s8 }
  0x27   : > { %s196_s11 = scalar_lea.vmem %s1915_s0, %s1267_s30 }
  0x28   : > { %v211_v0 = vld [vmem:[%s196_s11] sm:$0xff]  ;;  %v213_v1 = vld [vmem:[%s196_s11 + $0x48] sm:$0xff]  ;;  %v1198_v3 = vld [vmem:[%s196_s11 + $0x50] sm:$0xf] }
  0x29   : > { %v1196_v2 = vld [vmem:[%s196_s11 + $0x8] sm:$0xf]  ;;  %212 = vst [vmem:[%s190_s26] sm:$0xff] %v211_v0  ;;  %214 = vst [vmem:[%s190_s26 + $0xc] sm:$0xff] %v213_v1 }
  0x2a   : > { %1197 = vst [vmem:[%s190_s26 + $0x8] sm:$0xf] %v1196_v2  ;;  %1199 = vst [vmem:[%s190_s26 + $0x14] sm:$0xf] %v1198_v3 }
  0x2b PF: > { %232 = sbr.rel (!%p1640_p9) target bundleno = 101 (0x65), region = 46  ;;  %s234_s5 = sand.u32 (%p1640_p9), 1, %s1501_s18  }
  0x2c   : > { %s1273_s29 = smul.u32 (%p1640_p9), 384, %s234_s5  ;;  %s1200_s6 = sshll.u32 (%p1640_p9), %s1525_s24, 1 }
  0x2d   : > { %s1268_s30 = smul.u32 (%p1640_p9), 384, %s1521_s23  ;;  %s1916_s1 = sld [smem:[#allocation9_spill]] (%p1640_p9) }
  0x2e   : > { %s1678_s10 = scalar_lea.vmem (%p1640_p9), [#allocation4], %s1273_s29 }
  0x2f   : > { %s240_s9 = sadd.s32 (%p1640_p9), %s1268_s30, %s1200_s6 }
  0x30   : > { %s1202_s0 = sshll.u32 %s240_s9, 2 }
  0x33   : > { %s1673_s27 = scalar_lea.vmem %s1916_s1, %s1202_s0 }
  0x34   : > { %v365_v4 = vld [vmem:[%s1673_s27] sm:$0xff] }
  0x35   : > { %v367_v5 = vld [vmem:[%s1673_s27 + $0x20] sm:$0xff]  ;;  %366 = vst [vmem:[%s1678_s10] sm:$0xff] %v365_v4 }
  0x36   : > { %v369_v6 = vld [vmem:[%s1673_s27 + $0x40] sm:$0xff]  ;;  %368 = vst [vmem:[%s1678_s10 + $0x8] sm:$0xff] %v367_v5 }
  0x37   : > { %370 = vst [vmem:[%s1678_s10 + $0x10] sm:$0xff] %v369_v6  ;;  %v371_v7 = vld [vmem:[%s1673_s27 + $0x60] sm:$0xff] }
  0x38   : > { %v373_v8 = vld [vmem:[%s1673_s27 + $0x80] sm:$0xff]  ;;  %372 = vst [vmem:[%s1678_s10 + $0x18] sm:$0xff] %v371_v7 }
  0x39   : > { %v375_v9 = vld [vmem:[%s1673_s27 + $0xa0] sm:$0xff]  ;;  %374 = vst [vmem:[%s1678_s10 + $0x20] sm:$0xff] %v373_v8 }
  0x3a   : > { %376 = vst [vmem:[%s1678_s10 + $0x28] sm:$0xff] %v375_v9  ;;  %v377_v10 = vld [vmem:[%s1673_s27 + $0xc0] sm:$0xff] }
  0x3b   : > { %v379_v11 = vld [vmem:[%s1673_s27 + $0xe0] sm:$0xff]  ;;  %378 = vst [vmem:[%s1678_s10 + $0x30] sm:$0xff] %v377_v10 }
  0x3c   : > { %v381_v12 = vld [vmem:[%s1673_s27 + $0x100] sm:$0xff]  ;;  %380 = vst [vmem:[%s1678_s10 + $0x38] sm:$0xff] %v379_v11 }
  0x3d   : > { %382 = vst [vmem:[%s1678_s10 + $0x40] sm:$0xff] %v381_v12  ;;  %v383_v13 = vld [vmem:[%s1673_s27 + $0x120] sm:$0xff] }
  0x3e   : > { %v385_v14 = vld [vmem:[%s1673_s27 + $0x140] sm:$0xff]  ;;  %384 = vst [vmem:[%s1678_s10 + $0x48] sm:$0xff] %v383_v13 }
  0x3f   : > { %v387_v15 = vld [vmem:[%s1673_s27 + $0x160] sm:$0xff]  ;;  %386 = vst [vmem:[%s1678_s10 + $0x50] sm:$0xff] %v385_v14 }
  0x40   : > { %388 = vst [vmem:[%s1678_s10 + $0x58] sm:$0xff] %v387_v15  ;;  %v389_v16 = vld [vmem:[%s1673_s27 + $0x180] sm:$0xff] }
  0x41   : > { %v391_v17 = vld [vmem:[%s1673_s27 + $0x1a0] sm:$0xff]  ;;  %390 = vst [vmem:[%s1678_s10 + $0x60] sm:$0xff] %v389_v16 }
  0x42   : > { %v393_v18 = vld [vmem:[%s1673_s27 + $0x1c0] sm:$0xff]  ;;  %392 = vst [vmem:[%s1678_s10 + $0x68] sm:$0xff] %v391_v17 }
  0x43   : > { %394 = vst [vmem:[%s1678_s10 + $0x70] sm:$0xff] %v393_v18  ;;  %v395_v19 = vld [vmem:[%s1673_s27 + $0x1e0] sm:$0xff] }
  0x44   : > { %v397_v20 = vld [vmem:[%s1673_s27 + $0x200] sm:$0xff]  ;;  %396 = vst [vmem:[%s1678_s10 + $0x78] sm:$0xff] %v395_v19 }
  0x45   : > { %v399_v21 = vld [vmem:[%s1673_s27 + $0x220] sm:$0xff]  ;;  %398 = vst [vmem:[%s1678_s10 + $0x80] sm:$0xff] %v397_v20 }
  0x46   : > { %400 = vst [vmem:[%s1678_s10 + $0x88] sm:$0xff] %v399_v21  ;;  %v401_v22 = vld [vmem:[%s1673_s27 + $0x240] sm:$0xff] }
  0x47   : > { %v403_v23 = vld [vmem:[%s1673_s27 + $0x260] sm:$0xff]  ;;  %402 = vst [vmem:[%s1678_s10 + $0x90] sm:$0xff] %v401_v22 }
  0x48   : > { %v405_v24 = vld [vmem:[%s1673_s27 + $0x280] sm:$0xff]  ;;  %404 = vst [vmem:[%s1678_s10 + $0x98] sm:$0xff] %v403_v23 }
  0x49   : > { %406 = vst [vmem:[%s1678_s10 + $0xa0] sm:$0xff] %v405_v24  ;;  %v407_v25 = vld [vmem:[%s1673_s27 + $0x2a0] sm:$0xff] }
  0x4a   : > { %v409_v26 = vld [vmem:[%s1673_s27 + $0x2c0] sm:$0xff]  ;;  %408 = vst [vmem:[%s1678_s10 + $0xa8] sm:$0xff] %v407_v25 }
  0x4b   : > { %v411_v27 = vld [vmem:[%s1673_s27 + $0x2e0] sm:$0xff]  ;;  %410 = vst [vmem:[%s1678_s10 + $0xb0] sm:$0xff] %v409_v26 }
  0x4c   : > { %412 = vst [vmem:[%s1678_s10 + $0xb8] sm:$0xff] %v411_v27  ;;  %v413_v28 = vld [vmem:[%s1673_s27 + $0x300] sm:$0xff] }
  0x4d   : > { %v415_v29 = vld [vmem:[%s1673_s27 + $0x320] sm:$0xff]  ;;  %414 = vst [vmem:[%s1678_s10 + $0xc0] sm:$0xff] %v413_v28 }
  0x4e   : > { %v417_v30 = vld [vmem:[%s1673_s27 + $0x340] sm:$0xff]  ;;  %416 = vst [vmem:[%s1678_s10 + $0xc8] sm:$0xff] %v415_v29 }
  0x4f   : > { %418 = vst [vmem:[%s1678_s10 + $0xd0] sm:$0xff] %v417_v30  ;;  %v419_v31 = vld [vmem:[%s1673_s27 + $0x360] sm:$0xff] }
  0x50   : > { %v421_v32 = vld [vmem:[%s1673_s27 + $0x380] sm:$0xff]  ;;  %420 = vst [vmem:[%s1678_s10 + $0xd8] sm:$0xff] %v419_v31 }
  0x51   : > { %v423_v33 = vld [vmem:[%s1673_s27 + $0x3a0] sm:$0xff]  ;;  %422 = vst [vmem:[%s1678_s10 + $0xe0] sm:$0xff] %v421_v32 }
  0x52   : > { %424 = vst [vmem:[%s1678_s10 + $0xe8] sm:$0xff] %v423_v33  ;;  %v425_v34 = vld [vmem:[%s1673_s27 + $0x3c0] sm:$0xff] }
  0x53   : > { %v427_v35 = vld [vmem:[%s1673_s27 + $0x3e0] sm:$0xff]  ;;  %426 = vst [vmem:[%s1678_s10 + $0xf0] sm:$0xff] %v425_v34 }
  0x54   : > { %v429_v36 = vld [vmem:[%s1673_s27 + $0x400] sm:$0xff]  ;;  %428 = vst [vmem:[%s1678_s10 + $0xf8] sm:$0xff] %v427_v35 }
  0x55   : > { %430 = vst [vmem:[%s1678_s10 + $0x100] sm:$0xff] %v429_v36  ;;  %v431_v37 = vld [vmem:[%s1673_s27 + $0x420] sm:$0xff] }
  0x56   : > { %v433_v38 = vld [vmem:[%s1673_s27 + $0x440] sm:$0xff]  ;;  %432 = vst [vmem:[%s1678_s10 + $0x108] sm:$0xff] %v431_v37 }
  0x57   : > { %v435_v39 = vld [vmem:[%s1673_s27 + $0x460] sm:$0xff]  ;;  %434 = vst [vmem:[%s1678_s10 + $0x110] sm:$0xff] %v433_v38 }
  0x58   : > { %436 = vst [vmem:[%s1678_s10 + $0x118] sm:$0xff] %v435_v39  ;;  %v437_v40 = vld [vmem:[%s1673_s27 + $0x480] sm:$0xff] }
  0x59   : > { %v439_v41 = vld [vmem:[%s1673_s27 + $0x4a0] sm:$0xff]  ;;  %438 = vst [vmem:[%s1678_s10 + $0x120] sm:$0xff] %v437_v40 }
  0x5a   : > { %v441_v42 = vld [vmem:[%s1673_s27 + $0x4c0] sm:$0xff]  ;;  %440 = vst [vmem:[%s1678_s10 + $0x128] sm:$0xff] %v439_v41 }
  0x5b   : > { %442 = vst [vmem:[%s1678_s10 + $0x130] sm:$0xff] %v441_v42  ;;  %v443_v43 = vld [vmem:[%s1673_s27 + $0x4e0] sm:$0xff] }
  0x5c   : > { %v445_v44 = vld [vmem:[%s1673_s27 + $0x500] sm:$0xff]  ;;  %444 = vst [vmem:[%s1678_s10 + $0x138] sm:$0xff] %v443_v43 }
  0x5d   : > { %v447_v45 = vld [vmem:[%s1673_s27 + $0x520] sm:$0xff]  ;;  %446 = vst [vmem:[%s1678_s10 + $0x140] sm:$0xff] %v445_v44 }
  0x5e   : > { %448 = vst [vmem:[%s1678_s10 + $0x148] sm:$0xff] %v447_v45  ;;  %v449_v46 = vld [vmem:[%s1673_s27 + $0x540] sm:$0xff] }
  0x5f   : > { %v451_v47 = vld [vmem:[%s1673_s27 + $0x560] sm:$0xff]  ;;  %450 = vst [vmem:[%s1678_s10 + $0x150] sm:$0xff] %v449_v46 }
  0x60   : > { %v453_v48 = vld [vmem:[%s1673_s27 + $0x580] sm:$0xff]  ;;  %452 = vst [vmem:[%s1678_s10 + $0x158] sm:$0xff] %v451_v47 }
  0x61   : > { %454 = vst [vmem:[%s1678_s10 + $0x160] sm:$0xff] %v453_v48  ;;  %v455_v49 = vld [vmem:[%s1673_s27 + $0x5a0] sm:$0xff] }
  0x62   : > { %v457_v50 = vld [vmem:[%s1673_s27 + $0x5c0] sm:$0xff]  ;;  %456 = vst [vmem:[%s1678_s10 + $0x168] sm:$0xff] %v455_v49 }
  0x63   : > { %v459_v51 = vld [vmem:[%s1673_s27 + $0x5e0] sm:$0xff]  ;;  %458 = vst [vmem:[%s1678_s10 + $0x170] sm:$0xff] %v457_v50 }
  0x64   : > { %460 = vst [vmem:[%s1678_s10 + $0x178] sm:$0xff] %v459_v51 }
  0x65 PF: > { %p1203_p0 = scmp.ge.s32.totalorder %s1529_s25, 1  ;;  %p481_p1 = scmp.lt.s32.totalorder %s1529_s25, 25 }
  0x67   : > { %p482_p2 = pnand %p1203_p0, %p481_p1 }
  0x68   : > { %s488_s0 = sand.u32 (!%p482_p2), 1, %s1505_s19   ;;  %s495_s28 = sand.u32 (!%p482_p2), 1, %s1497_s17  }
  0x69   : > { %485 = sbr.rel (%p482_p2) target bundleno = 414 (0x19e), region = 92  ;;  %s528_s26 = sand.u32 (!%p482_p2), 1, %s1489_s15  }
  0x6a   : > { %s1274_s11 = smul.u32 (!%p482_p2), 24, %s488_s0  ;;  %s1204_s5 = sshll.u32 (!%p482_p2), %s528_s26, 4 }
  0x6b   : > { %s1275_s27 = smul.u32 (!%p482_p2), 384, %s495_s28  ;;  %s1205_s29 = sshll.u32 (!%p482_p2), %s1517_s22, 1 }
  0x6c   : > { %p536_p3 = scmp.lt.s32.totalorder (!%p482_p2), %s1205_s29, 7  ;;  %s1789_s19 = scalar_lea.vmem (!%p482_p2), [#allocation3], %s1274_s11 }
  0x6d   : > { %s1791_s17 = scalar_lea.vmem (!%p482_p2), [#allocation4], %s1275_s27  ;;  %s1793_s15 = scalar_lea.vmem (!%p482_p2), [#allocation5], %s1204_s5 }
  0x6e   : > { %s1936_s29 = smov (!%p536_p3, %s1205_s29), 7  ;;  %p1207_p4 = scmp.ne.s32.totalorder %s1513_s21, 0 }
  0x6f   : > { %s538_s9 = scalar_lea.vmem %s1903_s2, %s1936_s29  ;;  %s543_s1 = scalar_lea.vmem %s1904_s3, %s1936_s29 }
  0x70   : > { %551 = sbr.rel (%p1207_p4) target bundleno = 120 (0x78), region = 104 }
  0x75   : > { %v1531_v52 = vmov 0.0  }
  0x76   : > { %552 = vst [vmem:[#allocation2 + $0x10] sm:$0xff] %v1531_v52  ;;  %553 = vst [vmem:[#allocation2] sm:$0xff] %v1531_v52 }
  0x77   : > { %554 = vst [vmem:[#allocation2 + $0x18] sm:$0xff] %v1531_v52  ;;  %555 = vst [vmem:[#allocation2 + $0x8] sm:$0xff] %v1531_v52 }
  0x78 PF: > { %v1367_v53 = vld [vmem:[%s1791_s17 + $0x74] ss:$8 sps:$4 sm:$0xff]   ;;  %v1369_v54 = vld [vmem:[%s1791_s17 + $0x70] ss:$8 sps:$4 sm:$0xff]   ;;  %v1532_v55 = vmov 0   ;;  %p1259_p5 = scmp.ne.s32.totalorder %s1513_s21, 5 }
  0x79   : > { %943 = vmatprep.mubr.bf16.mxu1 %v1532_v55  ;;  %868 = vmatprep.subr.bf16.mxu0 %v1367_v53  ;;  %v1370_v56 = vld [vmem:[%s1791_s17 + $0x64] ss:$8 sps:$4 sm:$0xff]   ;;  %v1372_v57 = vld [vmem:[%s1791_s17 + $0x60] ss:$8 sps:$4 sm:$0xff]   ;;  %v1373_v58 = vld [vmem:[%s1791_s17 + $0x54] ss:$8 sps:$4 sm:$0xff]  }
  0x7a   : > { %869 = vmatpush1.bf16.msra.mxu0 %v1369_v54  ;;  %v1375_v59 = vld [vmem:[%s1791_s17 + $0x50] ss:$8 sps:$4 sm:$0xff]   ;;  %v1376_v60 = vld [vmem:[%s1791_s17 + $0x44] ss:$8 sps:$4 sm:$0xff]   ;;  %v1388_v61 = vld [vmem:[%s1791_s17 + $0x174] ss:$8 sps:$4 sm:$0xff]  }
  0x7b   : > { %870 = vmatprep.subr.bf16.mxu0 %v1370_v56  ;;  %v1390_v62 = vld [vmem:[%s1791_s17 + $0x170] ss:$8 sps:$4 sm:$0xff]   ;;  %v1378_v63 = vld [vmem:[%s1791_s17 + $0x40] ss:$8 sps:$4 sm:$0xff]   ;;  %v1379_v0 = vld [vmem:[%s1791_s17 + $0x34] ss:$8 sps:$4 sm:$0xff]   ;;  %911 = vmatprep.subr.bf16.mxu1 %v1388_v61 }
  0x7c   : > { %v1394_v1 = vld [vmem:[%s1791_s17 + $0x164] ss:$8 sps:$4 sm:$0xff]   ;;  %912 = vmatpush1.bf16.msra.mxu1 %v1390_v62  ;;  %v1396_v2 = vld [vmem:[%s1791_s17 + $0x160] ss:$8 sps:$4 sm:$0xff]   ;;  %v1381_v3 = vld [vmem:[%s1791_s17 + $0x30] ss:$8 sps:$4 sm:$0xff]  }
  0x7d   : > { %913 = vmatprep.subr.bf16.mxu1 %v1394_v1  ;;  %v1400_v4 = vld [vmem:[%s1791_s17 + $0x154] ss:$8 sps:$4 sm:$0xff]   ;;  %v1382_v5 = vld [vmem:[%s1791_s17 + $0x24] ss:$8 sps:$4 sm:$0xff]   ;;  %v1402_v6 = vld [vmem:[%s1791_s17 + $0x150] ss:$8 sps:$4 sm:$0xff]  }
  0x7e   : > { %871 = vmatpush1.bf16.msra.mxu0 %v1372_v57  ;;  %v1406_v7 = vld [vmem:[%s1791_s17 + $0x144] ss:$8 sps:$4 sm:$0xff]   ;;  %v1384_v8 = vld [vmem:[%s1791_s17 + $0x20] ss:$8 sps:$4 sm:$0xff]   ;;  %v1385_v9 = vld [vmem:[%s1791_s17 + $0x14] ss:$8 sps:$4 sm:$0xff]  }
  0x7f   : > { %872 = vmatprep.subr.bf16.mxu0 %v1373_v58  ;;  %v1408_v10 = vld [vmem:[%s1791_s17 + $0x140] ss:$8 sps:$4 sm:$0xff]   ;;  %v1412_v11 = vld [vmem:[%s1791_s17 + $0x134] ss:$8 sps:$4 sm:$0xff]   ;;  %v1387_v12 = vld [vmem:[%s1791_s17 + $0x10] ss:$8 sps:$4 sm:$0xff]  }
  0x80   : > { %914 = vmatpush1.bf16.msra.mxu1 %v1396_v2  ;;  %v1391_v13 = vld [vmem:[%s1791_s17 + $0x4] ss:$8 sps:$4 sm:$0xff]   ;;  %v1414_v14 = vld [vmem:[%s1791_s17 + $0x130] ss:$8 sps:$4 sm:$0xff]   ;;  %v1393_v16 = vld [vmem:[%s1791_s17] ss:$8 sps:$4 sm:$0xff]  }
  0x81   : > { %915 = vmatprep.subr.bf16.mxu1 %v1400_v4  ;;  %v1418_v15 = vld [vmem:[%s1791_s17 + $0x124] ss:$8 sps:$4 sm:$0xff]   ;;  %v1397_v17 = vld [vmem:[%s1791_s17 + $0xf4] ss:$8 sps:$4 sm:$0xff]   ;;  %v1420_v18 = vld [vmem:[%s1791_s17 + $0x120] ss:$8 sps:$4 sm:$0xff]  }
  0x82   : > { %873 = vmatpush1.bf16.msra.mxu0 %v1375_v59  ;;  %v1424_v19 = vld [vmem:[%s1791_s17 + $0x114] ss:$8 sps:$4 sm:$0xff]   ;;  %v1399_v20 = vld [vmem:[%s1791_s17 + $0xf0] ss:$8 sps:$4 sm:$0xff]   ;;  %v1403_v21 = vld [vmem:[%s1791_s17 + $0xe4] ss:$8 sps:$4 sm:$0xff]  }
  0x83   : > { %874 = vmatprep.subr.bf16.mxu0 %v1376_v60  ;;  %v1426_v22 = vld [vmem:[%s1791_s17 + $0x110] ss:$8 sps:$4 sm:$0xff]   ;;  %v1430_v23 = vld [vmem:[%s1791_s17 + $0x104] ss:$8 sps:$4 sm:$0xff]   ;;  %v1405_v25 = vld [vmem:[%s1791_s17 + $0xe0] ss:$8 sps:$4 sm:$0xff]  }
  0x84   : > { %916 = vmatpush1.bf16.msra.mxu1 %v1402_v6  ;;  %v1442_v24 = vld [vmem:[%s1789_s19 + $0x4] ss:$12 sps:$4 sm:$0xff]   ;;  %v1436_v30 = vld [vmem:[%s1789_s19 + $0x8] ss:$12 sps:$4 sm:$0xff]   ;;  %v1440_v40 = vld [vmem:[%s1789_s19] ss:$12 sps:$4 sm:$0xff]  }
  0x85   : > { %917 = vmatprep.subr.bf16.mxu1 %v1406_v7  ;;  %v1409_v26 = vld [vmem:[%s1791_s17 + $0xd4] ss:$8 sps:$4 sm:$0xff]   ;;  %900 = vmatprep.mubr.bf16.mxu0 %v1442_v24  ;;  %v1432_v27 = vld [vmem:[%s1791_s17 + $0x100] ss:$8 sps:$4 sm:$0xff]   ;;  %v1411_v28 = vld [vmem:[%s1791_s17 + $0xd0] ss:$8 sps:$4 sm:$0xff]  }
  0x86   : > { %875 = vmatpush1.bf16.msra.mxu0 %v1378_v63  ;;  %v1415_v29 = vld [vmem:[%s1791_s17 + $0xc4] ss:$8 sps:$4 sm:$0xff]   ;;  %v1417_v31 = vld [vmem:[%s1791_s17 + $0xc0] ss:$8 sps:$4 sm:$0xff]   ;;  %v1421_v32 = vld [vmem:[%s1791_s17 + $0xb4] ss:$8 sps:$4 sm:$0xff]  }
  0x87   : > { %876 = vmatprep.subr.bf16.mxu0 %v1379_v0  ;;  %v1423_v33 = vld [vmem:[%s1791_s17 + $0xb0] ss:$8 sps:$4 sm:$0xff]   ;;  %v1427_v34 = vld [vmem:[%s1791_s17 + $0xa4] ss:$8 sps:$4 sm:$0xff]   ;;  %v1429_v35 = vld [vmem:[%s1791_s17 + $0xa0] ss:$8 sps:$4 sm:$0xff]  }
  0x88   : > { %918 = vmatpush1.bf16.msra.mxu1 %v1408_v10  ;;  %v1433_v36 = vld [vmem:[%s1791_s17 + $0x94] ss:$8 sps:$4 sm:$0xff]   ;;  %v1435_v37 = vld [vmem:[%s1791_s17 + $0x90] ss:$8 sps:$4 sm:$0xff]   ;;  %v1437_v38 = vld [vmem:[%s1791_s17 + $0x84] ss:$8 sps:$4 sm:$0xff]  }
  0x89   : > { %919 = vmatprep.subr.bf16.mxu1 %v1412_v11  ;;  %v1439_v39 = vld [vmem:[%s1791_s17 + $0x80] ss:$8 sps:$4 sm:$0xff]   ;;  %v557_v47 = vld [vmem:[#allocation2] sm:$0xff]  ;;  %v559_v56 = vld [vmem:[#allocation2 + $0x8] sm:$0xff] }
  0x8a   : > { %877 = vmatpush1.bf16.msra.mxu0 %v1381_v3  ;;  %v556_v43 = vld [vmem:[#allocation2 + $0x10] sm:$0xff]  ;;  %v558_v51 = vld [vmem:[#allocation2 + $0x18] sm:$0xff] }
  0x8b   : > { %878 = vmatprep.subr.bf16.mxu0 %v1382_v5 }
  0x8c   : > { %920 = vmatpush1.bf16.msra.mxu1 %v1414_v14 }
  0x8d   : > { %921 = vmatprep.subr.bf16.mxu1 %v1418_v15 }
  0x8e   : > { %879 = vmatpush1.bf16.msra.mxu0 %v1384_v8 }
  0x8f   : > { %880 = vmatprep.subr.bf16.mxu0 %v1385_v9 }
  0x90   : > { %922 = vmatpush1.bf16.msra.mxu1 %v1420_v18 }
  0x91   : > { %923 = vmatprep.subr.bf16.mxu1 %v1424_v19 }
  0x92   : > { %881 = vmatpush1.bf16.msra.mxu0 %v1387_v12 }
  0x93   : > { %882 = vmatprep.subr.bf16.mxu0 %v1391_v13 }
  0x94   : > { %924 = vmatpush1.bf16.msra.mxu1 %v1426_v22 }
  0x95   : > { %925 = vmatprep.subr.bf16.mxu1 %v1430_v23 }
  0x96   : > { %883 = vmatpush1.bf16.msra.mxu0 %v1393_v16 }
  0x97   : > { %884 = vmatprep.subr.bf16.mxu0 %v1397_v17 }
  0x98   : > { %926 = vmatpush1.bf16.msra.mxu1 %v1432_v27 }
  0x9a   : > { %885 = vmatpush2.bf16.msra.mxu0 %v1399_v20 }
  0x9b   : > { %886 = vmatprep.subr.bf16.mxu0 %v1403_v21  ;;  %944 = vmatmul.mubr.bf16.vlgmr.msra.gmra.mxu1 %v1436_v30 }
  0x9e   : > { %887 = vmatpush2.bf16.msra.mxu0 %v1405_v25 }
  0x9f   : > { %888 = vmatprep.subr.bf16.mxu0 %v1409_v26 }
  0xa2   : > { %889 = vmatpush2.bf16.msra.mxu0 %v1411_v28 }
  0xa3   : > { %890 = vmatprep.subr.bf16.mxu0 %v1415_v29 }
  0xa6   : > { %891 = vmatpush2.bf16.msra.mxu0 %v1417_v31 }
  0xa7   : > { %892 = vmatprep.subr.bf16.mxu0 %v1421_v32 }
  0xaa   : > { %893 = vmatpush2.bf16.msra.mxu0 %v1423_v33 }
  0xab   : > { %894 = vmatprep.subr.bf16.mxu0 %v1427_v34 }
  0xae   : > { %895 = vmatpush2.bf16.msra.mxu0 %v1429_v35 }
  0xaf   : > { %896 = vmatprep.subr.bf16.mxu0 %v1433_v36 }
  0xb2   : > { %897 = vmatpush2.bf16.msra.mxu0 %v1435_v37 }
  0xb3   : > { %898 = vmatprep.subr.bf16.mxu0 %v1437_v38 }
  0xb6   : > { %899 = vmatpush2.bf16.msra.mxu0 %v1439_v39 }
  0xb9   : > { %901 = vmatmul.mubr.bf16.vlgmr.msra.gmra.mxu0 %v1440_v40 }
 0x15b   : > { %v945_v41 = vpop.f32.mrf.mxu1 }
 0x15d   : > { %v947_v42 = vpop.f32.mrf.mxu1 }
 0x15f   : > { %v949_v46 = vpop.f32.mrf.mxu1 }
 0x161   : > { %v951_v55 = vpop.f32.mrf.mxu1 }
 0x179   : > { %v902_v44 = vpop.f32.mrf.mxu0 }
 0x17a   : > { %v946_v45 = vadd.f32 %v945_v41, %v902_v44 }
 0x17b   : > { %v904_v48 = vpop.f32.mrf.mxu0 }
 0x17c   : > { %v954_v49 = vadd.f32 %v946_v45, %v556_v43  ;;  %v948_v50 = vadd.f32 %v947_v42, %v904_v48 }
 0x17d   : > { %v906_v52 = vpop.f32.mrf.mxu0 }
 0x17e   : > { %958 = vst [vmem:[#allocation2 + $0x10] sm:$0xff] %v954_v49  ;;  %v955_v53 = vadd.f32 %v948_v50, %v557_v47  ;;  %v950_v54 = vadd.f32 %v949_v46, %v906_v52 }
 0x17f   : > { %v908_v57 = vpop.f32.mrf.mxu0 }
 0x180   : > { %959 = vst [vmem:[#allocation2] sm:$0xff] %v955_v53  ;;  %v956_v58 = vadd.f32 %v950_v54, %v558_v51  ;;  %v952_v59 = vadd.f32 %v951_v55, %v908_v57  ;;  %965 = sbr.rel (%p1259_p5) target bundleno = 406 (0x196), region = 108 }
 0x182   : > { %960 = vst [vmem:[#allocation2 + $0x18] sm:$0xff] %v956_v58  ;;  %v957_v60 = vadd.f32 %v952_v59, %v559_v56 }
 0x184   : > { %961 = vst [vmem:[#allocation2 + $0x8] sm:$0xff] %v957_v60 }
 0x185   : > { %v972_v61 = vlaneseq  ;;  %v986_v62 = vld [vmem:[%s543_s1] sm:$0x3]  ;;  %v1533_v1 = vmov 0   ;;  %v966_v5 = vld [vmem:[#allocation2 + $0x10] sm:$0xff] }
 0x186   : > { %vm987_vm0 = vcmp.ne.f32.partialorder %v986_v62, 0.0  ;;  %v970_v0 = vld [vmem:[%s538_s9] sm:$0x3] }
 0x187   : > { %v973_v63 = vshrl.u32 %v972_v61, 7  ;;  %v992_v2 = vsel %vm987_vm0, 1, %v1533_v1  ;;  %v967_v6 = vld [vmem:[#allocation2] sm:$0xff] }
 0x189   : > { %v974_v3 = vsub.s32 0, %v973_v63  ;;  %v978_v4 = vsub.s32 1, %v973_v63  ;;  %v968_v11 = vld [vmem:[#allocation2 + $0x18] sm:$0xff] }
 0x18b   : > { %v975_v7 = vrot.slane %v970_v0, %v974_v3  ;;  %v979_v8 = vrot.slane %v970_v0, %v978_v4  ;;  %v996_v9 = vrot.slane %v992_v2, %v974_v3  ;;  %v1000_v10 = vrot.slane %v992_v2, %v978_v4  ;;  %v969_v12 = vld [vmem:[#allocation2 + $0x8] sm:$0xff] }
 0x18d   : > { %v982_v13 = vadd.f32 %v975_v7, %v966_v5  ;;  %v983_v14 = vadd.f32 %v979_v8, %v967_v6  ;;  %vm1001_vm1 = vcmp.eq.s32.totalorder %v996_v9, 1  ;;  %vm1002_vm2 = vcmp.eq.s32.totalorder %v1000_v10, 1 }
 0x18e   : > { %v984_v15 = vadd.f32 %v975_v7, %v968_v11  ;;  %v985_v16 = vadd.f32 %v979_v8, %v969_v12 }
 0x18f   : > { %v988_v17 = vmax.f32 %v982_v13, 0.0  ;;  %v989_v18 = vmax.f32 %v983_v14, 0.0 }
 0x190   : > { %v990_v19 = vmax.f32 %v984_v15, 0.0  ;;  %v991_v20 = vmax.f32 %v985_v16, 0.0 }
 0x191   : > { %v1003_v21 = vsel %vm1001_vm1, %v988_v17, %v982_v13  ;;  %v1004_v22 = vsel %vm1002_vm2, %v989_v18, %v983_v14 }
 0x192   : > { %v1269_v23 = vpack.c.bf16 %v1004_v22, %v1003_v21  ;;  %v1005_v24 = vsel %vm1001_vm1, %v990_v19, %v984_v15  ;;  %v1006_v25 = vsel %vm1002_vm2, %v991_v20, %v985_v16 }
 0x193   : > { %v1270_v26 = vpack.c.bf16 %v1006_v25, %v1005_v24 }
 0x194   : > { %1019 = vst [vmem:[%s1793_s15] sm:$0xff] %v1269_v23 }
 0x195   : > { %1020 = vst [vmem:[%s1793_s15 + $0x8] sm:$0xff] %v1270_v26 }
 0x196 PF: > { %1027 = sbr.rel (!%p1653_p12) target bundleno = 414 (0x19e), region = 112  ;;  %s1271_s1 = sshll.u32 (%p1653_p12), %s1517_s22, 3 }
 0x197   : > { %s1033_s5 = scalar_lea.vmem (%p1653_p12), %s1905_s4, %s1271_s1 }
 0x19b   : > { %v1064_v27 = vld [vmem:[%s1793_s15] sm:$0xff] }
 0x19c   : > { %v1066_v28 = vld [vmem:[%s1793_s15 + $0x8] sm:$0xff]  ;;  %1065 = vst [vmem:[%s1033_s5] sm:$0xff] %v1064_v27 }
 0x19d   : > { %1067 = vst [vmem:[%s1033_s5 + $0x20] sm:$0xff] %v1066_v28 }
 0x19e PF: > { %s14_s25 = sadd.s32 1, %s1529_s25   ;;  %s1917_s14 = sld [smem:[#allocation6_spill]] }
 0x19f   : > { %p11_p6 = scmp.ge.s32.totalorder %s14_s25, 26   ;;  %s1918_s29 = sld [smem:[#allocation7_spill]] }
 0x1a0   : > { %s1919_s15 = smov %s1493_s16  ;;  %s1920_s16 = smov %s1651_s13 }
 0x1a1   : > { %s1921_s17 = smov %s1501_s18  ;;  %s1922_s18 = smov %s1648_s12 }
 0x1a2   : > { %s1923_s19 = smov %s1509_s20  ;;  %s1924_s20 = smov %s1634_s7 }
 0x1a3   : > { %s1925_s21 = smov %s1521_s23  ;;  %s1926_s22 = smov %s1525_s24 }
 0x1a4   : > { %s1927_s23 = smov %s1917_s14  ;;  %13 = sbr.rel (!%p11_p6) target bundleno = 9 (0x9), region = 201 }
 0x1a5   : > { %s1928_s24 = smov %s1918_s29 }

// kernel: forgery_detector_forward.34
= control target key start
LH: loop header
LB: loop body
LE: loop exit
PB: predicated region body
PF: predicated region fallthrough
CT: control target
= control target key end

     0   :  { %s2209_s0 = inlined_call_operand.vmem [shape: bf16[16,4608], index: 0, kind: input, shape index: {}]   ;;  %s2210_s1 = inlined_call_operand.vmem [shape: bf16[4608,512], index: 1, kind: input, shape index: {}]   ;;  %s2211_s2 = inlined_call_operand.vmem [shape: f32[1,512], index: 2, kind: input, shape index: {}]   ;;  %s2212_s3 = inlined_call_operand.vmem [shape: bf16[16,512], index: 3, kind: input, shape index: {}]   ;;  %s2213_s4 = inlined_call_operand.vmem [shape: bf16[16,512], index: 4, kind: output, shape index: {}]  }
   0x1   :  { %2216 = sst [smem:[#allocation10_spill]] %s2209_s0 }
   0x2   :  { %s1802_s15 = smov 0   ;;  %s1804_s16 = smov 0  }
   0x3   :  { %s1806_s17 = smov 0   ;;  %s1808_s18 = smov 0  }
   0x4   :  { %s1810_s19 = smov 0   ;;  %s1812_s20 = smov 0  }
   0x5   :  { %s1814_s21 = smov 0   ;;  %s1816_s22 = smov 0  }
   0x6   :  { %s1818_s23 = smov 0   ;;  %s1820_s24 = smov 0  }
   0x7   :  { %s1822_s25 = smov 0  }
   0x8 LB: > { %s1393_s26 = sadd.s32 4294967295, %s1774_s25   ;;  %s26_s27 = sadd.s32 1, %s1766_s23  ;;  %s1774_s25 = sphi %s1822_s25, %s14_s25   ;;  %s1770_s24 = sphi %s1820_s24, %s2237_s24   ;;  %s1766_s23 = sphi %s1818_s23, %s2236_s23   ;;  %s1762_s22 = sphi %s1816_s22, %s2235_s22   ;;  %s1758_s21 = sphi %s1814_s21, %s2234_s21   ;;  %s1754_s20 = sphi %s1812_s20, %s2233_s20   ;;  %s1750_s19 = sphi %s1810_s19, %s2232_s19   ;;  %s1746_s18 = sphi %s1808_s18, %s2231_s18   ;;  %s1742_s17 = sphi %s1806_s17, %s2230_s17   ;;  %s1738_s16 = sphi %s1804_s16, %s2229_s16   ;;  %s1734_s15 = sphi %s1802_s15, %s2228_s15  }
   0x9   : > { %p27_p0 = scmp.ge.s32.totalorder %s26_s27, 9  ;;  %s29_s28 = sadd.s32 1, %s1770_s24 }
   0xa   : > { %s42_s29 = sadd.s32 1, %s1754_s20  ;;  %p49_p1 = scmp.ne.s32.totalorder %s1754_s20, %s1750_s19 }
   0xb   : > { %s2239_s27 = smov (%p27_p0, %s26_s27), 0  ;;  %s2241_s28 = smov (!%p27_p0, %s29_s28), %s1770_s24 }
   0xc   : > { %2217 = sst [smem:[#allocation7_spill]] %s2239_s27  ;;  %s38_s30 = ssub.s32 %s1766_s23, %s2239_s27 }
   0xd   : > { %p50_p2 = scmp.eq.s32.totalorder %s1774_s25, 0  ;;  %p31_p3 = scmp.ge.s32.totalorder %s2241_s28, 2 }
   0xe   : > { %p40_p4 = scmp.eq.s32.totalorder %s38_s30, 0  ;;  %s70_s6 = sadd.s32 1, %s1746_s18 }
   0xf   : > { %p1871_p5 = por %p50_p2, %p49_p1  ;;  %s2243_s28 = smov (%p31_p3, %s2241_s28), 0 }
  0x10   : > { %2219 = sst [smem:[#allocation8_spill]] %s2243_s28  ;;  %s66_s8 = ssub.s32 %s1770_s24, %s2243_s28 }
  0x11   : > { %s1879_s7 = scalar_select %p40_p4, %s1754_s20, %s42_s29  }
  0x12   : > { %p77_p6 = scmp.ne.s32.totalorder %s1746_s18, %s1742_s17  ;;  %s67_s9 = sor.u32 %s66_s8, %s38_s30 }
  0x13   : > { %2220 = sst [smem:[#allocation9_spill]] %s1879_s7  ;;  %p122_p7 = scmp.eq.s32.totalorder %s66_s8, 0 }
  0x14   : > { %p68_p8 = scmp.eq.s32.totalorder %s67_s9, 0  ;;  %p1887_p9 = por %p77_p6, %p50_p2 }
  0x15   : > { %s124_s11 = sadd.s32 1, %s1738_s16  ;;  %p131_p10 = scmp.ne.s32.totalorder %s1738_s16, %s1734_s15 }
  0x16   : > { %s1895_s12 = scalar_select %p68_p8, %s1746_s18, %s70_s6  }
  0x17   : > { %s1898_s13 = scalar_select %p122_p7, %s1738_s16, %s124_s11  }
  0x18   : > { %p1902_p11 = por %p131_p10, %p50_p2  ;;  %p163_p12 = scmp.eq.s32.totalorder %s1393_s26, 17 }
  0x19   : > { %p1396_p0 = scmp.ge.s32.totalorder %s1774_s25, 18 }
  0x1a   : > { %p1906_p13 = por %p163_p12, %p131_p10 }
  0x1b   : > { %185 = sbr.rel (%p1396_p0) target bundleno = 88 (0x58), region = 16 }
  0x20   : > { %188 = sbr.rel (!%p1871_p5) target bundleno = 44 (0x2c), region = 20  ;;  %s190_s30 = sand.u32 (%p1871_p5), 1, %s1754_s20  }
  0x21   : > { %s1491_s6 = sshll.u32 (%p1871_p5), %s1766_s23, 4  ;;  %s1397_s8 = sshll.u32 (%p1871_p5), %s190_s30, 5 }
  0x22   : > { %s2224_s0 = sld [smem:[#allocation10_spill]] (%p1871_p5)  ;;  %s192_s26 = scalar_lea.vmem (%p1871_p5), [#allocation3], %s1397_s8 }
  0x28   : > { %s198_s28 = scalar_lea.vmem %s2224_s0, %s1491_s6 }
  0x29   : > { %v211_v0 = vld [vmem:[%s198_s28] sm:$0xff]  ;;  %v213_v1 = vld [vmem:[%s198_s28 + $0x8] sm:$0xff]  ;;  %v215_v2 = vld [vmem:[%s198_s28 + $0x90] sm:$0xff] }
  0x2a   : > { %212 = vst [vmem:[%s192_s26] sm:$0xff] %v211_v0  ;;  %214 = vst [vmem:[%s192_s26 + $0x8] sm:$0xff] %v213_v1  ;;  %v217_v3 = vld [vmem:[%s198_s28 + $0x98] sm:$0xff] }
  0x2b   : > { %216 = vst [vmem:[%s192_s26 + $0x10] sm:$0xff] %v215_v2  ;;  %218 = vst [vmem:[%s192_s26 + $0x18] sm:$0xff] %v217_v3 }
  0x2c PF: > { %224 = sbr.rel (!%p1887_p9) target bundleno = 83 (0x53), region = 43  ;;  %s226_s5 = sand.u32 (%p1887_p9), 1, %s1746_s18  }
  0x2d   : > { %s1402_s30 = sshll.u32 (%p1887_p9), %s1770_s24, 1  ;;  %s1400_s9 = sshll.u32 (%p1887_p9), %s226_s5, 9 }
  0x2e   : > { %s1492_s6 = sshll.u32 (%p1887_p9), %s1766_s23, 8  ;;  %s1931_s28 = scalar_lea.vmem (%p1887_p9), [#allocation4], %s1400_s9 }
  0x2f   : > { %s232_s11 = sadd.s32 (%p1887_p9), %s1492_s6, %s1402_s30 }
  0x30   : > { %s1404_s0 = sshll.u32 (%p1887_p9), %s232_s11, 2 }
  0x31   : > { %s1926_s7 = scalar_lea.vmem %s2210_s1, %s1404_s0 }
  0x32   : > { %v389_v4 = vld [vmem:[%s1926_s7] sm:$0xff]  ;;  %v391_v5 = vld [vmem:[%s1926_s7 + $0x10] sm:$0xff] }
  0x33   : > { %v393_v6 = vld [vmem:[%s1926_s7 + $0x20] sm:$0xff]  ;;  %390 = vst [vmem:[%s1931_s28] sm:$0xff] %v389_v4  ;;  %392 = vst [vmem:[%s1931_s28 + $0x8] sm:$0xff] %v391_v5  ;;  %v395_v7 = vld [vmem:[%s1926_s7 + $0x30] sm:$0xff] }
  0x34   : > { %394 = vst [vmem:[%s1931_s28 + $0x10] sm:$0xff] %v393_v6  ;;  %v397_v8 = vld [vmem:[%s1926_s7 + $0x40] sm:$0xff]  ;;  %v399_v9 = vld [vmem:[%s1926_s7 + $0x50] sm:$0xff]  ;;  %396 = vst [vmem:[%s1931_s28 + $0x18] sm:$0xff] %v395_v7 }
  0x35   : > { %398 = vst [vmem:[%s1931_s28 + $0x20] sm:$0xff] %v397_v8  ;;  %400 = vst [vmem:[%s1931_s28 + $0x28] sm:$0xff] %v399_v9  ;;  %v401_v10 = vld [vmem:[%s1926_s7 + $0x60] sm:$0xff]  ;;  %v403_v11 = vld [vmem:[%s1926_s7 + $0x70] sm:$0xff] }
  0x36   : > { %v405_v12 = vld [vmem:[%s1926_s7 + $0x80] sm:$0xff]  ;;  %402 = vst [vmem:[%s1931_s28 + $0x30] sm:$0xff] %v401_v10  ;;  %404 = vst [vmem:[%s1931_s28 + $0x38] sm:$0xff] %v403_v11  ;;  %v407_v13 = vld [vmem:[%s1926_s7 + $0x90] sm:$0xff] }
  0x37   : > { %406 = vst [vmem:[%s1931_s28 + $0x40] sm:$0xff] %v405_v12  ;;  %v409_v14 = vld [vmem:[%s1926_s7 + $0xa0] sm:$0xff]  ;;  %v411_v15 = vld [vmem:[%s1926_s7 + $0xb0] sm:$0xff]  ;;  %408 = vst [vmem:[%s1931_s28 + $0x48] sm:$0xff] %v407_v13 }
  0x38   : > { %410 = vst [vmem:[%s1931_s28 + $0x50] sm:$0xff] %v409_v14  ;;  %412 = vst [vmem:[%s1931_s28 + $0x58] sm:$0xff] %v411_v15  ;;  %v413_v16 = vld [vmem:[%s1926_s7 + $0xc0] sm:$0xff]  ;;  %v415_v17 = vld [vmem:[%s1926_s7 + $0xd0] sm:$0xff] }
  0x39   : > { %v417_v18 = vld [vmem:[%s1926_s7 + $0xe0] sm:$0xff]  ;;  %414 = vst [vmem:[%s1931_s28 + $0x60] sm:$0xff] %v413_v16  ;;  %416 = vst [vmem:[%s1931_s28 + $0x68] sm:$0xff] %v415_v17  ;;  %v419_v19 = vld [vmem:[%s1926_s7 + $0xf0] sm:$0xff] }
  0x3a   : > { %418 = vst [vmem:[%s1931_s28 + $0x70] sm:$0xff] %v417_v18  ;;  %v421_v20 = vld [vmem:[%s1926_s7 + $0x100] sm:$0xff]  ;;  %v423_v21 = vld [vmem:[%s1926_s7 + $0x110] sm:$0xff]  ;;  %420 = vst [vmem:[%s1931_s28 + $0x78] sm:$0xff] %v419_v19 }
  0x3b   : > { %422 = vst [vmem:[%s1931_s28 + $0x80] sm:$0xff] %v421_v20  ;;  %424 = vst [vmem:[%s1931_s28 + $0x88] sm:$0xff] %v423_v21  ;;  %v425_v22 = vld [vmem:[%s1926_s7 + $0x120] sm:$0xff]  ;;  %v427_v23 = vld [vmem:[%s1926_s7 + $0x130] sm:$0xff] }
  0x3c   : > { %v429_v24 = vld [vmem:[%s1926_s7 + $0x140] sm:$0xff]  ;;  %426 = vst [vmem:[%s1931_s28 + $0x90] sm:$0xff] %v425_v22  ;;  %428 = vst [vmem:[%s1931_s28 + $0x98] sm:$0xff] %v427_v23  ;;  %v431_v25 = vld [vmem:[%s1926_s7 + $0x150] sm:$0xff] }
  0x3d   : > { %430 = vst [vmem:[%s1931_s28 + $0xa0] sm:$0xff] %v429_v24  ;;  %v433_v26 = vld [vmem:[%s1926_s7 + $0x160] sm:$0xff]  ;;  %v435_v27 = vld [vmem:[%s1926_s7 + $0x170] sm:$0xff]  ;;  %432 = vst [vmem:[%s1931_s28 + $0xa8] sm:$0xff] %v431_v25 }
  0x3e   : > { %434 = vst [vmem:[%s1931_s28 + $0xb0] sm:$0xff] %v433_v26  ;;  %436 = vst [vmem:[%s1931_s28 + $0xb8] sm:$0xff] %v435_v27  ;;  %v437_v28 = vld [vmem:[%s1926_s7 + $0x180] sm:$0xff]  ;;  %v439_v29 = vld [vmem:[%s1926_s7 + $0x190] sm:$0xff] }
  0x3f   : > { %v441_v30 = vld [vmem:[%s1926_s7 + $0x1a0] sm:$0xff]  ;;  %438 = vst [vmem:[%s1931_s28 + $0xc0] sm:$0xff] %v437_v28  ;;  %440 = vst [vmem:[%s1931_s28 + $0xc8] sm:$0xff] %v439_v29  ;;  %v443_v31 = vld [vmem:[%s1926_s7 + $0x1b0] sm:$0xff] }
  0x40   : > { %442 = vst [vmem:[%s1931_s28 + $0xd0] sm:$0xff] %v441_v30  ;;  %v445_v32 = vld [vmem:[%s1926_s7 + $0x1c0] sm:$0xff]  ;;  %v447_v33 = vld [vmem:[%s1926_s7 + $0x1d0] sm:$0xff]  ;;  %444 = vst [vmem:[%s1931_s28 + $0xd8] sm:$0xff] %v443_v31 }
  0x41   : > { %446 = vst [vmem:[%s1931_s28 + $0xe0] sm:$0xff] %v445_v32  ;;  %448 = vst [vmem:[%s1931_s28 + $0xe8] sm:$0xff] %v447_v33  ;;  %v449_v34 = vld [vmem:[%s1926_s7 + $0x1e0] sm:$0xff]  ;;  %v451_v35 = vld [vmem:[%s1926_s7 + $0x1f0] sm:$0xff] }
  0x42   : > { %v453_v36 = vld [vmem:[%s1926_s7 + $0x200] sm:$0xff]  ;;  %450 = vst [vmem:[%s1931_s28 + $0xf0] sm:$0xff] %v449_v34  ;;  %452 = vst [vmem:[%s1931_s28 + $0xf8] sm:$0xff] %v451_v35  ;;  %v455_v37 = vld [vmem:[%s1926_s7 + $0x210] sm:$0xff] }
  0x43   : > { %454 = vst [vmem:[%s1931_s28 + $0x100] sm:$0xff] %v453_v36  ;;  %v457_v38 = vld [vmem:[%s1926_s7 + $0x220] sm:$0xff]  ;;  %v459_v39 = vld [vmem:[%s1926_s7 + $0x230] sm:$0xff]  ;;  %456 = vst [vmem:[%s1931_s28 + $0x108] sm:$0xff] %v455_v37 }
  0x44   : > { %458 = vst [vmem:[%s1931_s28 + $0x110] sm:$0xff] %v457_v38  ;;  %460 = vst [vmem:[%s1931_s28 + $0x118] sm:$0xff] %v459_v39  ;;  %v461_v40 = vld [vmem:[%s1926_s7 + $0x240] sm:$0xff]  ;;  %v463_v41 = vld [vmem:[%s1926_s7 + $0x250] sm:$0xff] }
  0x45   : > { %v465_v42 = vld [vmem:[%s1926_s7 + $0x260] sm:$0xff]  ;;  %462 = vst [vmem:[%s1931_s28 + $0x120] sm:$0xff] %v461_v40  ;;  %464 = vst [vmem:[%s1931_s28 + $0x128] sm:$0xff] %v463_v41  ;;  %v467_v43 = vld [vmem:[%s1926_s7 + $0x270] sm:$0xff] }
  0x46   : > { %466 = vst [vmem:[%s1931_s28 + $0x130] sm:$0xff] %v465_v42  ;;  %v469_v44 = vld [vmem:[%s1926_s7 + $0x280] sm:$0xff]  ;;  %v471_v45 = vld [vmem:[%s1926_s7 + $0x290] sm:$0xff]  ;;  %468 = vst [vmem:[%s1931_s28 + $0x138] sm:$0xff] %v467_v43 }
  0x47   : > { %470 = vst [vmem:[%s1931_s28 + $0x140] sm:$0xff] %v469_v44  ;;  %472 = vst [vmem:[%s1931_s28 + $0x148] sm:$0xff] %v471_v45  ;;  %v473_v46 = vld [vmem:[%s1926_s7 + $0x2a0] sm:$0xff]  ;;  %v475_v47 = vld [vmem:[%s1926_s7 + $0x2b0] sm:$0xff] }
  0x48   : > { %v477_v48 = vld [vmem:[%s1926_s7 + $0x2c0] sm:$0xff]  ;;  %474 = vst [vmem:[%s1931_s28 + $0x150] sm:$0xff] %v473_v46  ;;  %476 = vst [vmem:[%s1931_s28 + $0x158] sm:$0xff] %v475_v47  ;;  %v479_v49 = vld [vmem:[%s1926_s7 + $0x2d0] sm:$0xff] }
  0x49   : > { %478 = vst [vmem:[%s1931_s28 + $0x160] sm:$0xff] %v477_v48  ;;  %v481_v50 = vld [vmem:[%s1926_s7 + $0x2e0] sm:$0xff]  ;;  %v483_v51 = vld [vmem:[%s1926_s7 + $0x2f0] sm:$0xff]  ;;  %480 = vst [vmem:[%s1931_s28 + $0x168] sm:$0xff] %v479_v49 }
  0x4a   : > { %482 = vst [vmem:[%s1931_s28 + $0x170] sm:$0xff] %v481_v50  ;;  %484 = vst [vmem:[%s1931_s28 + $0x178] sm:$0xff] %v483_v51  ;;  %v485_v52 = vld [vmem:[%s1926_s7 + $0x300] sm:$0xff]  ;;  %v487_v53 = vld [vmem:[%s1926_s7 + $0x310] sm:$0xff] }
  0x4b   : > { %v489_v54 = vld [vmem:[%s1926_s7 + $0x320] sm:$0xff]  ;;  %486 = vst [vmem:[%s1931_s28 + $0x180] sm:$0xff] %v485_v52  ;;  %488 = vst [vmem:[%s1931_s28 + $0x188] sm:$0xff] %v487_v53  ;;  %v491_v55 = vld [vmem:[%s1926_s7 + $0x330] sm:$0xff] }
  0x4c   : > { %490 = vst [vmem:[%s1931_s28 + $0x190] sm:$0xff] %v489_v54  ;;  %v493_v56 = vld [vmem:[%s1926_s7 + $0x340] sm:$0xff]  ;;  %v495_v57 = vld [vmem:[%s1926_s7 + $0x350] sm:$0xff]  ;;  %492 = vst [vmem:[%s1931_s28 + $0x198] sm:$0xff] %v491_v55 }
  0x4d   : > { %494 = vst [vmem:[%s1931_s28 + $0x1a0] sm:$0xff] %v493_v56  ;;  %496 = vst [vmem:[%s1931_s28 + $0x1a8] sm:$0xff] %v495_v57  ;;  %v497_v58 = vld [vmem:[%s1926_s7 + $0x360] sm:$0xff]  ;;  %v499_v59 = vld [vmem:[%s1926_s7 + $0x370] sm:$0xff] }
  0x4e   : > { %v501_v60 = vld [vmem:[%s1926_s7 + $0x380] sm:$0xff]  ;;  %498 = vst [vmem:[%s1931_s28 + $0x1b0] sm:$0xff] %v497_v58  ;;  %500 = vst [vmem:[%s1931_s28 + $0x1b8] sm:$0xff] %v499_v59  ;;  %v503_v61 = vld [vmem:[%s1926_s7 + $0x390] sm:$0xff] }
  0x4f   : > { %502 = vst [vmem:[%s1931_s28 + $0x1c0] sm:$0xff] %v501_v60  ;;  %v505_v62 = vld [vmem:[%s1926_s7 + $0x3a0] sm:$0xff]  ;;  %v507_v63 = vld [vmem:[%s1926_s7 + $0x3b0] sm:$0xff]  ;;  %504 = vst [vmem:[%s1931_s28 + $0x1c8] sm:$0xff] %v503_v61 }
  0x50   : > { %506 = vst [vmem:[%s1931_s28 + $0x1d0] sm:$0xff] %v505_v62  ;;  %508 = vst [vmem:[%s1931_s28 + $0x1d8] sm:$0xff] %v507_v63  ;;  %v509_v0 = vld [vmem:[%s1926_s7 + $0x3c0] sm:$0xff]  ;;  %v511_v1 = vld [vmem:[%s1926_s7 + $0x3d0] sm:$0xff] }
  0x51   : > { %v513_v2 = vld [vmem:[%s1926_s7 + $0x3e0] sm:$0xff]  ;;  %510 = vst [vmem:[%s1931_s28 + $0x1e0] sm:$0xff] %v509_v0  ;;  %512 = vst [vmem:[%s1931_s28 + $0x1e8] sm:$0xff] %v511_v1  ;;  %v515_v3 = vld [vmem:[%s1926_s7 + $0x3f0] sm:$0xff] }
  0x52   : > { %514 = vst [vmem:[%s1931_s28 + $0x1f0] sm:$0xff] %v513_v2  ;;  %516 = vst [vmem:[%s1931_s28 + $0x1f8] sm:$0xff] %v515_v3 }
  0x53 PF: > { %530 = sbr.rel (!%p1902_p11) target bundleno = 88 (0x58), region = 85  ;;  %s532_s0 = sand.u32 (%p1902_p11), 1, %s1738_s16  }
  0x54   : > { %s1493_s27 = sshll.u32 (%p1902_p11), %s1770_s24, 3  ;;  %s1405_s10 = sshll.u32 (%p1902_p11), %s532_s0, 4 }
  0x55   : > { %s540_s30 = scalar_lea.vmem (%p1902_p11), %s2212_s3, %s1493_s27  ;;  %s534_s9 = scalar_lea.vmem (%p1902_p11), [#allocation5], %s1405_s10 }
  0x56   : > { %v571_v4 = vld [vmem:[%s540_s30] sm:$0xff] (%p1902_p11)  ;;  %v573_v5 = vld [vmem:[%s540_s30 + $0x10] sm:$0xff] (%p1902_p11) }
  0x57   : > { %572 = vst [vmem:[%s534_s9] sm:$0xff] (%p1902_p11), %v571_v4  ;;  %574 = vst [vmem:[%s534_s9 + $0x8] sm:$0xff] (%p1902_p11), %v573_v5 }
  0x58 PF: > { %p1408_p1 = scmp.ge.s32.totalorder %s1774_s25, 1  ;;  %p579_p2 = scmp.lt.s32.totalorder %s1774_s25, 19 }
  0x5a   : > { %p580_p3 = pnand %p1408_p1, %p579_p2 }
  0x5b   : > { %s586_s7 = sand.u32 (!%p580_p3), 1, %s1750_s19   ;;  %s593_s14 = sand.u32 (!%p580_p3), 1, %s1742_s17  }
  0x5c   : > { %583 = sbr.rel (%p580_p3) target bundleno = 403 (0x193), region = 123  ;;  %s1409_s6 = sshll.u32 (!%p580_p3), %s586_s7, 5 }
  0x5d   : > { %s1410_s11 = sshll.u32 (!%p580_p3), %s593_s14, 9  ;;  %s600_s8 = sand.u32 (!%p580_p3), 1, %s1734_s15  }
  0x5e   : > { %s1413_s28 = sshll.u32 (!%p580_p3), %s1762_s22, 1  ;;  %s2071_s0 = sshll.u32 (!%p580_p3), %s600_s8, 4 }
  0x5f   : > { %p641_p4 = scmp.lt.s32.totalorder (!%p580_p3), %s1413_s28, 3  ;;  %s2079_s5 = scalar_lea.vmem (!%p580_p3), [#allocation3], %s1409_s6 }
  0x60   : > { %s2081_s19 = scalar_lea.vmem (!%p580_p3), [#allocation4], %s1410_s11  ;;  %s602_s17 = scalar_lea.vmem (!%p580_p3), [#allocation5], %s2071_s0 }
  0x61   : > { %s2245_s28 = smov (!%p641_p4, %s1413_s28), 3  ;;  %s2085_s30 = scalar_lea.vmem [#allocation6], %s2071_s0 }
  0x62   : > { %s643_s26 = scalar_lea.vmem %s2211_s2, %s2245_s28  ;;  %p1414_p5 = scmp.ne.s32.totalorder %s1758_s21, 0 }
  0x64   : > { %652 = sbr.rel (%p1414_p5) target bundleno = 108 (0x6c), region = 139 }
  0x69   : > { %v1776_v6 = vmov 0.0  }
  0x6a   : > { %653 = vst [vmem:[#allocation2 + $0x10] sm:$0xff] %v1776_v6  ;;  %654 = vst [vmem:[#allocation2] sm:$0xff] %v1776_v6 }
  0x6b   : > { %655 = vst [vmem:[#allocation2 + $0x18] sm:$0xff] %v1776_v6  ;;  %656 = vst [vmem:[#allocation2 + $0x8] sm:$0xff] %v1776_v6 }
  0x6c PF: > { %v1586_v7 = vld [vmem:[%s2081_s19 + $0x74] ss:$8 sps:$4 sm:$0xff]   ;;  %v1590_v9 = vld [vmem:[%s2081_s19 + $0x70] ss:$8 sps:$4 sm:$0xff]   ;;  %v1592_v11 = vld [vmem:[%s2081_s19 + $0x64] ss:$8 sps:$4 sm:$0xff]  }
  0x6d   : > { %v1588_v8 = vld [vmem:[%s2081_s19 + $0x174] ss:$8 sps:$4 sm:$0xff]   ;;  %1069 = vmatprep.subr.bf16.mxu0 %v1586_v7  ;;  %v1591_v10 = vld [vmem:[%s2081_s19 + $0x170] ss:$8 sps:$4 sm:$0xff]   ;;  %v1594_v12 = vld [vmem:[%s2081_s19 + $0x164] ss:$8 sps:$4 sm:$0xff]  }
  0x6e   : > { %1112 = vmatprep.subr.bf16.mxu1 %v1588_v8  ;;  %1070 = vmatpush1.bf16.msra.mxu0 %v1590_v9  ;;  %v1596_v13 = vld [vmem:[%s2081_s19 + $0x60] ss:$8 sps:$4 sm:$0xff]   ;;  %v1598_v15 = vld [vmem:[%s2081_s19 + $0x54] ss:$8 sps:$4 sm:$0xff]   ;;  %v1602_v17 = vld [vmem:[%s2081_s19 + $0x50] ss:$8 sps:$4 sm:$0xff]  }
  0x6f   : > { %1113 = vmatpush1.bf16.msra.mxu1 %v1591_v10  ;;  %1071 = vmatprep.subr.bf16.mxu0 %v1592_v11  ;;  %v1597_v14 = vld [vmem:[%s2081_s19 + $0x160] ss:$8 sps:$4 sm:$0xff]   ;;  %v1600_v16 = vld [vmem:[%s2081_s19 + $0x154] ss:$8 sps:$4 sm:$0xff]   ;;  %v1603_v18 = vld [vmem:[%s2081_s19 + $0x150] ss:$8 sps:$4 sm:$0xff]  }
  0x70   : > { %1114 = vmatprep.subr.bf16.mxu1 %v1594_v12  ;;  %v1604_v19 = vld [vmem:[%s2081_s19 + $0x44] ss:$8 sps:$4 sm:$0xff]   ;;  %v1608_v21 = vld [vmem:[%s2081_s19 + $0x40] ss:$8 sps:$4 sm:$0xff]   ;;  %v1610_v23 = vld [vmem:[%s2081_s19 + $0x34] ss:$8 sps:$4 sm:$0xff]  }
  0x71   : > { %v1606_v20 = vld [vmem:[%s2081_s19 + $0x144] ss:$8 sps:$4 sm:$0xff]   ;;  %v1609_v22 = vld [vmem:[%s2081_s19 + $0x140] ss:$8 sps:$4 sm:$0xff]   ;;  %v1612_v24 = vld [vmem:[%s2081_s19 + $0x134] ss:$8 sps:$4 sm:$0xff]  }
  0x72   : > { %1072 = vmatpush1.bf16.msra.mxu0 %v1596_v13  ;;  %v1614_v25 = vld [vmem:[%s2081_s19 + $0x30] ss:$8 sps:$4 sm:$0xff]   ;;  %v1616_v27 = vld [vmem:[%s2081_s19 + $0x24] ss:$8 sps:$4 sm:$0xff]   ;;  %v1620_v29 = vld [vmem:[%s2081_s19 + $0x20] ss:$8 sps:$4 sm:$0xff]  }
  0x73   : > { %1115 = vmatpush1.bf16.msra.mxu1 %v1597_v14  ;;  %1073 = vmatprep.subr.bf16.mxu0 %v1598_v15  ;;  %v1615_v26 = vld [vmem:[%s2081_s19 + $0x130] ss:$8 sps:$4 sm:$0xff]   ;;  %v1618_v28 = vld [vmem:[%s2081_s19 + $0x124] ss:$8 sps:$4 sm:$0xff]   ;;  %v1621_v30 = vld [vmem:[%s2081_s19 + $0x120] ss:$8 sps:$4 sm:$0xff]  }
  0x74   : > { %1116 = vmatprep.subr.bf16.mxu1 %v1600_v16  ;;  %v1622_v31 = vld [vmem:[%s2081_s19 + $0x14] ss:$8 sps:$4 sm:$0xff]   ;;  %v1626_v33 = vld [vmem:[%s2081_s19 + $0x10] ss:$8 sps:$4 sm:$0xff]   ;;  %v1628_v35 = vld [vmem:[%s2081_s19 + $0x4] ss:$8 sps:$4 sm:$0xff]  }
  0x75   : > { %v1624_v32 = vld [vmem:[%s2081_s19 + $0x114] ss:$8 sps:$4 sm:$0xff]   ;;  %v1627_v34 = vld [vmem:[%s2081_s19 + $0x110] ss:$8 sps:$4 sm:$0xff]   ;;  %v1630_v36 = vld [vmem:[%s2081_s19 + $0x104] ss:$8 sps:$4 sm:$0xff]  }
  0x76   : > { %1074 = vmatpush1.bf16.msra.mxu0 %v1602_v17  ;;  %v1632_v37 = vld [vmem:[%s2081_s19] ss:$8 sps:$4 sm:$0xff]   ;;  %v1634_v39 = vld [vmem:[%s2081_s19 + $0xf4] ss:$8 sps:$4 sm:$0xff]   ;;  %v1638_v41 = vld [vmem:[%s2081_s19 + $0xf0] ss:$8 sps:$4 sm:$0xff]  }
  0x77   : > { %1117 = vmatpush1.bf16.msra.mxu1 %v1603_v18  ;;  %1075 = vmatprep.subr.bf16.mxu0 %v1604_v19  ;;  %v1633_v38 = vld [vmem:[%s2081_s19 + $0x100] ss:$8 sps:$4 sm:$0xff]   ;;  %v1636_v40 = vld [vmem:[%s2081_s19 + $0x1f4] ss:$8 sps:$4 sm:$0xff]   ;;  %v1639_v42 = vld [vmem:[%s2081_s19 + $0x1f0] ss:$8 sps:$4 sm:$0xff]  }
  0x78   : > { %1118 = vmatprep.subr.bf16.mxu1 %v1606_v20  ;;  %v1640_v43 = vld [vmem:[%s2081_s19 + $0xe4] ss:$8 sps:$4 sm:$0xff]   ;;  %v1644_v45 = vld [vmem:[%s2081_s19 + $0xe0] ss:$8 sps:$4 sm:$0xff]   ;;  %v1646_v47 = vld [vmem:[%s2081_s19 + $0xd4] ss:$8 sps:$4 sm:$0xff]  }
  0x79   : > { %v1642_v44 = vld [vmem:[%s2081_s19 + $0x1e4] ss:$8 sps:$4 sm:$0xff]   ;;  %v1645_v46 = vld [vmem:[%s2081_s19 + $0x1e0] ss:$8 sps:$4 sm:$0xff]   ;;  %v1648_v48 = vld [vmem:[%s2081_s19 + $0x1d4] ss:$8 sps:$4 sm:$0xff]  }
  0x7a   : > { %1076 = vmatpush1.bf16.msra.mxu0 %v1608_v21  ;;  %v1650_v49 = vld [vmem:[%s2081_s19 + $0xd0] ss:$8 sps:$4 sm:$0xff]   ;;  %v1652_v51 = vld [vmem:[%s2081_s19 + $0xc4] ss:$8 sps:$4 sm:$0xff]   ;;  %v1656_v53 = vld [vmem:[%s2081_s19 + $0xc0] ss:$8 sps:$4 sm:$0xff]  }
  0x7b   : > { %1119 = vmatpush1.bf16.msra.mxu1 %v1609_v22  ;;  %1077 = vmatprep.subr.bf16.mxu0 %v1610_v23  ;;  %v1651_v50 = vld [vmem:[%s2081_s19 + $0x1d0] ss:$8 sps:$4 sm:$0xff]   ;;  %v1654_v52 = vld [vmem:[%s2081_s19 + $0x1c4] ss:$8 sps:$4 sm:$0xff]   ;;  %v1657_v55 = vld [vmem:[%s2081_s19 + $0x1c0] ss:$8 sps:$4 sm:$0xff]  }
  0x7c   : > { %1120 = vmatprep.subr.bf16.mxu1 %v1612_v24  ;;  %v1684_v54 = vld [vmem:[%s2079_s5 + $0x4] ss:$16 sps:$4 sm:$0xff]   ;;  %v1687_v58 = vld [vmem:[%s2079_s5 + $0xc] ss:$16 sps:$4 sm:$0xff]   ;;  %v1662_v59 = vld [vmem:[%s2081_s19 + $0xb0] ss:$8 sps:$4 sm:$0xff]  }
  0x7d   : > { %v1658_v56 = vld [vmem:[%s2081_s19 + $0xb4] ss:$8 sps:$4 sm:$0xff]   ;;  %1101 = vmatprep.mubr.bf16.mxu0 %v1684_v54  ;;  %1144 = vmatprep.mubr.bf16.mxu1 %v1687_v58  ;;  %v1663_v60 = vld [vmem:[%s2081_s19 + $0x1b0] ss:$8 sps:$4 sm:$0xff]   ;;  %v1664_v61 = vld [vmem:[%s2081_s19 + $0xa4] ss:$8 sps:$4 sm:$0xff]  }
  0x7e   : > { %1078 = vmatpush1.bf16.msra.mxu0 %v1614_v25  ;;  %v1660_v57 = vld [vmem:[%s2081_s19 + $0x1b4] ss:$8 sps:$4 sm:$0xff]   ;;  %v1666_v62 = vld [vmem:[%s2081_s19 + $0x1a4] ss:$8 sps:$4 sm:$0xff]   ;;  %v1668_v63 = vld [vmem:[%s2081_s19 + $0xa0] ss:$8 sps:$4 sm:$0xff]  }
  0x7f   : > { %1121 = vmatpush1.bf16.msra.mxu1 %v1615_v26  ;;  %1079 = vmatprep.subr.bf16.mxu0 %v1616_v27  ;;  %v1669_v0 = vld [vmem:[%s2081_s19 + $0x1a0] ss:$8 sps:$4 sm:$0xff]   ;;  %v1670_v1 = vld [vmem:[%s2081_s19 + $0x94] ss:$8 sps:$4 sm:$0xff]   ;;  %v1674_v3 = vld [vmem:[%s2081_s19 + $0x90] ss:$8 sps:$4 sm:$0xff]  }
  0x80   : > { %1122 = vmatprep.subr.bf16.mxu1 %v1618_v28  ;;  %v1672_v2 = vld [vmem:[%s2081_s19 + $0x194] ss:$8 sps:$4 sm:$0xff]   ;;  %v1675_v4 = vld [vmem:[%s2081_s19 + $0x190] ss:$8 sps:$4 sm:$0xff]   ;;  %v1676_v5 = vld [vmem:[%s2081_s19 + $0x84] ss:$8 sps:$4 sm:$0xff]  }
  0x81   : > { %v1678_v6 = vld [vmem:[%s2081_s19 + $0x184] ss:$8 sps:$4 sm:$0xff]   ;;  %v1680_v7 = vld [vmem:[%s2081_s19 + $0x80] ss:$8 sps:$4 sm:$0xff]   ;;  %v657_v12 = vld [vmem:[#allocation2 + $0x10] sm:$0xff]  ;;  %p1483_p6 = scmp.ne.s32.totalorder %s1758_s21, 8 }
  0x82   : > { %1080 = vmatpush1.bf16.msra.mxu0 %v1620_v29  ;;  %v1681_v8 = vld [vmem:[%s2081_s19 + $0x180] ss:$8 sps:$4 sm:$0xff]   ;;  %v659_v21 = vld [vmem:[#allocation2 + $0x18] sm:$0xff] }
  0x83   : > { %1123 = vmatpush1.bf16.msra.mxu1 %v1621_v30  ;;  %1081 = vmatprep.subr.bf16.mxu0 %v1622_v31  ;;  %v1682_v9 = vld [vmem:[%s2079_s5] ss:$16 sps:$4 sm:$0xff]   ;;  %v1685_v10 = vld [vmem:[%s2079_s5 + $0x8] ss:$16 sps:$4 sm:$0xff]  }
  0x84   : > { %1124 = vmatprep.subr.bf16.mxu1 %v1624_v32  ;;  %v658_v16 = vld [vmem:[#allocation2] sm:$0xff]  ;;  %v660_v26 = vld [vmem:[#allocation2 + $0x8] sm:$0xff] }
  0x86   : > { %1082 = vmatpush1.bf16.msra.mxu0 %v1626_v33 }
  0x87   : > { %1125 = vmatpush1.bf16.msra.mxu1 %v1627_v34  ;;  %1083 = vmatprep.subr.bf16.mxu0 %v1628_v35 }
  0x88   : > { %1126 = vmatprep.subr.bf16.mxu1 %v1630_v36 }
  0x8a   : > { %1084 = vmatpush1.bf16.msra.mxu0 %v1632_v37 }
  0x8b   : > { %1127 = vmatpush1.bf16.msra.mxu1 %v1633_v38  ;;  %1085 = vmatprep.subr.bf16.mxu0 %v1634_v39 }
  0x8c   : > { %1128 = vmatprep.subr.bf16.mxu1 %v1636_v40 }
  0x8e   : > { %1086 = vmatpush2.bf16.msra.mxu0 %v1638_v41 }
  0x8f   : > { %1129 = vmatpush2.bf16.msra.mxu1 %v1639_v42  ;;  %1087 = vmatprep.subr.bf16.mxu0 %v1640_v43 }
  0x90   : > { %1130 = vmatprep.subr.bf16.mxu1 %v1642_v44 }
  0x92   : > { %1088 = vmatpush2.bf16.msra.mxu0 %v1644_v45 }
  0x93   : > { %1131 = vmatpush2.bf16.msra.mxu1 %v1645_v46  ;;  %1089 = vmatprep.subr.bf16.mxu0 %v1646_v47 }
  0x94   : > { %1132 = vmatprep.subr.bf16.mxu1 %v1648_v48 }
  0x96   : > { %1090 = vmatpush2.bf16.msra.mxu0 %v1650_v49 }
  0x97   : > { %1133 = vmatpush2.bf16.msra.mxu1 %v1651_v50  ;;  %1091 = vmatprep.subr.bf16.mxu0 %v1652_v51 }
  0x98   : > { %1134 = vmatprep.subr.bf16.mxu1 %v1654_v52 }
  0x9a   : > { %1092 = vmatpush2.bf16.msra.mxu0 %v1656_v53 }
  0x9b   : > { %1135 = vmatpush2.bf16.msra.mxu1 %v1657_v55  ;;  %1093 = vmatprep.subr.bf16.mxu0 %v1658_v56 }
  0x9c   : > { %1136 = vmatprep.subr.bf16.mxu1 %v1660_v57 }
  0x9e   : > { %1094 = vmatpush2.bf16.msra.mxu0 %v1662_v59 }
  0x9f   : > { %1137 = vmatpush2.bf16.msra.mxu1 %v1663_v60  ;;  %1095 = vmatprep.subr.bf16.mxu0 %v1664_v61 }
  0xa0   : > { %1138 = vmatprep.subr.bf16.mxu1 %v1666_v62 }
  0xa2   : > { %1096 = vmatpush2.bf16.msra.mxu0 %v1668_v63 }
  0xa3   : > { %1139 = vmatpush2.bf16.msra.mxu1 %v1669_v0  ;;  %1097 = vmatprep.subr.bf16.mxu0 %v1670_v1 }
  0xa4   : > { %1140 = vmatprep.subr.bf16.mxu1 %v1672_v2 }
  0xa6   : > { %1098 = vmatpush2.bf16.msra.mxu0 %v1674_v3 }
  0xa7   : > { %1141 = vmatpush2.bf16.msra.mxu1 %v1675_v4  ;;  %1099 = vmatprep.subr.bf16.mxu0 %v1676_v5 }
  0xa8   : > { %1142 = vmatprep.subr.bf16.mxu1 %v1678_v6 }
  0xaa   : > { %1100 = vmatpush2.bf16.msra.mxu0 %v1680_v7 }
  0xab   : > { %1143 = vmatpush2.bf16.msra.mxu1 %v1681_v8 }
  0xad   : > { %1102 = vmatmul.mubr.bf16.vlgmr.msra.gmra.mxu0 %v1682_v9 }
  0xae   : > { %1145 = vmatmul.mubr.bf16.vlgmr.msra.gmra.mxu1 %v1685_v10 }
 0x16d   : > { %v1103_v11 = vpop.f32.mrf.mxu0 }
 0x16e   : > { %v1146_v13 = vpop.f32.mrf.mxu1 }
 0x16f   : > { %v1147_v14 = vadd.f32 %v1146_v13, %v1103_v11  ;;  %v1105_v15 = vpop.f32.mrf.mxu0 }
 0x170   : > { %v1148_v17 = vpop.f32.mrf.mxu1 }
 0x171   : > { %v1155_v18 = vadd.f32 %v1147_v14, %v657_v12  ;;  %v1149_v19 = vadd.f32 %v1148_v17, %v1105_v15  ;;  %v1107_v20 = vpop.f32.mrf.mxu0 }
 0x172   : > { %v1150_v22 = vpop.f32.mrf.mxu1 }
 0x173   : > { %1159 = vst [vmem:[#allocation2 + $0x10] sm:$0xff] %v1155_v18  ;;  %v1156_v23 = vadd.f32 %v1149_v19, %v658_v16  ;;  %v1151_v24 = vadd.f32 %v1150_v22, %v1107_v20  ;;  %v1109_v25 = vpop.f32.mrf.mxu0 }
 0x174   : > { %v1152_v27 = vpop.f32.mrf.mxu1 }
 0x175   : > { %1160 = vst [vmem:[#allocation2] sm:$0xff] %v1156_v23  ;;  %v1157_v28 = vadd.f32 %v1151_v24, %v659_v21  ;;  %v1153_v29 = vadd.f32 %v1152_v27, %v1109_v25  ;;  %1166 = sbr.rel (%p1483_p6) target bundleno = 395 (0x18b), region = 143 }
 0x177   : > { %1161 = vst [vmem:[#allocation2 + $0x18] sm:$0xff] %v1157_v28  ;;  %v1158_v30 = vadd.f32 %v1153_v29, %v660_v26 }
 0x179   : > { %1162 = vst [vmem:[#allocation2 + $0x8] sm:$0xff] %v1158_v30 }
 0x17a   : > { %v1173_v31 = vlaneseq  ;;  %v1187_v33 = vld [vmem:[%s602_s17] sm:$0xff]  ;;  %v1188_v35 = vld [vmem:[%s602_s17 + $0x8] sm:$0xff] }
 0x17b   : > { %v1171_v34 = vld [vmem:[%s643_s26] sm:$0x3]  ;;  %v1167_v36 = vld [vmem:[#allocation2 + $0x10] sm:$0xff]  ;;  %v1189_v40 = vunpack.c.l.bf16 %v1187_v33  ;;  %v1190_v41 = vunpack.c.h.bf16 %v1187_v33  ;;  %v1191_v46 = vunpack.c.l.bf16 %v1188_v35  ;;  %v1192_v47 = vunpack.c.h.bf16 %v1188_v35 }
 0x17c   : > { %v1174_v32 = vshrl.u32 %v1173_v31, 7  ;;  %v1168_v39 = vld [vmem:[#allocation2] sm:$0xff] }
 0x17e   : > { %v1175_v37 = vsub.s32 0, %v1174_v32  ;;  %v1179_v38 = vsub.s32 1, %v1174_v32  ;;  %v1169_v42 = vld [vmem:[#allocation2 + $0x18] sm:$0xff] }
 0x180   : > { %v1170_v43 = vld [vmem:[#allocation2 + $0x8] sm:$0xff]  ;;  %v1176_v44 = vrot.slane %v1171_v34, %v1175_v37  ;;  %v1180_v45 = vrot.slane %v1171_v34, %v1179_v38 }
 0x182   : > { %v1183_v48 = vadd.f32 %v1176_v44, %v1167_v36  ;;  %v1184_v49 = vadd.f32 %v1180_v45, %v1168_v39  ;;  %v1185_v50 = vadd.f32 %v1176_v44, %v1169_v42  ;;  %v1186_v51 = vadd.f32 %v1180_v45, %v1170_v43 }
 0x184   : > { %v1193_v52 = vadd.f32 %v1189_v40, %v1183_v48  ;;  %v1194_v53 = vadd.f32 %v1190_v41, %v1184_v49  ;;  %v1195_v54 = vadd.f32 %v1191_v46, %v1185_v50  ;;  %v1196_v55 = vadd.f32 %v1192_v47, %v1186_v51 }
 0x186   : > { %v1197_v56 = vmax.f32 %v1193_v52, 0.0  ;;  %v1198_v57 = vmax.f32 %v1194_v53, 0.0  ;;  %v1199_v58 = vmax.f32 %v1195_v54, 0.0  ;;  %v1200_v59 = vmax.f32 %v1196_v55, 0.0 }
 0x188   : > { %v1494_v60 = vpack.c.bf16 %v1198_v57, %v1197_v56  ;;  %v1495_v61 = vpack.c.bf16 %v1200_v59, %v1199_v58 }
 0x18a   : > { %1213 = vst [vmem:[%s2085_s30] sm:$0xff] %v1494_v60  ;;  %1214 = vst [vmem:[%s2085_s30 + $0x8] sm:$0xff] %v1495_v61 }
 0x18b PF: > { %1221 = sbr.rel (!%p1906_p13) target bundleno = 403 (0x193), region = 147  ;;  %s1496_s21 = sshll.u32 (%p1906_p13), %s1762_s22, 3 }
 0x18c   : > { %s1227_s6 = scalar_lea.vmem (%p1906_p13), %s2213_s4, %s1496_s21 }
 0x191   : > { %v1258_v62 = vld [vmem:[%s2085_s30] sm:$0xff]  ;;  %v1260_v63 = vld [vmem:[%s2085_s30 + $0x8] sm:$0xff] }
 0x192   : > { %1259 = vst [vmem:[%s1227_s6] sm:$0xff] %v1258_v62  ;;  %1261 = vst [vmem:[%s1227_s6 + $0x10] sm:$0xff] %v1260_v63 }
 0x193 PF: > { %s14_s25 = sadd.s32 1, %s1774_s25   ;;  %s2225_s29 = sld [smem:[#allocation9_spill]] }
 0x194   : > { %p11_p7 = scmp.ge.s32.totalorder %s14_s25, 20   ;;  %s2226_s11 = sld [smem:[#allocation7_spill]] }
 0x195   : > { %s2227_s8 = sld [smem:[#allocation8_spill]]  ;;  %s2228_s15 = smov %s1738_s16 }
 0x196   : > { %s2229_s16 = smov %s1898_s13  ;;  %s2230_s17 = smov %s1746_s18 }
 0x197   : > { %s2231_s18 = smov %s1895_s12  ;;  %s2232_s19 = smov %s1754_s20 }
 0x198   : > { %s2234_s21 = smov %s1766_s23  ;;  %s2235_s22 = smov %s1770_s24 }
 0x199   : > { %s2233_s20 = smov %s2225_s29  ;;  %13 = sbr.rel (!%p11_p7) target bundleno = 8 (0x8), region = 235 }
 0x19a   : > { %s2236_s23 = smov %s2226_s11 }
 0x19b   : > { %s2237_s24 = smov %s2227_s8 }

// kernel: forgery_detector_forward.35
= control target key start
LH: loop header
LB: loop body
LE: loop exit
PB: predicated region body
PF: predicated region fallthrough
CT: control target
= control target key end

     0   :  { %s2049_s0 = inlined_call_operand.vmem [shape: bf16[16,4608], index: 0, kind: input, shape index: {}]   ;;  %s2050_s1 = inlined_call_operand.vmem [shape: bf16[4608,512], index: 1, kind: input, shape index: {}]   ;;  %s2051_s2 = inlined_call_operand.vmem [shape: f32[1,512], index: 2, kind: input, shape index: {}]   ;;  %s2052_s3 = inlined_call_operand.vmem [shape: bf16[16,512], index: 3, kind: output, shape index: {}]  }
   0x1   :  { %2054 = sst [smem:[#allocation7_spill]] %s2049_s0 }
   0x2   :  { %2055 = sst [smem:[#allocation8_spill]] %s2050_s1 }
   0x3   :  { %s1667_s12 = smov 0   ;;  %s1669_s13 = smov 0  }
   0x4   :  { %s1671_s14 = smov 0   ;;  %s1673_s15 = smov 0  }
   0x5   :  { %s1675_s16 = smov 0   ;;  %s1677_s17 = smov 0  }
   0x6   :  { %s1679_s18 = smov 0   ;;  %s1681_s19 = smov 0  }
   0x7   :  { %s1683_s20 = smov 0   ;;  %s1685_s21 = smov 0  }
   0x8   :  { %s1687_s22 = smov 0  }
   0x9 LB: > { %s1268_s23 = sadd.s32 4294967295, %s1644_s22   ;;  %s25_s24 = sadd.s32 1, %s1636_s20  ;;  %s1644_s22 = sphi %s1687_s22, %s13_s22   ;;  %s1640_s21 = sphi %s1685_s21, %s2072_s21   ;;  %s1636_s20 = sphi %s1683_s20, %s2071_s20   ;;  %s1632_s19 = sphi %s1681_s19, %s2070_s19   ;;  %s1628_s18 = sphi %s1679_s18, %s2069_s18   ;;  %s1624_s17 = sphi %s1677_s17, %s2068_s17   ;;  %s1620_s16 = sphi %s1675_s16, %s2067_s16   ;;  %s1616_s15 = sphi %s1673_s15, %s2066_s15   ;;  %s1612_s14 = sphi %s1671_s14, %s2065_s14   ;;  %s1608_s13 = sphi %s1669_s13, %s2064_s13   ;;  %s1604_s12 = sphi %s1667_s12, %s2063_s12  }
   0xa   : > { %p26_p0 = scmp.ge.s32.totalorder %s25_s24, 9  ;;  %s28_s25 = sadd.s32 1, %s1640_s21 }
   0xb   : > { %s41_s26 = sadd.s32 1, %s1624_s17  ;;  %p48_p1 = scmp.ne.s32.totalorder %s1624_s17, %s1620_s16 }
   0xc   : > { %s2074_s24 = smov (%p26_p0, %s25_s24), 0  ;;  %s2076_s25 = smov (!%p26_p0, %s28_s25), %s1640_s21 }
   0xd   : > { %s37_s27 = ssub.s32 %s1636_s20, %s2074_s24  ;;  %p49_p2 = scmp.eq.s32.totalorder %s1644_s22, 0 }
   0xe   : > { %p30_p3 = scmp.ge.s32.totalorder %s2076_s25, 2  ;;  %p39_p4 = scmp.eq.s32.totalorder %s37_s27, 0 }
   0xf   : > { %p1734_p5 = por %p49_p2, %p48_p1  ;;  %s69_s29 = sadd.s32 1, %s1616_s15 }
  0x10   : > { %s2078_s25 = smov (%p30_p3, %s2076_s25), 0  ;;  %p76_p6 = scmp.ne.s32.totalorder %s1616_s15, %s1612_s14 }
  0x11   : > { %2057 = sst [smem:[#allocation6_spill]] %s2078_s25  ;;  %s65_s4 = ssub.s32 %s1640_s21, %s2078_s25 }
  0x12   : > { %s1742_s30 = scalar_select %p39_p4, %s1624_s17, %s41_s26  }
  0x13   : > { %s66_s5 = sor.u32 %s65_s4, %s37_s27  ;;  %p121_p7 = scmp.eq.s32.totalorder %s65_s4, 0 }
  0x14   : > { %p67_p8 = scmp.eq.s32.totalorder %s66_s5, 0  ;;  %p1748_p9 = por %p76_p6, %p49_p2 }
  0x15   : > { %s123_s7 = sadd.s32 1, %s1608_s13  ;;  %p133_p10 = scmp.ne.s32.totalorder %s1608_s13, %s1604_s12 }
  0x16   : > { %s1756_s8 = scalar_select %p67_p8, %s1616_s15, %s69_s29  }
  0x17   : > { %s1759_s9 = scalar_select %p121_p7, %s1608_s13, %s123_s7  }
  0x18   : > { %p134_p11 = scmp.eq.s32.totalorder %s1268_s23, 17  ;;  %p1271_p13 = scmp.ge.s32.totalorder %s1644_s22, 18 }
  0x1a   : > { %p1761_p12 = por %p134_p11, %p133_p10  ;;  %156 = sbr.rel (%p1271_p13) target bundleno = 85 (0x55), region = 16 }
  0x1f   : > { %159 = sbr.rel (!%p1734_p5) target bundleno = 43 (0x2b), region = 20  ;;  %s161_s11 = sand.u32 (%p1734_p5), 1, %s1624_s17  }
  0x20   : > { %s1362_s26 = sshll.u32 (%p1734_p5), %s1636_s20, 4  ;;  %s1272_s27 = sshll.u32 (%p1734_p5), %s161_s11, 5 }
  0x21   : > { %s2060_s0 = sld [smem:[#allocation7_spill]] (%p1734_p5)  ;;  %s163_s23 = scalar_lea.vmem (%p1734_p5), [#allocation3], %s1272_s27 }
  0x27   : > { %s169_s5 = scalar_lea.vmem %s2060_s0, %s1362_s26 }
  0x28   : > { %v182_v0 = vld [vmem:[%s169_s5] sm:$0xff]  ;;  %v184_v1 = vld [vmem:[%s169_s5 + $0x8] sm:$0xff]  ;;  %v186_v2 = vld [vmem:[%s169_s5 + $0x90] sm:$0xff] }
  0x29   : > { %183 = vst [vmem:[%s163_s23] sm:$0xff] %v182_v0  ;;  %185 = vst [vmem:[%s163_s23 + $0x8] sm:$0xff] %v184_v1  ;;  %v188_v3 = vld [vmem:[%s169_s5 + $0x98] sm:$0xff] }
  0x2a   : > { %187 = vst [vmem:[%s163_s23 + $0x10] sm:$0xff] %v186_v2  ;;  %189 = vst [vmem:[%s163_s23 + $0x18] sm:$0xff] %v188_v3 }
  0x2b PF: > { %195 = sbr.rel (!%p1748_p9) target bundleno = 85 (0x55), region = 43  ;;  %s197_s28 = sand.u32 (%p1748_p9), 1, %s1616_s15  }
  0x2c   : > { %s1277_s7 = sshll.u32 (%p1748_p9), %s1640_s21, 1  ;;  %s1275_s11 = sshll.u32 (%p1748_p9), %s197_s28, 9 }
  0x2d   : > { %s1363_s26 = sshll.u32 (%p1748_p9), %s1636_s20, 8  ;;  %s2061_s1 = sld [smem:[#allocation8_spill]] (%p1748_p9) }
  0x2e   : > { %s203_s29 = sadd.s32 (%p1748_p9), %s1363_s26, %s1277_s7  ;;  %s1786_s6 = scalar_lea.vmem (%p1748_p9), [#allocation4], %s1275_s11 }
  0x2f   : > { %s1279_s4 = sshll.u32 (%p1748_p9), %s203_s29, 2 }
  0x33   : > { %s1781_s25 = scalar_lea.vmem %s2061_s1, %s1279_s4 }
  0x34   : > { %v360_v4 = vld [vmem:[%s1781_s25] sm:$0xff]  ;;  %v362_v5 = vld [vmem:[%s1781_s25 + $0x10] sm:$0xff] }
  0x35   : > { %v364_v6 = vld [vmem:[%s1781_s25 + $0x20] sm:$0xff]  ;;  %361 = vst [vmem:[%s1786_s6] sm:$0xff] %v360_v4  ;;  %363 = vst [vmem:[%s1786_s6 + $0x8] sm:$0xff] %v362_v5  ;;  %v366_v7 = vld [vmem:[%s1781_s25 + $0x30] sm:$0xff] }
  0x36   : > { %365 = vst [vmem:[%s1786_s6 + $0x10] sm:$0xff] %v364_v6  ;;  %v368_v8 = vld [vmem:[%s1781_s25 + $0x40] sm:$0xff]  ;;  %v370_v9 = vld [vmem:[%s1781_s25 + $0x50] sm:$0xff]  ;;  %367 = vst [vmem:[%s1786_s6 + $0x18] sm:$0xff] %v366_v7 }
  0x37   : > { %369 = vst [vmem:[%s1786_s6 + $0x20] sm:$0xff] %v368_v8  ;;  %371 = vst [vmem:[%s1786_s6 + $0x28] sm:$0xff] %v370_v9  ;;  %v372_v10 = vld [vmem:[%s1781_s25 + $0x60] sm:$0xff]  ;;  %v374_v11 = vld [vmem:[%s1781_s25 + $0x70] sm:$0xff] }
  0x38   : > { %v376_v12 = vld [vmem:[%s1781_s25 + $0x80] sm:$0xff]  ;;  %373 = vst [vmem:[%s1786_s6 + $0x30] sm:$0xff] %v372_v10  ;;  %375 = vst [vmem:[%s1786_s6 + $0x38] sm:$0xff] %v374_v11  ;;  %v378_v13 = vld [vmem:[%s1781_s25 + $0x90] sm:$0xff] }
  0x39   : > { %377 = vst [vmem:[%s1786_s6 + $0x40] sm:$0xff] %v376_v12  ;;  %v380_v14 = vld [vmem:[%s1781_s25 + $0xa0] sm:$0xff]  ;;  %v382_v15 = vld [vmem:[%s1781_s25 + $0xb0] sm:$0xff]  ;;  %379 = vst [vmem:[%s1786_s6 + $0x48] sm:$0xff] %v378_v13 }
  0x3a   : > { %381 = vst [vmem:[%s1786_s6 + $0x50] sm:$0xff] %v380_v14  ;;  %383 = vst [vmem:[%s1786_s6 + $0x58] sm:$0xff] %v382_v15  ;;  %v384_v16 = vld [vmem:[%s1781_s25 + $0xc0] sm:$0xff]  ;;  %v386_v17 = vld [vmem:[%s1781_s25 + $0xd0] sm:$0xff] }
  0x3b   : > { %v388_v18 = vld [vmem:[%s1781_s25 + $0xe0] sm:$0xff]  ;;  %385 = vst [vmem:[%s1786_s6 + $0x60] sm:$0xff] %v384_v16  ;;  %387 = vst [vmem:[%s1786_s6 + $0x68] sm:$0xff] %v386_v17  ;;  %v390_v19 = vld [vmem:[%s1781_s25 + $0xf0] sm:$0xff] }
  0x3c   : > { %389 = vst [vmem:[%s1786_s6 + $0x70] sm:$0xff] %v388_v18  ;;  %v392_v20 = vld [vmem:[%s1781_s25 + $0x100] sm:$0xff]  ;;  %v394_v21 = vld [vmem:[%s1781_s25 + $0x110] sm:$0xff]  ;;  %391 = vst [vmem:[%s1786_s6 + $0x78] sm:$0xff] %v390_v19 }
  0x3d   : > { %393 = vst [vmem:[%s1786_s6 + $0x80] sm:$0xff] %v392_v20  ;;  %395 = vst [vmem:[%s1786_s6 + $0x88] sm:$0xff] %v394_v21  ;;  %v396_v22 = vld [vmem:[%s1781_s25 + $0x120] sm:$0xff]  ;;  %v398_v23 = vld [vmem:[%s1781_s25 + $0x130] sm:$0xff] }
  0x3e   : > { %v400_v24 = vld [vmem:[%s1781_s25 + $0x140] sm:$0xff]  ;;  %397 = vst [vmem:[%s1786_s6 + $0x90] sm:$0xff] %v396_v22  ;;  %399 = vst [vmem:[%s1786_s6 + $0x98] sm:$0xff] %v398_v23  ;;  %v402_v25 = vld [vmem:[%s1781_s25 + $0x150] sm:$0xff] }
  0x3f   : > { %401 = vst [vmem:[%s1786_s6 + $0xa0] sm:$0xff] %v400_v24  ;;  %v404_v26 = vld [vmem:[%s1781_s25 + $0x160] sm:$0xff]  ;;  %v406_v27 = vld [vmem:[%s1781_s25 + $0x170] sm:$0xff]  ;;  %403 = vst [vmem:[%s1786_s6 + $0xa8] sm:$0xff] %v402_v25 }
  0x40   : > { %405 = vst [vmem:[%s1786_s6 + $0xb0] sm:$0xff] %v404_v26  ;;  %407 = vst [vmem:[%s1786_s6 + $0xb8] sm:$0xff] %v406_v27  ;;  %v408_v28 = vld [vmem:[%s1781_s25 + $0x180] sm:$0xff]  ;;  %v410_v29 = vld [vmem:[%s1781_s25 + $0x190] sm:$0xff] }
  0x41   : > { %v412_v30 = vld [vmem:[%s1781_s25 + $0x1a0] sm:$0xff]  ;;  %409 = vst [vmem:[%s1786_s6 + $0xc0] sm:$0xff] %v408_v28  ;;  %411 = vst [vmem:[%s1786_s6 + $0xc8] sm:$0xff] %v410_v29  ;;  %v414_v31 = vld [vmem:[%s1781_s25 + $0x1b0] sm:$0xff] }
  0x42   : > { %413 = vst [vmem:[%s1786_s6 + $0xd0] sm:$0xff] %v412_v30  ;;  %v416_v32 = vld [vmem:[%s1781_s25 + $0x1c0] sm:$0xff]  ;;  %v418_v33 = vld [vmem:[%s1781_s25 + $0x1d0] sm:$0xff]  ;;  %415 = vst [vmem:[%s1786_s6 + $0xd8] sm:$0xff] %v414_v31 }
  0x43   : > { %417 = vst [vmem:[%s1786_s6 + $0xe0] sm:$0xff] %v416_v32  ;;  %419 = vst [vmem:[%s1786_s6 + $0xe8] sm:$0xff] %v418_v33  ;;  %v420_v34 = vld [vmem:[%s1781_s25 + $0x1e0] sm:$0xff]  ;;  %v422_v35 = vld [vmem:[%s1781_s25 + $0x1f0] sm:$0xff] }
  0x44   : > { %v424_v36 = vld [vmem:[%s1781_s25 + $0x200] sm:$0xff]  ;;  %421 = vst [vmem:[%s1786_s6 + $0xf0] sm:$0xff] %v420_v34  ;;  %423 = vst [vmem:[%s1786_s6 + $0xf8] sm:$0xff] %v422_v35  ;;  %v426_v37 = vld [vmem:[%s1781_s25 + $0x210] sm:$0xff] }
  0x45   : > { %425 = vst [vmem:[%s1786_s6 + $0x100] sm:$0xff] %v424_v36  ;;  %v428_v38 = vld [vmem:[%s1781_s25 + $0x220] sm:$0xff]  ;;  %v430_v39 = vld [vmem:[%s1781_s25 + $0x230] sm:$0xff]  ;;  %427 = vst [vmem:[%s1786_s6 + $0x108] sm:$0xff] %v426_v37 }
  0x46   : > { %429 = vst [vmem:[%s1786_s6 + $0x110] sm:$0xff] %v428_v38  ;;  %431 = vst [vmem:[%s1786_s6 + $0x118] sm:$0xff] %v430_v39  ;;  %v432_v40 = vld [vmem:[%s1781_s25 + $0x240] sm:$0xff]  ;;  %v434_v41 = vld [vmem:[%s1781_s25 + $0x250] sm:$0xff] }
  0x47   : > { %v436_v42 = vld [vmem:[%s1781_s25 + $0x260] sm:$0xff]  ;;  %433 = vst [vmem:[%s1786_s6 + $0x120] sm:$0xff] %v432_v40  ;;  %435 = vst [vmem:[%s1786_s6 + $0x128] sm:$0xff] %v434_v41  ;;  %v438_v43 = vld [vmem:[%s1781_s25 + $0x270] sm:$0xff] }
  0x48   : > { %437 = vst [vmem:[%s1786_s6 + $0x130] sm:$0xff] %v436_v42  ;;  %v440_v44 = vld [vmem:[%s1781_s25 + $0x280] sm:$0xff]  ;;  %v442_v45 = vld [vmem:[%s1781_s25 + $0x290] sm:$0xff]  ;;  %439 = vst [vmem:[%s1786_s6 + $0x138] sm:$0xff] %v438_v43 }
  0x49   : > { %441 = vst [vmem:[%s1786_s6 + $0x140] sm:$0xff] %v440_v44  ;;  %443 = vst [vmem:[%s1786_s6 + $0x148] sm:$0xff] %v442_v45  ;;  %v444_v46 = vld [vmem:[%s1781_s25 + $0x2a0] sm:$0xff]  ;;  %v446_v47 = vld [vmem:[%s1781_s25 + $0x2b0] sm:$0xff] }
  0x4a   : > { %v448_v48 = vld [vmem:[%s1781_s25 + $0x2c0] sm:$0xff]  ;;  %445 = vst [vmem:[%s1786_s6 + $0x150] sm:$0xff] %v444_v46  ;;  %447 = vst [vmem:[%s1786_s6 + $0x158] sm:$0xff] %v446_v47  ;;  %v450_v49 = vld [vmem:[%s1781_s25 + $0x2d0] sm:$0xff] }
  0x4b   : > { %449 = vst [vmem:[%s1786_s6 + $0x160] sm:$0xff] %v448_v48  ;;  %v452_v50 = vld [vmem:[%s1781_s25 + $0x2e0] sm:$0xff]  ;;  %v454_v51 = vld [vmem:[%s1781_s25 + $0x2f0] sm:$0xff]  ;;  %451 = vst [vmem:[%s1786_s6 + $0x168] sm:$0xff] %v450_v49 }
  0x4c   : > { %453 = vst [vmem:[%s1786_s6 + $0x170] sm:$0xff] %v452_v50  ;;  %455 = vst [vmem:[%s1786_s6 + $0x178] sm:$0xff] %v454_v51  ;;  %v456_v52 = vld [vmem:[%s1781_s25 + $0x300] sm:$0xff]  ;;  %v458_v53 = vld [vmem:[%s1781_s25 + $0x310] sm:$0xff] }
  0x4d   : > { %v460_v54 = vld [vmem:[%s1781_s25 + $0x320] sm:$0xff]  ;;  %457 = vst [vmem:[%s1786_s6 + $0x180] sm:$0xff] %v456_v52  ;;  %459 = vst [vmem:[%s1786_s6 + $0x188] sm:$0xff] %v458_v53  ;;  %v462_v55 = vld [vmem:[%s1781_s25 + $0x330] sm:$0xff] }
  0x4e   : > { %461 = vst [vmem:[%s1786_s6 + $0x190] sm:$0xff] %v460_v54  ;;  %v464_v56 = vld [vmem:[%s1781_s25 + $0x340] sm:$0xff]  ;;  %v466_v57 = vld [vmem:[%s1781_s25 + $0x350] sm:$0xff]  ;;  %463 = vst [vmem:[%s1786_s6 + $0x198] sm:$0xff] %v462_v55 }
  0x4f   : > { %465 = vst [vmem:[%s1786_s6 + $0x1a0] sm:$0xff] %v464_v56  ;;  %467 = vst [vmem:[%s1786_s6 + $0x1a8] sm:$0xff] %v466_v57  ;;  %v468_v58 = vld [vmem:[%s1781_s25 + $0x360] sm:$0xff]  ;;  %v470_v59 = vld [vmem:[%s1781_s25 + $0x370] sm:$0xff] }
  0x50   : > { %v472_v60 = vld [vmem:[%s1781_s25 + $0x380] sm:$0xff]  ;;  %469 = vst [vmem:[%s1786_s6 + $0x1b0] sm:$0xff] %v468_v58  ;;  %471 = vst [vmem:[%s1786_s6 + $0x1b8] sm:$0xff] %v470_v59  ;;  %v474_v61 = vld [vmem:[%s1781_s25 + $0x390] sm:$0xff] }
  0x51   : > { %473 = vst [vmem:[%s1786_s6 + $0x1c0] sm:$0xff] %v472_v60  ;;  %v476_v62 = vld [vmem:[%s1781_s25 + $0x3a0] sm:$0xff]  ;;  %v478_v63 = vld [vmem:[%s1781_s25 + $0x3b0] sm:$0xff]  ;;  %475 = vst [vmem:[%s1786_s6 + $0x1c8] sm:$0xff] %v474_v61 }
  0x52   : > { %477 = vst [vmem:[%s1786_s6 + $0x1d0] sm:$0xff] %v476_v62  ;;  %479 = vst [vmem:[%s1786_s6 + $0x1d8] sm:$0xff] %v478_v63  ;;  %v480_v0 = vld [vmem:[%s1781_s25 + $0x3c0] sm:$0xff]  ;;  %v482_v1 = vld [vmem:[%s1781_s25 + $0x3d0] sm:$0xff] }
  0x53   : > { %v484_v2 = vld [vmem:[%s1781_s25 + $0x3e0] sm:$0xff]  ;;  %481 = vst [vmem:[%s1786_s6 + $0x1e0] sm:$0xff] %v480_v0  ;;  %483 = vst [vmem:[%s1786_s6 + $0x1e8] sm:$0xff] %v482_v1  ;;  %v486_v3 = vld [vmem:[%s1781_s25 + $0x3f0] sm:$0xff] }
  0x54   : > { %485 = vst [vmem:[%s1786_s6 + $0x1f0] sm:$0xff] %v484_v2  ;;  %487 = vst [vmem:[%s1786_s6 + $0x1f8] sm:$0xff] %v486_v3 }
  0x55 PF: > { %p1280_p0 = scmp.ge.s32.totalorder %s1644_s22, 1  ;;  %p500_p1 = scmp.lt.s32.totalorder %s1644_s22, 19 }
  0x57   : > { %p501_p2 = pnand %p1280_p0, %p500_p1 }
  0x58   : > { %s507_s0 = sand.u32 (!%p501_p2), 1, %s1620_s16   ;;  %s514_s5 = sand.u32 (!%p501_p2), 1, %s1612_s14  }
  0x59   : > { %504 = sbr.rel (%p501_p2) target bundleno = 397 (0x18d), region = 85  ;;  %s1281_s23 = sshll.u32 (!%p501_p2), %s507_s0, 5 }
  0x5a   : > { %s1282_s28 = sshll.u32 (!%p501_p2), %s514_s5, 9  ;;  %s541_s7 = sand.u32 (!%p501_p2), 1, %s1604_s12  }
  0x5b   : > { %s1284_s11 = sshll.u32 (!%p501_p2), %s1632_s19, 1  ;;  %s1283_s25 = sshll.u32 (!%p501_p2), %s541_s7, 4 }
  0x5c   : > { %p549_p3 = scmp.lt.s32.totalorder (!%p501_p2), %s1284_s11, 3  ;;  %s1925_s27 = scalar_lea.vmem (!%p501_p2), [#allocation3], %s1281_s23 }
  0x5d   : > { %s1927_s6 = scalar_lea.vmem (!%p501_p2), [#allocation4], %s1282_s28  ;;  %s1929_s1 = scalar_lea.vmem (!%p501_p2), [#allocation5], %s1283_s25 }
  0x5e   : > { %s2080_s11 = smov (!%p549_p3, %s1284_s11), 3  ;;  %p1285_p4 = scmp.ne.s32.totalorder %s1628_s18, 0 }
  0x5f   : > { %s551_s4 = scalar_lea.vmem %s2051_s2, %s2080_s11 }
  0x60   : > { %558 = sbr.rel (%p1285_p4) target bundleno = 104 (0x68), region = 97 }
  0x65   : > { %v1646_v4 = vmov 0.0  }
  0x66   : > { %559 = vst [vmem:[#allocation2 + $0x10] sm:$0xff] %v1646_v4  ;;  %560 = vst [vmem:[#allocation2] sm:$0xff] %v1646_v4 }
  0x67   : > { %561 = vst [vmem:[#allocation2 + $0x18] sm:$0xff] %v1646_v4  ;;  %562 = vst [vmem:[#allocation2 + $0x8] sm:$0xff] %v1646_v4 }
  0x68 PF: > { %v1456_v5 = vld [vmem:[%s1927_s6 + $0x74] ss:$8 sps:$4 sm:$0xff]   ;;  %v1460_v7 = vld [vmem:[%s1927_s6 + $0x70] ss:$8 sps:$4 sm:$0xff]   ;;  %v1462_v9 = vld [vmem:[%s1927_s6 + $0x64] ss:$8 sps:$4 sm:$0xff]  }
  0x69   : > { %v1458_v6 = vld [vmem:[%s1927_s6 + $0x174] ss:$8 sps:$4 sm:$0xff]   ;;  %975 = vmatprep.subr.bf16.mxu0 %v1456_v5  ;;  %v1461_v8 = vld [vmem:[%s1927_s6 + $0x170] ss:$8 sps:$4 sm:$0xff]   ;;  %v1464_v10 = vld [vmem:[%s1927_s6 + $0x164] ss:$8 sps:$4 sm:$0xff]  }
  0x6a   : > { %1018 = vmatprep.subr.bf16.mxu1 %v1458_v6  ;;  %976 = vmatpush1.bf16.msra.mxu0 %v1460_v7  ;;  %v1466_v11 = vld [vmem:[%s1927_s6 + $0x60] ss:$8 sps:$4 sm:$0xff]   ;;  %v1468_v13 = vld [vmem:[%s1927_s6 + $0x54] ss:$8 sps:$4 sm:$0xff]   ;;  %v1472_v15 = vld [vmem:[%s1927_s6 + $0x50] ss:$8 sps:$4 sm:$0xff]  }
  0x6b   : > { %1019 = vmatpush1.bf16.msra.mxu1 %v1461_v8  ;;  %977 = vmatprep.subr.bf16.mxu0 %v1462_v9  ;;  %v1467_v12 = vld [vmem:[%s1927_s6 + $0x160] ss:$8 sps:$4 sm:$0xff]   ;;  %v1470_v14 = vld [vmem:[%s1927_s6 + $0x154] ss:$8 sps:$4 sm:$0xff]   ;;  %v1473_v16 = vld [vmem:[%s1927_s6 + $0x150] ss:$8 sps:$4 sm:$0xff]  }
  0x6c   : > { %1020 = vmatprep.subr.bf16.mxu1 %v1464_v10  ;;  %v1474_v17 = vld [vmem:[%s1927_s6 + $0x44] ss:$8 sps:$4 sm:$0xff]   ;;  %v1478_v19 = vld [vmem:[%s1927_s6 + $0x40] ss:$8 sps:$4 sm:$0xff]   ;;  %v1480_v21 = vld [vmem:[%s1927_s6 + $0x34] ss:$8 sps:$4 sm:$0xff]  }
  0x6d   : > { %v1476_v18 = vld [vmem:[%s1927_s6 + $0x144] ss:$8 sps:$4 sm:$0xff]   ;;  %v1479_v20 = vld [vmem:[%s1927_s6 + $0x140] ss:$8 sps:$4 sm:$0xff]   ;;  %v1482_v22 = vld [vmem:[%s1927_s6 + $0x134] ss:$8 sps:$4 sm:$0xff]  }
  0x6e   : > { %978 = vmatpush1.bf16.msra.mxu0 %v1466_v11  ;;  %v1484_v23 = vld [vmem:[%s1927_s6 + $0x30] ss:$8 sps:$4 sm:$0xff]   ;;  %v1486_v25 = vld [vmem:[%s1927_s6 + $0x24] ss:$8 sps:$4 sm:$0xff]   ;;  %v1490_v27 = vld [vmem:[%s1927_s6 + $0x20] ss:$8 sps:$4 sm:$0xff]  }
  0x6f   : > { %1021 = vmatpush1.bf16.msra.mxu1 %v1467_v12  ;;  %979 = vmatprep.subr.bf16.mxu0 %v1468_v13  ;;  %v1485_v24 = vld [vmem:[%s1927_s6 + $0x130] ss:$8 sps:$4 sm:$0xff]   ;;  %v1488_v26 = vld [vmem:[%s1927_s6 + $0x124] ss:$8 sps:$4 sm:$0xff]   ;;  %v1491_v28 = vld [vmem:[%s1927_s6 + $0x120] ss:$8 sps:$4 sm:$0xff]  }
  0x70   : > { %1022 = vmatprep.subr.bf16.mxu1 %v1470_v14  ;;  %v1492_v29 = vld [vmem:[%s1927_s6 + $0x14] ss:$8 sps:$4 sm:$0xff]   ;;  %v1496_v31 = vld [vmem:[%s1927_s6 + $0x10] ss:$8 sps:$4 sm:$0xff]   ;;  %v1498_v33 = vld [vmem:[%s1927_s6 + $0x4] ss:$8 sps:$4 sm:$0xff]  }
  0x71   : > { %v1494_v30 = vld [vmem:[%s1927_s6 + $0x114] ss:$8 sps:$4 sm:$0xff]   ;;  %v1497_v32 = vld [vmem:[%s1927_s6 + $0x110] ss:$8 sps:$4 sm:$0xff]   ;;  %v1500_v34 = vld [vmem:[%s1927_s6 + $0x104] ss:$8 sps:$4 sm:$0xff]  }
  0x72   : > { %980 = vmatpush1.bf16.msra.mxu0 %v1472_v15  ;;  %v1502_v35 = vld [vmem:[%s1927_s6] ss:$8 sps:$4 sm:$0xff]   ;;  %v1504_v37 = vld [vmem:[%s1927_s6 + $0xf4] ss:$8 sps:$4 sm:$0xff]   ;;  %v1508_v39 = vld [vmem:[%s1927_s6 + $0xf0] ss:$8 sps:$4 sm:$0xff]  }
  0x73   : > { %1023 = vmatpush1.bf16.msra.mxu1 %v1473_v16  ;;  %981 = vmatprep.subr.bf16.mxu0 %v1474_v17  ;;  %v1503_v36 = vld [vmem:[%s1927_s6 + $0x100] ss:$8 sps:$4 sm:$0xff]   ;;  %v1506_v38 = vld [vmem:[%s1927_s6 + $0x1f4] ss:$8 sps:$4 sm:$0xff]   ;;  %v1509_v40 = vld [vmem:[%s1927_s6 + $0x1f0] ss:$8 sps:$4 sm:$0xff]  }
  0x74   : > { %1024 = vmatprep.subr.bf16.mxu1 %v1476_v18  ;;  %v1510_v41 = vld [vmem:[%s1927_s6 + $0xe4] ss:$8 sps:$4 sm:$0xff]   ;;  %v1514_v43 = vld [vmem:[%s1927_s6 + $0xe0] ss:$8 sps:$4 sm:$0xff]   ;;  %v1516_v45 = vld [vmem:[%s1927_s6 + $0xd4] ss:$8 sps:$4 sm:$0xff]  }
  0x75   : > { %v1512_v42 = vld [vmem:[%s1927_s6 + $0x1e4] ss:$8 sps:$4 sm:$0xff]   ;;  %v1515_v44 = vld [vmem:[%s1927_s6 + $0x1e0] ss:$8 sps:$4 sm:$0xff]   ;;  %v1518_v46 = vld [vmem:[%s1927_s6 + $0x1d4] ss:$8 sps:$4 sm:$0xff]  }
  0x76   : > { %982 = vmatpush1.bf16.msra.mxu0 %v1478_v19  ;;  %v1520_v47 = vld [vmem:[%s1927_s6 + $0xd0] ss:$8 sps:$4 sm:$0xff]   ;;  %v1522_v49 = vld [vmem:[%s1927_s6 + $0xc4] ss:$8 sps:$4 sm:$0xff]   ;;  %v1526_v51 = vld [vmem:[%s1927_s6 + $0xc0] ss:$8 sps:$4 sm:$0xff]  }
  0x77   : > { %1025 = vmatpush1.bf16.msra.mxu1 %v1479_v20  ;;  %983 = vmatprep.subr.bf16.mxu0 %v1480_v21  ;;  %v1521_v48 = vld [vmem:[%s1927_s6 + $0x1d0] ss:$8 sps:$4 sm:$0xff]   ;;  %v1524_v50 = vld [vmem:[%s1927_s6 + $0x1c4] ss:$8 sps:$4 sm:$0xff]   ;;  %v1527_v53 = vld [vmem:[%s1927_s6 + $0x1c0] ss:$8 sps:$4 sm:$0xff]  }
  0x78   : > { %1026 = vmatprep.subr.bf16.mxu1 %v1482_v22  ;;  %v1554_v52 = vld [vmem:[%s1925_s27 + $0x4] ss:$16 sps:$4 sm:$0xff]   ;;  %v1557_v56 = vld [vmem:[%s1925_s27 + $0xc] ss:$16 sps:$4 sm:$0xff]   ;;  %v1532_v57 = vld [vmem:[%s1927_s6 + $0xb0] ss:$8 sps:$4 sm:$0xff]  }
  0x79   : > { %v1528_v54 = vld [vmem:[%s1927_s6 + $0xb4] ss:$8 sps:$4 sm:$0xff]   ;;  %1007 = vmatprep.mubr.bf16.mxu0 %v1554_v52  ;;  %1050 = vmatprep.mubr.bf16.mxu1 %v1557_v56  ;;  %v1533_v58 = vld [vmem:[%s1927_s6 + $0x1b0] ss:$8 sps:$4 sm:$0xff]   ;;  %v1534_v59 = vld [vmem:[%s1927_s6 + $0xa4] ss:$8 sps:$4 sm:$0xff]  }
  0x7a   : > { %984 = vmatpush1.bf16.msra.mxu0 %v1484_v23  ;;  %v1530_v55 = vld [vmem:[%s1927_s6 + $0x1b4] ss:$8 sps:$4 sm:$0xff]   ;;  %v1536_v60 = vld [vmem:[%s1927_s6 + $0x1a4] ss:$8 sps:$4 sm:$0xff]   ;;  %v1538_v61 = vld [vmem:[%s1927_s6 + $0xa0] ss:$8 sps:$4 sm:$0xff]  }
  0x7b   : > { %1027 = vmatpush1.bf16.msra.mxu1 %v1485_v24  ;;  %985 = vmatprep.subr.bf16.mxu0 %v1486_v25  ;;  %v1539_v62 = vld [vmem:[%s1927_s6 + $0x1a0] ss:$8 sps:$4 sm:$0xff]   ;;  %v1540_v63 = vld [vmem:[%s1927_s6 + $0x94] ss:$8 sps:$4 sm:$0xff]   ;;  %v1544_v1 = vld [vmem:[%s1927_s6 + $0x90] ss:$8 sps:$4 sm:$0xff]  }
  0x7c   : > { %1028 = vmatprep.subr.bf16.mxu1 %v1488_v26  ;;  %v1542_v0 = vld [vmem:[%s1927_s6 + $0x194] ss:$8 sps:$4 sm:$0xff]   ;;  %v1545_v2 = vld [vmem:[%s1927_s6 + $0x190] ss:$8 sps:$4 sm:$0xff]   ;;  %v1546_v3 = vld [vmem:[%s1927_s6 + $0x84] ss:$8 sps:$4 sm:$0xff]  }
  0x7d   : > { %v1548_v4 = vld [vmem:[%s1927_s6 + $0x184] ss:$8 sps:$4 sm:$0xff]   ;;  %v1550_v5 = vld [vmem:[%s1927_s6 + $0x80] ss:$8 sps:$4 sm:$0xff]   ;;  %v563_v10 = vld [vmem:[#allocation2 + $0x10] sm:$0xff]  ;;  %p1354_p5 = scmp.ne.s32.totalorder %s1628_s18, 8 }
  0x7e   : > { %986 = vmatpush1.bf16.msra.mxu0 %v1490_v27  ;;  %v1551_v6 = vld [vmem:[%s1927_s6 + $0x180] ss:$8 sps:$4 sm:$0xff]   ;;  %v565_v19 = vld [vmem:[#allocation2 + $0x18] sm:$0xff] }
  0x7f   : > { %1029 = vmatpush1.bf16.msra.mxu1 %v1491_v28  ;;  %987 = vmatprep.subr.bf16.mxu0 %v1492_v29  ;;  %v1552_v7 = vld [vmem:[%s1925_s27] ss:$16 sps:$4 sm:$0xff]   ;;  %v1555_v8 = vld [vmem:[%s1925_s27 + $0x8] ss:$16 sps:$4 sm:$0xff]  }
  0x80   : > { %1030 = vmatprep.subr.bf16.mxu1 %v1494_v30  ;;  %v564_v14 = vld [vmem:[#allocation2] sm:$0xff]  ;;  %v566_v24 = vld [vmem:[#allocation2 + $0x8] sm:$0xff] }
  0x82   : > { %988 = vmatpush1.bf16.msra.mxu0 %v1496_v31 }
  0x83   : > { %1031 = vmatpush1.bf16.msra.mxu1 %v1497_v32  ;;  %989 = vmatprep.subr.bf16.mxu0 %v1498_v33 }
  0x84   : > { %1032 = vmatprep.subr.bf16.mxu1 %v1500_v34 }
  0x86   : > { %990 = vmatpush1.bf16.msra.mxu0 %v1502_v35 }
  0x87   : > { %1033 = vmatpush1.bf16.msra.mxu1 %v1503_v36  ;;  %991 = vmatprep.subr.bf16.mxu0 %v1504_v37 }
  0x88   : > { %1034 = vmatprep.subr.bf16.mxu1 %v1506_v38 }
  0x8a   : > { %992 = vmatpush2.bf16.msra.mxu0 %v1508_v39 }
  0x8b   : > { %1035 = vmatpush2.bf16.msra.mxu1 %v1509_v40  ;;  %993 = vmatprep.subr.bf16.mxu0 %v1510_v41 }
  0x8c   : > { %1036 = vmatprep.subr.bf16.mxu1 %v1512_v42 }
  0x8e   : > { %994 = vmatpush2.bf16.msra.mxu0 %v1514_v43 }
  0x8f   : > { %1037 = vmatpush2.bf16.msra.mxu1 %v1515_v44  ;;  %995 = vmatprep.subr.bf16.mxu0 %v1516_v45 }
  0x90   : > { %1038 = vmatprep.subr.bf16.mxu1 %v1518_v46 }
  0x92   : > { %996 = vmatpush2.bf16.msra.mxu0 %v1520_v47 }
  0x93   : > { %1039 = vmatpush2.bf16.msra.mxu1 %v1521_v48  ;;  %997 = vmatprep.subr.bf16.mxu0 %v1522_v49 }
  0x94   : > { %1040 = vmatprep.subr.bf16.mxu1 %v1524_v50 }
  0x96   : > { %998 = vmatpush2.bf16.msra.mxu0 %v1526_v51 }
  0x97   : > { %1041 = vmatpush2.bf16.msra.mxu1 %v1527_v53  ;;  %999 = vmatprep.subr.bf16.mxu0 %v1528_v54 }
  0x98   : > { %1042 = vmatprep.subr.bf16.mxu1 %v1530_v55 }
  0x9a   : > { %1000 = vmatpush2.bf16.msra.mxu0 %v1532_v57 }
  0x9b   : > { %1043 = vmatpush2.bf16.msra.mxu1 %v1533_v58  ;;  %1001 = vmatprep.subr.bf16.mxu0 %v1534_v59 }
  0x9c   : > { %1044 = vmatprep.subr.bf16.mxu1 %v1536_v60 }
  0x9e   : > { %1002 = vmatpush2.bf16.msra.mxu0 %v1538_v61 }
  0x9f   : > { %1045 = vmatpush2.bf16.msra.mxu1 %v1539_v62  ;;  %1003 = vmatprep.subr.bf16.mxu0 %v1540_v63 }
  0xa0   : > { %1046 = vmatprep.subr.bf16.mxu1 %v1542_v0 }
  0xa2   : > { %1004 = vmatpush2.bf16.msra.mxu0 %v1544_v1 }
  0xa3   : > { %1047 = vmatpush2.bf16.msra.mxu1 %v1545_v2  ;;  %1005 = vmatprep.subr.bf16.mxu0 %v1546_v3 }
  0xa4   : > { %1048 = vmatprep.subr.bf16.mxu1 %v1548_v4 }
  0xa6   : > { %1006 = vmatpush2.bf16.msra.mxu0 %v1550_v5 }
  0xa7   : > { %1049 = vmatpush2.bf16.msra.mxu1 %v1551_v6 }
  0xa9   : > { %1008 = vmatmul.mubr.bf16.vlgmr.msra.gmra.mxu0 %v1552_v7 }
  0xaa   : > { %1051 = vmatmul.mubr.bf16.vlgmr.msra.gmra.mxu1 %v1555_v8 }
 0x169   : > { %v1009_v9 = vpop.f32.mrf.mxu0 }
 0x16a   : > { %v1052_v11 = vpop.f32.mrf.mxu1 }
 0x16b   : > { %v1053_v12 = vadd.f32 %v1052_v11, %v1009_v9  ;;  %v1011_v13 = vpop.f32.mrf.mxu0 }
 0x16c   : > { %v1054_v15 = vpop.f32.mrf.mxu1 }
 0x16d   : > { %v1061_v16 = vadd.f32 %v1053_v12, %v563_v10  ;;  %v1055_v17 = vadd.f32 %v1054_v15, %v1011_v13  ;;  %v1013_v18 = vpop.f32.mrf.mxu0 }
 0x16e   : > { %v1056_v20 = vpop.f32.mrf.mxu1 }
 0x16f   : > { %1065 = vst [vmem:[#allocation2 + $0x10] sm:$0xff] %v1061_v16  ;;  %v1062_v21 = vadd.f32 %v1055_v17, %v564_v14  ;;  %v1057_v22 = vadd.f32 %v1056_v20, %v1013_v18  ;;  %v1015_v23 = vpop.f32.mrf.mxu0 }
 0x170   : > { %v1058_v25 = vpop.f32.mrf.mxu1 }
 0x171   : > { %1066 = vst [vmem:[#allocation2] sm:$0xff] %v1062_v21  ;;  %v1063_v26 = vadd.f32 %v1057_v22, %v565_v19  ;;  %v1059_v27 = vadd.f32 %v1058_v25, %v1015_v23  ;;  %1072 = sbr.rel (%p1354_p5) target bundleno = 389 (0x185), region = 101 }
 0x173   : > { %1067 = vst [vmem:[#allocation2 + $0x18] sm:$0xff] %v1063_v26  ;;  %v1064_v28 = vadd.f32 %v1059_v27, %v566_v24 }
 0x175   : > { %1068 = vst [vmem:[#allocation2 + $0x8] sm:$0xff] %v1064_v28 }
 0x176   : > { %v1079_v29 = vlaneseq  ;;  %v1077_v31 = vld [vmem:[%s551_s4] sm:$0x3]  ;;  %v1073_v32 = vld [vmem:[#allocation2 + $0x10] sm:$0xff] }
 0x178   : > { %v1080_v30 = vshrl.u32 %v1079_v29, 7  ;;  %v1074_v35 = vld [vmem:[#allocation2] sm:$0xff] }
 0x17a   : > { %v1081_v33 = vsub.s32 0, %v1080_v30  ;;  %v1085_v34 = vsub.s32 1, %v1080_v30  ;;  %v1075_v36 = vld [vmem:[#allocation2 + $0x18] sm:$0xff] }
 0x17c   : > { %v1076_v37 = vld [vmem:[#allocation2 + $0x8] sm:$0xff]  ;;  %v1082_v38 = vrot.slane %v1077_v31, %v1081_v33  ;;  %v1086_v39 = vrot.slane %v1077_v31, %v1085_v34 }
 0x17e   : > { %v1089_v40 = vadd.f32 %v1082_v38, %v1073_v32  ;;  %v1090_v41 = vadd.f32 %v1086_v39, %v1074_v35  ;;  %v1091_v42 = vadd.f32 %v1082_v38, %v1075_v36  ;;  %v1092_v43 = vadd.f32 %v1086_v39, %v1076_v37 }
 0x180   : > { %v1093_v44 = vmax.f32 %v1089_v40, 0.0  ;;  %v1094_v45 = vmax.f32 %v1090_v41, 0.0  ;;  %v1095_v46 = vmax.f32 %v1091_v42, 0.0  ;;  %v1096_v47 = vmax.f32 %v1092_v43, 0.0 }
 0x182   : > { %v1364_v48 = vpack.c.bf16 %v1094_v45, %v1093_v44  ;;  %v1365_v49 = vpack.c.bf16 %v1096_v47, %v1095_v46 }
 0x184   : > { %1109 = vst [vmem:[%s1929_s1] sm:$0xff] %v1364_v48  ;;  %1110 = vst [vmem:[%s1929_s1 + $0x8] sm:$0xff] %v1365_v49 }
 0x185 PF: > { %1117 = sbr.rel (!%p1761_p12) target bundleno = 397 (0x18d), region = 105  ;;  %s1366_s16 = sshll.u32 (%p1761_p12), %s1632_s19, 3 }
 0x186   : > { %s1123_s5 = scalar_lea.vmem (%p1761_p12), %s2052_s3, %s1366_s16 }
 0x18b   : > { %v1154_v50 = vld [vmem:[%s1929_s1] sm:$0xff]  ;;  %v1156_v51 = vld [vmem:[%s1929_s1 + $0x8] sm:$0xff] }
 0x18c   : > { %1155 = vst [vmem:[%s1123_s5] sm:$0xff] %v1154_v50  ;;  %1157 = vst [vmem:[%s1123_s5 + $0x10] sm:$0xff] %v1156_v51 }
 0x18d PF: > { %s13_s22 = sadd.s32 1, %s1644_s22   ;;  %s2062_s1 = sld [smem:[#allocation6_spill]] }
 0x18e   : > { %p10_p6 = scmp.ge.s32.totalorder %s13_s22, 20   ;;  %s2063_s12 = smov %s1608_s13 }
 0x18f   : > { %s2064_s13 = smov %s1759_s9  ;;  %s2065_s14 = smov %s1616_s15 }
 0x190   : > { %s2066_s15 = smov %s1756_s8  ;;  %s2067_s16 = smov %s1624_s17 }
 0x191   : > { %s2068_s17 = smov %s1742_s30  ;;  %s2069_s18 = smov %s1636_s20 }
 0x192   : > { %s2070_s19 = smov %s1640_s21  ;;  %s2071_s20 = smov %s2074_s24 }
 0x193   : > { %s2072_s21 = smov %s2062_s1  ;;  %12 = sbr.rel (!%p10_p6) target bundleno = 9 (0x9), region = 185 }

// kernel: forgery_detector_forward.37
= control target key start
LH: loop header
LB: loop body
LE: loop exit
PB: predicated region body
PF: predicated region fallthrough
CT: control target
= control target key end

     0   :  { %v94_v32 = vlaneseq  ;;  %s614_s0 = inlined_call_operand.vmem [shape: bf16[2,1,512], index: 0, kind: input, shape index: {}]   ;;  %s615_s1 = inlined_call_operand.vmem [shape: f32[512,128], index: 1, kind: input, shape index: {}]   ;;  %s616_s2 = inlined_call_operand.vmem [shape: f32[1,128], index: 2, kind: input, shape index: {}]   ;;  %s617_s3 = inlined_call_operand.hbm [shape: f32[2,128], index: 3, kind: output, shape index: {}]  }
   0x1   :  { %v52_v0 = vld [vmem:[%s615_s1 + $0xf8] sm:$0xff]  ;;  %v51_v4 = vld [vmem:[%s615_s1 + $0xf0] sm:$0xff]  ;;  %v50_v8 = vld [vmem:[%s615_s1 + $0xe8] sm:$0xff] }
   0x2   :  { %v84_v1 = vld [vmem:[%s615_s1 + $0x1f8] sm:$0xff]  ;;  %295 = vmatprep.subr.mxu0 %v52_v0  ;;  %v83_v5 = vld [vmem:[%s615_s1 + $0x1f0] sm:$0xff]  ;;  %v82_v9 = vld [vmem:[%s615_s1 + $0x1e8] sm:$0xff]  ;;  %v95_v41 = vshrl.u32 %v94_v32, 7 }
   0x3   :  { %v36_v2 = vld [vmem:[%s615_s1 + $0x78] sm:$0xff]  ;;  %330 = vmatprep.subr.mxu1 %v84_v1  ;;  %v35_v6 = vld [vmem:[%s615_s1 + $0x70] sm:$0xff]  ;;  %v34_v10 = vld [vmem:[%s615_s1 + $0x68] sm:$0xff] }
   0x4   :  { %v68_v3 = vld [vmem:[%s615_s1 + $0x178] sm:$0xff]  ;;  %296 = vmatpush3.msra.mxu0 %v36_v2  ;;  %v67_v7 = vld [vmem:[%s615_s1 + $0x170] sm:$0xff]  ;;  %v66_v11 = vld [vmem:[%s615_s1 + $0x168] sm:$0xff]  ;;  %v100_v51 = vsub.s32 2, %v95_v41 }
   0x5   :  { %331 = vmatpush3.msra.mxu1 %v68_v3  ;;  %297 = vmatprep.subr.mxu0 %v51_v4  ;;  %v49_v12 = vld [vmem:[%s615_s1 + $0xe0] sm:$0xff]  ;;  %v48_v16 = vld [vmem:[%s615_s1 + $0xd8] sm:$0xff]  ;;  %v47_v20 = vld [vmem:[%s615_s1 + $0xd0] sm:$0xff] }
   0x6   :  { %332 = vmatprep.subr.mxu1 %v83_v5  ;;  %298 = vmatpush3.msra.mxu0 %v35_v6  ;;  %v81_v13 = vld [vmem:[%s615_s1 + $0x1e0] sm:$0xff]  ;;  %v80_v17 = vld [vmem:[%s615_s1 + $0x1d8] sm:$0xff]  ;;  %v79_v21 = vld [vmem:[%s615_s1 + $0x1d0] sm:$0xff] }
   0x7   :  { %333 = vmatpush3.msra.mxu1 %v67_v7  ;;  %299 = vmatprep.subr.mxu0 %v50_v8  ;;  %v33_v14 = vld [vmem:[%s615_s1 + $0x60] sm:$0xff]  ;;  %v32_v18 = vld [vmem:[%s615_s1 + $0x58] sm:$0xff]  ;;  %v31_v22 = vld [vmem:[%s615_s1 + $0x50] sm:$0xff] }
   0x8   :  { %334 = vmatprep.subr.mxu1 %v82_v9  ;;  %v65_v15 = vld [vmem:[%s615_s1 + $0x160] sm:$0xff]  ;;  %300 = vmatpush3.msra.mxu0 %v34_v10  ;;  %v64_v19 = vld [vmem:[%s615_s1 + $0x158] sm:$0xff]  ;;  %v63_v23 = vld [vmem:[%s615_s1 + $0x150] sm:$0xff] }
   0x9   :  { %335 = vmatpush3.msra.mxu1 %v66_v11  ;;  %301 = vmatprep.subr.mxu0 %v49_v12  ;;  %v46_v24 = vld [vmem:[%s615_s1 + $0xc8] sm:$0xff]  ;;  %v45_v28 = vld [vmem:[%s615_s1 + $0xc0] sm:$0xff]  ;;  %v44_v33 = vld [vmem:[%s615_s1 + $0xb8] sm:$0xff] }
   0xa   :  { %336 = vmatprep.subr.mxu1 %v81_v13  ;;  %302 = vmatpush3.msra.mxu0 %v33_v14  ;;  %v78_v25 = vld [vmem:[%s615_s1 + $0x1c8] sm:$0xff]  ;;  %v77_v29 = vld [vmem:[%s615_s1 + $0x1c0] sm:$0xff]  ;;  %v76_v34 = vld [vmem:[%s615_s1 + $0x1b8] sm:$0xff] }
   0xb   :  { %337 = vmatpush3.msra.mxu1 %v65_v15  ;;  %303 = vmatprep.subr.mxu0 %v48_v16  ;;  %v30_v26 = vld [vmem:[%s615_s1 + $0x48] sm:$0xff]  ;;  %v29_v30 = vld [vmem:[%s615_s1 + $0x40] sm:$0xff]  ;;  %v28_v35 = vld [vmem:[%s615_s1 + $0x38] sm:$0xff] }
   0xc   :  { %338 = vmatprep.subr.mxu1 %v80_v17  ;;  %304 = vmatpush3.msra.mxu0 %v32_v18  ;;  %v62_v27 = vld [vmem:[%s615_s1 + $0x148] sm:$0xff]  ;;  %v61_v31 = vld [vmem:[%s615_s1 + $0x140] sm:$0xff]  ;;  %v60_v36 = vld [vmem:[%s615_s1 + $0x138] sm:$0xff] }
   0xd   :  { %339 = vmatpush3.msra.mxu1 %v64_v19  ;;  %305 = vmatprep.subr.mxu0 %v47_v20  ;;  %v43_v37 = vld [vmem:[%s615_s1 + $0xb0] sm:$0xff]  ;;  %v42_v42 = vld [vmem:[%s615_s1 + $0xa8] sm:$0xff]  ;;  %v41_v46 = vld [vmem:[%s615_s1 + $0xa0] sm:$0xff] }
   0xe   :  { %340 = vmatprep.subr.mxu1 %v79_v21  ;;  %306 = vmatpush3.msra.mxu0 %v31_v22  ;;  %v75_v38 = vld [vmem:[%s615_s1 + $0x1b0] sm:$0xff]  ;;  %v74_v43 = vld [vmem:[%s615_s1 + $0x1a8] sm:$0xff]  ;;  %v73_v47 = vld [vmem:[%s615_s1 + $0x1a0] sm:$0xff] }
   0xf   :  { %341 = vmatpush3.msra.mxu1 %v63_v23  ;;  %307 = vmatprep.subr.mxu0 %v46_v24  ;;  %v27_v39 = vld [vmem:[%s615_s1 + $0x30] sm:$0xff]  ;;  %v26_v44 = vld [vmem:[%s615_s1 + $0x28] sm:$0xff]  ;;  %v25_v48 = vld [vmem:[%s615_s1 + $0x20] sm:$0xff] }
  0x10   :  { %342 = vmatprep.subr.mxu1 %v78_v25  ;;  %308 = vmatpush3.msra.mxu0 %v30_v26  ;;  %v59_v40 = vld [vmem:[%s615_s1 + $0x130] sm:$0xff]  ;;  %v58_v45 = vld [vmem:[%s615_s1 + $0x128] sm:$0xff]  ;;  %v57_v49 = vld [vmem:[%s615_s1 + $0x120] sm:$0xff] }
  0x11   :  { %343 = vmatpush3.msra.mxu1 %v62_v27  ;;  %309 = vmatprep.subr.mxu0 %v45_v28  ;;  %v292_v50 = vld [vmem:[%s614_s0] sm:$0xff]  }
  0x12   :  { %344 = vmatprep.subr.mxu1 %v77_v29  ;;  %310 = vmatpush3.msra.mxu0 %v29_v30 }
  0x13   :  { %345 = vmatpush3.msra.mxu1 %v61_v31  ;;  %311 = vmatprep.subr.mxu0 %v44_v33 }
  0x14   :  { %346 = vmatprep.subr.mxu1 %v76_v34  ;;  %312 = vmatpush3.msra.mxu0 %v28_v35 }
  0x15   :  { %347 = vmatpush3.msra.mxu1 %v60_v36  ;;  %313 = vmatprep.subr.mxu0 %v43_v37 }
  0x16   :  { %348 = vmatprep.subr.mxu1 %v75_v38  ;;  %314 = vmatpush3.msra.mxu0 %v27_v39 }
  0x17   :  { %349 = vmatpush3.msra.mxu1 %v59_v40  ;;  %315 = vmatprep.subr.mxu0 %v42_v42 }
  0x18   :  { %350 = vmatprep.subr.mxu1 %v74_v43 }
  0x19   :  { %8 = vsyncpa [#allocation3], 0  ;;  %316 = vmatpush3.msra.mxu0 %v26_v44  ;;  %351 = vmatpush3.msra.mxu1 %v58_v45  ;;  %v40_v52 = vld [vmem:[%s615_s1 + $0x98] sm:$0xff]  ;;  %v293_v54 = vunpack.c.l.bf16 %v292_v50  ;;  %v294_v55 = vunpack.c.h.bf16 %v292_v50  ;;  %v108_v56 = vsub.s32 6, %v95_v41  ;;  %v96_v57 = vsub.s32 0, %v95_v41  ;;  %v39_v61 = vld [vmem:[%s615_s1 + $0x90] sm:$0xff] }
  0x1a   :  { %v72_v53 = vld [vmem:[%s615_s1 + $0x198] sm:$0xff]  ;;  %317 = vmatprep.subr.mxu0 %v41_v46  ;;  %352 = vmatprep.subr.mxu1 %v73_v47  ;;  %v104_v60 = vsub.s32 4, %v95_v41  ;;  %v71_v62 = vld [vmem:[%s615_s1 + $0x190] sm:$0xff]  ;;  %v38_v3 = vld [vmem:[%s615_s1 + $0x88] sm:$0xff]  ;;  %vm126_vm0 = vcmask 1041409  }
  0x1b   :  { %v24_v58 = vld [vmem:[%s615_s1 + $0x18] sm:$0xff]  ;;  %318 = vmatpush3.msra.mxu0 %v25_v48  ;;  %353 = vmatpush3.msra.mxu1 %v57_v49  ;;  %v23_v63 = vld [vmem:[%s615_s1 + $0x10] sm:$0xff]  ;;  %v101_v1 = vrot.slane %v293_v54, %v100_v51  ;;  %v117_v2 = vrot.slane %v294_v55, %v100_v51  ;;  %v70_v4 = vld [vmem:[%s615_s1 + $0x188] sm:$0xff]  ;;  %v109_v5 = vrot.slane %v293_v54, %v108_v56 }
  0x1c   :  { %v56_v59 = vld [vmem:[%s615_s1 + $0x118] sm:$0xff]  ;;  %319 = vmatprep.subr.mxu0 %v40_v52  ;;  %354 = vmatprep.subr.mxu1 %v72_v53  ;;  %v55_v0 = vld [vmem:[%s615_s1 + $0x110] sm:$0xff]  ;;  %v125_v6 = vrot.slane %v294_v55, %v108_v56  ;;  %v97_v7 = vrot.slane %v293_v54, %v96_v57  ;;  %v22_v8 = vld [vmem:[%s615_s1 + $0x8] sm:$0xff]  ;;  %v113_v10 = vrot.slane %v294_v55, %v96_v57 }
  0x1d   :  { %320 = vmatpush3.msra.mxu0 %v24_v58  ;;  %355 = vmatpush3.msra.mxu1 %v56_v59  ;;  %v54_v9 = vld [vmem:[%s615_s1 + $0x108] sm:$0xff]  ;;  %v105_v11 = vrot.slane %v293_v54, %v104_v60  ;;  %v121_v12 = vrot.slane %v294_v55, %v104_v60  ;;  %v37_v13 = vld [vmem:[%s615_s1 + $0x80] sm:$0xff]  ;;  %v128_v16 = vsel %vm126_vm0, %v117_v2, %v101_v1 }
  0x1e   :  { %321 = vmatprep.subr.mxu0 %v39_v61  ;;  %356 = vmatprep.subr.mxu1 %v71_v62  ;;  %v69_v14 = vld [vmem:[%s615_s1 + $0x180] sm:$0xff]  ;;  %v130_v18 = vsel %vm126_vm0, %v125_v6, %v109_v5  ;;  %v127_v19 = vsel %vm126_vm0, %v113_v10, %v97_v7 }
  0x1f   :  { %322 = vmatpush3.msra.mxu0 %v23_v63  ;;  %357 = vmatpush3.msra.mxu1 %v55_v0  ;;  %v21_v15 = vld [vmem:[%s615_s1] sm:$0xff]  ;;  %v129_v20 = vsel %vm126_vm0, %v121_v12, %v105_v11 }
  0x20   :  { %323 = vmatprep.subr.mxu0 %v38_v3  ;;  %358 = vmatprep.subr.mxu1 %v70_v4  ;;  %v53_v17 = vld [vmem:[%s615_s1 + $0x100] sm:$0xff]  ;;  %s388_s1 = smov [#allocation2]  }
  0x21   :  { %324 = vmatpush3.msra.mxu0 %v22_v8  ;;  %359 = vmatpush3.msra.mxu1 %v54_v9  ;;  %v290_v23 = vld [vmem:[%s616_s2] ss:$0 sm:$0xff]  ;;  %s282_s7 = sshll.u32 %s388_s1, 4  ;;  %s283_s7 = int_to_ptr.vmem [resolvable:$true] %s282_s7 }
  0x22   :  { %325 = vmatprep.subr.mxu0 %v37_v13  ;;  %360 = vmatprep.subr.mxu1 %v69_v14  ;;  %s366_s8 = scalar_lea.vmem %s283_s7, 32  ;;  %p371_p1 = scmp.lt.s32.totalorder %s283_s7, %s283_s7 }
  0x23   :  { %326 = vmatpush3.msra.mxu0 %v21_v15  ;;  %199 = vmatprep.mubr.f32.mxu0 %v128_v16  ;;  %p367_p0 = scmp.ne.s32.totalorder %s283_s7, %s366_s8  ;;  %p372_p2 = scmp.lt.s32.totalorder %s366_s8, %s366_s8 }
  0x24   :  { %361 = vmatpush3.msra.mxu1 %v53_v17  ;;  %269 = vmatprep.mubr.f32.mxu1 %v130_v18 }
  0x25   :  { %200 = vmatmul.mubr.f32.vlgmr.msra.gmra.mxu0 %v127_v19  ;;  %270 = vmatmul.mubr.f32.vlgmr.msra.gmra.mxu1 %v129_v20  ;;  %p373_p3 = por %p372_p2, %p371_p1 }
  0x27   :  { %p374_p4 = pnand %p373_p3, %p367_p0 }
  0xe5   :  { %v327_v21 = vpop.f32.mrf.mxu0  ;;  %v362_v22 = vpop.f32.mrf.mxu1 }
  0xe7   :  { %v328_v24 = vpop.f32.mrf.mxu0  ;;  %v363_v25 = vpop.f32.mrf.mxu1 }
  0xe8   :  { %v329_v26 = vadd.f32 %v328_v24, %v327_v21  ;;  %v364_v28 = vadd.f32 %v363_v25, %v362_v22 }
  0xea   :  { %v202_v27 = vadd.f32 %v329_v26, %v290_v23 }
  0xec   :  { %v272_v29 = vadd.f32 %v364_v28, %v202_v27 }
  0xee   :  { %275 = vst [vmem:[#allocation2] sm:$0x3] %v272_v29 }
  0xef   :  { %377 = shalt.err (!%p374_p4)
}
  0xf0   :  { %285 = dma.vmem_to_hbm [thread:$0]  %s283_s7, 32, %s617_s3, [#allocation3]  }
  0xf1   :  { %386 = dma.done.wait [#allocation3], 32  }
  0xf2   :  { %387 = vsyncadd [#allocation3], 4294967264 }
  0xf3   :  { %289 = vsyncpa [#allocation3], 1 }

</bundles_post_ra>
